<compile_context>
chip_gen: v6e
topology: v6e:2x2x1
jax: 0.10.0
libtpu: 0.0.40
codegen_flags: <defaults>
</compile_context>

<pallas_src>
import functools

import numpy as np

import jax
import jax.numpy as jnp
from jax.experimental import pallas as pl
from jax.experimental.pallas import tpu as pltpu

_EPS = 1e-5
_CP = 8     # channels per pixel slot (lane-packed)
_PX = 16    # pixel slots per 128-lane vector row


# ------------------------------ Pallas kernel --------------------------------

def _up_kernel(g_ref, mask_ref, wup_ref, wconv_ref, vecs_ref, o_ref,
               buf_a, buf_b, *, mp, margin, offs, inv_m):
    """Fused ConvTranspose2d + 3x (Conv3x3 + BatchNorm(train) + ReLU).

    g_ref:    (mp, 128) parity-split NN-gathered input (16 px x 8 ch lanes)
    mask_ref: (mp, 128) 1.0 on real-pixel lanes, 0.0 on spatial pad / tail
    wup_ref:  (128, 128) block-diagonal ConvTranspose weights
    wconv_ref:(3*len(offs)*128, 128) per-layer, per-row-offset conv matrices
    vecs_ref: (16, 128) rows: 0 tconv bias, 1..3 conv biases, 4..6 BN gamma,
              7..9 BN beta (all tiled across the 16 pixel slots)
    o_ref:    (mp, 128) last layer output (pad lanes zeroed)
    buf_a/b:  (mp + 2*margin, 128) VMEM ping-pong buffers with zero halos
    """
    f32 = jnp.float32
    mask = mask_ref[...]                                        # (mp, 128)

    # lane%8 indicator matrix: one (1,128)@(128,128) dot folds per-channel
    # sums across the 16 pixel slots and broadcasts them back.
    rr = jax.lax.broadcasted_iota(jnp.int32, (128, 128), 0)
    cc = jax.lax.broadcasted_iota(jnp.int32, (128, 128), 1)
    fold = ((rr & 7) == (cc & 7)).astype(f32)

    # Zero only the halo rows; interiors are fully overwritten before reads.
    zero_halo = jnp.zeros((margin, 128), f32)
    buf_a[0:margin, :] = zero_halo
    buf_a[margin + mp:, :] = zero_halo
    buf_b[0:margin, :] = zero_halo
    buf_b[margin + mp:, :] = zero_halo

    # --- ConvTranspose2d(in,in,2,stride=2): one block-diagonal matmul -------
    up = jnp.dot(g_ref[...], wup_ref[...], preferred_element_type=f32)
    buf_a[margin:margin + mp, :] = (up + vecs_ref[0:1, :]) * mask

    n_offs = len(offs)

    def conv_bn_relu(src, layer):
        acc = jnp.zeros((mp, 128), f32)
        for k, off in enumerate(offs):
            lhs = src[margin + off:margin + off + mp, :]         # row-shifted view
            row0 = (layer * n_offs + k) * 128
            w = wconv_ref[row0:row0 + 128, :]
            acc = acc + jnp.dot(lhs, w, preferred_element_type=f32)
        acc = acc + vecs_ref[1 + layer:2 + layer, :]
        # BatchNorm2d training mode: batch stats over real pixels only,
        # biased variance, centered two-pass (no E[x^2]-mean^2 cancellation).
        s0 = jnp.sum(acc * mask, axis=0, keepdims=True)          # (1,128)
        mean = jnp.dot(s0, fold, preferred_element_type=f32) * inv_m
        cent = (acc - mean) * mask
        s1 = jnp.sum(cent * cent, axis=0, keepdims=True)
        var = jnp.dot(s1, fold, preferred_element_type=f32) * inv_m
        scale = vecs_ref[4 + layer:5 + layer, :] * jax.lax.rsqrt(var + _EPS)
        out = jnp.maximum(cent * scale + vecs_ref[7 + layer:8 + layer, :], 0.0)
        # Re-zero pad pixels -> they act as the next layer's zero padding.
        return out * mask

    buf_b[margin:margin + mp, :] = conv_bn_relu(buf_a, 0)
    buf_a[margin:margin + mp, :] = conv_bn_relu(buf_b, 1)
    o_ref[...] = conv_bn_relu(buf_a, 2)


# --------------------------- wrapper-side packing -----------------------------

def _build_tap_placement(s_rows, offs):
    """P[t, o_idx*16 + s, p] = 1 iff tap t (di*3+dj) reads source pixel slot s
    at packed-row offset offs[o_idx] when producing output pixel slot p."""
    off_index = {o: k for k, o in enumerate(offs)}
    P = np.zeros((9, len(offs) * _PX, _PX), np.float32)
    for di in range(3):
        for dj in range(3):
            t = di * 3 + dj
            for p in range(_PX):
                q = p + dj - 1
                o = (di - 1) * s_rows + (q // _PX)
                s = q % _PX
                P[t, off_index[o] * _PX + s, p] = 1.0
    return P


def up_pallas(x, params):
    """x: (N, in_ch, H, W) NCHW -> (N, out_ch, 2H, 2W) NCHW."""
    f32 = jnp.float32
    n, ci, h_in, w_in = x.shape
    co_up = params["tconv_w"].shape[1]           # ConvTranspose keeps in_ch
    out_ch = params["conv2_w"].shape[0]
    assert ci <= _CP // 2 and co_up <= _CP and out_ch <= _CP, \
        "lane packing assumes <=4 input channels and <=8 output channels"

    h2, w2 = 2 * h_in, 2 * w_in                  # upsampled spatial dims
    hp = h2 + 2                                  # +1 zero pad top/bottom
    wpad = _PX * pl.cdiv(w2 + 2, _PX)            # padded width, multiple of 16
    s_rows = wpad // _PX                         # packed rows per image row
    total_pix = n * hp * wpad
    mp = pl.cdiv(total_pix, 8 * _PX) * 8         # packed rows, multiple of 8
    mpix = mp * _PX
    margin = 8 * pl.cdiv(s_rows + 1, 8)          # halo rows (>= max |offset|)
    m_valid = float(n * h2 * w2)

    # ---- ConvTranspose input: NN gather + row-parity split (data movement) --
    x_nhwc = jnp.transpose(x, (0, 2, 3, 1)).astype(f32)              # (n,H,W,ci)
    x_nn = jnp.repeat(jnp.repeat(x_nhwc, 2, axis=1), 2, axis=2)      # (n,h2,w2,ci)
    x_nn = jnp.pad(x_nn, ((0, 0), (0, 0), (0, 0), (0, _CP // 2 - ci)))
    par = (jnp.arange(h2) % 2).astype(f32).reshape(1, h2, 1, 1)
    g8 = jnp.concatenate([x_nn * (1.0 - par), x_nn * par], axis=-1)  # (n,h2,w2,8)
    g8 = jnp.pad(g8, ((0, 0), (1, 1), (1, wpad - 1 - w2), (0, 0)))   # (n,hp,wpad,8)
    g = jnp.pad(g8.reshape(total_pix, _CP), ((0, mpix - total_pix), (0, 0)))
    g = g.reshape(mp, _PX * _CP)

    # ---- lane-dense spatial validity mask ------------------------------------
    flat = jnp.arange(mpix)
    q = flat % (hp * wpad)
    ii, jj = q // wpad, q % wpad
    vpix = ((flat < total_pix) & (ii >= 1) & (ii <= h2)
            & (jj >= 1) & (jj <= w2)).astype(f32)
    mask = jnp.repeat(vpix, _CP).reshape(mp, _PX * _CP)

    # ---- ConvTranspose weights -> one block-diagonal (128,128) matrix --------
    wt = params["tconv_w"].astype(f32)           # (ci, co, 2, 2)

    def up_block(b):
        blk = jnp.zeros((_CP, _CP), f32)
        blk = blk.at[0:ci, 0:co_up].set(wt[:, :, 0, b])               # even rows
        blk = blk.at[_CP // 2:_CP // 2 + ci, 0:co_up].set(wt[:, :, 1, b])  # odd
        return blk

    evenp = jnp.asarray(np.arange(_PX) % 2 == 0, f32)
    w_up = (jnp.kron(jnp.diag(evenp), up_block(1))
            + jnp.kron(jnp.diag(1.0 - evenp), up_block(0)))           # (128,128)

    # ---- 3x3 conv weights -> combined per-row-offset (128,128) matrices ------
    offs = tuple(sorted({(di - 1) * s_rows + e
                         for di in range(3) for e in (-1, 0, 1)}))
    P = jnp.asarray(_build_tap_placement(s_rows, offs))

    def layer_mats(wl):
        co, cin = wl.shape[0], wl.shape[1]
        taps = jnp.transpose(wl.astype(f32), (2, 3, 1, 0)).reshape(9, cin, co)
        taps = jnp.pad(taps, ((0, 0), (0, _CP - cin), (0, _CP - co)))
        m = jnp.einsum("tkp,tio->kipo", P, taps)       # (len(offs)*16, 8, 16, 8)
        return m.reshape(len(offs) * _PX * _CP, _PX * _CP)

    w_conv = jnp.concatenate(
        [layer_mats(params[f"conv{l}_w"]) for l in range(3)], axis=0)

    # ---- per-layer 128-lane vectors (biases / BN gamma / BN beta) ------------
    def tile_row(v):
        return jnp.tile(jnp.pad(v.astype(f32), (0, _CP - v.shape[0])), _PX)

    rows = ([tile_row(params["tconv_b"])]
            + [tile_row(params[f"conv{l}_b"]) for l in range(3)]
            + [tile_row(params[f"bn{l}_g"]) for l in range(3)]
            + [tile_row(params[f"bn{l}_b"]) for l in range(3)])
    vecs = jnp.stack(rows + [jnp.zeros(_PX * _CP, f32)] * (16 - len(rows)))

    kernel = functools.partial(_up_kernel, mp=mp, margin=margin, offs=offs,
                               inv_m=1.0 / m_valid)
    full = lambda i: (0, 0)

    out = pl.pallas_call(
        kernel,
        out_shape=jax.ShapeDtypeStruct((mp, _PX * _CP), f32),
        grid_spec=pltpu.PrefetchScalarGridSpec(
            num_scalar_prefetch=0,
            grid=(1,),
            in_specs=[
                pl.BlockSpec((mp, 128), full),
                pl.BlockSpec((mp, 128), full),
                pl.BlockSpec((128, 128), full),
                pl.BlockSpec((3 * len(offs) * 128, 128), full),
                pl.BlockSpec((16, 128), full),
            ],
            out_specs=pl.BlockSpec((mp, 128), full),
            scratch_shapes=[pltpu.VMEM((mp + 2 * margin, 128), f32),
                            pltpu.VMEM((mp + 2 * margin, 128), f32)],
        ),
        compiler_params=pltpu.CompilerParams(
            dimension_semantics=("arbitrary",)),
    )(g, mask, w_up, w_conv, vecs)

    # Unpack: (mp,128) -> (n,hp,wpad,8) -> crop pads -> NCHW
    y = out.reshape(mpix, _CP)[:total_pix].reshape(n, hp, wpad, _CP)
    y = y[:, 1:1 + h2, 1:1 + w2, :out_ch]
    return jnp.transpose(y, (0, 3, 1, 2))


up_forward = jax.jit(up_pallas)


# ------------------------------ Param init ------------------------------------

def init_params(key, in_ch, out_ch):
    ks = jax.random.split(key, 8)
    p = {
        "tconv_w": 0.1 * jax.random.normal(ks[0], (in_ch, in_ch, 2, 2), jnp.float32),
        "tconv_b": 0.1 * jax.random.normal(ks[1], (in_ch,), jnp.float32),
    }
    chans = [(in_ch, out_ch), (out_ch, out_ch), (out_ch, out_ch)]
    for k, (ci, co) in enumerate(chans):
        p[f"conv{k}_w"] = 0.1 * jax.random.normal(ks[2 + 2 * k], (co, ci, 3, 3), jnp.float32)
        p[f"conv{k}_b"] = 0.1 * jax.random.normal(ks[3 + 2 * k], (co,), jnp.float32)
        p[f"bn{k}_g"] = jnp.ones((co,), jnp.float32)    # PyTorch BatchNorm2d defaults
        p[f"bn{k}_b"] = jnp.zeros((co,), jnp.float32)
    return p


# --------------------------------- main ----------------------------------------

if __name__ == "__main__":
    in_ch, out_ch = 4, 8
    key = jax.random.PRNGKey(0)
    kx, kp = jax.random.split(key)
    x = jax.random.normal(kx, (2, in_ch, 16, 16), jnp.float32)   # NCHW
    params = init_params(kp, in_ch, out_ch)

    y = jax.block_until_ready(up_forward(x, params))

    assert y.shape == (2, out_ch, 32, 32), y.shape
    assert bool(jnp.all(jnp.isfinite(y)))
    assert bool(jnp.all(y >= 0.0))  # final op is ReLU (times 0/1 mask)
    print("KERNEL_OK")
</pallas_src>

<mosaic_0001>
module attributes {stable_mosaic.version = 11 : i64} {
  func.func @_up_kernel(%arg0: i32, %arg1: memref<208x128xf32, #tpu.memory_space<vmem>>, %arg2: memref<208x128xf32, #tpu.memory_space<vmem>>, %arg3: memref<128x128xf32, #tpu.memory_space<vmem>>, %arg4: memref<3456x128xf32, #tpu.memory_space<vmem>>, %arg5: memref<16x128xf32, #tpu.memory_space<vmem>>, %arg6: memref<208x128xf32, #tpu.memory_space<vmem>>, %arg7: memref<224x128xf32, #tpu.memory_space<vmem>>, %arg8: memref<224x128xf32, #tpu.memory_space<vmem>>) attributes {dimension_semantics = [#tpu.dimension_semantics<arbitrary>], iteration_bounds = array<i64: 1>, scalar_prefetch = 0 : i64, scratch_operands = 2 : i64, tpu.core_type = #tpu.core_type<tc>, window_params = [{pipeline_mode = #tpu.pipeline_mode<synchronous>, transform_indices = @transform_0, window_bounds = array<i64: 208, 128>}, {pipeline_mode = #tpu.pipeline_mode<synchronous>, transform_indices = @transform_1, window_bounds = array<i64: 208, 128>}, {pipeline_mode = #tpu.pipeline_mode<synchronous>, transform_indices = @transform_2, window_bounds = array<i64: 128, 128>}, {pipeline_mode = #tpu.pipeline_mode<synchronous>, transform_indices = @transform_3, window_bounds = array<i64: 3456, 128>}, {pipeline_mode = #tpu.pipeline_mode<synchronous>, transform_indices = @transform_4, window_bounds = array<i64: 16, 128>}, {pipeline_mode = #tpu.pipeline_mode<synchronous>, transform_indices = @transform_5, window_bounds = array<i64: 208, 128>}]} {
    %c0 = arith.constant 0 : index
    %c0_0 = arith.constant 0 : index
    %0 = vector.load %arg2[%c0, %c0_0] : memref<208x128xf32, #tpu.memory_space<vmem>>, vector<208x128xf32>
    %1 = tpu.iota {dimensions = array<i32: 0>} : vector<128x128xi32>
    %2 = tpu.iota {dimensions = array<i32: 1>} : vector<128x128xi32>
    %c7_i32 = arith.constant 7 : i32
    %3 = vector.broadcast %c7_i32 : i32 to vector<128x128xi32>
    %4 = arith.andi %1, %3 : vector<128x128xi32>
    %c7_i32_1 = arith.constant 7 : i32
    %5 = vector.broadcast %c7_i32_1 : i32 to vector<128x128xi32>
    %6 = arith.andi %2, %5 : vector<128x128xi32>
    %7 = arith.cmpi eq, %4, %6 : vector<128x128xi32>
    %8 = arith.extui %7 : vector<128x128xi1> to vector<128x128xi32>
    %9 = arith.sitofp %8 : vector<128x128xi32> to vector<128x128xf32>
    %cst = arith.constant 0.000000e+00 : f32
    %10 = vector.broadcast %cst : f32 to vector<8x128xf32>
    %c0_2 = arith.constant 0 : index
    %c0_3 = arith.constant 0 : index
    %11 = vector.load %arg7[%c0_2, %c0_3] : memref<224x128xf32, #tpu.memory_space<vmem>>, vector<8x128xf32>
    tpu.vector_store %arg7[%c0_2, %c0_3], %10 {strides = array<i32>} : memref<224x128xf32, #tpu.memory_space<vmem>>, vector<8x128xf32>,
    %c216 = arith.constant 216 : index
    %c0_4 = arith.constant 0 : index
    %12 = vector.load %arg7[%c216, %c0_4] : memref<224x128xf32, #tpu.memory_space<vmem>>, vector<8x128xf32>
    tpu.vector_store %arg7[%c216, %c0_4], %10 {strides = array<i32>} : memref<224x128xf32, #tpu.memory_space<vmem>>, vector<8x128xf32>,
    %c0_5 = arith.constant 0 : index
    %c0_6 = arith.constant 0 : index
    %13 = vector.load %arg8[%c0_5, %c0_6] : memref<224x128xf32, #tpu.memory_space<vmem>>, vector<8x128xf32>
    tpu.vector_store %arg8[%c0_5, %c0_6], %10 {strides = array<i32>} : memref<224x128xf32, #tpu.memory_space<vmem>>, vector<8x128xf32>,
    %c216_7 = arith.constant 216 : index
    %c0_8 = arith.constant 0 : index
    %14 = vector.load %arg8[%c216_7, %c0_8] : memref<224x128xf32, #tpu.memory_space<vmem>>, vector<8x128xf32>
    tpu.vector_store %arg8[%c216_7, %c0_8], %10 {strides = array<i32>} : memref<224x128xf32, #tpu.memory_space<vmem>>, vector<8x128xf32>,
    %c0_9 = arith.constant 0 : index
    %c0_10 = arith.constant 0 : index
    %15 = vector.load %arg1[%c0_9, %c0_10] : memref<208x128xf32, #tpu.memory_space<vmem>>, vector<208x128xf32>
    %c0_11 = arith.constant 0 : index
    %c0_12 = arith.constant 0 : index
    %16 = vector.load %arg3[%c0_11, %c0_12] : memref<128x128xf32, #tpu.memory_space<vmem>>, vector<128x128xf32>
    %cst_13 = arith.constant dense<0.000000e+00> : vector<208x128xf32>
    %17 = tpu.matmul %15, %16, %cst_13 {dimension_numbers = #tpu.dot_dimension_numbers<[1], [0], [0], [1], [0, 0, 1, 1], [], []>} : vector<208x128xf32>, vector<128x128xf32>, vector<208x128xf32> -> vector<208x128xf32>
    %c0_14 = arith.constant 0 : index
    %c0_15 = arith.constant 0 : index
    %18 = vector.load %arg5[%c0_14, %c0_15] : memref<16x128xf32, #tpu.memory_space<vmem>>, vector<1x128xf32>
    %19 = vector.broadcast %18 : vector<1x128xf32> to vector<208x128xf32>
    %20 = arith.addf %17, %19 : vector<208x128xf32>
    %21 = arith.mulf %20, %0 : vector<208x128xf32>
    %c8 = arith.constant 8 : index
    %c0_16 = arith.constant 0 : index
    %22 = vector.load %arg7[%c8, %c0_16] : memref<224x128xf32, #tpu.memory_space<vmem>>, vector<208x128xf32>
    tpu.vector_store %arg7[%c8, %c0_16], %21 {strides = array<i32>} : memref<224x128xf32, #tpu.memory_space<vmem>>, vector<208x128xf32>,
    %cst_17 = arith.constant 0.000000e+00 : f32
    %23 = vector.broadcast %cst_17 : f32 to vector<208x128xf32>
    %c4 = arith.constant 4 : index
    %c0_18 = arith.constant 0 : index
    %24 = vector.load %arg7[%c4, %c0_18] : memref<224x128xf32, #tpu.memory_space<vmem>>, vector<208x128xf32>
    %c0_19 = arith.constant 0 : index
    %c0_20 = arith.constant 0 : index
    %25 = vector.load %arg4[%c0_19, %c0_20] : memref<3456x128xf32, #tpu.memory_space<vmem>>, vector<128x128xf32>
    %cst_21 = arith.constant dense<0.000000e+00> : vector<208x128xf32>
    %26 = tpu.matmul %24, %25, %cst_21 {dimension_numbers = #tpu.dot_dimension_numbers<[1], [0], [0], [1], [0, 0, 1, 1], [], []>} : vector<208x128xf32>, vector<128x128xf32>, vector<208x128xf32> -> vector<208x128xf32>
    %27 = arith.addf %23, %26 : vector<208x128xf32>
    %c5 = arith.constant 5 : index
    %c0_22 = arith.constant 0 : index
    %28 = vector.load %arg7[%c5, %c0_22] : memref<224x128xf32, #tpu.memory_space<vmem>>, vector<208x128xf32>
    %c128 = arith.constant 128 : index
    %c0_23 = arith.constant 0 : index
    %29 = vector.load %arg4[%c128, %c0_23] : memref<3456x128xf32, #tpu.memory_space<vmem>>, vector<128x128xf32>
    %cst_24 = arith.constant dense<0.000000e+00> : vector<208x128xf32>
    %30 = tpu.matmul %28, %29, %cst_24 {dimension_numbers = #tpu.dot_dimension_numbers<[1], [0], [0], [1], [0, 0, 1, 1], [], []>} : vector<208x128xf32>, vector<128x128xf32>, vector<208x128xf32> -> vector<208x128xf32>
    %31 = arith.addf %27, %30 : vector<208x128xf32>
    %c6 = arith.constant 6 : index
    %c0_25 = arith.constant 0 : index
    %32 = vector.load %arg7[%c6, %c0_25] : memref<224x128xf32, #tpu.memory_space<vmem>>, vector<208x128xf32>
    %c256 = arith.constant 256 : index
    %c0_26 = arith.constant 0 : index
    %33 = vector.load %arg4[%c256, %c0_26] : memref<3456x128xf32, #tpu.memory_space<vmem>>, vector<128x128xf32>
    %cst_27 = arith.constant dense<0.000000e+00> : vector<208x128xf32>
    %34 = tpu.matmul %32, %33, %cst_27 {dimension_numbers = #tpu.dot_dimension_numbers<[1], [0], [0], [1], [0, 0, 1, 1], [], []>} : vector<208x128xf32>, vector<128x128xf32>, vector<208x128xf32> -> vector<208x128xf32>
    %35 = arith.addf %31, %34 : vector<208x128xf32>
    %c7 = arith.constant 7 : index
    %c0_28 = arith.constant 0 : index
    %36 = vector.load %arg7[%c7, %c0_28] : memref<224x128xf32, #tpu.memory_space<vmem>>, vector<208x128xf32>
    %c384 = arith.constant 384 : index
    %c0_29 = arith.constant 0 : index
    %37 = vector.load %arg4[%c384, %c0_29] : memref<3456x128xf32, #tpu.memory_space<vmem>>, vector<128x128xf32>
    %cst_30 = arith.constant dense<0.000000e+00> : vector<208x128xf32>
    %38 = tpu.matmul %36, %37, %cst_30 {dimension_numbers = #tpu.dot_dimension_numbers<[1], [0], [0], [1], [0, 0, 1, 1], [], []>} : vector<208x128xf32>, vector<128x128xf32>, vector<208x128xf32> -> vector<208x128xf32>
    %39 = arith.addf %35, %38 : vector<208x128xf32>
    %c8_31 = arith.constant 8 : index
    %c0_32 = arith.constant 0 : index
    %40 = vector.load %arg7[%c8_31, %c0_32] : memref<224x128xf32, #tpu.memory_space<vmem>>, vector<208x128xf32>
    %c512 = arith.constant 512 : index
    %c0_33 = arith.constant 0 : index
    %41 = vector.load %arg4[%c512, %c0_33] : memref<3456x128xf32, #tpu.memory_space<vmem>>, vector<128x128xf32>
    %cst_34 = arith.constant dense<0.000000e+00> : vector<208x128xf32>
    %42 = tpu.matmul %40, %41, %cst_34 {dimension_numbers = #tpu.dot_dimension_numbers<[1], [0], [0], [1], [0, 0, 1, 1], [], []>} : vector<208x128xf32>, vector<128x128xf32>, vector<208x128xf32> -> vector<208x128xf32>
    %43 = arith.addf %39, %42 : vector<208x128xf32>
    %c9 = arith.constant 9 : index
    %c0_35 = arith.constant 0 : index
    %44 = vector.load %arg7[%c9, %c0_35] : memref<224x128xf32, #tpu.memory_space<vmem>>, vector<208x128xf32>
    %c640 = arith.constant 640 : index
    %c0_36 = arith.constant 0 : index
    %45 = vector.load %arg4[%c640, %c0_36] : memref<3456x128xf32, #tpu.memory_space<vmem>>, vector<128x128xf32>
    %cst_37 = arith.constant dense<0.000000e+00> : vector<208x128xf32>
    %46 = tpu.matmul %44, %45, %cst_37 {dimension_numbers = #tpu.dot_dimension_numbers<[1], [0], [0], [1], [0, 0, 1, 1], [], []>} : vector<208x128xf32>, vector<128x128xf32>, vector<208x128xf32> -> vector<208x128xf32>
    %47 = arith.addf %43, %46 : vector<208x128xf32>
    %c10 = arith.constant 10 : index
    %c0_38 = arith.constant 0 : index
    %48 = vector.load %arg7[%c10, %c0_38] : memref<224x128xf32, #tpu.memory_space<vmem>>, vector<208x128xf32>
    %c768 = arith.constant 768 : index
    %c0_39 = arith.constant 0 : index
    %49 = vector.load %arg4[%c768, %c0_39] : memref<3456x128xf32, #tpu.memory_space<vmem>>, vector<128x128xf32>
    %cst_40 = arith.constant dense<0.000000e+00> : vector<208x128xf32>
    %50 = tpu.matmul %48, %49, %cst_40 {dimension_numbers = #tpu.dot_dimension_numbers<[1], [0], [0], [1], [0, 0, 1, 1], [], []>} : vector<208x128xf32>, vector<128x128xf32>, vector<208x128xf32> -> vector<208x128xf32>
    %51 = arith.addf %47, %50 : vector<208x128xf32>
    %c11 = arith.constant 11 : index
    %c0_41 = arith.constant 0 : index
    %52 = vector.load %arg7[%c11, %c0_41] : memref<224x128xf32, #tpu.memory_space<vmem>>, vector<208x128xf32>
    %c896 = arith.constant 896 : index
    %c0_42 = arith.constant 0 : index
    %53 = vector.load %arg4[%c896, %c0_42] : memref<3456x128xf32, #tpu.memory_space<vmem>>, vector<128x128xf32>
    %cst_43 = arith.constant dense<0.000000e+00> : vector<208x128xf32>
    %54 = tpu.matmul %52, %53, %cst_43 {dimension_numbers = #tpu.dot_dimension_numbers<[1], [0], [0], [1], [0, 0, 1, 1], [], []>} : vector<208x128xf32>, vector<128x128xf32>, vector<208x128xf32> -> vector<208x128xf32>
    %55 = arith.addf %51, %54 : vector<208x128xf32>
    %c12 = arith.constant 12 : index
    %c0_44 = arith.constant 0 : index
    %56 = vector.load %arg7[%c12, %c0_44] : memref<224x128xf32, #tpu.memory_space<vmem>>, vector<208x128xf32>
    %c1024 = arith.constant 1024 : index
    %c0_45 = arith.constant 0 : index
    %57 = vector.load %arg4[%c1024, %c0_45] : memref<3456x128xf32, #tpu.memory_space<vmem>>, vector<128x128xf32>
    %cst_46 = arith.constant dense<0.000000e+00> : vector<208x128xf32>
    %58 = tpu.matmul %56, %57, %cst_46 {dimension_numbers = #tpu.dot_dimension_numbers<[1], [0], [0], [1], [0, 0, 1, 1], [], []>} : vector<208x128xf32>, vector<128x128xf32>, vector<208x128xf32> -> vector<208x128xf32>
    %59 = arith.addf %55, %58 : vector<208x128xf32>
    %c1 = arith.constant 1 : index
    %c0_47 = arith.constant 0 : index
    %60 = vector.load %arg5[%c1, %c0_47] : memref<16x128xf32, #tpu.memory_space<vmem>>, vector<1x128xf32>
    %61 = vector.broadcast %60 : vector<1x128xf32> to vector<208x128xf32>
    %62 = arith.addf %59, %61 : vector<208x128xf32>
    %63 = arith.mulf %62, %0 : vector<208x128xf32>
    %cst_48 = arith.constant dense<0.000000e+00> : vector<128xf32>
    %64 = vector.multi_reduction <add>, %63, %cst_48 [0] : vector<208x128xf32> to vector<128xf32>
    %65 = vector.shape_cast %64 : vector<128xf32> to vector<1x128xf32>
    %cst_49 = arith.constant dense<0.000000e+00> : vector<1x128xf32>
    %66 = tpu.matmul %65, %9, %cst_49 {dimension_numbers = #tpu.dot_dimension_numbers<[1], [0], [0], [1], [0, 0, 1, 1], [], []>} : vector<1x128xf32>, vector<128x128xf32>, vector<1x128xf32> -> vector<1x128xf32>
    %cst_50 = arith.constant 4.8828125E-4 : f32
    %67 = vector.broadcast %cst_50 : f32 to vector<1x128xf32>
    %68 = arith.mulf %66, %67 : vector<1x128xf32>
    %69 = vector.broadcast %68 : vector<1x128xf32> to vector<208x128xf32>
    %70 = arith.subf %62, %69 : vector<208x128xf32>
    %71 = arith.mulf %70, %0 : vector<208x128xf32>
    %72 = arith.mulf %71, %71 : vector<208x128xf32>
    %cst_51 = arith.constant dense<0.000000e+00> : vector<128xf32>
    %73 = vector.multi_reduction <add>, %72, %cst_51 [0] : vector<208x128xf32> to vector<128xf32>
    %74 = vector.shape_cast %73 : vector<128xf32> to vector<1x128xf32>
    %cst_52 = arith.constant dense<0.000000e+00> : vector<1x128xf32>
    %75 = tpu.matmul %74, %9, %cst_52 {dimension_numbers = #tpu.dot_dimension_numbers<[1], [0], [0], [1], [0, 0, 1, 1], [], []>} : vector<1x128xf32>, vector<128x128xf32>, vector<1x128xf32> -> vector<1x128xf32>
    %cst_53 = arith.constant 4.8828125E-4 : f32
    %76 = vector.broadcast %cst_53 : f32 to vector<1x128xf32>
    %77 = arith.mulf %75, %76 : vector<1x128xf32>
    %c4_54 = arith.constant 4 : index
    %c0_55 = arith.constant 0 : index
    %78 = vector.load %arg5[%c4_54, %c0_55] : memref<16x128xf32, #tpu.memory_space<vmem>>, vector<1x128xf32>
    %cst_56 = arith.constant 9.99999974E-6 : f32
    %79 = vector.broadcast %cst_56 : f32 to vector<1x128xf32>
    %80 = arith.addf %77, %79 : vector<1x128xf32>
    %81 = math.rsqrt %80 : vector<1x128xf32>
    %82 = arith.mulf %78, %81 : vector<1x128xf32>
    %83 = vector.broadcast %82 : vector<1x128xf32> to vector<208x128xf32>
    %84 = arith.mulf %71, %83 : vector<208x128xf32>
    %c7_57 = arith.constant 7 : index
    %c0_58 = arith.constant 0 : index
    %85 = vector.load %arg5[%c7_57, %c0_58] : memref<16x128xf32, #tpu.memory_space<vmem>>, vector<1x128xf32>
    %86 = vector.broadcast %85 : vector<1x128xf32> to vector<208x128xf32>
    %87 = arith.addf %84, %86 : vector<208x128xf32>
    %cst_59 = arith.constant 0.000000e+00 : f32
    %88 = vector.broadcast %cst_59 : f32 to vector<208x128xf32>
    %89 = arith.maximumf %87, %88 : vector<208x128xf32>
    %90 = arith.mulf %89, %0 : vector<208x128xf32>
    %c8_60 = arith.constant 8 : index
    %c0_61 = arith.constant 0 : index
    %91 = vector.load %arg8[%c8_60, %c0_61] : memref<224x128xf32, #tpu.memory_space<vmem>>, vector<208x128xf32>
    tpu.vector_store %arg8[%c8_60, %c0_61], %90 {strides = array<i32>} : memref<224x128xf32, #tpu.memory_space<vmem>>, vector<208x128xf32>,
    %cst_62 = arith.constant 0.000000e+00 : f32
    %92 = vector.broadcast %cst_62 : f32 to vector<208x128xf32>
    %c4_63 = arith.constant 4 : index
    %c0_64 = arith.constant 0 : index
    %93 = vector.load %arg8[%c4_63, %c0_64] : memref<224x128xf32, #tpu.memory_space<vmem>>, vector<208x128xf32>
    %c1152 = arith.constant 1152 : index
    %c0_65 = arith.constant 0 : index
    %94 = vector.load %arg4[%c1152, %c0_65] : memref<3456x128xf32, #tpu.memory_space<vmem>>, vector<128x128xf32>
    %cst_66 = arith.constant dense<0.000000e+00> : vector<208x128xf32>
    %95 = tpu.matmul %93, %94, %cst_66 {dimension_numbers = #tpu.dot_dimension_numbers<[1], [0], [0], [1], [0, 0, 1, 1], [], []>} : vector<208x128xf32>, vector<128x128xf32>, vector<208x128xf32> -> vector<208x128xf32>
    %96 = arith.addf %92, %95 : vector<208x128xf32>
    %c5_67 = arith.constant 5 : index
    %c0_68 = arith.constant 0 : index
    %97 = vector.load %arg8[%c5_67, %c0_68] : memref<224x128xf32, #tpu.memory_space<vmem>>, vector<208x128xf32>
    %c1280 = arith.constant 1280 : index
    %c0_69 = arith.constant 0 : index
    %98 = vector.load %arg4[%c1280, %c0_69] : memref<3456x128xf32, #tpu.memory_space<vmem>>, vector<128x128xf32>
    %cst_70 = arith.constant dense<0.000000e+00> : vector<208x128xf32>
    %99 = tpu.matmul %97, %98, %cst_70 {dimension_numbers = #tpu.dot_dimension_numbers<[1], [0], [0], [1], [0, 0, 1, 1], [], []>} : vector<208x128xf32>, vector<128x128xf32>, vector<208x128xf32> -> vector<208x128xf32>
    %100 = arith.addf %96, %99 : vector<208x128xf32>
    %c6_71 = arith.constant 6 : index
    %c0_72 = arith.constant 0 : index
    %101 = vector.load %arg8[%c6_71, %c0_72] : memref<224x128xf32, #tpu.memory_space<vmem>>, vector<208x128xf32>
    %c1408 = arith.constant 1408 : index
    %c0_73 = arith.constant 0 : index
    %102 = vector.load %arg4[%c1408, %c0_73] : memref<3456x128xf32, #tpu.memory_space<vmem>>, vector<128x128xf32>
    %cst_74 = arith.constant dense<0.000000e+00> : vector<208x128xf32>
    %103 = tpu.matmul %101, %102, %cst_74 {dimension_numbers = #tpu.dot_dimension_numbers<[1], [0], [0], [1], [0, 0, 1, 1], [], []>} : vector<208x128xf32>, vector<128x128xf32>, vector<208x128xf32> -> vector<208x128xf32>
    %104 = arith.addf %100, %103 : vector<208x128xf32>
    %c7_75 = arith.constant 7 : index
    %c0_76 = arith.constant 0 : index
    %105 = vector.load %arg8[%c7_75, %c0_76] : memref<224x128xf32, #tpu.memory_space<vmem>>, vector<208x128xf32>
    %c1536 = arith.constant 1536 : index
    %c0_77 = arith.constant 0 : index
    %106 = vector.load %arg4[%c1536, %c0_77] : memref<3456x128xf32, #tpu.memory_space<vmem>>, vector<128x128xf32>
    %cst_78 = arith.constant dense<0.000000e+00> : vector<208x128xf32>
    %107 = tpu.matmul %105, %106, %cst_78 {dimension_numbers = #tpu.dot_dimension_numbers<[1], [0], [0], [1], [0, 0, 1, 1], [], []>} : vector<208x128xf32>, vector<128x128xf32>, vector<208x128xf32> -> vector<208x128xf32>
    %108 = arith.addf %104, %107 : vector<208x128xf32>
    %c8_79 = arith.constant 8 : index
    %c0_80 = arith.constant 0 : index
    %109 = vector.load %arg8[%c8_79, %c0_80] : memref<224x128xf32, #tpu.memory_space<vmem>>, vector<208x128xf32>
    %c1664 = arith.constant 1664 : index
    %c0_81 = arith.constant 0 : index
    %110 = vector.load %arg4[%c1664, %c0_81] : memref<3456x128xf32, #tpu.memory_space<vmem>>, vector<128x128xf32>
    %cst_82 = arith.constant dense<0.000000e+00> : vector<208x128xf32>
    %111 = tpu.matmul %109, %110, %cst_82 {dimension_numbers = #tpu.dot_dimension_numbers<[1], [0], [0], [1], [0, 0, 1, 1], [], []>} : vector<208x128xf32>, vector<128x128xf32>, vector<208x128xf32> -> vector<208x128xf32>
    %112 = arith.addf %108, %111 : vector<208x128xf32>
    %c9_83 = arith.constant 9 : index
    %c0_84 = arith.constant 0 : index
    %113 = vector.load %arg8[%c9_83, %c0_84] : memref<224x128xf32, #tpu.memory_space<vmem>>, vector<208x128xf32>
    %c1792 = arith.constant 1792 : index
    %c0_85 = arith.constant 0 : index
    %114 = vector.load %arg4[%c1792, %c0_85] : memref<3456x128xf32, #tpu.memory_space<vmem>>, vector<128x128xf32>
    %cst_86 = arith.constant dense<0.000000e+00> : vector<208x128xf32>
    %115 = tpu.matmul %113, %114, %cst_86 {dimension_numbers = #tpu.dot_dimension_numbers<[1], [0], [0], [1], [0, 0, 1, 1], [], []>} : vector<208x128xf32>, vector<128x128xf32>, vector<208x128xf32> -> vector<208x128xf32>
    %116 = arith.addf %112, %115 : vector<208x128xf32>
    %c10_87 = arith.constant 10 : index
    %c0_88 = arith.constant 0 : index
    %117 = vector.load %arg8[%c10_87, %c0_88] : memref<224x128xf32, #tpu.memory_space<vmem>>, vector<208x128xf32>
    %c1920 = arith.constant 1920 : index
    %c0_89 = arith.constant 0 : index
    %118 = vector.load %arg4[%c1920, %c0_89] : memref<3456x128xf32, #tpu.memory_space<vmem>>, vector<128x128xf32>
    %cst_90 = arith.constant dense<0.000000e+00> : vector<208x128xf32>
    %119 = tpu.matmul %117, %118, %cst_90 {dimension_numbers = #tpu.dot_dimension_numbers<[1], [0], [0], [1], [0, 0, 1, 1], [], []>} : vector<208x128xf32>, vector<128x128xf32>, vector<208x128xf32> -> vector<208x128xf32>
    %120 = arith.addf %116, %119 : vector<208x128xf32>
    %c11_91 = arith.constant 11 : index
    %c0_92 = arith.constant 0 : index
    %121 = vector.load %arg8[%c11_91, %c0_92] : memref<224x128xf32, #tpu.memory_space<vmem>>, vector<208x128xf32>
    %c2048 = arith.constant 2048 : index
    %c0_93 = arith.constant 0 : index
    %122 = vector.load %arg4[%c2048, %c0_93] : memref<3456x128xf32, #tpu.memory_space<vmem>>, vector<128x128xf32>
    %cst_94 = arith.constant dense<0.000000e+00> : vector<208x128xf32>
    %123 = tpu.matmul %121, %122, %cst_94 {dimension_numbers = #tpu.dot_dimension_numbers<[1], [0], [0], [1], [0, 0, 1, 1], [], []>} : vector<208x128xf32>, vector<128x128xf32>, vector<208x128xf32> -> vector<208x128xf32>
    %124 = arith.addf %120, %123 : vector<208x128xf32>
    %c12_95 = arith.constant 12 : index
    %c0_96 = arith.constant 0 : index
    %125 = vector.load %arg8[%c12_95, %c0_96] : memref<224x128xf32, #tpu.memory_space<vmem>>, vector<208x128xf32>
    %c2176 = arith.constant 2176 : index
    %c0_97 = arith.constant 0 : index
    %126 = vector.load %arg4[%c2176, %c0_97] : memref<3456x128xf32, #tpu.memory_space<vmem>>, vector<128x128xf32>
    %cst_98 = arith.constant dense<0.000000e+00> : vector<208x128xf32>
    %127 = tpu.matmul %125, %126, %cst_98 {dimension_numbers = #tpu.dot_dimension_numbers<[1], [0], [0], [1], [0, 0, 1, 1], [], []>} : vector<208x128xf32>, vector<128x128xf32>, vector<208x128xf32> -> vector<208x128xf32>
    %128 = arith.addf %124, %127 : vector<208x128xf32>
    %c2 = arith.constant 2 : index
    %c0_99 = arith.constant 0 : index
    %129 = vector.load %arg5[%c2, %c0_99] : memref<16x128xf32, #tpu.memory_space<vmem>>, vector<1x128xf32>
    %130 = vector.broadcast %129 : vector<1x128xf32> to vector<208x128xf32>
    %131 = arith.addf %128, %130 : vector<208x128xf32>
    %132 = arith.mulf %131, %0 : vector<208x128xf32>
    %cst_100 = arith.constant dense<0.000000e+00> : vector<128xf32>
    %133 = vector.multi_reduction <add>, %132, %cst_100 [0] : vector<208x128xf32> to vector<128xf32>
    %134 = vector.shape_cast %133 : vector<128xf32> to vector<1x128xf32>
    %cst_101 = arith.constant dense<0.000000e+00> : vector<1x128xf32>
    %135 = tpu.matmul %134, %9, %cst_101 {dimension_numbers = #tpu.dot_dimension_numbers<[1], [0], [0], [1], [0, 0, 1, 1], [], []>} : vector<1x128xf32>, vector<128x128xf32>, vector<1x128xf32> -> vector<1x128xf32>
    %cst_102 = arith.constant 4.8828125E-4 : f32
    %136 = vector.broadcast %cst_102 : f32 to vector<1x128xf32>
    %137 = arith.mulf %135, %136 : vector<1x128xf32>
    %138 = vector.broadcast %137 : vector<1x128xf32> to vector<208x128xf32>
    %139 = arith.subf %131, %138 : vector<208x128xf32>
    %140 = arith.mulf %139, %0 : vector<208x128xf32>
    %141 = arith.mulf %140, %140 : vector<208x128xf32>
    %cst_103 = arith.constant dense<0.000000e+00> : vector<128xf32>
    %142 = vector.multi_reduction <add>, %141, %cst_103 [0] : vector<208x128xf32> to vector<128xf32>
    %143 = vector.shape_cast %142 : vector<128xf32> to vector<1x128xf32>
    %cst_104 = arith.constant dense<0.000000e+00> : vector<1x128xf32>
    %144 = tpu.matmul %143, %9, %cst_104 {dimension_numbers = #tpu.dot_dimension_numbers<[1], [0], [0], [1], [0, 0, 1, 1], [], []>} : vector<1x128xf32>, vector<128x128xf32>, vector<1x128xf32> -> vector<1x128xf32>
    %cst_105 = arith.constant 4.8828125E-4 : f32
    %145 = vector.broadcast %cst_105 : f32 to vector<1x128xf32>
    %146 = arith.mulf %144, %145 : vector<1x128xf32>
    %c5_106 = arith.constant 5 : index
    %c0_107 = arith.constant 0 : index
    %147 = vector.load %arg5[%c5_106, %c0_107] : memref<16x128xf32, #tpu.memory_space<vmem>>, vector<1x128xf32>
    %cst_108 = arith.constant 9.99999974E-6 : f32
    %148 = vector.broadcast %cst_108 : f32 to vector<1x128xf32>
    %149 = arith.addf %146, %148 : vector<1x128xf32>
    %150 = math.rsqrt %149 : vector<1x128xf32>
    %151 = arith.mulf %147, %150 : vector<1x128xf32>
    %152 = vector.broadcast %151 : vector<1x128xf32> to vector<208x128xf32>
    %153 = arith.mulf %140, %152 : vector<208x128xf32>
    %c8_109 = arith.constant 8 : index
    %c0_110 = arith.constant 0 : index
    %154 = vector.load %arg5[%c8_109, %c0_110] : memref<16x128xf32, #tpu.memory_space<vmem>>, vector<1x128xf32>
    %155 = vector.broadcast %154 : vector<1x128xf32> to vector<208x128xf32>
    %156 = arith.addf %153, %155 : vector<208x128xf32>
    %cst_111 = arith.constant 0.000000e+00 : f32
    %157 = vector.broadcast %cst_111 : f32 to vector<208x128xf32>
    %158 = arith.maximumf %156, %157 : vector<208x128xf32>
    %159 = arith.mulf %158, %0 : vector<208x128xf32>
    %c8_112 = arith.constant 8 : index
    %c0_113 = arith.constant 0 : index
    %160 = vector.load %arg7[%c8_112, %c0_113] : memref<224x128xf32, #tpu.memory_space<vmem>>, vector<208x128xf32>
    tpu.vector_store %arg7[%c8_112, %c0_113], %159 {strides = array<i32>} : memref<224x128xf32, #tpu.memory_space<vmem>>, vector<208x128xf32>,
    %cst_114 = arith.constant 0.000000e+00 : f32
    %161 = vector.broadcast %cst_114 : f32 to vector<208x128xf32>
    %c4_115 = arith.constant 4 : index
    %c0_116 = arith.constant 0 : index
    %162 = vector.load %arg7[%c4_115, %c0_116] : memref<224x128xf32, #tpu.memory_space<vmem>>, vector<208x128xf32>
    %c2304 = arith.constant 2304 : index
    %c0_117 = arith.constant 0 : index
    %163 = vector.load %arg4[%c2304, %c0_117] : memref<3456x128xf32, #tpu.memory_space<vmem>>, vector<128x128xf32>
    %cst_118 = arith.constant dense<0.000000e+00> : vector<208x128xf32>
    %164 = tpu.matmul %162, %163, %cst_118 {dimension_numbers = #tpu.dot_dimension_numbers<[1], [0], [0], [1], [0, 0, 1, 1], [], []>} : vector<208x128xf32>, vector<128x128xf32>, vector<208x128xf32> -> vector<208x128xf32>
    %165 = arith.addf %161, %164 : vector<208x128xf32>
    %c5_119 = arith.constant 5 : index
    %c0_120 = arith.constant 0 : index
    %166 = vector.load %arg7[%c5_119, %c0_120] : memref<224x128xf32, #tpu.memory_space<vmem>>, vector<208x128xf32>
    %c2432 = arith.constant 2432 : index
    %c0_121 = arith.constant 0 : index
    %167 = vector.load %arg4[%c2432, %c0_121] : memref<3456x128xf32, #tpu.memory_space<vmem>>, vector<128x128xf32>
    %cst_122 = arith.constant dense<0.000000e+00> : vector<208x128xf32>
    %168 = tpu.matmul %166, %167, %cst_122 {dimension_numbers = #tpu.dot_dimension_numbers<[1], [0], [0], [1], [0, 0, 1, 1], [], []>} : vector<208x128xf32>, vector<128x128xf32>, vector<208x128xf32> -> vector<208x128xf32>
    %169 = arith.addf %165, %168 : vector<208x128xf32>
    %c6_123 = arith.constant 6 : index
    %c0_124 = arith.constant 0 : index
    %170 = vector.load %arg7[%c6_123, %c0_124] : memref<224x128xf32, #tpu.memory_space<vmem>>, vector<208x128xf32>
    %c2560 = arith.constant 2560 : index
    %c0_125 = arith.constant 0 : index
    %171 = vector.load %arg4[%c2560, %c0_125] : memref<3456x128xf32, #tpu.memory_space<vmem>>, vector<128x128xf32>
    %cst_126 = arith.constant dense<0.000000e+00> : vector<208x128xf32>
    %172 = tpu.matmul %170, %171, %cst_126 {dimension_numbers = #tpu.dot_dimension_numbers<[1], [0], [0], [1], [0, 0, 1, 1], [], []>} : vector<208x128xf32>, vector<128x128xf32>, vector<208x128xf32> -> vector<208x128xf32>
    %173 = arith.addf %169, %172 : vector<208x128xf32>
    %c7_127 = arith.constant 7 : index
    %c0_128 = arith.constant 0 : index
    %174 = vector.load %arg7[%c7_127, %c0_128] : memref<224x128xf32, #tpu.memory_space<vmem>>, vector<208x128xf32>
    %c2688 = arith.constant 2688 : index
    %c0_129 = arith.constant 0 : index
    %175 = vector.load %arg4[%c2688, %c0_129] : memref<3456x128xf32, #tpu.memory_space<vmem>>, vector<128x128xf32>
    %cst_130 = arith.constant dense<0.000000e+00> : vector<208x128xf32>
    %176 = tpu.matmul %174, %175, %cst_130 {dimension_numbers = #tpu.dot_dimension_numbers<[1], [0], [0], [1], [0, 0, 1, 1], [], []>} : vector<208x128xf32>, vector<128x128xf32>, vector<208x128xf32> -> vector<208x128xf32>
    %177 = arith.addf %173, %176 : vector<208x128xf32>
    %c8_131 = arith.constant 8 : index
    %c0_132 = arith.constant 0 : index
    %178 = vector.load %arg7[%c8_131, %c0_132] : memref<224x128xf32, #tpu.memory_space<vmem>>, vector<208x128xf32>
    %c2816 = arith.constant 2816 : index
    %c0_133 = arith.constant 0 : index
    %179 = vector.load %arg4[%c2816, %c0_133] : memref<3456x128xf32, #tpu.memory_space<vmem>>, vector<128x128xf32>
    %cst_134 = arith.constant dense<0.000000e+00> : vector<208x128xf32>
    %180 = tpu.matmul %178, %179, %cst_134 {dimension_numbers = #tpu.dot_dimension_numbers<[1], [0], [0], [1], [0, 0, 1, 1], [], []>} : vector<208x128xf32>, vector<128x128xf32>, vector<208x128xf32> -> vector<208x128xf32>
    %181 = arith.addf %177, %180 : vector<208x128xf32>
    %c9_135 = arith.constant 9 : index
    %c0_136 = arith.constant 0 : index
    %182 = vector.load %arg7[%c9_135, %c0_136] : memref<224x128xf32, #tpu.memory_space<vmem>>, vector<208x128xf32>
    %c2944 = arith.constant 2944 : index
    %c0_137 = arith.constant 0 : index
    %183 = vector.load %arg4[%c2944, %c0_137] : memref<3456x128xf32, #tpu.memory_space<vmem>>, vector<128x128xf32>
    %cst_138 = arith.constant dense<0.000000e+00> : vector<208x128xf32>
    %184 = tpu.matmul %182, %183, %cst_138 {dimension_numbers = #tpu.dot_dimension_numbers<[1], [0], [0], [1], [0, 0, 1, 1], [], []>} : vector<208x128xf32>, vector<128x128xf32>, vector<208x128xf32> -> vector<208x128xf32>
    %185 = arith.addf %181, %184 : vector<208x128xf32>
    %c10_139 = arith.constant 10 : index
    %c0_140 = arith.constant 0 : index
    %186 = vector.load %arg7[%c10_139, %c0_140] : memref<224x128xf32, #tpu.memory_space<vmem>>, vector<208x128xf32>
    %c3072 = arith.constant 3072 : index
    %c0_141 = arith.constant 0 : index
    %187 = vector.load %arg4[%c3072, %c0_141] : memref<3456x128xf32, #tpu.memory_space<vmem>>, vector<128x128xf32>
    %cst_142 = arith.constant dense<0.000000e+00> : vector<208x128xf32>
    %188 = tpu.matmul %186, %187, %cst_142 {dimension_numbers = #tpu.dot_dimension_numbers<[1], [0], [0], [1], [0, 0, 1, 1], [], []>} : vector<208x128xf32>, vector<128x128xf32>, vector<208x128xf32> -> vector<208x128xf32>
    %189 = arith.addf %185, %188 : vector<208x128xf32>
    %c11_143 = arith.constant 11 : index
    %c0_144 = arith.constant 0 : index
    %190 = vector.load %arg7[%c11_143, %c0_144] : memref<224x128xf32, #tpu.memory_space<vmem>>, vector<208x128xf32>
    %c3200 = arith.constant 3200 : index
    %c0_145 = arith.constant 0 : index
    %191 = vector.load %arg4[%c3200, %c0_145] : memref<3456x128xf32, #tpu.memory_space<vmem>>, vector<128x128xf32>
    %cst_146 = arith.constant dense<0.000000e+00> : vector<208x128xf32>
    %192 = tpu.matmul %190, %191, %cst_146 {dimension_numbers = #tpu.dot_dimension_numbers<[1], [0], [0], [1], [0, 0, 1, 1], [], []>} : vector<208x128xf32>, vector<128x128xf32>, vector<208x128xf32> -> vector<208x128xf32>
    %193 = arith.addf %189, %192 : vector<208x128xf32>
    %c12_147 = arith.constant 12 : index
    %c0_148 = arith.constant 0 : index
    %194 = vector.load %arg7[%c12_147, %c0_148] : memref<224x128xf32, #tpu.memory_space<vmem>>, vector<208x128xf32>
    %c3328 = arith.constant 3328 : index
    %c0_149 = arith.constant 0 : index
    %195 = vector.load %arg4[%c3328, %c0_149] : memref<3456x128xf32, #tpu.memory_space<vmem>>, vector<128x128xf32>
    %cst_150 = arith.constant dense<0.000000e+00> : vector<208x128xf32>
    %196 = tpu.matmul %194, %195, %cst_150 {dimension_numbers = #tpu.dot_dimension_numbers<[1], [0], [0], [1], [0, 0, 1, 1], [], []>} : vector<208x128xf32>, vector<128x128xf32>, vector<208x128xf32> -> vector<208x128xf32>
    %197 = arith.addf %193, %196 : vector<208x128xf32>
    %c3 = arith.constant 3 : index
    %c0_151 = arith.constant 0 : index
    %198 = vector.load %arg5[%c3, %c0_151] : memref<16x128xf32, #tpu.memory_space<vmem>>, vector<1x128xf32>
    %199 = vector.broadcast %198 : vector<1x128xf32> to vector<208x128xf32>
    %200 = arith.addf %197, %199 : vector<208x128xf32>
    %201 = arith.mulf %200, %0 : vector<208x128xf32>
    %cst_152 = arith.constant dense<0.000000e+00> : vector<128xf32>
    %202 = vector.multi_reduction <add>, %201, %cst_152 [0] : vector<208x128xf32> to vector<128xf32>
    %203 = vector.shape_cast %202 : vector<128xf32> to vector<1x128xf32>
    %cst_153 = arith.constant dense<0.000000e+00> : vector<1x128xf32>
    %204 = tpu.matmul %203, %9, %cst_153 {dimension_numbers = #tpu.dot_dimension_numbers<[1], [0], [0], [1], [0, 0, 1, 1], [], []>} : vector<1x128xf32>, vector<128x128xf32>, vector<1x128xf32> -> vector<1x128xf32>
    %cst_154 = arith.constant 4.8828125E-4 : f32
    %205 = vector.broadcast %cst_154 : f32 to vector<1x128xf32>
    %206 = arith.mulf %204, %205 : vector<1x128xf32>
    %207 = vector.broadcast %206 : vector<1x128xf32> to vector<208x128xf32>
    %208 = arith.subf %200, %207 : vector<208x128xf32>
    %209 = arith.mulf %208, %0 : vector<208x128xf32>
    %210 = arith.mulf %209, %209 : vector<208x128xf32>
    %cst_155 = arith.constant dense<0.000000e+00> : vector<128xf32>
    %211 = vector.multi_reduction <add>, %210, %cst_155 [0] : vector<208x128xf32> to vector<128xf32>
    %212 = vector.shape_cast %211 : vector<128xf32> to vector<1x128xf32>
    %cst_156 = arith.constant dense<0.000000e+00> : vector<1x128xf32>
    %213 = tpu.matmul %212, %9, %cst_156 {dimension_numbers = #tpu.dot_dimension_numbers<[1], [0], [0], [1], [0, 0, 1, 1], [], []>} : vector<1x128xf32>, vector<128x128xf32>, vector<1x128xf32> -> vector<1x128xf32>
    %cst_157 = arith.constant 4.8828125E-4 : f32
    %214 = vector.broadcast %cst_157 : f32 to vector<1x128xf32>
    %215 = arith.mulf %213, %214 : vector<1x128xf32>
    %c6_158 = arith.constant 6 : index
    %c0_159 = arith.constant 0 : index
    %216 = vector.load %arg5[%c6_158, %c0_159] : memref<16x128xf32, #tpu.memory_space<vmem>>, vector<1x128xf32>
    %cst_160 = arith.constant 9.99999974E-6 : f32
    %217 = vector.broadcast %cst_160 : f32 to vector<1x128xf32>
    %218 = arith.addf %215, %217 : vector<1x128xf32>
    %219 = math.rsqrt %218 : vector<1x128xf32>
    %220 = arith.mulf %216, %219 : vector<1x128xf32>
    %221 = vector.broadcast %220 : vector<1x128xf32> to vector<208x128xf32>
    %222 = arith.mulf %209, %221 : vector<208x128xf32>
    %c9_161 = arith.constant 9 : index
    %c0_162 = arith.constant 0 : index
    %223 = vector.load %arg5[%c9_161, %c0_162] : memref<16x128xf32, #tpu.memory_space<vmem>>, vector<1x128xf32>
    %224 = vector.broadcast %223 : vector<1x128xf32> to vector<208x128xf32>
    %225 = arith.addf %222, %224 : vector<208x128xf32>
    %cst_163 = arith.constant 0.000000e+00 : f32
    %226 = vector.broadcast %cst_163 : f32 to vector<208x128xf32>
    %227 = arith.maximumf %225, %226 : vector<208x128xf32>
    %228 = arith.mulf %227, %0 : vector<208x128xf32>
    %c0_164 = arith.constant 0 : index
    %c0_165 = arith.constant 0 : index
    %229 = vector.load %arg6[%c0_164, %c0_165] : memref<208x128xf32, #tpu.memory_space<vmem>>, vector<208x128xf32>
    tpu.vector_store %arg6[%c0_164, %c0_165], %228 {strides = array<i32>} : memref<208x128xf32, #tpu.memory_space<vmem>>, vector<208x128xf32>,
    return
  }
  func.func @transform_0(%arg0: i32) -> (i32, i32) {
    %c0_i32 = arith.constant 0 : i32
    %c0_i32_0 = arith.constant 0 : i32
    %c0_i32_1 = arith.constant 0 : i32
    return %c0_i32, %c0_i32_0 : i32, i32
  }
  func.func @transform_1(%arg0: i32) -> (i32, i32) {
    %c0_i32 = arith.constant 0 : i32
    %c0_i32_0 = arith.constant 0 : i32
    %c0_i32_1 = arith.constant 0 : i32
    return %c0_i32, %c0_i32_0 : i32, i32
  }
  func.func @transform_2(%arg0: i32) -> (i32, i32) {
    %c0_i32 = arith.constant 0 : i32
    %c0_i32_0 = arith.constant 0 : i32
    %c0_i32_1 = arith.constant 0 : i32
    return %c0_i32, %c0_i32_0 : i32, i32
  }
  func.func @transform_3(%arg0: i32) -> (i32, i32) {
    %c0_i32 = arith.constant 0 : i32
    %c0_i32_0 = arith.constant 0 : i32
    %c0_i32_1 = arith.constant 0 : i32
    return %c0_i32, %c0_i32_0 : i32, i32
  }
  func.func @transform_4(%arg0: i32) -> (i32, i32) {
    %c0_i32 = arith.constant 0 : i32
    %c0_i32_0 = arith.constant 0 : i32
    %c0_i32_1 = arith.constant 0 : i32
    return %c0_i32, %c0_i32_0 : i32, i32
  }
  func.func @transform_5(%arg0: i32) -> (i32, i32) {
    %c0_i32 = arith.constant 0 : i32
    %c0_i32_0 = arith.constant 0 : i32
    %c0_i32_1 = arith.constant 0 : i32
    return %c0_i32, %c0_i32_0 : i32, i32
  }
}

</mosaic_0001>

<bundles_post_ra>
// kernel: tile.53
= control target key start
LH: loop header
LB: loop body
LE: loop exit
PB: predicated region body
PF: predicated region fallthrough
CT: control target
= control target key end

     0   :  { %s28_s0 = inlined_call_operand.vmem [shape: f32[8], index: 0, kind: input, shape index: {}]   ;;  %s29_s1 = inlined_call_operand.vmem [shape: f32[16,8], index: 1, kind: output, shape index: {}]  }
   0x1   :  { %v4_v0 = vld [vmem:[%s28_s0] ss:$0 sm:$0xff] }
   0x2   :  { %5 = vst [vmem:[%s29_s1] sm:$0xff] %v4_v0  ;;  %8 = vst [vmem:[%s29_s1 + $0x8] sm:$0xff] %v4_v0 }

// kernel: tile.90
= control target key start
LH: loop header
LB: loop body
LE: loop exit
PB: predicated region body
PF: predicated region fallthrough
CT: control target
= control target key end

     0   :  { %s133_s10 = smov 120   ;;  %s134_s11 = smov 104   ;;  %vm3_vm0 = vcmask 64512   ;;  %vm9_vm1 = vcmask 1048512   ;;  %vm15_vm2 = vcmask 982912   ;;  %vm21_vm3 = vcmask 917312   ;;  %s209_s0 = inlined_call_operand.vmem [shape: f32[16,8], index: 0, kind: input, shape index: {}]   ;;  %s210_s1 = inlined_call_operand.vmem [shape: f32[1,128], index: 1, kind: output, shape index: {}]  }
   0x1   :  { %v103_v0 = vld [vmem:[%s209_s0 + $0xf] sm:$0x1]   ;;  %v105_v1 = vld [vmem:[%s209_s0 + $0xd] sm:$0x1]   ;;  %v104_v2 = vld [vmem:[%s209_s0 + $0xe] sm:$0x1]  }
   0x2   :  { %7 = vrot.lane.b32.xlu0 %v103_v0, %s133_s10  ;;  %19 = vrot.lane.b32.xlu1 %v105_v1, %s134_s11  ;;  %v106_v3 = vld [vmem:[%s209_s0 + $0xc] sm:$0x1]   ;;  %s135_s16 = smov 112   ;;  %s136_s17 = smov 96   ;;  %v107_v4 = vld [vmem:[%s209_s0 + $0xb] sm:$0x1]  }
   0x3   :  { %v108_v5 = vld [vmem:[%s209_s0 + $0xa] sm:$0x1]   ;;  %v2_v6 = vld [vmem:[%s209_s0] sm:$0x1]   ;;  %s137_s24 = smov 88   ;;  %s138_s25 = smov 80  }
   0x4   :  { %4 = vst.msk [vmem:[#allocation0] sm:$0x1] %vm3_vm0, %v2_v6   ;;  %v109_v7 = vld [vmem:[%s209_s0 + $0x9] sm:$0x1]   ;;  %v110_v8 = vld [vmem:[%s209_s0 + $0x8] sm:$0x1]  }
   0x5   :  { %s139_s30 = smov 72   ;;  %s140_s2 = smov 64   ;;  %v111_v9 = vld [vmem:[%s209_s0 + $0x7] sm:$0x1]   ;;  %v112_v10 = vld [vmem:[%s209_s0 + $0x6] sm:$0x1]  }
   0x6   :  { %13 = vrot.lane.b32.xlu0 %v104_v2, %s135_s16  ;;  %25 = vrot.lane.b32.xlu1 %v106_v3, %s136_s17  ;;  %s141_s7 = smov 56   ;;  %s142_s8 = smov 48   ;;  %v113_v11 = vld [vmem:[%s209_s0 + $0x5] sm:$0x1]   ;;  %v114_v12 = vld [vmem:[%s209_s0 + $0x4] sm:$0x1]  }
   0x7   :  { %s143_s13 = smov 40   ;;  %s144_s14 = smov 32   ;;  %v115_v13 = vld [vmem:[%s209_s0 + $0x3] sm:$0x1]   ;;  %v116_v14 = vld [vmem:[%s209_s0 + $0x2] sm:$0x1]  }
   0x8   :  { %s145_s19 = smov 24   ;;  %s146_s20 = smov 16   ;;  %v117_v15 = vld [vmem:[%s209_s0 + $0x1] sm:$0x1]   ;;  %vm27_vm4 = vcmask 851712   ;;  %vm33_vm5 = vcmask 786112  }
   0x9   :  { %s147_s0 = smov 8   ;;  %vm39_vm6 = vcmask 720512   ;;  %vm45_vm7 = vcmask 654912   ;;  %vm51_vm8 = vcmask 589312   ;;  %vm57_vm9 = vcmask 523712  }
   0xa   :  { %31 = vrot.lane.b32.xlu0 %v107_v4, %s137_s24  ;;  %37 = vrot.lane.b32.xlu1 %v108_v5, %s138_s25  ;;  %vm63_vm10 = vcmask 458112   ;;  %vm69_vm11 = vcmask 392512   ;;  %vm75_vm12 = vcmask 326912   ;;  %vm81_vm13 = vcmask 261312  }
   0xb   :  { %vm87_vm14 = vcmask 195712   ;;  %vm93_vm15 = vcmask 130112  }
   0xe   :  { %43 = vrot.lane.b32.xlu0 %v109_v7, %s139_s30  ;;  %49 = vrot.lane.b32.xlu1 %v110_v8, %s140_s2 }
  0x12   :  { %55 = vrot.lane.b32.xlu0 %v111_v9, %s141_s7  ;;  %61 = vrot.lane.b32.xlu1 %v112_v10, %s142_s8 }
  0x16   :  { %67 = vrot.lane.b32.xlu0 %v113_v11, %s143_s13  ;;  %73 = vrot.lane.b32.xlu1 %v114_v12, %s144_s14 }
  0x1a   :  { %79 = vrot.lane.b32.xlu0 %v115_v13, %s145_s19  ;;  %85 = vrot.lane.b32.xlu1 %v116_v14, %s146_s20 }
  0x1e   :  { %91 = vrot.lane.b32.xlu0 %v117_v15, %s147_s0 }
  0x74   :  { %v8_v16 = vpop.permute.xlu0 %7   ;;  %v20_v17 = vpop.permute.xlu1 %19  }
  0x75   :  { %10 = vst.msk [vmem:[#allocation0] sm:$0x1] %vm9_vm1, %v8_v16  }
  0x78   :  { %v14_v18 = vpop.permute.xlu0 %13   ;;  %v26_v19 = vpop.permute.xlu1 %25  }
  0x79   :  { %16 = vst.msk [vmem:[#allocation0] sm:$0x1] %vm15_vm2, %v14_v18  }
  0x7a   :  { %22 = vst.msk [vmem:[#allocation0] sm:$0x1] %vm21_vm3, %v20_v17  }
  0x7b   :  { %28 = vst.msk [vmem:[#allocation0] sm:$0x1] %vm27_vm4, %v26_v19  }
  0x7c   :  { %v32_v20 = vpop.permute.xlu0 %31   ;;  %v38_v21 = vpop.permute.xlu1 %37  }
  0x7d   :  { %34 = vst.msk [vmem:[#allocation0] sm:$0x1] %vm33_vm5, %v32_v20  }
  0x7e   :  { %40 = vst.msk [vmem:[#allocation0] sm:$0x1] %vm39_vm6, %v38_v21  }
  0x80   :  { %v44_v22 = vpop.permute.xlu0 %43   ;;  %v50_v23 = vpop.permute.xlu1 %49  }
  0x81   :  { %46 = vst.msk [vmem:[#allocation0] sm:$0x1] %vm45_vm7, %v44_v22  }
  0x82   :  { %52 = vst.msk [vmem:[#allocation0] sm:$0x1] %vm51_vm8, %v50_v23  }
  0x84   :  { %v56_v24 = vpop.permute.xlu0 %55   ;;  %v62_v25 = vpop.permute.xlu1 %61  }
  0x85   :  { %58 = vst.msk [vmem:[#allocation0] sm:$0x1] %vm57_vm9, %v56_v24  }
  0x86   :  { %64 = vst.msk [vmem:[#allocation0] sm:$0x1] %vm63_vm10, %v62_v25  }
  0x88   :  { %v68_v26 = vpop.permute.xlu0 %67   ;;  %v74_v27 = vpop.permute.xlu1 %73  }
  0x89   :  { %70 = vst.msk [vmem:[#allocation0] sm:$0x1] %vm69_vm11, %v68_v26  }
  0x8a   :  { %76 = vst.msk [vmem:[#allocation0] sm:$0x1] %vm75_vm12, %v74_v27  }
  0x8c   :  { %v80_v28 = vpop.permute.xlu0 %79   ;;  %v86_v29 = vpop.permute.xlu1 %85  }
  0x8d   :  { %82 = vst.msk [vmem:[#allocation0] sm:$0x1] %vm81_vm13, %v80_v28  }
  0x8e   :  { %88 = vst.msk [vmem:[#allocation0] sm:$0x1] %vm87_vm14, %v86_v29  }
  0x90   :  { %v92_v30 = vpop.permute.xlu0 %91  }
  0x91   :  { %94 = vst.msk [vmem:[#allocation0] sm:$0x1] %vm93_vm15, %v92_v30  }
  0x98   :  { %v99_v31 = vld [vmem:[#allocation0] sm:$0x1] }
  0x99   :  { %102 = vst [vmem:[%s210_s1] sm:$0x1] %v99_v31 }

// kernel: up_pallas.1
= control target key start
LH: loop header
LB: loop body
LE: loop exit
PB: predicated region body
PF: predicated region fallthrough
CT: control target
= control target key end

     0   :  { %vm17998_vm12 = vmmov 0   ;;  %s17967_s2 = inlined_call_operand.vmem [shape: f32[128,128], index: 2, kind: input, shape index: {}]   ;;  %s17968_s0 = inlined_call_operand.vmem [shape: f32[208,128], index: 0, kind: input, shape index: {}]   ;;  %s17969_s3 = inlined_call_operand.vmem [shape: f32[3456,128], index: 3, kind: input, shape index: {}]   ;;  %s17970_s4 = inlined_call_operand.vmem [shape: f32[16,128], index: 4, kind: input, shape index: {}]   ;;  %s17971_s1 = inlined_call_operand.vmem [shape: f32[208,128], index: 1, kind: input, shape index: {}]   ;;  %s17972_s5 = inlined_call_operand.vmem [shape: f32[208,128], index: 5, kind: output, shape index: {}]  }
   0x1   :  { %v175_v0 = vld [vmem:[%s17967_s2 + $0x78] sm:$0xff]  ;;  %v174_v1 = vld [vmem:[%s17967_s2 + $0x70] sm:$0xff]  ;;  %v173_v2 = vld [vmem:[%s17967_s2 + $0x68] sm:$0xff] }
   0x2   :  { %10232 = vmatprep.subr.mxu0 %v175_v0  ;;  %v172_v3 = vld [vmem:[%s17967_s2 + $0x60] sm:$0xff]  ;;  %v171_v5 = vld [vmem:[%s17967_s2 + $0x58] sm:$0xff]  ;;  %v170_v6 = vld [vmem:[%s17967_s2 + $0x50] sm:$0xff] }
   0x3   :  { %10233 = vmatpush3.msra.mxu0 %v175_v0  ;;  %v134_v4 = vld [vmem:[%s17968_s0] sm:$0xff]  ;;  %v169_v7 = vld [vmem:[%s17967_s2 + $0x48] sm:$0xff]  ;;  %v167_v9 = vld [vmem:[%s17967_s2 + $0x38] sm:$0xff] }
   0x4   :  { %10234 = vmatprep.subr.mxu0 %v174_v1  ;;  %10264 = vmatprep.mubr.f32.mxu0 %v134_v4  ;;  %v168_v8 = vld [vmem:[%s17967_s2 + $0x40] sm:$0xff]  ;;  %v511_v10 = vld [vmem:[%s17969_s3 + $0xf8] sm:$0xff]  ;;  %v510_v11 = vld [vmem:[%s17969_s3 + $0xf0] sm:$0xff]  ;;  %v12541_v4 = vmov 0.0  }
   0x5   :  { %10235 = vmatpush3.msra.mxu0 %v174_v1  ;;  %10303 = vmatprep.subr.mxu1 %v511_v10  ;;  %v166_v12 = vld [vmem:[%s17967_s2 + $0x30] sm:$0xff]  ;;  %v509_v13 = vld [vmem:[%s17969_s3 + $0xe8] sm:$0xff]  ;;  %v508_v15 = vld [vmem:[%s17969_s3 + $0xe0] sm:$0xff]  ;;  %130 = vst [vmem:[#allocation2] sm:$0xff] %v12541_v4 }
   0x6   :  { %10236 = vmatprep.subr.mxu0 %v173_v2  ;;  %10304 = vmatpush3.msra.mxu1 %v511_v10  ;;  %v165_v14 = vld [vmem:[%s17967_s2 + $0x28] sm:$0xff]  ;;  %v164_v16 = vld [vmem:[%s17967_s2 + $0x20] sm:$0xff]  ;;  %v507_v17 = vld [vmem:[%s17969_s3 + $0xd8] sm:$0xff]  ;;  %131 = vst [vmem:[#allocation2 + $0xd8] sm:$0xff] %v12541_v4 }
   0x7   :  { %10237 = vmatpush3.msra.mxu0 %v173_v2  ;;  %10305 = vmatprep.subr.mxu1 %v510_v11  ;;  %v163_v18 = vld [vmem:[%s17967_s2 + $0x18] sm:$0xff]  ;;  %v506_v19 = vld [vmem:[%s17969_s3 + $0xd0] sm:$0xff]  ;;  %v505_v21 = vld [vmem:[%s17969_s3 + $0xc8] sm:$0xff]  ;;  %132 = vst [vmem:[#allocation3] sm:$0xff] %v12541_v4 }
   0x8   :  { %10238 = vmatprep.subr.mxu0 %v172_v3  ;;  %10306 = vmatpush3.msra.mxu1 %v510_v11  ;;  %v162_v20 = vld [vmem:[%s17967_s2 + $0x10] sm:$0xff]  ;;  %v161_v22 = vld [vmem:[%s17967_s2 + $0x8] sm:$0xff]  ;;  %v504_v23 = vld [vmem:[%s17969_s3 + $0xc0] sm:$0xff]  ;;  %133 = vst [vmem:[#allocation3 + $0xd8] sm:$0xff] %v12541_v4 }
   0x9   :  { %10239 = vmatpush3.msra.mxu0 %v172_v3  ;;  %10307 = vmatprep.subr.mxu1 %v509_v13  ;;  %v160_v24 = vld [vmem:[%s17967_s2] sm:$0xff]  ;;  %v503_v25 = vld [vmem:[%s17969_s3 + $0xb8] sm:$0xff]  ;;  %v135_v26 = vld [vmem:[%s17968_s0 + $0x8] sm:$0xff] }
   0xa   :  { %10240 = vmatprep.subr.mxu0 %v171_v5  ;;  %10308 = vmatpush3.msra.mxu1 %v509_v13  ;;  %v469_v27 = vld [vmem:[%s17969_s3 + $0x78] sm:$0xff]  ;;  %v136_v28 = vld [vmem:[%s17968_s0 + $0x10] sm:$0xff]  ;;  %v467_v31 = vld [vmem:[%s17969_s3 + $0x68] sm:$0xff] }
   0xb   :  { %10241 = vmatpush3.msra.mxu0 %v171_v5  ;;  %10309 = vmatprep.subr.mxu1 %v508_v15  ;;  %v468_v29 = vld [vmem:[%s17969_s3 + $0x70] sm:$0xff]  ;;  %v137_v30 = vld [vmem:[%s17968_s0 + $0x18] sm:$0xff]  ;;  %v138_v32 = vld [vmem:[%s17968_s0 + $0x20] sm:$0xff] }
   0xc   :  { %10242 = vmatprep.subr.mxu0 %v170_v6  ;;  %10310 = vmatpush3.msra.mxu1 %v508_v15  ;;  %v466_v33 = vld [vmem:[%s17969_s3 + $0x60] sm:$0xff]  ;;  %v139_v34 = vld [vmem:[%s17968_s0 + $0x28] sm:$0xff]  ;;  %v465_v35 = vld [vmem:[%s17969_s3 + $0x58] sm:$0xff] }
   0xd   :  { %10243 = vmatpush3.msra.mxu0 %v170_v6  ;;  %10311 = vmatprep.subr.mxu1 %v507_v17  ;;  %v140_v36 = vld [vmem:[%s17968_s0 + $0x30] sm:$0xff]  ;;  %v141_v38 = vld [vmem:[%s17968_s0 + $0x38] sm:$0xff]  ;;  %v463_v39 = vld [vmem:[%s17969_s3 + $0x48] sm:$0xff] }
   0xe   :  { %10244 = vmatprep.subr.mxu0 %v169_v7  ;;  %10312 = vmatpush3.msra.mxu1 %v507_v17  ;;  %v464_v37 = vld [vmem:[%s17969_s3 + $0x50] sm:$0xff]  ;;  %v142_v40 = vld [vmem:[%s17968_s0 + $0x40] sm:$0xff]  ;;  %v143_v42 = vld [vmem:[%s17968_s0 + $0x48] sm:$0xff] }
   0xf   :  { %10245 = vmatpush3.msra.mxu0 %v169_v7  ;;  %10313 = vmatprep.subr.mxu1 %v506_v19  ;;  %v462_v41 = vld [vmem:[%s17969_s3 + $0x40] sm:$0xff]  ;;  %v144_v43 = vld [vmem:[%s17968_s0 + $0x50] sm:$0xff]  ;;  %v145_v44 = vld [vmem:[%s17968_s0 + $0x58] sm:$0xff] }
  0x10   :  { %10246 = vmatprep.subr.mxu0 %v168_v8  ;;  %10314 = vmatpush3.msra.mxu1 %v506_v19  ;;  %v146_v45 = vld [vmem:[%s17968_s0 + $0x60] sm:$0xff]  ;;  %v147_v46 = vld [vmem:[%s17968_s0 + $0x68] sm:$0xff]  ;;  %v148_v47 = vld [vmem:[%s17968_s0 + $0x70] sm:$0xff] }
  0x11   :  { %10247 = vmatpush3.msra.mxu0 %v168_v8  ;;  %10315 = vmatprep.subr.mxu1 %v505_v21  ;;  %v149_v48 = vld [vmem:[%s17968_s0 + $0x78] sm:$0xff]  ;;  %v150_v49 = vld [vmem:[%s17968_s0 + $0x80] sm:$0xff]  ;;  %v151_v50 = vld [vmem:[%s17968_s0 + $0x88] sm:$0xff] }
  0x12   :  { %10248 = vmatprep.subr.mxu0 %v167_v9  ;;  %10316 = vmatpush3.msra.mxu1 %v505_v21  ;;  %v152_v51 = vld [vmem:[%s17968_s0 + $0x90] sm:$0xff]  ;;  %v153_v52 = vld [vmem:[%s17968_s0 + $0x98] sm:$0xff]  ;;  %v154_v53 = vld [vmem:[%s17968_s0 + $0xa0] sm:$0xff] }
  0x13   :  { %10249 = vmatpush3.msra.mxu0 %v167_v9  ;;  %10317 = vmatprep.subr.mxu1 %v504_v23  ;;  %v155_v54 = vld [vmem:[%s17968_s0 + $0xa8] sm:$0xff]  ;;  %v156_v55 = vld [vmem:[%s17968_s0 + $0xb0] sm:$0xff]  ;;  %v157_v56 = vld [vmem:[%s17968_s0 + $0xb8] sm:$0xff] }
  0x14   :  { %10250 = vmatprep.subr.mxu0 %v166_v12  ;;  %10318 = vmatpush3.msra.mxu1 %v504_v23  ;;  %v158_v57 = vld [vmem:[%s17968_s0 + $0xc0] sm:$0xff]  ;;  %v159_v58 = vld [vmem:[%s17968_s0 + $0xc8] sm:$0xff]  ;;  %v461_v59 = vld [vmem:[%s17969_s3 + $0x38] sm:$0xff] }
  0x15   :  { %10251 = vmatpush3.msra.mxu0 %v166_v12  ;;  %10319 = vmatprep.subr.mxu1 %v503_v25  ;;  %v502_v60 = vld [vmem:[%s17969_s3 + $0xb0] sm:$0xff]  ;;  %v501_v62 = vld [vmem:[%s17969_s3 + $0xa8] sm:$0xff]  ;;  %v500_v0 = vld [vmem:[%s17969_s3 + $0xa0] sm:$0xff] }
  0x16   :  { %10252 = vmatprep.subr.mxu0 %v165_v14  ;;  %10320 = vmatpush3.msra.mxu1 %v503_v25  ;;  %v460_v61 = vld [vmem:[%s17969_s3 + $0x30] sm:$0xff]  ;;  %v459_v63 = vld [vmem:[%s17969_s3 + $0x28] sm:$0xff]  ;;  %v458_v1 = vld [vmem:[%s17969_s3 + $0x20] sm:$0xff] }
  0x17   :  { %10253 = vmatpush3.msra.mxu0 %v165_v14  ;;  %10321 = vmatprep.subr.mxu1 %v502_v60  ;;  %v499_v2 = vld [vmem:[%s17969_s3 + $0x98] sm:$0xff]  ;;  %v498_v5 = vld [vmem:[%s17969_s3 + $0x90] sm:$0xff]  ;;  %v497_v7 = vld [vmem:[%s17969_s3 + $0x88] sm:$0xff] }
  0x18   :  { %10254 = vmatprep.subr.mxu0 %v164_v16  ;;  %10322 = vmatpush3.msra.mxu1 %v502_v60  ;;  %v457_v3 = vld [vmem:[%s17969_s3 + $0x18] sm:$0xff]  ;;  %v456_v6 = vld [vmem:[%s17969_s3 + $0x10] sm:$0xff]  ;;  %v455_v8 = vld [vmem:[%s17969_s3 + $0x8] sm:$0xff] }
  0x19   :  { %10255 = vmatpush3.msra.mxu0 %v164_v16  ;;  %10323 = vmatprep.subr.mxu1 %v501_v62  ;;  %v496_v9 = vld [vmem:[%s17969_s3 + $0x80] sm:$0xff]  ;;  %v943_v11 = vld [vmem:[%s17969_s3 + $0x178] sm:$0xff]  ;;  %v21_v14 = vld [vmem:[%s17971_s1 + $0x8] sm:$0xff] }
  0x1a   :  { %10256 = vmatprep.subr.mxu0 %v163_v18  ;;  %10324 = vmatpush3.msra.mxu1 %v501_v62  ;;  %v454_v10 = vld [vmem:[%s17969_s3] sm:$0xff]  ;;  %v1206_v12 = vld [vmem:[%s17969_s3 + $0x1f8] sm:$0xff]  ;;  %v22_v25 = vld [vmem:[%s17971_s1 + $0x10] sm:$0xff] }
  0x1b   :  { %10257 = vmatpush3.msra.mxu0 %v163_v18  ;;  %10325 = vmatprep.subr.mxu1 %v500_v0  ;;  %v12805_v13 = vld [vmem:[%s17970_s4] ss:$0 sm:$0xff]  ;;  %v23_v21 = vld [vmem:[%s17971_s1 + $0x18] sm:$0xff] }
  0x1c   :  { %10258 = vmatprep.subr.mxu0 %v162_v20  ;;  %10326 = vmatpush3.msra.mxu1 %v500_v0  ;;  %v20_v17 = vld [vmem:[%s17971_s1] sm:$0xff]  ;;  %v1204_v0 = vld [vmem:[%s17969_s3 + $0x1e8] sm:$0xff] }
  0x1d   :  { %10259 = vmatpush3.msra.mxu0 %v162_v20  ;;  %10327 = vmatprep.subr.mxu1 %v499_v2 }
  0x1e   :  { %10260 = vmatprep.subr.mxu0 %v161_v22  ;;  %10328 = vmatpush3.msra.mxu1 %v499_v2 }
  0x1f   :  { %10261 = vmatpush3.msra.mxu0 %v161_v22  ;;  %10329 = vmatprep.subr.mxu1 %v498_v5 }
  0x20   :  { %10262 = vmatprep.subr.mxu0 %v160_v24  ;;  %10330 = vmatpush3.msra.mxu1 %v498_v5  ;;  %v30_v5 = vld [vmem:[%s17971_s1 + $0x50] sm:$0xff] }
  0x21   :  { %10263 = vmatpush3.msra.mxu0 %v160_v24  ;;  %10331 = vmatprep.subr.mxu1 %v497_v7 }
  0x22   :  { %10265 = vmatmul.mubr.f32.vlgmr.msra.gmra.mxu0 %v135_v26  ;;  %10374 = vmatprep.subr.mxu0 %v469_v27 }
  0x23   :  { %10267 = vmatprep.mubr.f32.mxu0 %v136_v28  ;;  %10375 = vmatpush3.msra.mxu0 %v469_v27 }
  0x24   :  { %10376 = vmatprep.subr.mxu0 %v468_v29  ;;  %10332 = vmatpush3.msra.mxu1 %v497_v7 }
  0x25   :  { %10377 = vmatpush3.msra.mxu0 %v468_v29  ;;  %10333 = vmatprep.subr.mxu1 %v496_v9  ;;  %v25_v29 = vld [vmem:[%s17971_s1 + $0x28] sm:$0xff] }
  0x26   :  { %10268 = vmatmul.mubr.f32.gmra.mxu0 %v137_v30  ;;  %10378 = vmatprep.subr.mxu0 %v467_v31 }
  0x27   :  { %10270 = vmatprep.mubr.f32.mxu0 %v138_v32  ;;  %10379 = vmatpush3.msra.mxu0 %v467_v31 }
  0x28   :  { %10380 = vmatprep.subr.mxu0 %v466_v33  ;;  %10334 = vmatpush3.msra.mxu1 %v496_v9 }
  0x29   :  { %10381 = vmatpush3.msra.mxu0 %v466_v33  ;;  %10445 = vmatprep.subr.mxu1 %v943_v11  ;;  %v24_v33 = vld [vmem:[%s17971_s1 + $0x20] sm:$0xff] }
  0x2a   :  { %10271 = vmatmul.mubr.f32.gmra.mxu0 %v139_v34  ;;  %10382 = vmatprep.subr.mxu0 %v465_v35 }
  0x2b   :  { %10273 = vmatprep.mubr.f32.mxu0 %v140_v36  ;;  %10383 = vmatpush3.msra.mxu0 %v465_v35 }
  0x2c   :  { %10384 = vmatprep.subr.mxu0 %v464_v37 }
  0x2d   :  { %10385 = vmatpush3.msra.mxu0 %v464_v37  ;;  %v27_v37 = vld [vmem:[%s17971_s1 + $0x38] sm:$0xff] }
  0x2e   :  { %10274 = vmatmul.mubr.f32.gmra.mxu0 %v141_v38  ;;  %10386 = vmatprep.subr.mxu0 %v463_v39 }
  0x2f   :  { %10276 = vmatprep.mubr.f32.mxu0 %v142_v40  ;;  %10387 = vmatpush3.msra.mxu0 %v463_v39 }
  0x30   :  { %10388 = vmatprep.subr.mxu0 %v462_v41 }
  0x31   :  { %10389 = vmatpush3.msra.mxu0 %v462_v41  ;;  %v26_v41 = vld [vmem:[%s17971_s1 + $0x30] sm:$0xff] }
  0x32   :  { %10277 = vmatmul.mubr.f32.gmra.mxu0 %v143_v42  ;;  %10390 = vmatprep.subr.mxu0 %v461_v59 }
  0x33   :  { %10279 = vmatprep.mubr.f32.mxu0 %v144_v43  ;;  %10391 = vmatpush3.msra.mxu0 %v461_v59 }
  0x34   :  { %10392 = vmatprep.subr.mxu0 %v460_v61 }
  0x35   :  { %10393 = vmatpush3.msra.mxu0 %v460_v61 }
  0x36   :  { %10280 = vmatmul.mubr.f32.gmra.mxu0 %v145_v44  ;;  %10394 = vmatprep.subr.mxu0 %v459_v63 }
  0x37   :  { %10282 = vmatprep.mubr.f32.mxu0 %v146_v45  ;;  %10395 = vmatpush3.msra.mxu0 %v459_v63  ;;  %v941_v63 = vld [vmem:[%s17969_s3 + $0x168] sm:$0xff] }
  0x38   :  { %10396 = vmatprep.subr.mxu0 %v458_v1 }
  0x39   :  { %10397 = vmatpush3.msra.mxu0 %v458_v1  ;;  %v31_v1 = vld [vmem:[%s17971_s1 + $0x58] sm:$0xff] }
  0x3a   :  { %10283 = vmatmul.mubr.f32.gmra.mxu0 %v147_v46  ;;  %10398 = vmatprep.subr.mxu0 %v457_v3 }
  0x3b   :  { %10285 = vmatprep.mubr.f32.mxu0 %v148_v47  ;;  %10399 = vmatpush3.msra.mxu0 %v457_v3 }
  0x3c   :  { %10400 = vmatprep.subr.mxu0 %v456_v6 }
  0x3d   :  { %10401 = vmatpush3.msra.mxu0 %v456_v6  ;;  %v940_v6 = vld [vmem:[%s17969_s3 + $0x160] sm:$0xff] }
  0x3e   :  { %10286 = vmatmul.mubr.f32.gmra.mxu0 %v149_v48  ;;  %10402 = vmatprep.subr.mxu0 %v455_v8 }
  0x3f   :  { %10288 = vmatprep.mubr.f32.mxu0 %v150_v49  ;;  %10403 = vmatpush3.msra.mxu0 %v455_v8  ;;  %v942_v49 = vld [vmem:[%s17969_s3 + $0x170] sm:$0xff] }
  0x40   :  { %10404 = vmatprep.subr.mxu0 %v454_v10 }
  0x41   :  { %10405 = vmatpush3.msra.mxu0 %v454_v10 }
  0x42   :  { %10289 = vmatmul.mubr.f32.gmra.mxu0 %v151_v50  ;;  %10516 = vmatprep.subr.mxu0 %v1206_v12  ;;  %v1205_v50 = vld [vmem:[%s17969_s3 + $0x1f0] sm:$0xff] }
  0x43   :  { %10291 = vmatprep.mubr.f32.mxu0 %v152_v51  ;;  %v29_v51 = vld [vmem:[%s17971_s1 + $0x48] sm:$0xff] }
  0x46   :  { %10292 = vmatmul.mubr.f32.gmra.mxu0 %v153_v52 }
  0x47   :  { %10294 = vmatprep.mubr.f32.mxu0 %v154_v53 }
  0x4a   :  { %10295 = vmatmul.mubr.f32.gmra.mxu0 %v155_v54 }
  0x4b   :  { %10297 = vmatprep.mubr.f32.mxu0 %v156_v55  ;;  %v28_v55 = vld [vmem:[%s17971_s1 + $0x40] sm:$0xff] }
  0x4e   :  { %10298 = vmatmul.mubr.f32.gmra.mxu0 %v157_v56 }
  0x4f   :  { %10300 = vmatprep.mubr.f32.mxu0 %v158_v57 }
  0x52   :  { %10301 = vmatmul.mubr.f32.gmra.mxu0 %v159_v58 }
  0xe2   :  { %v10266_v15 = vpop.f32.mrf.mxu0 }
  0xe3   :  { %v253_v16 = vadd.f32 %v10266_v15, %v12805_v13  ;;  %v33_v15 = vld [vmem:[%s17971_s1 + $0x68] sm:$0xff] }
  0xe4   :  { %v247_v18 = vpop.f32.mrf.mxu0 }
  0xe5   :  { %v377_v19 = vmul.f32 %v253_v16, %v21_v14  ;;  %v248_v20 = vadd.f32 %v12805_v13, %v247_v18 }
  0xe6   :  { %v10269_v22 = vpop.f32.mrf.mxu0 }
  0xe7   :  { %403 = vst [vmem:[#allocation2 + $0x10] sm:$0xff] %v377_v19  ;;  %v376_v23 = vmul.f32 %v248_v20, %v20_v17  ;;  %v263_v24 = vadd.f32 %v10269_v22, %v12805_v13  ;;  %v32_v19 = vld [vmem:[%s17971_s1 + $0x60] sm:$0xff]  ;;  %v939_v20 = vld [vmem:[%s17969_s3 + $0x158] sm:$0xff] }
  0xe8   :  { %v257_v26 = vpop.f32.mrf.mxu0 }
  0xe9   :  { %402 = vst [vmem:[#allocation2 + $0x8] sm:$0xff] %v376_v23  ;;  %v379_v27 = vmul.f32 %v263_v24, %v23_v21  ;;  %v258_v28 = vadd.f32 %v12805_v13, %v257_v26  ;;  %v1203_v21 = vld [vmem:[%s17969_s3 + $0x1e0] sm:$0xff] }
  0xea   :  { %v10272_v30 = vpop.f32.mrf.mxu0 }
  0xeb   :  { %405 = vst [vmem:[#allocation2 + $0x20] sm:$0xff] %v379_v27  ;;  %v378_v31 = vmul.f32 %v258_v28, %v22_v25  ;;  %v273_v32 = vadd.f32 %v10272_v30, %v12805_v13 }
  0xec   :  { %v267_v34 = vpop.f32.mrf.mxu0 }
  0xed   :  { %404 = vst [vmem:[#allocation2 + $0x18] sm:$0xff] %v378_v31  ;;  %v381_v35 = vmul.f32 %v273_v32, %v25_v29  ;;  %v268_v36 = vadd.f32 %v12805_v13, %v267_v34  ;;  %v35_v29 = vld [vmem:[%s17971_s1 + $0x78] sm:$0xff]  ;;  %v938_v34 = vld [vmem:[%s17969_s3 + $0x150] sm:$0xff] }
  0xee   :  { %v10275_v38 = vpop.f32.mrf.mxu0 }
  0xef   :  { %407 = vst [vmem:[#allocation2 + $0x30] sm:$0xff] %v381_v35  ;;  %v380_v39 = vmul.f32 %v268_v36, %v24_v33  ;;  %v283_v40 = vadd.f32 %v10275_v38, %v12805_v13  ;;  %v34_v33 = vld [vmem:[%s17971_s1 + $0x70] sm:$0xff]  ;;  %v1202_v35 = vld [vmem:[%s17969_s3 + $0x1d8] sm:$0xff] }
  0xf0   :  { %v277_v42 = vpop.f32.mrf.mxu0  ;;  %v470_v43 = vld [vmem:[#allocation2 + $0x5] sm:$0xff]  ;;  %v471_v45 = vld [vmem:[#allocation2 + $0xd] sm:$0xff] }
  0xf1   :  { %v428_v44 = vld [vmem:[#allocation2 + $0x4] sm:$0xff]  ;;  %406 = vst [vmem:[#allocation2 + $0x28] sm:$0xff] %v380_v39  ;;  %v383_v46 = vmul.f32 %v283_v40, %v27_v37  ;;  %v278_v47 = vadd.f32 %v12805_v13, %v277_v42  ;;  %10335 = vmatprep.mubr.f32.mxu1 %v470_v43  ;;  %v429_v48 = vld [vmem:[#allocation2 + $0xc] sm:$0xff] }
  0xf2   :  { %10406 = vmatprep.mubr.f32.mxu0 %v428_v44  ;;  %v10278_v52 = vpop.f32.mrf.mxu0  ;;  %10336 = vmatmul.mubr.f32.vlgmr.msra.gmra.mxu1 %v471_v45  ;;  %v37_v43 = vld [vmem:[%s17971_s1 + $0x88] sm:$0xff] }
  0xf3   :  { %10407 = vmatmul.mubr.f32.vlgmr.msra.gmra.mxu0 %v429_v48  ;;  %409 = vst [vmem:[#allocation2 + $0x40] sm:$0xff] %v383_v46  ;;  %v382_v53 = vmul.f32 %v278_v47, %v26_v41  ;;  %v293_v54 = vadd.f32 %v10278_v52, %v12805_v13  ;;  %10446 = vmatpush3.msra.mxu1 %v943_v11  ;;  %v36_v47 = vld [vmem:[%s17971_s1 + $0x80] sm:$0xff]  ;;  %v937_v48 = vld [vmem:[%s17969_s3 + $0x148] sm:$0xff] }
  0xf4   :  { %10517 = vmatpush3.msra.mxu0 %v1206_v12  ;;  %v287_v56 = vpop.f32.mrf.mxu0  ;;  %v472_v57 = vld [vmem:[#allocation2 + $0x15] sm:$0xff]  ;;  %10447 = vmatprep.subr.mxu1 %v942_v49  ;;  %v473_v59 = vld [vmem:[#allocation2 + $0x1d] sm:$0xff] }
  0xf5   :  { %v430_v58 = vld [vmem:[#allocation2 + $0x14] sm:$0xff]  ;;  %10518 = vmatprep.subr.mxu0 %v1205_v50  ;;  %408 = vst [vmem:[#allocation2 + $0x38] sm:$0xff] %v382_v53  ;;  %v385_v60 = vmul.f32 %v293_v54, %v29_v51  ;;  %v288_v61 = vadd.f32 %v12805_v13, %v287_v56  ;;  %10338 = vmatprep.mubr.f32.mxu1 %v472_v57  ;;  %v431_v62 = vld [vmem:[#allocation2 + $0x1c] sm:$0xff] }
  0xf6   :  { %10409 = vmatprep.mubr.f32.mxu0 %v430_v58  ;;  %v10281_v2 = vpop.f32.mrf.mxu0  ;;  %10339 = vmatmul.mubr.f32.gmra.mxu1 %v473_v59  ;;  %v39_v57 = vld [vmem:[%s17971_s1 + $0x98] sm:$0xff]  ;;  %v936_v59 = vld [vmem:[%s17969_s3 + $0x140] sm:$0xff] }
  0xf7   :  { %10410 = vmatmul.mubr.f32.gmra.mxu0 %v431_v62  ;;  %411 = vst [vmem:[#allocation2 + $0x50] sm:$0xff] %v385_v60  ;;  %v384_v3 = vmul.f32 %v288_v61, %v28_v55  ;;  %v303_v4 = vadd.f32 %v10281_v2, %v12805_v13  ;;  %10448 = vmatpush3.msra.mxu1 %v942_v49  ;;  %v1201_v49 = vld [vmem:[%s17969_s3 + $0x1d0] sm:$0xff] }
  0xf8   :  { %10519 = vmatpush3.msra.mxu0 %v1205_v50  ;;  %v297_v7 = vpop.f32.mrf.mxu0  ;;  %10449 = vmatprep.subr.mxu1 %v941_v63  ;;  %v474_v8 = vld [vmem:[#allocation2 + $0x25] sm:$0xff]  ;;  %v475_v10 = vld [vmem:[#allocation2 + $0x2d] sm:$0xff] }
  0xf9   :  { %v432_v9 = vld [vmem:[#allocation2 + $0x24] sm:$0xff]  ;;  %10520 = vmatprep.subr.mxu0 %v1204_v0  ;;  %410 = vst [vmem:[#allocation2 + $0x48] sm:$0xff] %v384_v3  ;;  %v387_v11 = vmul.f32 %v303_v4, %v31_v1  ;;  %v298_v12 = vadd.f32 %v12805_v13, %v297_v7  ;;  %10341 = vmatprep.mubr.f32.mxu1 %v474_v8  ;;  %v433_v14 = vld [vmem:[#allocation2 + $0x2c] sm:$0xff] }
  0xfa   :  { %10412 = vmatprep.mubr.f32.mxu0 %v432_v9  ;;  %10450 = vmatpush3.msra.mxu1 %v941_v63  ;;  %v10284_v16 = vpop.f32.mrf.mxu0  ;;  %v38_v62 = vld [vmem:[%s17971_s1 + $0x90] sm:$0xff]  ;;  %v1200_v7 = vld [vmem:[%s17969_s3 + $0x1c8] sm:$0xff] }
  0xfb   :  { %10413 = vmatmul.mubr.f32.gmra.mxu0 %v433_v14  ;;  %413 = vst [vmem:[#allocation2 + $0x60] sm:$0xff] %v387_v11  ;;  %v12873_v17 = vmul.f32 %v298_v12, %v30_v5  ;;  %v313_v18 = vadd.f32 %v10284_v16, %v12805_v13  ;;  %10342 = vmatmul.mubr.f32.gmra.mxu1 %v475_v10  ;;  %v41_v8 = vld [vmem:[%s17971_s1 + $0xa8] sm:$0xff]  ;;  %v40_v12 = vld [vmem:[%s17971_s1 + $0xa0] sm:$0xff]  ;;  %v934_v14 = vld [vmem:[%s17969_s3 + $0x130] sm:$0xff] }
  0xfc   :  { %10451 = vmatprep.subr.mxu1 %v940_v6  ;;  %v307_v22 = vpop.f32.mrf.mxu0  ;;  %v476_v23 = vld [vmem:[#allocation2 + $0x35] sm:$0xff]  ;;  %v477_v25 = vld [vmem:[#allocation2 + $0x3d] sm:$0xff]  ;;  %10521 = vmatpush3.msra.mxu0 %v1204_v0 }
  0xfd   :  { %10452 = vmatpush3.msra.mxu1 %v940_v6  ;;  %v434_v24 = vld [vmem:[#allocation2 + $0x34] sm:$0xff]  ;;  %412 = vst [vmem:[#allocation2 + $0x58] sm:$0xff] %v12873_v17  ;;  %v389_v26 = vmul.f32 %v313_v18, %v33_v15  ;;  %v308_v27 = vadd.f32 %v12805_v13, %v307_v22  ;;  %10344 = vmatprep.mubr.f32.mxu1 %v476_v23  ;;  %v435_v28 = vld [vmem:[#allocation2 + $0x3c] sm:$0xff] }
  0xfe   :  { %10415 = vmatprep.mubr.f32.mxu0 %v434_v24  ;;  %v10287_v30 = vpop.f32.mrf.mxu0  ;;  %10453 = vmatprep.subr.mxu1 %v939_v20  ;;  %v935_v6 = vld [vmem:[%s17969_s3 + $0x138] sm:$0xff] }
  0xff   :  { %10416 = vmatmul.mubr.f32.gmra.mxu0 %v435_v28  ;;  %415 = vst [vmem:[#allocation2 + $0x70] sm:$0xff] %v389_v26  ;;  %v12890_v31 = vmul.f32 %v308_v27, %v32_v19  ;;  %v323_v32 = vadd.f32 %v10287_v30, %v12805_v13  ;;  %10345 = vmatmul.mubr.f32.gmra.mxu1 %v477_v25  ;;  %v43_v23 = vld [vmem:[%s17971_s1 + $0xb8] sm:$0xff]  ;;  %v42_v27 = vld [vmem:[%s17971_s1 + $0xb0] sm:$0xff]  ;;  %v933_v28 = vld [vmem:[%s17969_s3 + $0x128] sm:$0xff] }
 0x100   :  { %10522 = vmatprep.subr.mxu0 %v1203_v21  ;;  %10454 = vmatpush3.msra.mxu1 %v939_v20  ;;  %v317_v36 = vpop.f32.mrf.mxu0  ;;  %v478_v37 = vld [vmem:[#allocation2 + $0x45] sm:$0xff]  ;;  %v479_v39 = vld [vmem:[#allocation2 + $0x4d] sm:$0xff] }
 0x101   :  { %v436_v38 = vld [vmem:[#allocation2 + $0x44] sm:$0xff]  ;;  %10523 = vmatpush3.msra.mxu0 %v1203_v21  ;;  %414 = vst [vmem:[#allocation2 + $0x68] sm:$0xff] %v12890_v31  ;;  %v391_v40 = vmul.f32 %v323_v32, %v35_v29  ;;  %v318_v41 = vadd.f32 %v12805_v13, %v317_v36  ;;  %10347 = vmatprep.mubr.f32.mxu1 %v478_v37  ;;  %v437_v42 = vld [vmem:[#allocation2 + $0x4c] sm:$0xff] }
 0x102   :  { %10418 = vmatprep.mubr.f32.mxu0 %v436_v38  ;;  %v10290_v44 = vpop.f32.mrf.mxu0  ;;  %10455 = vmatprep.subr.mxu1 %v938_v34  ;;  %v1199_v29 = vld [vmem:[%s17969_s3 + $0x1c0] sm:$0xff]  ;;  %v45_v38 = vld [vmem:[%s17971_s1 + $0xc8] sm:$0xff] }
 0x103   :  { %10419 = vmatmul.mubr.f32.gmra.mxu0 %v437_v42  ;;  %417 = vst [vmem:[#allocation2 + $0x80] sm:$0xff] %v391_v40  ;;  %v12907_v45 = vmul.f32 %v318_v41, %v34_v33  ;;  %v333_v46 = vadd.f32 %v10290_v44, %v12805_v13  ;;  %10348 = vmatmul.mubr.f32.gmra.mxu1 %v479_v39  ;;  %v44_v42 = vld [vmem:[%s17971_s1 + $0xc0] sm:$0xff]  ;;  %v1198_v44 = vld [vmem:[%s17969_s3 + $0x1b8] sm:$0xff] }
 0x104   :  { %10524 = vmatprep.subr.mxu0 %v1202_v35  ;;  %10456 = vmatpush3.msra.mxu1 %v938_v34  ;;  %v327_v50 = vpop.f32.mrf.mxu0  ;;  %v480_v51 = vld [vmem:[#allocation2 + $0x55] sm:$0xff]  ;;  %v481_v53 = vld [vmem:[#allocation2 + $0x5d] sm:$0xff] }
 0x105   :  { %v438_v52 = vld [vmem:[#allocation2 + $0x54] sm:$0xff]  ;;  %10525 = vmatpush3.msra.mxu0 %v1202_v35  ;;  %416 = vst [vmem:[#allocation2 + $0x78] sm:$0xff] %v12907_v45  ;;  %v12920_v54 = vmul.f32 %v333_v46, %v37_v43  ;;  %v328_v55 = vadd.f32 %v12805_v13, %v327_v50  ;;  %10350 = vmatprep.mubr.f32.mxu1 %v480_v51  ;;  %v439_v56 = vld [vmem:[#allocation2 + $0x5c] sm:$0xff] }
 0x106   :  { %10421 = vmatprep.mubr.f32.mxu0 %v438_v52  ;;  %10457 = vmatprep.subr.mxu1 %v937_v48  ;;  %v10293_v58 = vpop.f32.mrf.mxu0  ;;  %v932_v43 = vld [vmem:[%s17969_s3 + $0x120] sm:$0xff] }
 0x107   :  { %10422 = vmatmul.mubr.f32.gmra.mxu0 %v439_v56  ;;  %419 = vst [vmem:[#allocation2 + $0x90] sm:$0xff] %v12920_v54  ;;  %v12930_v60 = vmul.f32 %v328_v55, %v36_v47  ;;  %v343_v61 = vadd.f32 %v10293_v58, %v12805_v13  ;;  %10351 = vmatmul.mubr.f32.gmra.mxu1 %v481_v53  ;;  %v931_v53 = vld [vmem:[%s17969_s3 + $0x118] sm:$0xff]  ;;  %v1197_v55 = vld [vmem:[%s17969_s3 + $0x1b0] sm:$0xff] }
 0x108   :  { %10526 = vmatprep.subr.mxu0 %v1201_v49  ;;  %10458 = vmatpush3.msra.mxu1 %v937_v48  ;;  %v337_v63 = vpop.f32.mrf.mxu0  ;;  %v482_v0 = vld [vmem:[#allocation2 + $0x65] sm:$0xff]  ;;  %v483_v2 = vld [vmem:[#allocation2 + $0x6d] sm:$0xff] }
 0x109   :  { %v440_v1 = vld [vmem:[#allocation2 + $0x64] sm:$0xff]  ;;  %10527 = vmatpush3.msra.mxu0 %v1201_v49  ;;  %418 = vst [vmem:[#allocation2 + $0x88] sm:$0xff] %v12930_v60  ;;  %v12937_v3 = vmul.f32 %v343_v61, %v39_v57  ;;  %v338_v4 = vadd.f32 %v12805_v13, %v337_v63  ;;  %10459 = vmatprep.subr.mxu1 %v936_v59  ;;  %v441_v5 = vld [vmem:[#allocation2 + $0x6c] sm:$0xff] }
 0x10a   :  { %10353 = vmatprep.mubr.f32.mxu1 %v482_v0  ;;  %10424 = vmatprep.mubr.f32.mxu0 %v440_v1  ;;  %v10296_v9 = vpop.f32.mrf.mxu0  ;;  %v1196_v61 = vld [vmem:[%s17969_s3 + $0x1a8] sm:$0xff]  ;;  %v1195_v63 = vld [vmem:[%s17969_s3 + $0x1a0] sm:$0xff] }
 0x10b   :  { %10460 = vmatpush3.msra.mxu1 %v936_v59  ;;  %421 = vst [vmem:[#allocation2 + $0xa0] sm:$0xff] %v12937_v3  ;;  %v12950_v10 = vmul.f32 %v338_v4, %v38_v62  ;;  %v353_v11 = vadd.f32 %v10296_v9, %v12805_v13  ;;  %10425 = vmatmul.mubr.f32.gmra.mxu0 %v441_v5  ;;  %v930_v62 = vld [vmem:[%s17969_s3 + $0x110] sm:$0xff]  ;;  %v1194_v5 = vld [vmem:[%s17969_s3 + $0x198] sm:$0xff] }
 0x10c   :  { %10354 = vmatmul.mubr.f32.gmra.mxu1 %v483_v2  ;;  %10461 = vmatprep.subr.mxu1 %v935_v6  ;;  %v347_v15 = vpop.f32.mrf.mxu0  ;;  %v484_v16 = vld [vmem:[#allocation2 + $0x75] sm:$0xff]  ;;  %v485_v19 = vld [vmem:[#allocation2 + $0x7d] sm:$0xff] }
 0x10d   :  { %v442_v18 = vld [vmem:[#allocation2 + $0x74] sm:$0xff]  ;;  %10528 = vmatprep.subr.mxu0 %v1200_v7  ;;  %420 = vst [vmem:[#allocation2 + $0x98] sm:$0xff] %v12950_v10  ;;  %v12960_v20 = vmul.f32 %v353_v11, %v41_v8  ;;  %v348_v21 = vadd.f32 %v12805_v13, %v347_v15  ;;  %10462 = vmatpush3.msra.mxu1 %v935_v6  ;;  %v443_v22 = vld [vmem:[#allocation2 + $0x7c] sm:$0xff]  ;;  %v929_v6 = vld [vmem:[%s17969_s3 + $0x108] sm:$0xff] }
 0x10e   :  { %10356 = vmatprep.mubr.f32.mxu1 %v484_v16  ;;  %10427 = vmatprep.mubr.f32.mxu0 %v442_v18  ;;  %v10299_v24 = vpop.f32.mrf.mxu0  ;;  %v1192_v15 = vld [vmem:[%s17969_s3 + $0x188] sm:$0xff]  ;;  %v1191_v18 = vld [vmem:[%s17969_s3 + $0x180] sm:$0xff] }
 0x10f   :  { %10463 = vmatprep.subr.mxu1 %v934_v14  ;;  %423 = vst [vmem:[#allocation2 + $0xb0] sm:$0xff] %v12960_v20  ;;  %v12967_v25 = vmul.f32 %v348_v21, %v40_v12  ;;  %v363_v26 = vadd.f32 %v10299_v24, %v12805_v13  ;;  %10428 = vmatmul.mubr.f32.gmra.mxu0 %v443_v22  ;;  %v902_v16 = vld [vmem:[#allocation2 + $0x6] sm:$0xff]  ;;  %v903_v22 = vld [vmem:[#allocation2 + $0xe] sm:$0xff] }
 0x110   :  { %10357 = vmatmul.mubr.f32.gmra.mxu1 %v485_v19  ;;  %v357_v30 = vpop.f32.mrf.mxu0  ;;  %v486_v32 = vld [vmem:[#allocation2 + $0x85] sm:$0xff]  ;;  %v487_v34 = vld [vmem:[#allocation2 + $0x8d] sm:$0xff]  ;;  %10529 = vmatpush3.msra.mxu0 %v1200_v7  ;;  %v1469_v19 = vld [vmem:[%s17969_s3 + $0x278] sm:$0xff] }
 0x111   :  { %10464 = vmatpush3.msra.mxu1 %v934_v14  ;;  %v444_v33 = vld [vmem:[#allocation2 + $0x84] sm:$0xff]  ;;  %422 = vst [vmem:[#allocation2 + $0xa8] sm:$0xff] %v12967_v25  ;;  %v12980_v35 = vmul.f32 %v363_v26, %v43_v23  ;;  %v358_v36 = vadd.f32 %v12805_v13, %v357_v30  ;;  %10359 = vmatprep.mubr.f32.mxu1 %v486_v32  ;;  %v445_v37 = vld [vmem:[#allocation2 + $0x8c] sm:$0xff]  ;;  %v1732_v26 = vld [vmem:[%s17969_s3 + $0x2f8] sm:$0xff] }
 0x112   :  { %10430 = vmatprep.mubr.f32.mxu0 %v444_v33  ;;  %v10302_v39 = vpop.f32.mrf.mxu0  ;;  %10465 = vmatprep.subr.mxu1 %v933_v28  ;;  %v1193_v7 = vld [vmem:[%s17969_s3 + $0x190] sm:$0xff]  ;;  %v928_v14 = vld [vmem:[%s17969_s3 + $0x100] sm:$0xff]  ;;  %v1467_v32 = vld [vmem:[%s17969_s3 + $0x268] sm:$0xff] }
 0x113   :  { %10530 = vmatprep.subr.mxu0 %v1199_v29  ;;  %425 = vst [vmem:[#allocation2 + $0xc0] sm:$0xff] %v12980_v35  ;;  %v12987_v40 = vmul.f32 %v358_v36, %v42_v27  ;;  %v373_v41 = vadd.f32 %v10302_v39, %v12805_v13  ;;  %10431 = vmatmul.mubr.f32.gmra.mxu0 %v445_v37  ;;  %v1165_v21 = vld [vmem:[#allocation2 + $0x7] sm:$0xff]  ;;  %v1166_v23 = vld [vmem:[#allocation2 + $0xf] sm:$0xff]  ;;  %v1168_v30 = vld [vmem:[#allocation2 + $0x1f] sm:$0xff] }
 0x114   :  { %10360 = vmatmul.mubr.f32.gmra.mxu1 %v487_v34  ;;  %v367_v46 = vpop.f32.mrf.mxu0  ;;  %v488_v47 = vld [vmem:[#allocation2 + $0x95] sm:$0xff]  ;;  %10531 = vmatpush3.msra.mxu0 %v1199_v29  ;;  %v489_v49 = vld [vmem:[#allocation2 + $0x9d] sm:$0xff]  ;;  %v906_v34 = vld [vmem:[#allocation2 + $0x26] sm:$0xff] }
 0x115   :  { %10466 = vmatpush3.msra.mxu1 %v933_v28  ;;  %v446_v48 = vld [vmem:[#allocation2 + $0x94] sm:$0xff]  ;;  %424 = vst [vmem:[#allocation2 + $0xb8] sm:$0xff] %v12987_v40  ;;  %v13000_v50 = vmul.f32 %v373_v41, %v45_v38  ;;  %v368_v51 = vadd.f32 %v12805_v13, %v367_v46  ;;  %10362 = vmatprep.mubr.f32.mxu1 %v488_v47  ;;  %v447_v52 = vld [vmem:[#allocation2 + $0x9c] sm:$0xff]  ;;  %v1169_v36 = vld [vmem:[#allocation2 + $0x27] sm:$0xff] }
 0x116   :  { %10433 = vmatprep.mubr.f32.mxu0 %v446_v48  ;;  %10467 = vmatprep.subr.mxu1 %v932_v43  ;;  %v1468_v24 = vld [vmem:[%s17969_s3 + $0x270] sm:$0xff]  ;;  %v905_v29 = vld [vmem:[#allocation2 + $0x1e] sm:$0xff]  ;;  %v1730_v41 = vld [vmem:[%s17969_s3 + $0x2e8] sm:$0xff] }
 0x117   :  { %10532 = vmatprep.subr.mxu0 %v1198_v44  ;;  %427 = vst [vmem:[#allocation2 + $0xd0] sm:$0xff] %v13000_v50  ;;  %v13010_v56 = vmul.f32 %v368_v51, %v44_v42  ;;  %10434 = vmatmul.mubr.f32.gmra.mxu0 %v447_v52  ;;  %v904_v27 = vld [vmem:[#allocation2 + $0x16] sm:$0xff]  ;;  %v1466_v37 = vld [vmem:[%s17969_s3 + $0x260] sm:$0xff]  ;;  %v907_v38 = vld [vmem:[#allocation2 + $0x2e] sm:$0xff] }
 0x118   :  { %10363 = vmatmul.mubr.f32.gmra.mxu1 %v489_v49  ;;  %10533 = vmatpush3.msra.mxu0 %v1198_v44  ;;  %v490_v13 = vld [vmem:[#allocation2 + $0xa5] sm:$0xff]  ;;  %v491_v58 = vld [vmem:[#allocation2 + $0xad] sm:$0xff]  ;;  %v1167_v28 = vld [vmem:[#allocation2 + $0x17] sm:$0xff] }
 0x119   :  { %10468 = vmatpush3.msra.mxu1 %v932_v43  ;;  %v448_v57 = vld [vmem:[#allocation2 + $0xa4] sm:$0xff]  ;;  %426 = vst [vmem:[#allocation2 + $0xc8] sm:$0xff] %v13010_v56  ;;  %10534 = vmatprep.subr.mxu0 %v1197_v55  ;;  %v449_v59 = vld [vmem:[#allocation2 + $0xac] sm:$0xff]  ;;  %v908_v42 = vld [vmem:[#allocation2 + $0x36] sm:$0xff] }
 0x11a   :  { %10469 = vmatprep.subr.mxu1 %v931_v53  ;;  %10365 = vmatprep.mubr.f32.mxu1 %v490_v13  ;;  %v1731_v33 = vld [vmem:[%s17969_s3 + $0x2f0] sm:$0xff]  ;;  %v1465_v44 = vld [vmem:[%s17969_s3 + $0x258] sm:$0xff]  ;;  %v910_v48 = vld [vmem:[#allocation2 + $0x46] sm:$0xff] }
 0x11b   :  { %10436 = vmatprep.mubr.f32.mxu0 %v448_v57  ;;  %10470 = vmatpush3.msra.mxu1 %v931_v53  ;;  %v1170_v39 = vld [vmem:[#allocation2 + $0x2f] sm:$0xff]  ;;  %v1171_v43 = vld [vmem:[#allocation2 + $0x37] sm:$0xff]  ;;  %v1172_v47 = vld [vmem:[#allocation2 + $0x3f] sm:$0xff] }
 0x11c   :  { %10535 = vmatpush3.msra.mxu0 %v1197_v55  ;;  %10366 = vmatmul.mubr.f32.gmra.mxu1 %v491_v58  ;;  %v492_v0 = vld [vmem:[#allocation2 + $0xb5] sm:$0xff]  ;;  %v493_v2 = vld [vmem:[#allocation2 + $0xbd] sm:$0xff]  ;;  %v1173_v52 = vld [vmem:[#allocation2 + $0x47] sm:$0xff] }
 0x11d   :  { %10437 = vmatmul.mubr.f32.gmra.mxu0 %v449_v59  ;;  %v450_v1 = vld [vmem:[#allocation2 + $0xb4] sm:$0xff]  ;;  %10536 = vmatprep.subr.mxu0 %v1196_v61  ;;  %v451_v4 = vld [vmem:[#allocation2 + $0xbc] sm:$0xff]  ;;  %v1463_v13 = vld [vmem:[%s17969_s3 + $0x248] sm:$0xff] }
 0x11e   :  { %10471 = vmatprep.subr.mxu1 %v930_v62  ;;  %10537 = vmatpush3.msra.mxu0 %v1196_v61  ;;  %v909_v46 = vld [vmem:[#allocation2 + $0x3e] sm:$0xff]  ;;  %v1464_v49 = vld [vmem:[%s17969_s3 + $0x250] sm:$0xff] }
 0x11f   :  { %10368 = vmatprep.mubr.f32.mxu1 %v492_v0  ;;  %10538 = vmatprep.subr.mxu0 %v1195_v63  ;;  %v1729_v51 = vld [vmem:[%s17969_s3 + $0x2e0] sm:$0xff]  ;;  %v911_v53 = vld [vmem:[#allocation2 + $0x4e] sm:$0xff]  ;;  %v912_v57 = vld [vmem:[#allocation2 + $0x56] sm:$0xff] }
 0x120   :  { %10439 = vmatprep.mubr.f32.mxu0 %v450_v1  ;;  %10472 = vmatpush3.msra.mxu1 %v930_v62  ;;  %v494_v8 = vld [vmem:[#allocation2 + $0xc5] sm:$0xff]  ;;  %v495_v11 = vld [vmem:[#allocation2 + $0xcd] sm:$0xff]  ;;  %v1175_v58 = vld [vmem:[#allocation2 + $0x57] sm:$0xff] }
 0x121   :  { %10539 = vmatpush3.msra.mxu0 %v1195_v63  ;;  %10369 = vmatmul.mubr.f32.gmra.mxu1 %v493_v2  ;;  %v452_v9 = vld [vmem:[#allocation2 + $0xc4] sm:$0xff]  ;;  %v453_v12 = vld [vmem:[#allocation2 + $0xcc] sm:$0xff]  ;;  %v1728_v59 = vld [vmem:[%s17969_s3 + $0x2d8] sm:$0xff] }
 0x122   :  { %10440 = vmatmul.mubr.f32.gmra.mxu0 %v451_v4  ;;  %10540 = vmatprep.subr.mxu0 %v1194_v5  ;;  %v1174_v55 = vld [vmem:[#allocation2 + $0x4f] sm:$0xff]  ;;  %v913_v61 = vld [vmem:[#allocation2 + $0x5e] sm:$0xff]  ;;  %v914_v0 = vld [vmem:[#allocation2 + $0x66] sm:$0xff] }
 0x123   :  { %10473 = vmatprep.subr.mxu1 %v929_v6  ;;  %10541 = vmatpush3.msra.mxu0 %v1194_v5  ;;  %v1176_v62 = vld [vmem:[#allocation2 + $0x5f] sm:$0xff]  ;;  %v1177_v1 = vld [vmem:[#allocation2 + $0x67] sm:$0xff]  ;;  %v1178_v5 = vld [vmem:[#allocation2 + $0x6f] sm:$0xff] }
 0x124   :  { %10474 = vmatpush3.msra.mxu1 %v929_v6  ;;  %10542 = vmatprep.subr.mxu0 %v1193_v7  ;;  %v1462_v63 = vld [vmem:[%s17969_s3 + $0x240] sm:$0xff]  ;;  %v1461_v2 = vld [vmem:[%s17969_s3 + $0x238] sm:$0xff]  ;;  %v915_v4 = vld [vmem:[#allocation2 + $0x6e] sm:$0xff] }
 0x125   :  { %10371 = vmatprep.mubr.f32.mxu1 %v494_v8  ;;  %10442 = vmatprep.mubr.f32.mxu0 %v452_v9  ;;  %v1727_v6 = vld [vmem:[%s17969_s3 + $0x2d0] sm:$0xff] }
 0x126   :  { %10543 = vmatpush3.msra.mxu0 %v1193_v7  ;;  %10372 = vmatmul.mubr.f32.gmra.mxu1 %v495_v11  ;;  %v916_v7 = vld [vmem:[#allocation2 + $0x76] sm:$0xff]  ;;  %v917_v11 = vld [vmem:[#allocation2 + $0x7e] sm:$0xff] }
 0x127   :  { %10443 = vmatmul.mubr.f32.gmra.mxu0 %v453_v12  ;;  %10475 = vmatprep.subr.mxu1 %v928_v14  ;;  %v1179_v8 = vld [vmem:[#allocation2 + $0x77] sm:$0xff]  ;;  %v1180_v12 = vld [vmem:[#allocation2 + $0x7f] sm:$0xff] }
 0x128   :  { %10544 = vmatprep.subr.mxu0 %v1192_v15  ;;  %10476 = vmatpush3.msra.mxu1 %v928_v14  ;;  %v1460_v9 = vld [vmem:[%s17969_s3 + $0x230] sm:$0xff]  ;;  %v1726_v14 = vld [vmem:[%s17969_s3 + $0x2c8] sm:$0xff] }
 0x129   :  { %10477 = vmatprep.mubr.f32.mxu1 %v902_v16  ;;  %10545 = vmatpush3.msra.mxu0 %v1192_v15  ;;  %v918_v15 = vld [vmem:[#allocation2 + $0x86] sm:$0xff] }
 0x12a   :  { %10548 = vmatprep.mubr.f32.mxu0 %v1165_v21  ;;  %10546 = vmatprep.subr.mxu0 %v1191_v18  ;;  %v1181_v16 = vld [vmem:[#allocation2 + $0x87] sm:$0xff]  ;;  %v1182_v21 = vld [vmem:[#allocation2 + $0x8f] sm:$0xff] }
 0x12b   :  { %10587 = vmatprep.subr.mxu1 %v1469_v19  ;;  %10547 = vmatpush3.msra.mxu0 %v1191_v18  ;;  %v1459_v18 = vld [vmem:[%s17969_s3 + $0x228] sm:$0xff] }
 0x12c   :  { %10478 = vmatmul.mubr.f32.vlgmr.msra.gmra.mxu1 %v903_v22  ;;  %10549 = vmatmul.mubr.f32.vlgmr.msra.gmra.mxu0 %v1166_v23  ;;  %v920_v22 = vld [vmem:[#allocation2 + $0x96] sm:$0xff]  ;;  %v1725_v23 = vld [vmem:[%s17969_s3 + $0x2c0] sm:$0xff] }
 0x12d   :  { %10588 = vmatpush3.msra.mxu1 %v1469_v19  ;;  %10480 = vmatprep.mubr.f32.mxu1 %v904_v27  ;;  %v919_v19 = vld [vmem:[#allocation2 + $0x8e] sm:$0xff]  ;;  %v921_v27 = vld [vmem:[#allocation2 + $0x9e] sm:$0xff] }
 0x12e   :  { %10551 = vmatprep.mubr.f32.mxu0 %v1167_v28  ;;  %10589 = vmatprep.subr.mxu1 %v1468_v24  ;;  %v1724_v28 = vld [vmem:[%s17969_s3 + $0x2b8] sm:$0xff] }
 0x12f   :  { %10658 = vmatprep.subr.mxu0 %v1732_v26  ;;  %10590 = vmatpush3.msra.mxu1 %v1468_v24  ;;  %v1458_v24 = vld [vmem:[%s17969_s3 + $0x220] sm:$0xff] }
 0x130   :  { %10481 = vmatmul.mubr.f32.gmra.mxu1 %v905_v29  ;;  %10659 = vmatpush3.msra.mxu0 %v1732_v26  ;;  %v1183_v26 = vld [vmem:[#allocation2 + $0x97] sm:$0xff]  ;;  %v1184_v29 = vld [vmem:[#allocation2 + $0x9f] sm:$0xff] }
 0x131   :  { %10552 = vmatmul.mubr.f32.gmra.mxu0 %v1168_v30  ;;  %10483 = vmatprep.mubr.f32.mxu1 %v906_v34  ;;  %v922_v30 = vld [vmem:[#allocation2 + $0xa6] sm:$0xff] }
 0x132   :  { %10554 = vmatprep.mubr.f32.mxu0 %v1169_v36  ;;  %10591 = vmatprep.subr.mxu1 %v1467_v32  ;;  %v1185_v34 = vld [vmem:[#allocation2 + $0xa7] sm:$0xff] }
 0x133   :  { %10660 = vmatprep.subr.mxu0 %v1731_v33  ;;  %10592 = vmatpush3.msra.mxu1 %v1467_v32  ;;  %v1457_v32 = vld [vmem:[%s17969_s3 + $0x218] sm:$0xff]  ;;  %v1722_v36 = vld [vmem:[%s17969_s3 + $0x2a8] sm:$0xff] }
 0x134   :  { %10661 = vmatpush3.msra.mxu0 %v1731_v33  ;;  %10484 = vmatmul.mubr.f32.gmra.mxu1 %v907_v38  ;;  %v1723_v33 = vld [vmem:[%s17969_s3 + $0x2b0] sm:$0xff] }
 0x135   :  { %10555 = vmatmul.mubr.f32.gmra.mxu0 %v1170_v39  ;;  %10486 = vmatprep.mubr.f32.mxu1 %v908_v42  ;;  %v1186_v38 = vld [vmem:[#allocation2 + $0xaf] sm:$0xff]  ;;  %v1721_v42 = vld [vmem:[%s17969_s3 + $0x2a0] sm:$0xff] }
 0x136   :  { %10557 = vmatprep.mubr.f32.mxu0 %v1171_v43  ;;  %10593 = vmatprep.subr.mxu1 %v1466_v37  ;;  %v924_v39 = vld [vmem:[#allocation2 + $0xb6] sm:$0xff] }
 0x137   :  { %10662 = vmatprep.subr.mxu0 %v1730_v41  ;;  %10594 = vmatpush3.msra.mxu1 %v1466_v37  ;;  %v923_v37 = vld [vmem:[#allocation2 + $0xae] sm:$0xff]  ;;  %v1187_v43 = vld [vmem:[#allocation2 + $0xb7] sm:$0xff] }
 0x138   :  { %10663 = vmatpush3.msra.mxu0 %v1730_v41  ;;  %10487 = vmatmul.mubr.f32.gmra.mxu1 %v909_v46  ;;  %v1456_v41 = vld [vmem:[%s17969_s3 + $0x210] sm:$0xff]  ;;  %v925_v46 = vld [vmem:[#allocation2 + $0xbe] sm:$0xff] }
 0x139   :  { %10558 = vmatmul.mubr.f32.gmra.mxu0 %v1172_v47  ;;  %10595 = vmatprep.subr.mxu1 %v1465_v44  ;;  %v1188_v47 = vld [vmem:[#allocation2 + $0xbf] sm:$0xff] }
 0x13a   :  { %10489 = vmatprep.mubr.f32.mxu1 %v910_v48  ;;  %10560 = vmatprep.mubr.f32.mxu0 %v1173_v52  ;;  %v1455_v48 = vld [vmem:[%s17969_s3 + $0x208] sm:$0xff]  ;;  %v1719_v52 = vld [vmem:[%s17969_s3 + $0x290] sm:$0xff] }
 0x13b   :  { %10596 = vmatpush3.msra.mxu1 %v1465_v44  ;;  %10664 = vmatprep.subr.mxu0 %v1729_v51  ;;  %v1720_v44 = vld [vmem:[%s17969_s3 + $0x298] sm:$0xff] }
 0x13c   :  { %10597 = vmatprep.subr.mxu1 %v1464_v49  ;;  %10490 = vmatmul.mubr.f32.gmra.mxu1 %v911_v53  ;;  %v1454_v53 = vld [vmem:[%s17969_s3 + $0x200] sm:$0xff] }
 0x13d   :  { %10561 = vmatmul.mubr.f32.gmra.mxu0 %v1174_v55  ;;  %10492 = vmatprep.mubr.f32.mxu1 %v912_v57  ;;  %v927_v55 = vld [vmem:[#allocation2 + $0xce] sm:$0xff] }
 0x13e   :  { %10563 = vmatprep.mubr.f32.mxu0 %v1175_v58  ;;  %10598 = vmatpush3.msra.mxu1 %v1464_v49  ;;  %v926_v49 = vld [vmem:[#allocation2 + $0xc6] sm:$0xff]  ;;  %v1190_v57 = vld [vmem:[#allocation2 + $0xcf] sm:$0xff] }
 0x13f   :  { %10665 = vmatpush3.msra.mxu0 %v1729_v51  ;;  %10599 = vmatprep.subr.mxu1 %v1463_v13  ;;  %v1189_v51 = vld [vmem:[#allocation2 + $0xc7] sm:$0xff] }
 0x140   :  { %10666 = vmatprep.subr.mxu0 %v1728_v59  ;;  %10493 = vmatmul.mubr.f32.gmra.mxu1 %v913_v61  ;;  %v1428_v58 = vld [vmem:[#allocation2 + $0x8] sm:$0xff]  ;;  %v1995_v61 = vld [vmem:[%s17969_s3 + $0x378] sm:$0xff] }
 0x141   :  { %10564 = vmatmul.mubr.f32.gmra.mxu0 %v1176_v62  ;;  %10600 = vmatpush3.msra.mxu1 %v1463_v13  ;;  %v1718_v13 = vld [vmem:[%s17969_s3 + $0x288] sm:$0xff] }
 0x142   :  { %10495 = vmatprep.mubr.f32.mxu1 %v914_v0  ;;  %10566 = vmatprep.mubr.f32.mxu0 %v1177_v1  ;;  %v1691_v62 = vld [vmem:[#allocation2 + $0x9] sm:$0xff]  ;;  %v1692_v0 = vld [vmem:[#allocation2 + $0x11] sm:$0xff] }
 0x143   :  { %10601 = vmatprep.subr.mxu1 %v1462_v63  ;;  %10667 = vmatpush3.msra.mxu0 %v1728_v59  ;;  %v1717_v59 = vld [vmem:[%s17969_s3 + $0x280] sm:$0xff]  ;;  %v1994_v1 = vld [vmem:[%s17969_s3 + $0x370] sm:$0xff] }
 0x144   :  { %10602 = vmatpush3.msra.mxu1 %v1462_v63  ;;  %10668 = vmatprep.subr.mxu0 %v1727_v6  ;;  %v1429_v63 = vld [vmem:[#allocation2 + $0x10] sm:$0xff] }
 0x145   :  { %10496 = vmatmul.mubr.f32.gmra.mxu1 %v915_v4  ;;  %10567 = vmatmul.mubr.f32.gmra.mxu0 %v1178_v5  ;;  %v1430_v4 = vld [vmem:[#allocation2 + $0x18] sm:$0xff] }
 0x146   :  { %10498 = vmatprep.mubr.f32.mxu1 %v916_v7  ;;  %10569 = vmatprep.mubr.f32.mxu0 %v1179_v8  ;;  %v1693_v5 = vld [vmem:[#allocation2 + $0x19] sm:$0xff]  ;;  %v1694_v7 = vld [vmem:[#allocation2 + $0x21] sm:$0xff] }
 0x147   :  { %10603 = vmatprep.subr.mxu1 %v1461_v2  ;;  %10669 = vmatpush3.msra.mxu0 %v1727_v6  ;;  %v1431_v6 = vld [vmem:[#allocation2 + $0x20] sm:$0xff]  ;;  %v1993_v8 = vld [vmem:[%s17969_s3 + $0x368] sm:$0xff] }
 0x148   :  { %10604 = vmatpush3.msra.mxu1 %v1461_v2  ;;  %10670 = vmatprep.subr.mxu0 %v1726_v14  ;;  %v2258_v2 = vld [vmem:[%s17969_s3 + $0x3f8] sm:$0xff] }
 0x149   :  { %10499 = vmatmul.mubr.f32.gmra.mxu1 %v917_v11  ;;  %10570 = vmatmul.mubr.f32.gmra.mxu0 %v1180_v12  ;;  %v1432_v11 = vld [vmem:[#allocation2 + $0x28] sm:$0xff] }
 0x14a   :  { %10501 = vmatprep.mubr.f32.mxu1 %v918_v15  ;;  %10572 = vmatprep.mubr.f32.mxu0 %v1181_v16  ;;  %v1695_v12 = vld [vmem:[#allocation2 + $0x29] sm:$0xff]  ;;  %v1696_v16 = vld [vmem:[#allocation2 + $0x31] sm:$0xff] }
 0x14b   :  { %10605 = vmatprep.subr.mxu1 %v1460_v9  ;;  %10671 = vmatpush3.msra.mxu0 %v1726_v14  ;;  %v1992_v14 = vld [vmem:[%s17969_s3 + $0x360] sm:$0xff]  ;;  %v1433_v15 = vld [vmem:[#allocation2 + $0x30] sm:$0xff] }
 0x14c   :  { %10606 = vmatpush3.msra.mxu1 %v1460_v9  ;;  %10672 = vmatprep.subr.mxu0 %v1725_v23  ;;  %v2257_v9 = vld [vmem:[%s17969_s3 + $0x3f0] sm:$0xff] }
 0x14d   :  { %10502 = vmatmul.mubr.f32.gmra.mxu1 %v919_v19  ;;  %10573 = vmatmul.mubr.f32.gmra.mxu0 %v1182_v21  ;;  %v1434_v19 = vld [vmem:[#allocation2 + $0x38] sm:$0xff] }
 0x14e   :  { %10607 = vmatprep.subr.mxu1 %v1459_v18  ;;  %10504 = vmatprep.mubr.f32.mxu1 %v920_v22  ;;  %v1697_v21 = vld [vmem:[#allocation2 + $0x39] sm:$0xff] }
 0x14f   :  { %10575 = vmatprep.mubr.f32.mxu0 %v1183_v26  ;;  %10608 = vmatpush3.msra.mxu1 %v1459_v18  ;;  %v2256_v18 = vld [vmem:[%s17969_s3 + $0x3e8] sm:$0xff]  ;;  %v1991_v22 = vld [vmem:[%s17969_s3 + $0x358] sm:$0xff] }
 0x150   :  { %10609 = vmatprep.subr.mxu1 %v1458_v24  ;;  %10673 = vmatpush3.msra.mxu0 %v1725_v23  ;;  %v1435_v23 = vld [vmem:[#allocation2 + $0x40] sm:$0xff]  ;;  %v1436_v26 = vld [vmem:[#allocation2 + $0x48] sm:$0xff] }
 0x151   :  { %10505 = vmatmul.mubr.f32.gmra.mxu1 %v921_v27  ;;  %10576 = vmatmul.mubr.f32.gmra.mxu0 %v1184_v29  ;;  %v1990_v27 = vld [vmem:[%s17969_s3 + $0x350] sm:$0xff] }
 0x152   :  { %10610 = vmatpush3.msra.mxu1 %v1458_v24  ;;  %10674 = vmatprep.subr.mxu0 %v1724_v28  ;;  %v1698_v24 = vld [vmem:[#allocation2 + $0x41] sm:$0xff]  ;;  %v1699_v29 = vld [vmem:[#allocation2 + $0x49] sm:$0xff] }
 0x153   :  { %10507 = vmatprep.mubr.f32.mxu1 %v922_v30  ;;  %10578 = vmatprep.mubr.f32.mxu0 %v1185_v34  ;;  %v1437_v30 = vld [vmem:[#allocation2 + $0x50] sm:$0xff]  ;;  %v1989_v34 = vld [vmem:[%s17969_s3 + $0x348] sm:$0xff] }
 0x154   :  { %10675 = vmatpush3.msra.mxu0 %v1724_v28  ;;  %10611 = vmatprep.subr.mxu1 %v1457_v32  ;;  %v2255_v28 = vld [vmem:[%s17969_s3 + $0x3e0] sm:$0xff] }
 0x155   :  { %10676 = vmatprep.subr.mxu0 %v1723_v33  ;;  %10612 = vmatpush3.msra.mxu1 %v1457_v32  ;;  %v1700_v32 = vld [vmem:[#allocation2 + $0x51] sm:$0xff] }
 0x156   :  { %10677 = vmatpush3.msra.mxu0 %v1723_v33  ;;  %10508 = vmatmul.mubr.f32.gmra.mxu1 %v923_v37  ;;  %v1701_v33 = vld [vmem:[#allocation2 + $0x59] sm:$0xff] }
 0x157   :  { %10579 = vmatmul.mubr.f32.gmra.mxu0 %v1186_v38  ;;  %10678 = vmatprep.subr.mxu0 %v1722_v36  ;;  %v1439_v37 = vld [vmem:[#allocation2 + $0x60] sm:$0xff] }
 0x158   :  { %10510 = vmatprep.mubr.f32.mxu1 %v924_v39  ;;  %10581 = vmatprep.mubr.f32.mxu0 %v1187_v43  ;;  %v1702_v38 = vld [vmem:[#allocation2 + $0x61] sm:$0xff]  ;;  %v1987_v43 = vld [vmem:[%s17969_s3 + $0x338] sm:$0xff] }
 0x159   :  { %10679 = vmatpush3.msra.mxu0 %v1722_v36  ;;  %10613 = vmatprep.subr.mxu1 %v1456_v41  ;;  %v2254_v36 = vld [vmem:[%s17969_s3 + $0x3d8] sm:$0xff]  ;;  %v1988_v39 = vld [vmem:[%s17969_s3 + $0x340] sm:$0xff] }
 0x15a   :  { %10680 = vmatprep.subr.mxu0 %v1721_v42  ;;  %10614 = vmatpush3.msra.mxu1 %v1456_v41  ;;  %v1703_v41 = vld [vmem:[#allocation2 + $0x69] sm:$0xff] }
 0x15b   :  { %10681 = vmatpush3.msra.mxu0 %v1721_v42  ;;  %10511 = vmatmul.mubr.f32.gmra.mxu1 %v925_v46  ;;  %v1704_v42 = vld [vmem:[#allocation2 + $0x71] sm:$0xff]  ;;  %v1705_v46 = vld [vmem:[#allocation2 + $0x79] sm:$0xff] }
 0x15c   :  { %10582 = vmatmul.mubr.f32.gmra.mxu0 %v1188_v47  ;;  %10682 = vmatprep.subr.mxu0 %v1720_v44  ;;  %v1706_v47 = vld [vmem:[#allocation2 + $0x81] sm:$0xff] }
 0x15d   :  { %10513 = vmatprep.mubr.f32.mxu1 %v926_v49  ;;  %10584 = vmatprep.mubr.f32.mxu0 %v1189_v51  ;;  %v2252_v49 = vld [vmem:[%s17969_s3 + $0x3c8] sm:$0xff] }
 0x15e   :  { %10615 = vmatprep.subr.mxu1 %v1455_v48  ;;  %10683 = vmatpush3.msra.mxu0 %v1720_v44  ;;  %v2253_v44 = vld [vmem:[%s17969_s3 + $0x3d0] sm:$0xff] }
 0x15f   :  { %10616 = vmatpush3.msra.mxu1 %v1455_v48  ;;  %10684 = vmatprep.subr.mxu0 %v1719_v52  ;;  %v1986_v48 = vld [vmem:[%s17969_s3 + $0x330] sm:$0xff] }
 0x160   :  { %10514 = vmatmul.mubr.f32.gmra.mxu1 %v927_v55  ;;  %10685 = vmatpush3.msra.mxu0 %v1719_v52  ;;  %v1707_v51 = vld [vmem:[#allocation2 + $0x89] sm:$0xff]  ;;  %v1708_v52 = vld [vmem:[#allocation2 + $0x91] sm:$0xff]  ;;  %v1709_v55 = vld [vmem:[#allocation2 + $0x99] sm:$0xff] }
 0x161   :  { %10617 = vmatprep.subr.mxu1 %v1454_v53  ;;  %10585 = vmatmul.mubr.f32.gmra.mxu0 %v1190_v57  ;;  %v1983_v57 = vld [vmem:[%s17969_s3 + $0x318] sm:$0xff] }
 0x162   :  { %10686 = vmatprep.subr.mxu0 %v1718_v13  ;;  %10618 = vmatpush3.msra.mxu1 %v1454_v53  ;;  %v2251_v53 = vld [vmem:[%s17969_s3 + $0x3c0] sm:$0xff] }
 0x163   :  { %10619 = vmatprep.mubr.f32.mxu1 %v1428_v58  ;;  %10687 = vmatpush3.msra.mxu0 %v1718_v13  ;;  %v1710_v13 = vld [vmem:[#allocation2 + $0xa1] sm:$0xff]  ;;  %v1711_v58 = vld [vmem:[#allocation2 + $0xa9] sm:$0xff] }
 0x164   :  { %10690 = vmatprep.mubr.f32.mxu0 %v1691_v62  ;;  %10688 = vmatprep.subr.mxu0 %v1717_v59  ;;  %v1713_v62 = vld [vmem:[#allocation2 + $0xb9] sm:$0xff] }
 0x165   :  { %10729 = vmatprep.subr.mxu1 %v1995_v61  ;;  %10689 = vmatpush3.msra.mxu0 %v1717_v59  ;;  %v1712_v59 = vld [vmem:[#allocation2 + $0xb1] sm:$0xff] }
 0x166   :  { %10620 = vmatmul.mubr.f32.vlgmr.msra.gmra.mxu1 %v1429_v63  ;;  %10691 = vmatmul.mubr.f32.vlgmr.msra.gmra.mxu0 %v1692_v0  ;;  %v1714_v63 = vld [vmem:[#allocation2 + $0xc1] sm:$0xff] }
 0x167   :  { %10730 = vmatpush3.msra.mxu1 %v1995_v61  ;;  %10622 = vmatprep.mubr.f32.mxu1 %v1430_v4  ;;  %v1982_v61 = vld [vmem:[%s17969_s3 + $0x310] sm:$0xff]  ;;  %v1981_v0 = vld [vmem:[%s17969_s3 + $0x308] sm:$0xff] }
 0x168   :  { %10693 = vmatprep.mubr.f32.mxu0 %v1693_v5  ;;  %10731 = vmatprep.subr.mxu1 %v1994_v1  ;;  %v1954_v4 = vld [vmem:[#allocation2 + $0xa] sm:$0xff]  ;;  %v2243_v5 = vld [vmem:[%s17969_s3 + $0x380] sm:$0xff] }
 0x169   :  { %10800 = vmatprep.subr.mxu0 %v2258_v2  ;;  %10732 = vmatpush3.msra.mxu1 %v1994_v1  ;;  %v2245_v1 = vld [vmem:[%s17969_s3 + $0x390] sm:$0xff] }
 0x16a   :  { %10623 = vmatmul.mubr.f32.gmra.mxu1 %v1431_v6  ;;  %10801 = vmatpush3.msra.mxu0 %v2258_v2  ;;  %v1980_v2 = vld [vmem:[%s17969_s3 + $0x300] sm:$0xff]  ;;  %v2521_v6 = vld [vmem:[%s17969_s3 + $0x478] sm:$0xff] }
 0x16b   :  { %10694 = vmatmul.mubr.f32.gmra.mxu0 %v1694_v7  ;;  %10625 = vmatprep.mubr.f32.mxu1 %v1432_v11  ;;  %v2217_v7 = vld [vmem:[#allocation2 + $0xb] sm:$0xff]  ;;  %v1956_v11 = vld [vmem:[#allocation2 + $0x1a] sm:$0xff] }
 0x16c   :  { %10696 = vmatprep.mubr.f32.mxu0 %v1695_v12  ;;  %10733 = vmatprep.subr.mxu1 %v1993_v8  ;;  %v2219_v12 = vld [vmem:[#allocation2 + $0x1b] sm:$0xff] }
 0x16d   :  { %10802 = vmatprep.subr.mxu0 %v2257_v9  ;;  %10734 = vmatpush3.msra.mxu1 %v1993_v8  ;;  %v2218_v8 = vld [vmem:[#allocation2 + $0x13] sm:$0xff] }
 0x16e   :  { %10803 = vmatpush3.msra.mxu0 %v2257_v9  ;;  %10626 = vmatmul.mubr.f32.gmra.mxu1 %v1433_v15  ;;  %v2520_v9 = vld [vmem:[%s17969_s3 + $0x470] sm:$0xff]  ;;  %v13251_v15 = vld [vmem:[#allocation2] sm:$0xff] }
 0x16f   :  { %10697 = vmatmul.mubr.f32.gmra.mxu0 %v1696_v16  ;;  %10628 = vmatprep.mubr.f32.mxu1 %v1434_v19  ;;  %v2220_v16 = vld [vmem:[#allocation2 + $0x23] sm:$0xff] }
 0x170   :  { %10699 = vmatprep.mubr.f32.mxu0 %v1697_v21  ;;  %10735 = vmatprep.subr.mxu1 %v1992_v14  ;;  %v1958_v19 = vld [vmem:[#allocation2 + $0x2a] sm:$0xff] }
 0x171   :  { %10804 = vmatprep.subr.mxu0 %v2256_v18  ;;  %10736 = vmatpush3.msra.mxu1 %v1992_v14  ;;  %v1957_v14 = vld [vmem:[#allocation2 + $0x22] sm:$0xff]  ;;  %v2221_v21 = vld [vmem:[#allocation2 + $0x2b] sm:$0xff] }
 0x172   :  { %10805 = vmatpush3.msra.mxu0 %v2256_v18  ;;  %10629 = vmatmul.mubr.f32.gmra.mxu1 %v1435_v23  ;;  %v2519_v18 = vld [vmem:[%s17969_s3 + $0x468] sm:$0xff]  ;;  %v2222_v23 = vld [vmem:[#allocation2 + $0x33] sm:$0xff] }
 0x173   :  { %10700 = vmatmul.mubr.f32.gmra.mxu0 %v1698_v24  ;;  %10737 = vmatprep.subr.mxu1 %v1991_v22  ;;  %v2518_v24 = vld [vmem:[%s17969_s3 + $0x460] sm:$0xff] }
 0x174   :  { %10631 = vmatprep.mubr.f32.mxu1 %v1436_v26  ;;  %10702 = vmatprep.mubr.f32.mxu0 %v1699_v29  ;;  %v1960_v26 = vld [vmem:[#allocation2 + $0x3a] sm:$0xff]  ;;  %v1961_v29 = vld [vmem:[#allocation2 + $0x42] sm:$0xff] }
 0x175   :  { %10738 = vmatpush3.msra.mxu1 %v1991_v22  ;;  %10806 = vmatprep.subr.mxu0 %v2255_v28  ;;  %v1959_v22 = vld [vmem:[#allocation2 + $0x32] sm:$0xff] }
 0x176   :  { %10739 = vmatprep.subr.mxu1 %v1990_v27  ;;  %10632 = vmatmul.mubr.f32.gmra.mxu1 %v1437_v30  ;;  %v2224_v30 = vld [vmem:[#allocation2 + $0x43] sm:$0xff] }
 0x177   :  { %10703 = vmatmul.mubr.f32.gmra.mxu0 %v1700_v32  ;;  %10634 = vmatprep.mubr.f32.mxu1 %v12873_v17  ;;  %v1441_v17 = vld [vmem:[#allocation2 + $0x70] sm:$0xff] }
 0x178   :  { %10705 = vmatprep.mubr.f32.mxu0 %v1701_v33  ;;  %10740 = vmatpush3.msra.mxu1 %v1990_v27  ;;  %v2223_v27 = vld [vmem:[#allocation2 + $0x3b] sm:$0xff]  ;;  %v1962_v32 = vld [vmem:[#allocation2 + $0x4a] sm:$0xff] }
 0x179   :  { %10807 = vmatpush3.msra.mxu0 %v2255_v28  ;;  %10741 = vmatprep.subr.mxu1 %v1989_v34  ;;  %v2517_v28 = vld [vmem:[%s17969_s3 + $0x458] sm:$0xff]  ;;  %v2516_v33 = vld [vmem:[%s17969_s3 + $0x450] sm:$0xff] }
 0x17a   :  { %10808 = vmatprep.subr.mxu0 %v2254_v36  ;;  %10635 = vmatmul.mubr.f32.gmra.mxu1 %v1439_v37  ;;  %v2226_v37 = vld [vmem:[#allocation2 + $0x53] sm:$0xff] }
 0x17b   :  { %10706 = vmatmul.mubr.f32.gmra.mxu0 %v1702_v38  ;;  %10742 = vmatpush3.msra.mxu1 %v1989_v34  ;;  %v2225_v34 = vld [vmem:[#allocation2 + $0x4b] sm:$0xff]  ;;  %v1964_v38 = vld [vmem:[#allocation2 + $0x5a] sm:$0xff] }
 0x17c   :  { %10637 = vmatprep.mubr.f32.mxu1 %v12890_v31  ;;  %10708 = vmatprep.mubr.f32.mxu0 %v1703_v41  ;;  %v1443_v31 = vld [vmem:[#allocation2 + $0x80] sm:$0xff]  ;;  %v2515_v41 = vld [vmem:[%s17969_s3 + $0x448] sm:$0xff] }
 0x17d   :  { %10743 = vmatprep.subr.mxu1 %v1988_v39  ;;  %10809 = vmatpush3.msra.mxu0 %v2254_v36  ;;  %v1963_v36 = vld [vmem:[#allocation2 + $0x52] sm:$0xff] }
 0x17e   :  { %10744 = vmatpush3.msra.mxu1 %v1988_v39  ;;  %10810 = vmatprep.subr.mxu0 %v2253_v44  ;;  %v2227_v39 = vld [vmem:[#allocation2 + $0x5b] sm:$0xff] }
 0x17f   :  { %10638 = vmatmul.mubr.f32.gmra.mxu1 %v1441_v17  ;;  %10709 = vmatmul.mubr.f32.gmra.mxu0 %v1704_v42 }
 0x180   :  { %10640 = vmatprep.mubr.f32.mxu1 %v12907_v45  ;;  %10711 = vmatprep.mubr.f32.mxu0 %v1705_v46  ;;  %v1985_v45 = vld [vmem:[%s17969_s3 + $0x328] sm:$0xff]  ;;  %v2514_v46 = vld [vmem:[%s17969_s3 + $0x440] sm:$0xff] }
 0x181   :  { %10745 = vmatprep.subr.mxu1 %v1987_v43  ;;  %10811 = vmatpush3.msra.mxu0 %v2253_v44  ;;  %v2228_v44 = vld [vmem:[#allocation2 + $0x63] sm:$0xff] }
 0x182   :  { %10746 = vmatpush3.msra.mxu1 %v1987_v43  ;;  %10812 = vmatprep.subr.mxu0 %v2252_v49  ;;  %v1965_v43 = vld [vmem:[#allocation2 + $0x62] sm:$0xff] }
 0x183   :  { %10641 = vmatmul.mubr.f32.gmra.mxu1 %v1443_v31  ;;  %10712 = vmatmul.mubr.f32.gmra.mxu0 %v1706_v47  ;;  %v1966_v47 = vld [vmem:[#allocation2 + $0x6a] sm:$0xff] }
 0x184   :  { %10643 = vmatprep.mubr.f32.mxu1 %v12930_v60  ;;  %10714 = vmatprep.mubr.f32.mxu0 %v1707_v51  ;;  %v1984_v60 = vld [vmem:[%s17969_s3 + $0x320] sm:$0xff]  ;;  %v2229_v51 = vld [vmem:[#allocation2 + $0x6b] sm:$0xff] }
 0x185   :  { %10747 = vmatprep.subr.mxu1 %v1986_v48  ;;  %10813 = vmatpush3.msra.mxu0 %v2252_v49 }
 0x186   :  { %10748 = vmatpush3.msra.mxu1 %v1986_v48  ;;  %10814 = vmatprep.subr.mxu0 %v2251_v53 }
 0x187   :  { %10644 = vmatmul.mubr.f32.gmra.mxu1 %v12920_v54  ;;  %10715 = vmatmul.mubr.f32.gmra.mxu0 %v1708_v52  ;;  %v2250_v54 = vld [vmem:[%s17969_s3 + $0x3b8] sm:$0xff] }
 0x188   :  { %10749 = vmatprep.subr.mxu1 %v1985_v45  ;;  %10646 = vmatprep.mubr.f32.mxu1 %v12950_v10  ;;  %v2249_v10 = vld [vmem:[%s17969_s3 + $0x3b0] sm:$0xff] }
 0x189   :  { %10717 = vmatprep.mubr.f32.mxu0 %v1709_v55  ;;  %10750 = vmatpush3.msra.mxu1 %v1985_v45  ;;  %v2513_v55 = vld [vmem:[%s17969_s3 + $0x438] sm:$0xff] }
 0x18a   :  { %10751 = vmatprep.subr.mxu1 %v1984_v60  ;;  %10815 = vmatpush3.msra.mxu0 %v2251_v53  ;;  %v1967_v53 = vld [vmem:[#allocation2 + $0x72] sm:$0xff] }
 0x18b   :  { %10647 = vmatmul.mubr.f32.gmra.mxu1 %v12937_v3  ;;  %10718 = vmatmul.mubr.f32.gmra.mxu0 %v1710_v13  ;;  %v2248_v3 = vld [vmem:[%s17969_s3 + $0x3a8] sm:$0xff]  ;;  %v1968_v13 = vld [vmem:[#allocation2 + $0x7a] sm:$0xff] }
 0x18c   :  { %10752 = vmatpush3.msra.mxu1 %v1984_v60  ;;  %10816 = vmatprep.subr.mxu0 %v2250_v54  ;;  %v2230_v60 = vld [vmem:[#allocation2 + $0x73] sm:$0xff] }
 0x18d   :  { %10649 = vmatprep.mubr.f32.mxu1 %v12967_v25  ;;  %10720 = vmatprep.mubr.f32.mxu0 %v1711_v58  ;;  %v2247_v25 = vld [vmem:[%s17969_s3 + $0x3a0] sm:$0xff] }
 0x18e   :  { %10817 = vmatpush3.msra.mxu0 %v2250_v54  ;;  %10753 = vmatprep.subr.mxu1 %v1983_v57 }
 0x18f   :  { %10818 = vmatprep.subr.mxu0 %v2249_v10  ;;  %10754 = vmatpush3.msra.mxu1 %v1983_v57  ;;  %v2231_v57 = vld [vmem:[#allocation2 + $0x7b] sm:$0xff] }
 0x190   :  { %10819 = vmatpush3.msra.mxu0 %v2249_v10  ;;  %10650 = vmatmul.mubr.f32.gmra.mxu1 %v12960_v20  ;;  %v2246_v20 = vld [vmem:[%s17969_s3 + $0x398] sm:$0xff] }
 0x191   :  { %10721 = vmatmul.mubr.f32.gmra.mxu0 %v1712_v59  ;;  %10820 = vmatprep.subr.mxu0 %v2248_v3  ;;  %v1969_v59 = vld [vmem:[#allocation2 + $0x82] sm:$0xff] }
 0x192   :  { %10652 = vmatprep.mubr.f32.mxu1 %v12987_v40  ;;  %10723 = vmatprep.mubr.f32.mxu0 %v1713_v62  ;;  %v1715_v40 = vld [vmem:[#allocation2 + $0xc9] sm:$0xff] }
 0x193   :  { %10821 = vmatpush3.msra.mxu0 %v2248_v3  ;;  %10755 = vmatprep.subr.mxu1 %v1982_v61 }
 0x194   :  { %10822 = vmatprep.subr.mxu0 %v2247_v25  ;;  %10756 = vmatpush3.msra.mxu1 %v1982_v61  ;;  %v2232_v61 = vld [vmem:[#allocation2 + $0x83] sm:$0xff] }
 0x195   :  { %10823 = vmatpush3.msra.mxu0 %v2247_v25  ;;  %10653 = vmatmul.mubr.f32.gmra.mxu1 %v12980_v35  ;;  %v2244_v35 = vld [vmem:[%s17969_s3 + $0x388] sm:$0xff]  ;;  %v2512_v25 = vld [vmem:[%s17969_s3 + $0x430] sm:$0xff] }
 0x196   :  { %10724 = vmatmul.mubr.f32.gmra.mxu0 %v1714_v63  ;;  %10824 = vmatprep.subr.mxu0 %v2246_v20  ;;  %v2233_v63 = vld [vmem:[#allocation2 + $0x8b] sm:$0xff] }
 0x197   :  { %10655 = vmatprep.mubr.f32.mxu1 %v13010_v56  ;;  %10726 = vmatprep.mubr.f32.mxu0 %v1715_v40  ;;  %v1716_v56 = vld [vmem:[#allocation2 + $0xd1] sm:$0xff] }
 0x198   :  { %10757 = vmatprep.subr.mxu1 %v1981_v0  ;;  %10825 = vmatpush3.msra.mxu0 %v2246_v20  ;;  %v1970_v20 = vld [vmem:[#allocation2 + $0x8a] sm:$0xff] }
 0x199   :  { %10758 = vmatpush3.msra.mxu1 %v1981_v0  ;;  %10826 = vmatprep.subr.mxu0 %v2245_v1 }
 0x19a   :  { %10656 = vmatmul.mubr.f32.gmra.mxu1 %v13000_v50  ;;  %10827 = vmatpush3.msra.mxu0 %v2245_v1  ;;  %v1955_v50 = vld [vmem:[#allocation2 + $0x12] sm:$0xff] }
 0x19b   :  { %10759 = vmatprep.subr.mxu1 %v1980_v2  ;;  %10727 = vmatmul.mubr.f32.gmra.mxu0 %v1716_v56  ;;  %v1971_v56 = vld [vmem:[#allocation2 + $0x92] sm:$0xff] }
 0x19c   :  { %10828 = vmatprep.subr.mxu0 %v2244_v35  ;;  %10760 = vmatpush3.msra.mxu1 %v1980_v2  ;;  %v2511_v2 = vld [vmem:[%s17969_s3 + $0x428] sm:$0xff] }
 0x19d   :  { %10761 = vmatprep.mubr.f32.mxu1 %v1954_v4  ;;  %10829 = vmatpush3.msra.mxu0 %v2244_v35  ;;  %v2234_v4 = vld [vmem:[#allocation2 + $0x93] sm:$0xff] }
 0x19e   :  { %10832 = vmatprep.mubr.f32.mxu0 %v2217_v7  ;;  %10830 = vmatprep.subr.mxu0 %v2243_v5  ;;  %v2510_v7 = vld [vmem:[%s17969_s3 + $0x420] sm:$0xff] }
 0x19f   :  { %10871 = vmatprep.subr.mxu1 %v2521_v6  ;;  %10831 = vmatpush3.msra.mxu0 %v2243_v5 }
 0x1a0   :  { %10762 = vmatmul.mubr.f32.vlgmr.msra.gmra.mxu1 %v1955_v50  ;;  %10833 = vmatmul.mubr.f32.vlgmr.msra.gmra.mxu0 %v2218_v8 }
 0x1a1   :  { %10872 = vmatpush3.msra.mxu1 %v2521_v6  ;;  %10764 = vmatprep.mubr.f32.mxu1 %v1956_v11  ;;  %v1972_v6 = vld [vmem:[#allocation2 + $0x9a] sm:$0xff] }
 0x1a2   :  { %10835 = vmatprep.mubr.f32.mxu0 %v2219_v12  ;;  %10873 = vmatprep.subr.mxu1 %v2520_v9 }
 0x1a3   :  { %10942 = vmatprep.subr.mxu0 %v13251_v15  ;;  %10874 = vmatpush3.msra.mxu1 %v2520_v9  ;;  %v2235_v9 = vld [vmem:[#allocation2 + $0x9b] sm:$0xff] }
 0x1a4   :  { %10765 = vmatmul.mubr.f32.gmra.mxu1 %v1957_v14  ;;  %10836 = vmatmul.mubr.f32.gmra.mxu0 %v2220_v16  ;;  %v1973_v14 = vld [vmem:[#allocation2 + $0xa2] sm:$0xff] }
 0x1a5   :  { %10767 = vmatprep.mubr.f32.mxu1 %v1958_v19  ;;  %10838 = vmatprep.mubr.f32.mxu0 %v2221_v21  ;;  %v2236_v16 = vld [vmem:[#allocation2 + $0xa3] sm:$0xff] }
 0x1a6   :  { %10875 = vmatprep.subr.mxu1 %v2519_v18  ;;  %v1974_v21 = vld [vmem:[#allocation2 + $0xaa] sm:$0xff] }
 0x1a7   :  { %10876 = vmatpush3.msra.mxu1 %v2519_v18  ;;  %v2509_v18 = vld [vmem:[%s17969_s3 + $0x418] sm:$0xff] }
 0x1a8   :  { %10768 = vmatmul.mubr.f32.gmra.mxu1 %v1959_v22  ;;  %10839 = vmatmul.mubr.f32.gmra.mxu0 %v2222_v23 }
 0x1a9   :  { %10770 = vmatprep.mubr.f32.mxu1 %v1960_v26  ;;  %10841 = vmatprep.mubr.f32.mxu0 %v2223_v27 }
 0x1aa   :  { %10877 = vmatprep.subr.mxu1 %v2518_v24 }
 0x1ab   :  { %10878 = vmatpush3.msra.mxu1 %v2518_v24  ;;  %v2237_v24 = vld [vmem:[#allocation2 + $0xab] sm:$0xff] }
 0x1ac   :  { %10771 = vmatmul.mubr.f32.gmra.mxu1 %v1961_v29  ;;  %10842 = vmatmul.mubr.f32.gmra.mxu0 %v2224_v30  ;;  %v2238_v29 = vld [vmem:[#allocation2 + $0xb3] sm:$0xff] }
 0x1ad   :  { %10879 = vmatprep.subr.mxu1 %v2517_v28  ;;  %10773 = vmatprep.mubr.f32.mxu1 %v1962_v32  ;;  %v2508_v30 = vld [vmem:[%s17969_s3 + $0x410] sm:$0xff] }
 0x1ae   :  { %10844 = vmatprep.mubr.f32.mxu0 %v2225_v34  ;;  %10880 = vmatpush3.msra.mxu1 %v2517_v28  ;;  %v1975_v28 = vld [vmem:[#allocation2 + $0xb2] sm:$0xff]  ;;  %v2239_v34 = vld [vmem:[#allocation2 + $0xbb] sm:$0xff] }
 0x1af   :  { %10881 = vmatprep.subr.mxu1 %v2516_v33 }
 0x1b0   :  { %10774 = vmatmul.mubr.f32.gmra.mxu1 %v1963_v36  ;;  %10845 = vmatmul.mubr.f32.gmra.mxu0 %v2226_v37 }
 0x1b1   :  { %10776 = vmatprep.mubr.f32.mxu1 %v1964_v38  ;;  %10847 = vmatprep.mubr.f32.mxu0 %v2227_v39  ;;  %v1977_v39 = vld [vmem:[#allocation2 + $0xc2] sm:$0xff] }
 0x1b2   :  { %10882 = vmatpush3.msra.mxu1 %v2516_v33  ;;  %v10337_v17 = vpop.f32.mrf.mxu1  ;;  %v1976_v33 = vld [vmem:[#allocation2 + $0xba] sm:$0xff] }
 0x1b3   :  { %v10408_v42 = vpop.f32.mrf.mxu0  ;;  %10883 = vmatprep.subr.mxu1 %v2515_v41 }
 0x1b4   :  { %v13272_v31 = vadd.f32 %v10408_v42, %v10337_v17  ;;  %10777 = vmatmul.mubr.f32.gmra.mxu1 %v1965_v43  ;;  %10848 = vmatmul.mubr.f32.gmra.mxu0 %v2228_v44  ;;  %v13274_v48 = vpop.f32.mrf.mxu1  ;;  %v2507_v17 = vld [vmem:[%s17969_s3 + $0x408] sm:$0xff] }
 0x1b5   :  { %v13276_v49 = vpop.f32.mrf.mxu0  ;;  %10884 = vmatpush3.msra.mxu1 %v2515_v41  ;;  %10779 = vmatprep.mubr.f32.mxu1 %v1966_v47  ;;  %v2240_v41 = vld [vmem:[#allocation2 + $0xc3] sm:$0xff] }
 0x1b6   :  { %10850 = vmatprep.mubr.f32.mxu0 %v2229_v51  ;;  %10885 = vmatprep.subr.mxu1 %v2514_v46  ;;  %v10340_v45 = vpop.f32.mrf.mxu1  ;;  %v1978_v44 = vld [vmem:[#allocation2 + $0xca] sm:$0xff] }
 0x1b7   :  { %v10411_v52 = vpop.f32.mrf.mxu0  ;;  %10886 = vmatpush3.msra.mxu1 %v2514_v46  ;;  %v2241_v46 = vld [vmem:[#allocation2 + $0xcb] sm:$0xff] }
 0x1b8   :  { %v13281_v54 = vadd.f32 %v10411_v52, %v10340_v45  ;;  %10780 = vmatmul.mubr.f32.gmra.mxu1 %v1967_v53  ;;  %10851 = vmatmul.mubr.f32.gmra.mxu0 %v2230_v60  ;;  %v13283_v10 = vpop.f32.mrf.mxu1  ;;  %v2506_v52 = vld [vmem:[%s17969_s3 + $0x400] sm:$0xff]  ;;  %v1979_v53 = vld [vmem:[#allocation2 + $0xd2] sm:$0xff] }
 0x1b9   :  { %v13285_v58 = vpop.f32.mrf.mxu0  ;;  %10782 = vmatprep.mubr.f32.mxu1 %v1968_v13  ;;  %10853 = vmatprep.mubr.f32.mxu0 %v2231_v57  ;;  %v2242_v60 = vld [vmem:[#allocation2 + $0xd3] sm:$0xff] }
 0x1ba   :  { %10887 = vmatprep.subr.mxu1 %v2513_v55  ;;  %v2480_v57 = vld [vmem:[#allocation2 + $0xc] sm:$0xff] }
 0x1bb   :  { %v10414_v3 = vpop.f32.mrf.mxu0  ;;  %10888 = vmatpush3.msra.mxu1 %v2513_v55  ;;  %v10343_v62 = vpop.f32.mrf.mxu1 }
 0x1bc   :  { %10783 = vmatmul.mubr.f32.gmra.mxu1 %v1969_v59  ;;  %10854 = vmatmul.mubr.f32.gmra.mxu0 %v2232_v61  ;;  %v13290_v0 = vadd.f32 %v10414_v3, %v10343_v62 }
 0x1bd   :  { %v13292_v40 = vpop.f32.mrf.mxu0  ;;  %10785 = vmatprep.mubr.f32.mxu1 %v1970_v20  ;;  %10856 = vmatprep.mubr.f32.mxu0 %v2233_v63  ;;  %v13294_v1 = vpop.f32.mrf.mxu1  ;;  %v2482_v63 = vld [vmem:[#allocation2 + $0x1c] sm:$0xff] }
 0x1be   :  { %10889 = vmatprep.subr.mxu1 %v2512_v25 }
 0x1bf   :  { %v10417_v35 = vpop.f32.mrf.mxu0  ;;  %10890 = vmatpush3.msra.mxu1 %v2512_v25  ;;  %v10346_v5 = vpop.f32.mrf.mxu1  ;;  %v2481_v25 = vld [vmem:[#allocation2 + $0x14] sm:$0xff] }
 0x1c0   :  { %10786 = vmatmul.mubr.f32.gmra.mxu1 %v1971_v56  ;;  %10857 = vmatmul.mubr.f32.gmra.mxu0 %v2234_v4  ;;  %v13302_v50 = vadd.f32 %v10417_v35, %v10346_v5  ;;  %v2483_v4 = vld [vmem:[#allocation2 + $0x24] sm:$0xff] }
 0x1c1   :  { %v13304_v8 = vpop.f32.mrf.mxu0  ;;  %10891 = vmatprep.subr.mxu1 %v2511_v2  ;;  %10788 = vmatprep.mubr.f32.mxu1 %v1972_v6  ;;  %v13306_v11 = vpop.f32.mrf.mxu1 }
 0x1c2   :  { %10859 = vmatprep.mubr.f32.mxu0 %v2235_v9  ;;  %10892 = vmatpush3.msra.mxu1 %v2511_v2 }
 0x1c3   :  { %v10420_v12 = vpop.f32.mrf.mxu0  ;;  %10893 = vmatprep.subr.mxu1 %v2510_v7  ;;  %v10349_v19 = vpop.f32.mrf.mxu1 }
 0x1c4   :  { %10789 = vmatmul.mubr.f32.gmra.mxu1 %v1973_v14  ;;  %10860 = vmatmul.mubr.f32.gmra.mxu0 %v2236_v16  ;;  %v13311_v22 = vadd.f32 %v10420_v12, %v10349_v19  ;;  %v2485_v16 = vld [vmem:[#allocation2 + $0x34] sm:$0xff] }
 0x1c5   :  { %v13313_v23 = vpop.f32.mrf.mxu0  ;;  %10894 = vmatpush3.msra.mxu1 %v2510_v7  ;;  %10791 = vmatprep.mubr.f32.mxu1 %v1974_v21  ;;  %v13315_v26 = vpop.f32.mrf.mxu1  ;;  %v2484_v7 = vld [vmem:[#allocation2 + $0x2c] sm:$0xff] }
 0x1c6   :  { %10862 = vmatprep.mubr.f32.mxu0 %v2237_v24  ;;  %10895 = vmatprep.subr.mxu1 %v2509_v18 }
 0x1c7   :  { %v10423_v27 = vpop.f32.mrf.mxu0  ;;  %10896 = vmatpush3.msra.mxu1 %v2509_v18  ;;  %v10352_v32 = vpop.f32.mrf.mxu1  ;;  %v2486_v18 = vld [vmem:[#allocation2 + $0x3c] sm:$0xff] }
 0x1c8   :  { %10792 = vmatmul.mubr.f32.gmra.mxu1 %v1975_v28  ;;  %10863 = vmatmul.mubr.f32.gmra.mxu0 %v2238_v29  ;;  %v13320_v36 = vadd.f32 %v10423_v27, %v10352_v32  ;;  %v2487_v29 = vld [vmem:[#allocation2 + $0x44] sm:$0xff] }
 0x1c9   :  { %v13322_v37 = vpop.f32.mrf.mxu0  ;;  %10794 = vmatprep.mubr.f32.mxu1 %v1976_v33  ;;  %10865 = vmatprep.mubr.f32.mxu0 %v2239_v34  ;;  %v13324_v38 = vpop.f32.mrf.mxu1 }
 0x1ca   :  { %10897 = vmatprep.subr.mxu1 %v2508_v30 }
 0x1cb   :  { %10898 = vmatpush3.msra.mxu1 %v2508_v30  ;;  %v10426_v43 = vpop.f32.mrf.mxu0  ;;  %v2488_v30 = vld [vmem:[#allocation2 + $0x4c] sm:$0xff] }
 0x1cc   :  { %v10355_v42 = vpop.f32.mrf.mxu1  ;;  %10795 = vmatmul.mubr.f32.gmra.mxu1 %v1977_v39  ;;  %10866 = vmatmul.mubr.f32.gmra.mxu0 %v2240_v41  ;;  %v2489_v39 = vld [vmem:[#allocation2 + $0x54] sm:$0xff] }
 0x1cd   :  { %v13329_v47 = vadd.f32 %v10426_v43, %v10355_v42  ;;  %10797 = vmatprep.mubr.f32.mxu1 %v1978_v44  ;;  %10868 = vmatprep.mubr.f32.mxu0 %v2241_v46  ;;  %v13333_v45 = vpop.f32.mrf.mxu0  ;;  %v2490_v42 = vld [vmem:[#allocation2 + $0x5c] sm:$0xff]  ;;  %v2491_v46 = vld [vmem:[#allocation2 + $0x64] sm:$0xff] }
 0x1ce   :  { %v13331_v51 = vpop.f32.mrf.mxu1  ;;  %10899 = vmatprep.subr.mxu1 %v2507_v17 }
 0x1cf   :  { %10900 = vmatpush3.msra.mxu1 %v2507_v17  ;;  %v10429_v13 = vpop.f32.mrf.mxu0 }
 0x1d0   :  { %v10358_v55 = vpop.f32.mrf.mxu1  ;;  %10798 = vmatmul.mubr.f32.gmra.mxu1 %v1979_v53  ;;  %10869 = vmatmul.mubr.f32.gmra.mxu0 %v2242_v60  ;;  %v2492_v53 = vld [vmem:[#allocation2 + $0x6c] sm:$0xff] }
 0x1d1   :  { %v13338_v3 = vadd.f32 %v10429_v13, %v10358_v55  ;;  %10901 = vmatprep.subr.mxu1 %v2506_v52  ;;  %10903 = vmatprep.mubr.f32.mxu1 %v2480_v57  ;;  %v13342_v61 = vpop.f32.mrf.mxu0  ;;  %v2493_v13 = vld [vmem:[#allocation2 + $0x74] sm:$0xff] }
 0x1d2   :  { %v13340_v59 = vpop.f32.mrf.mxu1  ;;  %10902 = vmatpush3.msra.mxu1 %v2506_v52  ;;  %10974 = vmatprep.mubr.msk.f32.mxu0 %vm17998_vm12, %v13251_v15 }
 0x1d3   :  { %v10432_v20 = vpop.f32.mrf.mxu0  ;;  %10977 = vmatprep.subr.mxu1 %v13251_v15 }
 0x1d4   :  { %v10361_v62 = vpop.f32.mrf.mxu1  ;;  %10904 = vmatmul.mubr.f32.vlgmr.msra.gmra.mxu1 %v2481_v25  ;;  %v2494_v25 = vld [vmem:[#allocation2 + $0x7c] sm:$0xff] }
 0x1d5   :  { %v13345_v2 = vadd.f32 %v10432_v20, %v10361_v62  ;;  %10906 = vmatprep.mubr.f32.mxu1 %v2482_v63  ;;  %v13349_v56 = vpop.f32.mrf.mxu0 }
 0x1d6   :  { %v13347_v35 = vpop.f32.mrf.mxu1 }
 0x1d7   :  { %v10435_v6 = vpop.f32.mrf.mxu0 }
 0x1d8   :  { %v10364_v5 = vpop.f32.mrf.mxu1  ;;  %10907 = vmatmul.mubr.f32.gmra.mxu1 %v2483_v4 }
 0x1d9   :  { %v13351_v9 = vadd.f32 %v10435_v6, %v10364_v5  ;;  %10909 = vmatprep.mubr.f32.mxu1 %v2484_v7  ;;  %v13355_v14 = vpop.f32.mrf.mxu0  ;;  %v2495_v6 = vld [vmem:[#allocation2 + $0x84] sm:$0xff] }
 0x1da   :  { %v13353_v12 = vpop.f32.mrf.mxu1 }
 0x1dc   :  { %10910 = vmatmul.mubr.f32.gmra.mxu1 %v2485_v16  ;;  %v10367_v19 = vpop.f32.mrf.mxu1  ;;  %v2496_v16 = vld [vmem:[#allocation2 + $0x8c] sm:$0xff] }
 0x1dd   :  { %v10438_v21 = vpop.f32.mrf.mxu0  ;;  %10912 = vmatprep.mubr.f32.mxu1 %v2486_v18 }
 0x1de   :  { %v13357_v24 = vadd.f32 %v10438_v21, %v10367_v19  ;;  %v13359_v27 = vpop.f32.mrf.mxu1 }
 0x1df   :  { %v13361_v28 = vpop.f32.mrf.mxu0 }
 0x1e0   :  { %18063 = vst [vmem:[#allocation4_spill] sm:$0xff] %v13361_v28  ;;  %10913 = vmatmul.mubr.f32.gmra.mxu1 %v2487_v29  ;;  %v17979_v28 = vmov 1.0  }
 0x1e1   :  { %10915 = vmatprep.mubr.f32.mxu1 %v2488_v30  ;;  %v10370_v32 = vpop.f32.mrf.mxu1  ;;  %v2497_v30 = vld [vmem:[#allocation2 + $0x94] sm:$0xff] }
 0x1e2   :  { %v10441_v33 = vpop.f32.mrf.mxu0 }
 0x1e3   :  { %v13363_v34 = vadd.f32 %v10441_v33, %v10370_v32  ;;  %v13365_v41 = vpop.f32.mrf.mxu1  ;;  %v2498_v32 = vld [vmem:[#allocation2 + $0x9c] sm:$0xff] }
 0x1e4   :  { %18064 = vst [vmem:[#allocation5_spill] sm:$0xff] %v13365_v41  ;;  %v13367_v17 = vpop.f32.mrf.mxu0  ;;  %10916 = vmatmul.mubr.f32.gmra.mxu1 %v2489_v39 }
 0x1e5   :  { %18065 = vst [vmem:[#allocation6_spill] sm:$0xff] %v13367_v17  ;;  %10918 = vmatprep.mubr.f32.mxu1 %v2490_v42 }
 0x1e6   :  { %v10373_v43 = vpop.f32.mrf.mxu1 }
 0x1e7   :  { %v10444_v44 = vpop.f32.mrf.mxu0 }
 0x1e8   :  { %v13369_v52 = vadd.f32 %v10444_v44, %v10373_v43  ;;  %10919 = vmatmul.mubr.f32.gmra.mxu1 %v2491_v46  ;;  %v13371_v60 = vpop.f32.mrf.mxu1 }
 0x1e9   :  { %18066 = vst [vmem:[#allocation7_spill] sm:$0xff] %v13371_v60  ;;  %v13373_v55 = vpop.f32.mrf.mxu0  ;;  %10921 = vmatprep.mubr.f32.mxu1 %v2492_v53  ;;  %v2500_v53 = vld [vmem:[#allocation2 + $0xac] sm:$0xff] }
 0x1ea   :  { %18067 = vst [vmem:[#allocation8_spill] sm:$0xff] %v13373_v55 }
 0x1ec   :  { %v10479_v57 = vpop.f32.mrf.mxu1  ;;  %10922 = vmatmul.mubr.f32.gmra.mxu1 %v2493_v13  ;;  %v10550_v20 = vpop.f32.mrf.mxu0 }
 0x1ed   :  { %v1140_v62 = vadd.f32 %v10479_v57, %v13272_v31  ;;  %10924 = vmatprep.mubr.f32.mxu1 %v2494_v25 }
 0x1ee   :  { %v13376_v63 = vpop.f32.mrf.mxu1  ;;  %v13380_v5 = vpop.f32.mrf.mxu0 }
 0x1ef   :  { %v13378_v4 = vadd.f32 %v10550_v20, %v1140_v62 }
 0x1f0   :  { %v10482_v7 = vpop.f32.mrf.mxu1  ;;  %10925 = vmatmul.mubr.f32.gmra.mxu1 %v2495_v6  ;;  %v2501_v6 = vld [vmem:[#allocation2 + $0xb4] sm:$0xff] }
 0x1f1   :  { %v1142_v18 = vadd.f32 %v10482_v7, %v13281_v54  ;;  %v10553_v19 = vpop.f32.mrf.mxu0  ;;  %10927 = vmatprep.mubr.f32.mxu1 %v2496_v16  ;;  %v2499_v54 = vld [vmem:[#allocation2 + $0xa4] sm:$0xff]  ;;  %v2502_v7 = vld [vmem:[#allocation2 + $0xbc] sm:$0xff] }
 0x1f2   :  { %v13383_v21 = vpop.f32.mrf.mxu1 }
 0x1f3   :  { %v13385_v29 = vadd.f32 %v10553_v19, %v1142_v18  ;;  %v13387_v31 = vpop.f32.mrf.mxu0 }
 0x1f4   :  { %10928 = vmatmul.mubr.f32.gmra.mxu1 %v2497_v30  ;;  %v10485_v33 = vpop.f32.mrf.mxu1 }
 0x1f5   :  { %v10556_v39 = vpop.f32.mrf.mxu0  ;;  %10930 = vmatprep.mubr.f32.mxu1 %v2498_v32  ;;  %v1144_v42 = vadd.f32 %v10485_v33, %v13290_v0  ;;  %v2503_v33 = vld [vmem:[#allocation2 + $0xc4] sm:$0xff] }
 0x1f6   :  { %v13390_v43 = vpop.f32.mrf.mxu1 }
 0x1f7   :  { %v13392_v44 = vpop.f32.mrf.mxu0  ;;  %v13394_v46 = vadd.f32 %v10556_v39, %v1144_v42  ;;  %v2504_v39 = vld [vmem:[#allocation2 + $0xcc] sm:$0xff] }
 0x1f8   :  { %10931 = vmatmul.mubr.f32.gmra.mxu1 %v2499_v54  ;;  %v10488_v13 = vpop.f32.mrf.mxu1 }
 0x1f9   :  { %v10559_v57 = vpop.f32.mrf.mxu0  ;;  %10933 = vmatprep.mubr.f32.mxu1 %v2500_v53  ;;  %v1146_v25 = vadd.f32 %v10488_v13, %v13302_v50 }
 0x1fa   :  { %v13397_v62 = vpop.f32.mrf.mxu1 }
 0x1fb   :  { %v13399_v20 = vpop.f32.mrf.mxu0  ;;  %v13401_v0 = vadd.f32 %v10559_v57, %v1146_v25  ;;  %v2505_v25 = vld [vmem:[#allocation2 + $0xd4] sm:$0xff] }
 0x1fc   :  { %18068 = vst [vmem:[#allocation9_spill] sm:$0xff] %v13399_v20  ;;  %10934 = vmatmul.mubr.f32.gmra.mxu1 %v2501_v6  ;;  %v10491_v16 = vpop.f32.mrf.mxu1 }
 0x1fd   :  { %v10562_v18 = vpop.f32.mrf.mxu0  ;;  %10936 = vmatprep.mubr.f32.mxu1 %v2502_v7  ;;  %v1148_v19 = vadd.f32 %v10491_v16, %v13311_v22 }
 0x1fe   :  { %v13404_v30 = vpop.f32.mrf.mxu1 }
 0x1ff   :  { %v13406_v32 = vpop.f32.mrf.mxu0  ;;  %v13408_v50 = vadd.f32 %v10562_v18, %v1148_v19 }
 0x200   :  { %18069 = vst [vmem:[#allocation10_spill] sm:$0xff] %v13406_v32  ;;  %10937 = vmatmul.mubr.f32.gmra.mxu1 %v2503_v33  ;;  %v10494_v42 = vpop.f32.mrf.mxu1 }
 0x201   :  { %v10565_v54 = vpop.f32.mrf.mxu0  ;;  %10939 = vmatprep.mubr.f32.mxu1 %v2504_v39  ;;  %v1150_v53 = vadd.f32 %v10494_v42, %v13320_v36 }
 0x202   :  { %v13411_v13 = vpop.f32.mrf.mxu1 }
 0x203   :  { %v13413_v57 = vpop.f32.mrf.mxu0  ;;  %v13415_v22 = vadd.f32 %v10565_v54, %v1150_v53 }
 0x204   :  { %18070 = vst [vmem:[#allocation11_spill] sm:$0xff] %v13413_v57  ;;  %10940 = vmatmul.mubr.f32.gmra.mxu1 %v2505_v25 }
 0x205   :  { %v10497_v6 = vpop.f32.mrf.mxu1  ;;  %v10568_v7 = vpop.f32.mrf.mxu0 }
 0x206   :  { %v1152_v16 = vadd.f32 %v10497_v6, %v13329_v47 }
 0x207   :  { %v13418_v18 = vpop.f32.mrf.mxu1  ;;  %v13420_v19 = vpop.f32.mrf.mxu0 }
 0x208   :  { %18071 = vst [vmem:[#allocation12_spill] sm:$0xff] %v13418_v18  ;;  %18072 = vst [vmem:[#allocation13_spill] sm:$0xff] %v13420_v19  ;;  %v13422_v33 = vadd.f32 %v10568_v7, %v1152_v16 }
 0x209   :  { %v10500_v39 = vpop.f32.mrf.mxu1  ;;  %v10571_v36 = vpop.f32.mrf.mxu0 }
 0x20a   :  { %v1154_v42 = vadd.f32 %v10500_v39, %v13338_v3 }
 0x20b   :  { %v13425_v32 = vpop.f32.mrf.mxu1  ;;  %v13427_v57 = vpop.f32.mrf.mxu0 }
 0x20c   :  { %18073 = vst [vmem:[#allocation14_spill] sm:$0xff] %v13425_v32  ;;  %18074 = vst [vmem:[#allocation15_spill] sm:$0xff] %v13427_v57  ;;  %v13429_v54 = vadd.f32 %v10571_v36, %v1154_v42 }
 0x20d   :  { %v10503_v53 = vpop.f32.mrf.mxu1  ;;  %v10574_v25 = vpop.f32.mrf.mxu0 }
 0x20e   :  { %v1156_v47 = vadd.f32 %v10503_v53, %v13345_v2 }
 0x20f   :  { %v13432_v6 = vpop.f32.mrf.mxu1  ;;  %v13434_v18 = vpop.f32.mrf.mxu0 }
 0x210   :  { %18075 = vst [vmem:[#allocation16_spill] sm:$0xff] %v13432_v6  ;;  %18076 = vst [vmem:[#allocation17_spill] sm:$0xff] %v13434_v18  ;;  %v13436_v7 = vadd.f32 %v10574_v25, %v1156_v47 }
 0x211   :  { %v10506_v16 = vpop.f32.mrf.mxu1  ;;  %v10577_v3 = vpop.f32.mrf.mxu0 }
 0x212   :  { %v1158_v19 = vadd.f32 %v10506_v16, %v13351_v9 }
 0x213   :  { %v13439_v39 = vpop.f32.mrf.mxu1  ;;  %v13443_v36 = vpop.f32.mrf.mxu0 }
 0x214   :  { %18077 = vst [vmem:[#allocation18_spill] sm:$0xff] %v13439_v39  ;;  %v13441_v32 = vadd.f32 %v10577_v3, %v1158_v19  ;;  %18078 = vst [vmem:[#allocation19_spill] sm:$0xff] %v13443_v36 }
 0x216   :  { %v10509_v42 = vpop.f32.mrf.mxu1 }
 0x217   :  { %v10580_v57 = vpop.f32.mrf.mxu0  ;;  %v1160_v2 = vadd.f32 %v10509_v42, %v13357_v24 }
 0x218   :  { %v13446_v53 = vpop.f32.mrf.mxu1 }
 0x219   :  { %18079 = vst [vmem:[#allocation20_spill] sm:$0xff] %v13446_v53  ;;  %v13448_v6 = vpop.f32.mrf.mxu0  ;;  %v13450_v25 = vadd.f32 %v10580_v57, %v1160_v2 }
 0x21a   :  { %18080 = vst [vmem:[#allocation21_spill] sm:$0xff] %v13448_v6 }
 0x21b   :  { %v10512_v47 = vpop.f32.mrf.mxu1 }
 0x21c   :  { %v10583_v18 = vpop.f32.mrf.mxu0  ;;  %v1162_v9 = vadd.f32 %v10512_v47, %v13363_v34 }
 0x21d   :  { %v13453_v16 = vpop.f32.mrf.mxu1 }
 0x21e   :  { %18081 = vst [vmem:[#allocation22_spill] sm:$0xff] %v13453_v16  ;;  %v13455_v19 = vpop.f32.mrf.mxu0  ;;  %v13457_v3 = vadd.f32 %v10583_v18, %v1162_v9 }
 0x21f   :  { %18082 = vst [vmem:[#allocation23_spill] sm:$0xff] %v13455_v19 }
 0x220   :  { %v10515_v36 = vpop.f32.mrf.mxu1 }
 0x221   :  { %v1164_v39 = vadd.f32 %v10515_v36, %v13369_v52  ;;  %v10586_v24 = vpop.f32.mrf.mxu0 }
 0x222   :  { %v13460_v42 = vpop.f32.mrf.mxu1 }
 0x223   :  { %18083 = vst [vmem:[#allocation24_spill] sm:$0xff] %v13460_v42  ;;  %v13462_v53 = vadd.f32 %v10586_v24, %v1164_v39  ;;  %v13464_v57 = vpop.f32.mrf.mxu0 }
 0x224   :  { %18084 = vst [vmem:[#allocation25_spill] sm:$0xff] %v13464_v57  ;;  %v46_v57 = vlaneseq }
 0x226   :  { %v10621_v2 = vpop.f32.mrf.mxu1  ;;  %v13469_v34 = vpop.f32.mrf.mxu0  ;;  %v13489_v19 = vshrl.u32 %v46_v57, 7  ;;  %v64_v16 = vand.u32 127, %v46_v57 }
 0x227   :  { %v13467_v6 = vadd.f32 %v10621_v2, %v13378_v4 }
 0x228   :  { %v13471_v47 = vpop.f32.mrf.mxu1  ;;  %v13473_v18 = vpop.f32.mrf.mxu0  ;;  %18088 = vst [vmem:[#allocation29_spill] sm:$0xff] %v13489_v19  ;;  %v13496_v55 = vand.u32 7, %v64_v16  ;;  %v61_v41 = vadd.s32 112, %v13489_v19  ;;  %v60_v16 = vadd.s32 104, %v13489_v19 }
 0x22a   :  { %v10624_v9 = vpop.f32.mrf.mxu1 }
 0x22b   :  { %v13476_v52 = vadd.f32 %v10624_v9, %v13385_v29  ;;  %v13478_v36 = vpop.f32.mrf.mxu0  ;;  %v62_v9 = vadd.s32 120, %v13489_v19 }
 0x22c   :  { %v13480_v39 = vpop.f32.mrf.mxu1 }
 0x22d   :  { %v13482_v24 = vpop.f32.mrf.mxu0 }
 0x22e   :  { %18085 = vst [vmem:[#allocation26_spill] sm:$0xff] %v13482_v24  ;;  %v10627_v42 = vpop.f32.mrf.mxu1 }
 0x22f   :  { %v13484_v4 = vpop.f32.mrf.mxu0  ;;  %v13487_v2 = vadd.f32 %v10627_v42, %v13394_v46  ;;  %v80_v46 = vand.u32 7, %v62_v9 }
 0x230   :  { %18086 = vst [vmem:[#allocation27_spill] sm:$0xff] %v13484_v4  ;;  %v13491_v20 = vpop.f32.mrf.mxu1 }
 0x231   :  { %18087 = vst [vmem:[#allocation28_spill] sm:$0xff] %v13487_v2  ;;  %v13493_v29 = vpop.f32.mrf.mxu0  ;;  %v79_v2 = vand.u32 7, %v61_v41  ;;  %vm13509_vm0 = vcmp.eq.s32.totalorder %v80_v46, %v13496_v55 }
 0x232   :  { %18089 = vst [vmem:[#allocation30_spill] sm:$0xff] %v13493_v29  ;;  %v10630_v60 = vpop.f32.mrf.mxu1  ;;  %v18091_v29 = vmov 0  ;;  %10943 = vmatpush3.msk.msra.mxu0 %vm13509_vm0, %v17979_v28  ;;  %10978 = vmatpush3.msk.msra.mxu1 %vm13509_vm0, %v17979_v28 }
 0x233   :  { %v13498_v17 = vpop.f32.mrf.mxu0  ;;  %v13502_v4 = vadd.f32 %v10630_v60, %v13401_v0  ;;  %v18092_v29 = vsel %vm13509_vm0, 4294967295, %v18091_v29  ;;  %vm13520_vm1 = vcmp.eq.s32.totalorder %v79_v2, %v13496_v55  ;;  %v18095_v60 = vmov 0  ;;  %10944 = vmatprep.subr.mxu0 %v13251_v15  ;;  %10979 = vmatprep.subr.mxu1 %v13251_v15 }
 0x234   :  { %18090 = vst [vmem:[#allocation31_spill] sm:$0xff] %v13498_v17  ;;  %v13504_v42 = vpop.f32.mrf.mxu1  ;;  %18093 = vst [vmem:[#allocation32_spill] sm:$0xff] %v18092_v29  ;;  %v18096_v60 = vsel %vm13520_vm1, 4294967295, %v18095_v60  ;;  %v78_v0 = vand.u32 7, %v60_v16  ;;  %10945 = vmatpush3.msk.msra.mxu0 %vm13520_vm1, %v17979_v28  ;;  %10980 = vmatpush3.msk.msra.mxu1 %vm13520_vm1, %v17979_v28 }
 0x235   :  { %v13506_v57 = vpop.f32.mrf.mxu0  ;;  %18097 = vst [vmem:[#allocation34_spill] sm:$0xff] %v18096_v60  ;;  %10946 = vmatprep.subr.mxu0 %v13251_v15  ;;  %10981 = vmatprep.subr.mxu1 %v13251_v15 }
 0x236   :  { %v10633_v24 = vpop.f32.mrf.mxu1  ;;  %vm13544_vm2 = vcmp.eq.s32.totalorder %v78_v0, %v13496_v55 }
 0x237   :  { %v13514_v17 = vpop.f32.mrf.mxu0  ;;  %v13528_v41 = vadd.f32 %v10633_v24, %v13408_v50  ;;  %v18100_v50 = vmov 0  ;;  %v59_v24 = vadd.s32 96, %v13489_v19  ;;  %10947 = vmatpush3.msk.msra.mxu0 %vm13544_vm2, %v17979_v28  ;;  %10982 = vmatpush3.msk.msra.mxu1 %vm13544_vm2, %v17979_v28 }
 0x238   :  { %18094 = vst [vmem:[#allocation33_spill] sm:$0xff] %v13514_v17  ;;  %v13532_v9 = vpop.f32.mrf.mxu1  ;;  %v18101_v50 = vsel %vm13544_vm2, 4294967295, %v18100_v50  ;;  %10948 = vmatprep.subr.mxu0 %v13251_v15  ;;  %10983 = vmatprep.subr.mxu1 %v13251_v15 }
 0x239   :  { %18098 = vst [vmem:[#allocation35_spill] sm:$0xff] %v13528_v41  ;;  %v13534_v46 = vpop.f32.mrf.mxu0  ;;  %18102 = vst [vmem:[#allocation37_spill] sm:$0xff] %v18101_v50  ;;  %v77_v60 = vand.u32 7, %v59_v24  ;;  %v58_v50 = vadd.s32 88, %v13489_v19 }
 0x23a   :  { %18099 = vst [vmem:[#allocation36_spill] sm:$0xff] %v13534_v46  ;;  %v10636_v2 = vpop.f32.mrf.mxu1 }
 0x23b   :  { %v13550_v16 = vpop.f32.mrf.mxu0  ;;  %v13559_v0 = vadd.f32 %v10636_v2, %v13415_v22  ;;  %vm13568_vm3 = vcmp.eq.s32.totalorder %v77_v60, %v13496_v55  ;;  %v18111_v22 = vmov 1.0   ;;  %v76_v60 = vand.u32 7, %v58_v50 }
 0x23c   :  { %18103 = vst [vmem:[#allocation38_spill] sm:$0xff] %v13550_v16  ;;  %v13563_v29 = vpop.f32.mrf.mxu1  ;;  %v18107_v16 = vmov 0  ;;  %10949 = vmatpush3.msk.msra.mxu0 %vm13568_vm3, %v18111_v22  ;;  %10984 = vmatpush3.msk.msra.mxu1 %vm13568_vm3, %v18111_v22 }
 0x23d   :  { %18104 = vst [vmem:[#allocation39_spill] sm:$0xff] %v13559_v0  ;;  %18105 = vst [vmem:[#allocation40_spill] sm:$0xff] %v13563_v29  ;;  %v13565_v46 = vpop.f32.mrf.mxu0  ;;  %v18108_v16 = vsel %vm13568_vm3, 4294967295, %v18107_v16  ;;  %10950 = vmatprep.subr.mxu0 %v13251_v15  ;;  %10985 = vmatprep.subr.mxu1 %v13251_v15  ;;  %vm13591_vm4 = vcmp.eq.s32.totalorder %v76_v60, %v13496_v55 }
 0x23e   :  { %18106 = vst [vmem:[#allocation41_spill] sm:$0xff] %v13565_v46  ;;  %18109 = vst [vmem:[#allocation42_spill] sm:$0xff] %v18108_v16  ;;  %v57_v16 = vadd.s32 80, %v13489_v19  ;;  %10951 = vmatpush3.msk.msra.mxu0 %vm13591_vm4, %v18111_v22  ;;  %10986 = vmatpush3.msk.msra.mxu1 %vm13591_vm4, %v18111_v22 }
 0x23f   :  { %v10639_v28 = vpop.f32.mrf.mxu1  ;;  %v13573_v17 = vpop.f32.mrf.mxu0  ;;  %10952 = vmatprep.subr.mxu0 %v13251_v15  ;;  %10987 = vmatprep.subr.mxu1 %v13251_v15 }
 0x240   :  { %18110 = vst [vmem:[#allocation43_spill] sm:$0xff] %v13573_v17  ;;  %v13582_v24 = vadd.f32 %v10639_v28, %v13422_v33  ;;  %v18115_v17 = vmov 0  ;;  %v56_v28 = vadd.s32 72, %v13489_v19  ;;  %v75_v50 = vand.u32 7, %v57_v16 }
 0x241   :  { %v13586_v2 = vpop.f32.mrf.mxu1  ;;  %v13588_v46 = vpop.f32.mrf.mxu0  ;;  %v18116_v17 = vsel %vm13591_vm4, 4294967295, %v18115_v17  ;;  %v18126_v16 = vmov 0 }
 0x242   :  { %18112 = vst [vmem:[#allocation44_spill] sm:$0xff] %v13582_v24  ;;  %18113 = vst [vmem:[#allocation45_spill] sm:$0xff] %v13586_v2  ;;  %vm13615_vm5 = vcmp.eq.s32.totalorder %v75_v50, %v13496_v55  ;;  %v18122_v24 = vmov 0 }
 0x243   :  { %18114 = vst [vmem:[#allocation46_spill] sm:$0xff] %v13588_v46  ;;  %18117 = vst [vmem:[#allocation47_spill] sm:$0xff] %v18116_v17  ;;  %v10642_v0 = vpop.f32.mrf.mxu1  ;;  %v13596_v29 = vpop.f32.mrf.mxu0  ;;  %v74_v46 = vand.u32 7, %v56_v28  ;;  %v18123_v24 = vsel %vm13615_vm5, 4294967295, %v18122_v24  ;;  %v55_v17 = vadd.s32 64, %v13489_v19  ;;  %10953 = vmatpush3.msk.msra.mxu0 %vm13615_vm5, %v18111_v22  ;;  %10988 = vmatpush3.msk.msra.mxu1 %vm13615_vm5, %v18111_v22 }
 0x244   :  { %18118 = vst [vmem:[#allocation48_spill] sm:$0xff] %v13596_v29  ;;  %v13606_v33 = vadd.f32 %v10642_v0, %v13429_v54  ;;  %18124 = vst [vmem:[#allocation52_spill] sm:$0xff] %v18123_v24  ;;  %10954 = vmatprep.subr.mxu0 %v13251_v15  ;;  %10989 = vmatprep.subr.mxu1 %v13251_v15 }
 0x245   :  { %v13610_v60 = vpop.f32.mrf.mxu1  ;;  %v13612_v29 = vpop.f32.mrf.mxu0  ;;  %vm13626_vm6 = vcmp.eq.s32.totalorder %v74_v46, %v13496_v55  ;;  %v73_v28 = vand.u32 7, %v55_v17  ;;  %v54_v17 = vadd.s32 56, %v13489_v19 }
 0x246   :  { %18119 = vst [vmem:[#allocation49_spill] sm:$0xff] %v13606_v33  ;;  %18120 = vst [vmem:[#allocation50_spill] sm:$0xff] %v13610_v60  ;;  %v18127_v16 = vsel %vm13626_vm6, 4294967295, %v18126_v16  ;;  %10955 = vmatpush3.msk.msra.mxu0 %vm13626_vm6, %v18111_v22  ;;  %10990 = vmatpush3.msk.msra.mxu1 %vm13626_vm6, %v18111_v22 }
 0x247   :  { %18121 = vst [vmem:[#allocation51_spill] sm:$0xff] %v13612_v29  ;;  %v10645_v2 = vpop.f32.mrf.mxu1  ;;  %v13620_v54 = vpop.f32.mrf.mxu0  ;;  %18128 = vst [vmem:[#allocation54_spill] sm:$0xff] %v18127_v16  ;;  %10956 = vmatprep.subr.mxu0 %v13251_v15  ;;  %vm13650_vm7 = vcmp.eq.s32.totalorder %v73_v28, %v13496_v55  ;;  %10991 = vmatprep.subr.mxu1 %v13251_v15  ;;  %v72_v16 = vand.u32 7, %v54_v17 }
 0x248   :  { %18125 = vst [vmem:[#allocation53_spill] sm:$0xff] %v13620_v54  ;;  %v13634_v0 = vadd.f32 %v10645_v2, %v13436_v7  ;;  %v18132_v7 = vmov 0  ;;  %10957 = vmatpush3.msk.msra.mxu0 %vm13650_vm7, %v18111_v22  ;;  %10992 = vmatpush3.msk.msra.mxu1 %vm13650_vm7, %v18111_v22 }
 0x249   :  { %v13638_v50 = vpop.f32.mrf.mxu1  ;;  %v13640_v54 = vpop.f32.mrf.mxu0  ;;  %v18133_v7 = vsel %vm13650_vm7, 4294967295, %v18132_v7  ;;  %10958 = vmatprep.subr.mxu0 %v13251_v15  ;;  %10993 = vmatprep.subr.mxu1 %v13251_v15  ;;  %vm13674_vm8 = vcmp.eq.s32.totalorder %v72_v16, %v13496_v55 }
 0x24a   :  { %18129 = vst [vmem:[#allocation55_spill] sm:$0xff] %v13634_v0  ;;  %18130 = vst [vmem:[#allocation56_spill] sm:$0xff] %v13638_v50  ;;  %v18139_v0 = vmov 0  ;;  %10959 = vmatpush3.msk.msra.mxu0 %vm13674_vm8, %v18111_v22  ;;  %10994 = vmatpush3.msk.msra.mxu1 %vm13674_vm8, %v18111_v22 }
 0x24b   :  { %18131 = vst [vmem:[#allocation57_spill] sm:$0xff] %v13640_v54  ;;  %18134 = vst [vmem:[#allocation58_spill] sm:$0xff] %v18133_v7  ;;  %v10648_v46 = vpop.f32.mrf.mxu1  ;;  %v13665_v28 = vpop.f32.mrf.mxu0  ;;  %v18140_v0 = vsel %vm13674_vm8, 4294967295, %v18139_v0  ;;  %10960 = vmatprep.subr.mxu0 %v13251_v15  ;;  %10995 = vmatprep.subr.mxu1 %v13251_v15 }
 0x24c   :  { %v13663_v2 = vadd.f32 %v10648_v46, %v13441_v32  ;;  %18136 = vst [vmem:[#allocation60_spill] sm:$0xff] %v13665_v28  ;;  %18141 = vst [vmem:[#allocation63_spill] sm:$0xff] %v18140_v0 }
 0x24d   :  { %v13669_v24 = vpop.f32.mrf.mxu1  ;;  %v13671_v54 = vpop.f32.mrf.mxu0 }
 0x24e   :  { %18135 = vst [vmem:[#allocation59_spill] sm:$0xff] %v13663_v2  ;;  %18137 = vst [vmem:[#allocation61_spill] sm:$0xff] %v13669_v24 }
 0x24f   :  { %18138 = vst [vmem:[#allocation62_spill] sm:$0xff] %v13671_v54 }
 0x250   :  { %v10651_v32 = vpop.f32.mrf.mxu1 }
 0x251   :  { %v13686_v17 = vpop.f32.mrf.mxu0  ;;  %v13689_v16 = vadd.f32 %v10651_v32, %v13450_v25 }
 0x252   :  { %18142 = vst [vmem:[#allocation64_spill] sm:$0xff] %v13686_v17  ;;  %v13691_v46 = vpop.f32.mrf.mxu1 }
 0x253   :  { %18143 = vst [vmem:[#allocation65_spill] sm:$0xff] %v13689_v16  ;;  %18144 = vst [vmem:[#allocation66_spill] sm:$0xff] %v13691_v46  ;;  %v13693_v7 = vpop.f32.mrf.mxu0  ;;  %v52_v16 = vadd.s32 40, %v13489_v19  ;;  %v12440_v46 = vld [vmem:[#allocation2] sm:$0xff] }
 0x254   :  { %18145 = vst [vmem:[#allocation67_spill] sm:$0xff] %v13693_v7  ;;  %v53_v7 = vadd.s32 48, %v13489_v19 }
 0x255   :  { %v10654_v54 = vpop.f32.mrf.mxu1 }
 0x256   :  { %v13695_v28 = vpop.f32.mrf.mxu0  ;;  %v13698_v0 = vadd.f32 %v10654_v54, %v13457_v3  ;;  %v50_v3 = vadd.s32 24, %v13489_v19 }
 0x257   :  { %18146 = vst [vmem:[#allocation68_spill] sm:$0xff] %v13695_v28  ;;  %v13700_v2 = vpop.f32.mrf.mxu1  ;;  %v51_v28 = vadd.s32 32, %v13489_v19 }
 0x258   :  { %18147 = vst [vmem:[#allocation69_spill] sm:$0xff] %v13698_v0  ;;  %18148 = vst [vmem:[#allocation70_spill] sm:$0xff] %v13700_v2  ;;  %v13702_v24 = vpop.f32.mrf.mxu0  ;;  %v71_v0 = vand.u32 7, %v53_v7 }
 0x259   :  { %18149 = vst [vmem:[#allocation71_spill] sm:$0xff] %v13702_v24  ;;  %v70_v24 = vand.u32 7, %v52_v16  ;;  %v69_v2 = vand.u32 7, %v51_v28 }
 0x25a   :  { %v10657_v50 = vpop.f32.mrf.mxu1  ;;  %vm13721_vm9 = vcmp.eq.s32.totalorder %v71_v0, %v13496_v55  ;;  %v18160_v0 = vmov 0 }
 0x25b   :  { %v13705_v17 = vadd.f32 %v10657_v50, %v13462_v53  ;;  %v13707_v25 = vpop.f32.mrf.mxu0  ;;  %v49_v53 = vadd.s32 16, %v13489_v19  ;;  %vm13726_vm10 = vcmp.eq.s32.totalorder %v70_v24, %v13496_v55  ;;  %10961 = vmatpush3.msk.msra.mxu0 %vm13721_vm9, %v18111_v22  ;;  %vm13740_vm11 = vcmp.eq.s32.totalorder %v69_v2, %v13496_v55  ;;  %10996 = vmatpush3.msk.msra.mxu1 %vm13721_vm9, %v18111_v22 }
 0x25c   :  { %18151 = vst [vmem:[#allocation73_spill] sm:$0xff] %v13707_v25  ;;  %v13709_v32 = vpop.f32.mrf.mxu1  ;;  %v18154_v25 = vmov 0  ;;  %10962 = vmatprep.subr.mxu0 %v13251_v15  ;;  %v18161_v0 = vsel %vm13740_vm11, 4294967295, %v18160_v0  ;;  %v18163_v2 = vmov 0  ;;  %10997 = vmatprep.subr.mxu1 %v13251_v15 }
 0x25d   :  { %18150 = vst [vmem:[#allocation72_spill] sm:$0xff] %v13705_v17  ;;  %18152 = vst [vmem:[#allocation74_spill] sm:$0xff] %v13709_v32  ;;  %v13715_v54 = vpop.f32.mrf.mxu0  ;;  %v18155_v25 = vsel %vm13721_vm9, 4294967295, %v18154_v25  ;;  %v18157_v17 = vmov 0  ;;  %v68_v32 = vand.u32 7, %v50_v3  ;;  %v67_v24 = vand.u32 7, %v49_v53  ;;  %10963 = vmatpush3.msk.msra.mxu0 %vm13726_vm10, %v18111_v22  ;;  %10998 = vmatpush3.msk.msra.mxu1 %vm13726_vm10, %v18111_v22 }
 0x25e   :  { %18153 = vst [vmem:[#allocation75_spill] sm:$0xff] %v13715_v54  ;;  %18156 = vst [vmem:[#allocation76_spill] sm:$0xff] %v18155_v25  ;;  %v18158_v17 = vsel %vm13726_vm10, 4294967295, %v18157_v17  ;;  %v48_v54 = vadd.s32 8, %v13489_v19  ;;  %10964 = vmatprep.subr.mxu0 %v13251_v15  ;;  %10999 = vmatprep.subr.mxu1 %v13251_v15 }
 0x25f   :  { %18159 = vst [vmem:[#allocation77_spill] sm:$0xff] %v18158_v17  ;;  %18162 = vst [vmem:[#allocation78_spill] sm:$0xff] %v18161_v0  ;;  %vm13758_vm13 = vcmp.eq.s32.totalorder %v68_v32, %v13496_v55  ;;  %10965 = vmatpush3.msk.msra.mxu0 %vm13740_vm11, %v18111_v22  ;;  %vm13773_vm14 = vcmp.eq.s32.totalorder %v67_v24, %v13496_v55  ;;  %v18166_v32 = vmov 0  ;;  %11000 = vmatpush3.msk.msra.mxu1 %vm13740_vm11, %v18111_v22  ;;  %v18169_v24 = vmov 0 }
 0x260   :  { %v13718_v50 = vpop.f32.mrf.mxu1  ;;  %v13731_v7 = vpop.f32.mrf.mxu0  ;;  %v18164_v2 = vsel %vm13758_vm13, 4294967295, %v18163_v2  ;;  %v66_v53 = vand.u32 7, %v48_v54  ;;  %10966 = vmatprep.subr.mxu0 %v13251_v15  ;;  %v18167_v32 = vsel %vm13773_vm14, 4294967295, %v18166_v32  ;;  %v65_v54 = vand.u32 7, %v13489_v19  ;;  %11001 = vmatprep.subr.mxu1 %v13251_v15 }
 0x261   :  { %18165 = vst [vmem:[#allocation79_spill] sm:$0xff] %v18164_v2  ;;  %18168 = vst [vmem:[#allocation80_spill] sm:$0xff] %v18167_v32  ;;  %10967 = vmatpush3.msk.msra.mxu0 %vm13758_vm13, %v18111_v22  ;;  %11002 = vmatpush3.msk.msra.mxu1 %vm13758_vm13, %v18111_v22  ;;  %vm18175_vm13 = vmmov 0  }
 0x262   :  { %v13736_v28 = vpop.f32.mrf.mxu1  ;;  %v13752_v16 = vpop.f32.mrf.mxu0  ;;  %10968 = vmatprep.subr.mxu0 %v13251_v15  ;;  %vm13789_vm15 = vcmp.eq.s32.totalorder %v66_v53, %v13496_v55  ;;  %vm13804_vm12 = vcmp.eq.s32.totalorder %v65_v54, %v13496_v55  ;;  %v18172_v53 = vmov 0  ;;  %11003 = vmatprep.subr.mxu1 %v13251_v15 }
 0x263   :  { %v18170_v24 = vsel %vm13789_vm15, 4294967295, %v18169_v24  ;;  %10969 = vmatpush3.msk.msra.mxu0 %vm13773_vm14, %v18111_v22  ;;  %v18173_v53 = vsel %vm13804_vm12, 4294967295, %v18172_v53  ;;  %11004 = vmatpush3.msk.msra.mxu1 %vm13773_vm14, %v18111_v22 }
 0x264   :  { %v13754_v3 = vpop.f32.mrf.mxu1  ;;  %v13785_v17 = vpop.f32.mrf.mxu0  ;;  %18171 = vst [vmem:[#allocation81_spill] sm:$0xff] %v18170_v24  ;;  %10970 = vmatprep.subr.mxu0 %v13251_v15  ;;  %18174 = vst [vmem:[#allocation82_spill] sm:$0xff] %v18173_v53  ;;  %11005 = vmatprep.subr.mxu1 %v12440_v46 }
 0x265   :  { %10971 = vmatpush3.msk.msra.mxu0 %vm13789_vm15, %v18111_v22  ;;  %11006 = vmatpush3.msk.msra.mxu1 %vm13789_vm15, %v18111_v22 }
 0x266   :  { %v13769_v25 = vpop.f32.mrf.mxu1  ;;  %v13817_v2 = vpop.f32.mrf.mxu0  ;;  %10972 = vmatprep.subr.mxu0 %v12440_v46  ;;  %11007 = vmatprep.subr.mxu1 %v12440_v46 }
 0x267   :  { %10973 = vmatpush3.msk.msra.mxu0 %vm13804_vm12, %v18111_v22  ;;  %11009 = vmatprep.mubr.msk.f32.mxu1 %vm18175_vm13, %v12440_v46 }
 0x268   :  { %v13794_v19 = vpop.f32.mrf.mxu1  ;;  %11008 = vmatpush3.msk.msra.mxu1 %vm13804_vm12, %v18111_v22  ;;  %v13833_v54 = vpop.f32.mrf.mxu0 }
 0x269   :  { %18177 = vst [vmem:[#allocation84_spill] sm:$0xff] %v13833_v54 }
 0x26a   :  { %v13809_v0 = vpop.f32.mrf.mxu1  ;;  %v13839_v33 = vpop.f32.mrf.mxu0 }
 0x26b   :  { %18180 = vst [vmem:[#allocation87_spill] sm:$0xff] %v13839_v33 }
 0x26c   :  { %v13819_v55 = vpop.f32.mrf.mxu1  ;;  %v13845_v41 = vpop.f32.mrf.mxu0 }
 0x26e   :  { %v13828_v15 = vpop.f32.mrf.mxu1  ;;  %v13851_v53 = vpop.f32.mrf.mxu0 }
 0x26f   :  { %18176 = vst [vmem:[#allocation83_spill] sm:$0xff] %v13828_v15  ;;  %18185 = vst [vmem:[#allocation92_spill] sm:$0xff] %v13851_v53 }
 0x270   :  { %v13835_v32 = vpop.f32.mrf.mxu1 }
 0x271   :  { %18178 = vst [vmem:[#allocation85_spill] sm:$0xff] %v13835_v32  ;;  %v13857_v32 = vpop.f32.mrf.mxu0 }
 0x272   :  { %v13837_v29 = vpop.f32.mrf.mxu1  ;;  %18188 = vst [vmem:[#allocation95_spill] sm:$0xff] %v13857_v32 }
 0x273   :  { %18179 = vst [vmem:[#allocation86_spill] sm:$0xff] %v13837_v29 }
 0x274   :  { %v13841_v60 = vpop.f32.mrf.mxu1 }
 0x275   :  { %18181 = vst [vmem:[#allocation88_spill] sm:$0xff] %v13841_v60  ;;  %v13865_v60 = vpop.f32.mrf.mxu0 }
 0x276   :  { %v13843_v24 = vpop.f32.mrf.mxu1 }
 0x277   :  { %18182 = vst [vmem:[#allocation89_spill] sm:$0xff] %v13843_v24  ;;  %v774_v24 = vadd.f32 %v13276_v49, %v13274_v48  ;;  %v794_v48 = vadd.f32 %v13292_v40, %v13294_v1  ;;  %v814_v40 = vadd.f32 %v13313_v23, %v13315_v26  ;;  %v844_v23 = vadd.f32 %v13342_v61, %v13340_v59  ;;  %v18192_v59 = vld [vmem:[#allocation4_spill] sm:$0xff] }
 0x278   :  { %v13847_v46 = vpop.f32.mrf.mxu1  ;;  %v854_v26 = vadd.f32 %v13349_v56, %v13347_v35  ;;  %v13928_v61 = vadd.f32 %v18192_v59, %v13359_v27  ;;  %v18193_v35 = vld [vmem:[#allocation26_spill] sm:$0xff]  ;;  %v18199_v27 = vld [vmem:[#allocation12_spill] sm:$0xff] }
 0x279   :  { %18183 = vst [vmem:[#allocation90_spill] sm:$0xff] %v13847_v46 }
 0x27a   :  { %v13849_v15 = vpop.f32.mrf.mxu1 }
 0x27b   :  { %18184 = vst [vmem:[#allocation91_spill] sm:$0xff] %v13849_v15  ;;  %v1139_v15 = vadd.f32 %v13376_v63, %v774_v24 }
 0x27c   :  { %v13853_v22 = vpop.f32.mrf.mxu1 }
 0x27d   :  { %18186 = vst [vmem:[#allocation93_spill] sm:$0xff] %v13853_v22  ;;  %v13874_v22 = vpop.f32.mrf.mxu0 }
 0x27e   :  { %v13855_v54 = vpop.f32.mrf.mxu1 }
 0x27f   :  { %18187 = vst [vmem:[#allocation94_spill] sm:$0xff] %v13855_v54  ;;  %v784_v54 = vadd.f32 %v13285_v58, %v13283_v10  ;;  %v13885_v24 = vpop.f32.mrf.mxu0 }
 0x280   :  { %v13859_v29 = vpop.f32.mrf.mxu1 }
 0x281   :  { %18189 = vst [vmem:[#allocation96_spill] sm:$0xff] %v13859_v29  ;;  %v1141_v29 = vadd.f32 %v13383_v21, %v784_v54  ;;  %v804_v21 = vadd.f32 %v13304_v8, %v13306_v11 }
 0x282   :  { %v13861_v33 = vpop.f32.mrf.mxu1 }
 0x283   :  { %18190 = vst [vmem:[#allocation97_spill] sm:$0xff] %v13861_v33  ;;  %v1402_v33 = vadd.f32 %v13380_v5, %v1139_v15  ;;  %v1404_v58 = vadd.f32 %v13387_v31, %v1141_v29  ;;  %v1929_v5 = vadd.f32 %v13469_v34, %v13467_v6  ;;  %v824_v31 = vadd.f32 %v13322_v37, %v13324_v38 }
 0x284   :  { %v13867_v46 = vpop.f32.mrf.mxu1  ;;  %v834_v6 = vadd.f32 %v13333_v45, %v13331_v51  ;;  %v1145_v11 = vadd.f32 %v13397_v62, %v804_v21  ;;  %v864_v38 = vadd.f32 %v13355_v14, %v13353_v12  ;;  %v1147_v51 = vadd.f32 %v13404_v30, %v814_v40  ;;  %v18194_v12 = vld [vmem:[#allocation5_spill] sm:$0xff]  ;;  %v18195_v14 = vld [vmem:[#allocation6_spill] sm:$0xff] }
 0x285   :  { %v1665_v63 = vadd.f32 %v13471_v47, %v1402_v33  ;;  %v1667_v47 = vadd.f32 %v13480_v39, %v1404_v58  ;;  %v13902_v33 = vpop.f32.mrf.mxu0  ;;  %v1149_v45 = vadd.f32 %v13411_v13, %v824_v31  ;;  %v13937_v30 = vadd.f32 %v18195_v14, %v18194_v12  ;;  %v18196_v13 = vld [vmem:[#allocation7_spill] sm:$0xff]  ;;  %v18202_v21 = vld [vmem:[#allocation10_spill] sm:$0xff] }
 0x286   :  { %v13870_v53 = vpop.f32.mrf.mxu1  ;;  %v1410_v40 = vadd.f32 %v18202_v21, %v1147_v51  ;;  %v18216_v21 = vld [vmem:[#allocation83_spill] sm:$0xff] }
 0x287   :  { %18191 = vst [vmem:[#allocation98_spill] sm:$0xff] %v13870_v53  ;;  %v1143_v53 = vadd.f32 %v13390_v43, %v794_v48  ;;  %v1928_v1 = vadd.f32 %v13473_v18, %v1665_v63  ;;  %v2192_v43 = vadd.f32 %v13718_v50, %v1929_v5  ;;  %v1931_v18 = vadd.f32 %v13478_v36, %v13476_v52  ;;  %v13933_v39 = vpop.f32.mrf.mxu0  ;;  %v18198_v50 = vld [vmem:[#allocation9_spill] sm:$0xff]  ;;  %v18200_v48 = vld [vmem:[#allocation28_spill] sm:$0xff]  ;;  %v18201_v63 = vld [vmem:[#allocation27_spill] sm:$0xff] }
 0x288   :  { %v13876_v32 = vpop.f32.mrf.mxu1  ;;  %v1930_v56 = vadd.f32 %v18193_v35, %v1667_v47 }
 0x289   :  { %v1406_v8 = vadd.f32 %v13392_v44, %v1143_v53  ;;  %v2191_v37 = vadd.f32 %v13736_v28, %v1928_v1  ;;  %v2455_v52 = vadd.f32 %v13731_v7, %v2192_v43  ;;  %v2194_v36 = vadd.f32 %v13754_v3, %v1931_v18  ;;  %v18203_v1 = vld [vmem:[#allocation11_spill] sm:$0xff]  ;;  %v18204_v43 = vld [vmem:[#allocation30_spill] sm:$0xff] }
 0x28a   :  { %v13882_v49 = vpop.f32.mrf.mxu1  ;;  %v1408_v28 = vadd.f32 %v18198_v50, %v1145_v11  ;;  %v1151_v53 = vadd.f32 %v18199_v27, %v834_v6  ;;  %v1933_v7 = vadd.f32 %v18201_v63, %v18200_v48  ;;  %v2193_v58 = vadd.f32 %v13769_v25, %v1930_v56  ;;  %v13956_v6 = vld [vmem:[%s17970_s4 + $0x1] ss:$0 sm:$0xff]  ;;  %v18205_v18 = vld [vmem:[#allocation14_spill] sm:$0xff]  ;;  %v18212_v63 = vld [vmem:[#allocation17_spill] sm:$0xff] }
 0x28b   :  { %v1669_v44 = vadd.f32 %v13491_v20, %v1406_v8  ;;  %v18197_v20 = vld [vmem:[#allocation8_spill] sm:$0xff]  ;;  %v2454_v3 = vadd.f32 %v13752_v16, %v2191_v37  ;;  %v1412_v47 = vadd.f32 %v18203_v1, %v1149_v45  ;;  %v1153_v59 = vadd.f32 %v18205_v18, %v844_v23  ;;  %v13961_v37 = vpop.f32.mrf.mxu0  ;;  %v18206_v45 = vld [vmem:[#allocation13_spill] sm:$0xff] }
 0x28c   :  { %v13888_v10 = vpop.f32.mrf.mxu1  ;;  %v13941_v29 = vadd.f32 %v18197_v20, %v18196_v13  ;;  %v1671_v8 = vadd.f32 %v13504_v42, %v1408_v28  ;;  %v2457_v16 = vadd.f32 %v13785_v17, %v2194_v36  ;;  %v2196_v25 = vadd.f32 %v13794_v19, %v1933_v7  ;;  %v18208_v42 = vld [vmem:[#allocation31_spill] sm:$0xff]  ;;  %v18209_v36 = vld [vmem:[#allocation18_spill] sm:$0xff]  ;;  %v13986_v48 = vld [vmem:[%s17971_s1] sm:$0xff] }
 0x28d   :  { %v1932_v31 = vadd.f32 %v18204_v43, %v1669_v44  ;;  %v1414_v35 = vadd.f32 %v18206_v45, %v1151_v53  ;;  %v18207_v44 = vld [vmem:[#allocation16_spill] sm:$0xff]  ;;  %v2456_v13 = vadd.f32 %v13817_v2, %v2193_v58  ;;  %v1157_v20 = vadd.f32 %v18209_v36, %v864_v38  ;;  %v18214_v7 = vld [vmem:[#allocation33_spill] sm:$0xff]  ;;  %v18215_v58 = vld [vmem:[#allocation87_spill] sm:$0xff] }
 0x28e   :  { %v13895_v15 = vpop.f32.mrf.mxu1  ;;  %v1155_v56 = vadd.f32 %v18207_v44, %v854_v26  ;;  %v1934_v50 = vadd.f32 %v13506_v57, %v1671_v8  ;;  %v1673_v26 = vadd.f32 %v13532_v9, %v1410_v40  ;;  %v18211_v53 = vld [vmem:[#allocation84_spill] sm:$0xff]  ;;  %v14000_v43 = vld [vmem:[%s17971_s1 + $0x8] sm:$0xff] }
 0x28f   :  { %v2195_v12 = vadd.f32 %v13809_v0, %v1932_v31  ;;  %v18210_v0 = vld [vmem:[#allocation15_spill] sm:$0xff]  ;;  %v2459_v2 = vadd.f32 %v18211_v53, %v2196_v25  ;;  %v18218_v25 = vld [vmem:[#allocation36_spill] sm:$0xff] }
 0x290   :  { %v13910_v34 = vpop.f32.mrf.mxu1  ;;  %v1416_v27 = vadd.f32 %v18210_v0, %v1153_v59  ;;  %v13991_v9 = vadd.f32 %v18212_v63, %v1155_v56  ;;  %v2197_v40 = vadd.f32 %v18216_v21, %v1934_v50  ;;  %v18217_v59 = vld [vmem:[#allocation19_spill] sm:$0xff]  ;;  %v18219_v45 = vld [vmem:[#allocation40_spill] sm:$0xff] }
 0x291   :  { %v1675_v44 = vadd.f32 %v18219_v45, %v1412_v47  ;;  %v18221_v50 = vld [vmem:[#allocation39_spill] sm:$0xff] }
 0x292   :  { %v13924_v62 = vpop.f32.mrf.mxu1 }
 0x294   :  { %v10905_v54 = vpop.f32.mrf.mxu1 }
 0x295   :  { %v2718_v5 = vadd.f32 %v10905_v54, %v2455_v52  ;;  %v1935_v52 = vadd.f32 %v18208_v42, %v13502_v4  ;;  %v13981_v54 = vpop.f32.mrf.mxu0 }
 0x296   :  { %v2588_v11 = vpop.f32.mrf.mxu1 }
 0x297   :  { %v2717_v51 = vadd.f32 %v2588_v11, %v2454_v3  ;;  %v13970_v23 = vadd.f32 %v13956_v6, %v2718_v5  ;;  %v2198_v4 = vadd.f32 %v13819_v55, %v1935_v52  ;;  %v18213_v55 = vld [vmem:[#allocation35_spill] sm:$0xff]  ;;  %v2458_v5 = vadd.f32 %v18215_v58, %v2195_v12  ;;  %v18220_v52 = vld [vmem:[#allocation85_spill] sm:$0xff] }
 0x298   :  { %v10908_v14 = vpop.f32.mrf.mxu1  ;;  %v1937_v3 = vadd.f32 %v18214_v7, %v18213_v55 }
 0x299   :  { %v13973_v19 = vadd.f32 %v13956_v6, %v2717_v51  ;;  %v2720_v17 = vadd.f32 %v10908_v14, %v2457_v16  ;;  %v2775_v31 = vmul.f32 %v14000_v43, %v13970_v23  ;;  %v14011_v16 = vadd.f32 %v18217_v59, %v1157_v20  ;;  %v14017_v14 = vpop.f32.mrf.mxu0 }
 0x29a   :  { %v2598_v28 = vpop.f32.mrf.mxu1  ;;  %v1936_v51 = vadd.f32 %v18218_v25, %v1673_v26  ;;  %v2461_v56 = vadd.f32 %v13845_v41, %v2198_v4  ;;  %v2200_v12 = vadd.f32 %v18220_v52, %v1937_v3  ;;  %v18222_v26 = vld [vmem:[#allocation38_spill] sm:$0xff]  ;;  %v18225_v3 = vld [vmem:[#allocation20_spill] sm:$0xff]  ;;  %v18229_v25 = vld [vmem:[#allocation95_spill] sm:$0xff] }
 0x29b   :  { %v2774_v38 = vmul.f32 %v13986_v48, %v13973_v19  ;;  %v2719_v57 = vadd.f32 %v2598_v28, %v2456_v13  ;;  %v14005_v8 = vadd.f32 %v13956_v6, %v2720_v17  ;;  %v14022_v17 = vld [vmem:[%s17971_s1 + $0x10] sm:$0xff]  ;;  %v1939_v47 = vadd.f32 %v18222_v26, %v18221_v50  ;;  %v18223_v28 = vld [vmem:[#allocation92_spill] sm:$0xff]  ;;  %v14049_v45 = vpop.f32.mrf.mxu0 }
 0x29c   :  { %v10911_v1 = vpop.f32.mrf.mxu1  ;;  %v2460_v41 = vadd.f32 %v18223_v28, %v2197_v40  ;;  %v18224_v4 = vld [vmem:[#allocation86_spill] sm:$0xff]  ;;  %v1159_v58 = vadd.f32 %v18225_v3, %v13928_v61  ;;  %v18227_v40 = vld [vmem:[#allocation45_spill] sm:$0xff] }
 0x29d   :  { %v14008_v11 = vadd.f32 %v13956_v6, %v2719_v57  ;;  %v2722_v18 = vadd.f32 %v10911_v1, %v2459_v2  ;;  %v2800_v13 = vadd.f32 %v2775_v31, %v2774_v38  ;;  %v2199_v0 = vadd.f32 %v18224_v4, %v1936_v51  ;;  %v14036_v38 = vld [vmem:[%s17971_s1 + $0x18] sm:$0xff]  ;;  %v18228_v31 = vld [vmem:[#allocation88_spill] sm:$0xff]  ;;  %v18235_v3 = vld [vmem:[#allocation50_spill] sm:$0xff] }
 0x29e   :  { %v2608_v42 = vpop.f32.mrf.mxu1  ;;  %v2777_v57 = vmul.f32 %v14036_v38, %v14005_v8  ;;  %v1677_v1 = vadd.f32 %v18227_v40, %v1414_v35  ;;  %v2463_v51 = vadd.f32 %v18229_v25, %v2200_v12  ;;  %v14065_v12 = vld [vmem:[%s17971_s1 + $0x28] sm:$0xff]  ;;  %v14082_v25 = vpop.f32.mrf.mxu0 }
 0x29f   :  { %v2776_v36 = vmul.f32 %v14022_v17, %v14008_v11  ;;  %v2721_v20 = vadd.f32 %v2608_v42, %v2458_v5  ;;  %v14031_v53 = vadd.f32 %v13956_v6, %v2722_v18  ;;  %v18226_v5 = vld [vmem:[#allocation41_spill] sm:$0xff]  ;;  %v2202_v18 = vadd.f32 %v18228_v31, %v1939_v47  ;;  %v14054_v42 = vld [vmem:[%s17971_s1 + $0x20] sm:$0xff]  ;;  %v18236_v31 = vld [vmem:[#allocation90_spill] sm:$0xff] }
 0x2a0   :  { %v10914_v2 = vpop.f32.mrf.mxu1  ;;  %v1938_v21 = vadd.f32 %v18226_v5, %v1675_v44  ;;  %v18230_v44 = vld [vmem:[#allocation44_spill] sm:$0xff]  ;;  %v1679_v5 = vadd.f32 %v18235_v3, %v1416_v27 }
 0x2a1   :  { %v2801_v63 = vadd.f32 %v2800_v13, %v2776_v36  ;;  %v14041_v55 = vadd.f32 %v13956_v6, %v2721_v20  ;;  %v2724_v7 = vadd.f32 %v10914_v2, %v2461_v56  ;;  %v18231_v13 = vld [vmem:[#allocation43_spill] sm:$0xff]  ;;  %v2462_v36 = vadd.f32 %v13865_v60, %v2199_v0  ;;  %v18232_v20 = vld [vmem:[#allocation89_spill] sm:$0xff] }
 0x2a2   :  { %v2618_v59 = vpop.f32.mrf.mxu1  ;;  %v1941_v35 = vadd.f32 %v18231_v13, %v18230_v44  ;;  %v2201_v50 = vadd.f32 %v18232_v20, %v1938_v21  ;;  %v2779_v26 = vmul.f32 %v14065_v12, %v14031_v53  ;;  %v18233_v60 = vld [vmem:[#allocation21_spill] sm:$0xff]  ;;  %v2465_v21 = vadd.f32 %v13874_v22, %v2202_v18  ;;  %v18239_v18 = vld [vmem:[#allocation91_spill] sm:$0xff] }
 0x2a3   :  { %v2778_v56 = vmul.f32 %v14054_v42, %v14041_v55  ;;  %v2802_v61 = vadd.f32 %v2801_v63, %v2777_v57  ;;  %v2723_v52 = vadd.f32 %v2618_v59, %v2460_v41  ;;  %v14070_v4 = vadd.f32 %v13956_v6, %v2724_v7  ;;  %v18234_v57 = vld [vmem:[#allocation46_spill] sm:$0xff] }
 0x2a4   :  { %v10917_v47 = vpop.f32.mrf.mxu1  ;;  %v14076_v0 = vadd.f32 %v18233_v60, %v1159_v58  ;;  %v1940_v63 = vadd.f32 %v18234_v57, %v1677_v1  ;;  %v2204_v59 = vadd.f32 %v18236_v31, %v1941_v35  ;;  %v14087_v7 = vld [vmem:[%s17971_s1 + $0x30] sm:$0xff]  ;;  %v18237_v1 = vld [vmem:[#allocation49_spill] sm:$0xff]  ;;  %v2464_v22 = vadd.f32 %v13885_v24, %v2201_v50  ;;  %v14101_v35 = vld [vmem:[%s17971_s1 + $0x38] sm:$0xff] }
 0x2a5   :  { %v2803_v28 = vadd.f32 %v2802_v61, %v2778_v56  ;;  %v14073_v41 = vadd.f32 %v13956_v6, %v2723_v52  ;;  %v2726_v2 = vadd.f32 %v10917_v47, %v2463_v51  ;;  %v18238_v61 = vld [vmem:[#allocation48_spill] sm:$0xff]  ;;  %v2781_v20 = vmul.f32 %v14101_v35, %v14070_v4  ;;  %v18240_v24 = vld [vmem:[#allocation22_spill] sm:$0xff] }
 0x2a6   :  { %v2628_v40 = vpop.f32.mrf.mxu1  ;;  %v1943_v27 = vadd.f32 %v18238_v61, %v18237_v1  ;;  %v2203_v52 = vadd.f32 %v18239_v18, %v1940_v63  ;;  %v1161_v50 = vadd.f32 %v18240_v24, %v13937_v30  ;;  %v18242_v60 = vld [vmem:[#allocation56_spill] sm:$0xff]  ;;  %v18243_v63 = vld [vmem:[#allocation93_spill] sm:$0xff]  ;;  %v2467_v31 = vadd.f32 %v13902_v33, %v2204_v59  ;;  %v14115_v1 = vpop.f32.mrf.mxu0 }
 0x2a7   :  { %v2780_v58 = vmul.f32 %v14087_v7, %v14073_v41  ;;  %v2804_v51 = vadd.f32 %v2803_v28, %v2779_v26  ;;  %v2725_v56 = vadd.f32 %v2628_v40, %v2462_v36  ;;  %v14096_v44 = vadd.f32 %v13956_v6, %v2726_v2  ;;  %v18241_v28 = vld [vmem:[#allocation51_spill] sm:$0xff]  ;;  %v14131_v33 = vld [vmem:[%s17971_s1 + $0x48] sm:$0xff] }
 0x2a8   :  { %v10920_v13 = vpop.f32.mrf.mxu1  ;;  %v1942_v2 = vadd.f32 %v18241_v28, %v1679_v5  ;;  %v1681_v57 = vadd.f32 %v18242_v60, %v13991_v9  ;;  %v2206_v3 = vadd.f32 %v18243_v63, %v1943_v27  ;;  %v2466_v61 = vadd.f32 %v13933_v39, %v2203_v52  ;;  %v18246_v27 = vld [vmem:[#allocation94_spill] sm:$0xff]  ;;  %v18247_v39 = vld [vmem:[#allocation23_spill] sm:$0xff]  ;;  %v18248_v28 = vld [vmem:[#allocation57_spill] sm:$0xff] }
 0x2a9   :  { %v2805_v36 = vadd.f32 %v2804_v51, %v2780_v58  ;;  %v14106_v26 = vadd.f32 %v13956_v6, %v2725_v56  ;;  %v2728_v47 = vadd.f32 %v10920_v13, %v2465_v21  ;;  %v14120_v58 = vld [vmem:[%s17971_s1 + $0x40] sm:$0xff]  ;;  %v18244_v51 = vld [vmem:[#allocation55_spill] sm:$0xff]  ;;  %v18245_v56 = vld [vmem:[#allocation53_spill] sm:$0xff]  ;;  %v2783_v59 = vmul.f32 %v14131_v33, %v14096_v44 }
 0x2aa   :  { %v2638_v40 = vpop.f32.mrf.mxu1  ;;  %v1945_v9 = vadd.f32 %v18245_v56, %v18244_v51  ;;  %v2205_v18 = vadd.f32 %v18246_v27, %v1942_v2  ;;  %v1424_v52 = vadd.f32 %v18247_v39, %v1161_v50  ;;  %v1944_v2 = vadd.f32 %v18248_v28, %v1681_v57  ;;  %v18249_v60 = vld [vmem:[#allocation61_spill] sm:$0xff]  ;;  %v18250_v56 = vld [vmem:[#allocation96_spill] sm:$0xff]  ;;  %v18252_v57 = vld [vmem:[#allocation59_spill] sm:$0xff] }
 0x2ab   :  { %v2782_v30 = vmul.f32 %v14120_v58, %v14106_v26  ;;  %v2806_v21 = vadd.f32 %v2805_v36, %v2781_v20  ;;  %v2727_v5 = vadd.f32 %v2638_v40, %v2464_v22  ;;  %v14136_v20 = vadd.f32 %v13956_v6, %v2728_v47  ;;  %v14150_v47 = vld [vmem:[%s17971_s1 + $0x50] sm:$0xff]  ;;  %v14164_v28 = vld [vmem:[%s17971_s1 + $0x58] sm:$0xff] }
 0x2ac   :  { %v10923_v13 = vpop.f32.mrf.mxu1  ;;  %v1683_v63 = vadd.f32 %v18249_v60, %v14011_v16  ;;  %v2469_v40 = vadd.f32 %v13961_v37, %v2206_v3  ;;  %v2208_v27 = vadd.f32 %v18250_v56, %v1945_v9  ;;  %18251 = vst [vmem:[#allocation4_spill] sm:$0xff] %v14150_v47  ;;  %v2468_v16 = vadd.f32 %v13981_v54, %v2205_v18  ;;  %v18254_v37 = vld [vmem:[#allocation97_spill] sm:$0xff]  ;;  %v18255_v54 = vld [vmem:[#allocation24_spill] sm:$0xff] }
 0x2ad   :  { %v2807_v24 = vadd.f32 %v2806_v21, %v2782_v30  ;;  %v14139_v22 = vadd.f32 %v13956_v6, %v2727_v5  ;;  %v2730_v36 = vadd.f32 %v10923_v13, %v2467_v31  ;;  %v10864_v30 = vpop.f32.mrf.mxu0  ;;  %v18253_v5 = vld [vmem:[#allocation60_spill] sm:$0xff]  ;;  %v2207_v3 = vadd.f32 %v18254_v37, %v1944_v2  ;;  %v18256_v2 = vld [vmem:[#allocation62_spill] sm:$0xff] }
 0x2ae   :  { %v2648_v51 = vpop.f32.mrf.mxu1  ;;  %v1947_v13 = vadd.f32 %v18253_v5, %v18252_v57  ;;  %v1163_v18 = vadd.f32 %v18255_v54, %v13941_v29  ;;  %v2471_v37 = vadd.f32 %v14017_v14, %v2208_v27  ;;  %v14192_v14 = vld [vmem:[%s17971_s1 + $0x68] sm:$0xff] }
 0x2af   :  { %v2784_v31 = vmul.f32 %v14150_v47, %v14139_v22  ;;  %v2808_v50 = vadd.f32 %v2807_v24, %v2783_v59  ;;  %v2729_v21 = vadd.f32 %v2648_v51, %v2466_v61  ;;  %v14159_v9 = vadd.f32 %v13956_v6, %v2730_v36  ;;  %v18257_v51 = vld [vmem:[#allocation66_spill] sm:$0xff]  ;;  %v2425_v47 = vpop.f32.mrf.mxu0  ;;  %18262 = vst [vmem:[#allocation5_spill] sm:$0xff] %v14192_v14 }
 0x2b0   :  { %v10926_v39 = vpop.f32.mrf.mxu1  ;;  %v2785_v59 = vmul.f32 %v14164_v28, %v14136_v20  ;;  %v1946_v36 = vadd.f32 %v18256_v2, %v1683_v63  ;;  %v1685_v56 = vadd.f32 %v18257_v51, %v14076_v0  ;;  %v2210_v57 = vadd.f32 %v13867_v46, %v1947_v13  ;;  %v18259_v63 = vld [vmem:[#allocation65_spill] sm:$0xff]  ;;  %v18261_v46 = vld [vmem:[#allocation98_spill] sm:$0xff] }
 0x2b1   :  { %v2809_v61 = vadd.f32 %v2808_v50, %v2784_v31  ;;  %v14169_v24 = vadd.f32 %v13956_v6, %v2729_v21  ;;  %v2732_v60 = vadd.f32 %v10926_v39, %v2469_v40  ;;  %v14181_v31 = vld [vmem:[%s17971_s1 + $0x60] sm:$0xff]  ;;  %v2470_v0 = vadd.f32 %v14049_v45, %v2207_v3  ;;  %v18263_v45 = vld [vmem:[#allocation25_spill] sm:$0xff] }
 0x2b2   :  { %v2658_v5 = vpop.f32.mrf.mxu1  ;;  %18258 = vst [vmem:[#allocation26_spill] sm:$0xff] %v14181_v31  ;;  %v18260_v21 = vld [vmem:[#allocation64_spill] sm:$0xff]  ;;  %v2209_v13 = vadd.f32 %v18261_v46, %v1946_v36  ;;  %v2787_v27 = vmul.f32 %v14192_v14, %v14159_v9  ;;  %v1426_v3 = vadd.f32 %v18263_v45, %v1163_v18  ;;  %v18264_v36 = vld [vmem:[#allocation67_spill] sm:$0xff] }
 0x2b3   :  { %v2786_v40 = vmul.f32 %v14181_v31, %v14169_v24  ;;  %v2810_v29 = vadd.f32 %v2809_v61, %v2785_v59  ;;  %v2731_v50 = vadd.f32 %v2658_v5, %v2468_v16  ;;  %v1949_v39 = vadd.f32 %v18260_v21, %v18259_v63  ;;  %v18265_v5 = vld [vmem:[#allocation70_spill] sm:$0xff]  ;;  %v10867_v31 = vpop.f32.mrf.mxu0 }
 0x2b4   :  { %v10929_v54 = vpop.f32.mrf.mxu1  ;;  %v14197_v59 = vadd.f32 %v13956_v6, %v2732_v60  ;;  %v1948_v51 = vadd.f32 %v18264_v36, %v1685_v56  ;;  %v1687_v63 = vadd.f32 %v18265_v5, %v1424_v52  ;;  %v2473_v21 = vadd.f32 %v14082_v25, %v2210_v57  ;;  %v14210_v60 = vld [vmem:[%s17971_s1 + $0x70] sm:$0xff]  ;;  %v18267_v56 = vld [vmem:[#allocation68_spill] sm:$0xff] }
 0x2b5   :  { %v2811_v2 = vadd.f32 %v2810_v29, %v2786_v40  ;;  %v14200_v16 = vadd.f32 %v13956_v6, %v2731_v50  ;;  %v2734_v61 = vadd.f32 %v10929_v54, %v2471_v37  ;;  %v2212_v14 = vadd.f32 %v13876_v32, %v1949_v39  ;;  %v18266_v29 = vld [vmem:[#allocation69_spill] sm:$0xff]  ;;  %v14224_v39 = vld [vmem:[%s17971_s1 + $0x78] sm:$0xff]  ;;  %v2435_v5 = vpop.f32.mrf.mxu0 }
 0x2b6   :  { %v2668_v46 = vpop.f32.mrf.mxu1  ;;  %v1951_v50 = vadd.f32 %v18267_v56, %v18266_v29  ;;  %v2472_v52 = vadd.f32 %v14115_v1, %v2209_v13  ;;  %v2211_v25 = vadd.f32 %v13882_v49, %v1948_v51  ;;  %v18268_v1 = vld [vmem:[#allocation71_spill] sm:$0xff]  ;;  %v18269_v49 = vld [vmem:[#allocation74_spill] sm:$0xff]  ;;  %v18271_v29 = vld [vmem:[#allocation73_spill] sm:$0xff] }
 0x2b7   :  { %v2788_v37 = vmul.f32 %v14210_v60, %v14200_v16  ;;  %v2812_v40 = vadd.f32 %v2811_v2, %v2787_v27  ;;  %v2733_v18 = vadd.f32 %v2668_v46, %v2470_v0  ;;  %v14219_v32 = vadd.f32 %v13956_v6, %v2734_v61  ;;  %v14237_v46 = vld [vmem:[%s17971_s1 + $0x80] sm:$0xff] }
 0x2b8   :  { %v10932_v57 = vpop.f32.mrf.mxu1  ;;  %v2789_v27 = vmul.f32 %v14224_v39, %v14197_v59  ;;  %v1950_v13 = vadd.f32 %v18268_v1, %v1687_v63  ;;  %v1689_v45 = vadd.f32 %v18269_v49, %v1426_v3  ;;  %v2214_v61 = vadd.f32 %v13888_v10, %v1951_v50  ;;  %v14247_v10 = vld [vmem:[%s17971_s1 + $0x88] sm:$0xff]  ;;  %v14262_v49 = vld [vmem:[%s17971_s1 + $0x90] sm:$0xff] }
 0x2b9   :  { %v2813_v0 = vadd.f32 %v2812_v40, %v2788_v37  ;;  %v14229_v54 = vadd.f32 %v13956_v6, %v2733_v18  ;;  %v2736_v2 = vadd.f32 %v10932_v57, %v2473_v21  ;;  %v2475_v51 = vadd.f32 %v10864_v30, %v2212_v14  ;;  %v18270_v21 = vld [vmem:[#allocation72_spill] sm:$0xff] }
 0x2ba   :  { %v2678_v36 = vpop.f32.mrf.mxu1  ;;  %v1953_v63 = vadd.f32 %v18271_v29, %v18270_v21  ;;  %v2474_v56 = vadd.f32 %v2425_v47, %v2211_v25  ;;  %v2213_v3 = vadd.f32 %v13895_v15, %v1950_v13  ;;  %v2791_v30 = vmul.f32 %v14247_v10, %v14219_v32  ;;  %v18272_v47 = vld [vmem:[#allocation75_spill] sm:$0xff]  ;;  %v10870_v13 = vpop.f32.mrf.mxu0 }
 0x2bb   :  { %v2790_v37 = vmul.f32 %v14237_v46, %v14229_v54  ;;  %v2814_v40 = vadd.f32 %v2813_v0, %v2789_v27  ;;  %v2735_v18 = vadd.f32 %v2678_v36, %v2472_v52  ;;  %v14252_v57 = vadd.f32 %v13956_v6, %v2736_v2 }
 0x2bc   :  { %v10935_v14 = vpop.f32.mrf.mxu1  ;;  %v1952_v25 = vadd.f32 %v18272_v47, %v1689_v45  ;;  %v2477_v15 = vadd.f32 %v10867_v31, %v2214_v61  ;;  %v2216_v1 = vadd.f32 %v13910_v34, %v1953_v63  ;;  %v14273_v34 = vld [vmem:[%s17971_s1 + $0x98] sm:$0xff] }
 0x2bd   :  { %v2815_v50 = vadd.f32 %v2814_v40, %v2790_v37  ;;  %v14255_v52 = vadd.f32 %v13956_v6, %v2735_v18  ;;  %v2738_v27 = vadd.f32 %v10935_v14, %v2475_v51  ;;  %v2476_v40 = vadd.f32 %v2435_v5, %v2213_v3 }
 0x2be   :  { %v2688_v0 = vpop.f32.mrf.mxu1  ;;  %v2215_v51 = vadd.f32 %v13924_v62, %v1952_v25  ;;  %v2793_v61 = vmul.f32 %v14273_v34, %v14252_v57  ;;  %v2479_v63 = vadd.f32 %v10870_v13, %v2216_v1  ;;  %v2445_v62 = vpop.f32.mrf.mxu0 }
 0x2bf   :  { %v2792_v2 = vmul.f32 %v14262_v49, %v14255_v52  ;;  %v2816_v36 = vadd.f32 %v2815_v50, %v2791_v30  ;;  %v2737_v37 = vadd.f32 %v2688_v0, %v2474_v56  ;;  %v14268_v45 = vadd.f32 %v13956_v6, %v2738_v27  ;;  %v14283_v56 = vld [vmem:[%s17971_s1 + $0xa0] sm:$0xff]  ;;  %v14290_v27 = vld [vmem:[%s17971_s1 + $0xa8] sm:$0xff] }
 0x2c0   :  { %v10938_v31 = vpop.f32.mrf.mxu1  ;;  %v2478_v50 = vadd.f32 %v2445_v62, %v2215_v51  ;;  %18273 = vst [vmem:[#allocation6_spill] sm:$0xff] %v14290_v27 }
 0x2c1   :  { %v2817_v18 = vadd.f32 %v2816_v36, %v2792_v2  ;;  %v14278_v21 = vadd.f32 %v13956_v6, %v2737_v37  ;;  %v2740_v29 = vadd.f32 %v10938_v31, %v2477_v15  ;;  %v2795_v47 = vmul.f32 %v14290_v27, %v14268_v45  ;;  %v14303_v36 = vld [vmem:[%s17971_s1 + $0xb0] sm:$0xff]  ;;  %v14310_v31 = vld [vmem:[%s17971_s1 + $0xb8] sm:$0xff] }
 0x2c2   :  { %v2698_v5 = vpop.f32.mrf.mxu1  ;;  %18274 = vst [vmem:[#allocation7_spill] sm:$0xff] %v14303_v36  ;;  %18275 = vst [vmem:[#allocation8_spill] sm:$0xff] %v14310_v31 }
 0x2c3   :  { %v2794_v3 = vmul.f32 %v14283_v56, %v14278_v21  ;;  %v2818_v30 = vadd.f32 %v2817_v18, %v2793_v61  ;;  %v2739_v14 = vadd.f32 %v2698_v5, %v2476_v40  ;;  %v14295_v0 = vadd.f32 %v13956_v6, %v2740_v29 }
 0x2c4   :  { %v10941_v25 = vpop.f32.mrf.mxu1 }
 0x2c5   :  { %v2819_v15 = vadd.f32 %v2818_v30, %v2794_v3  ;;  %v14298_v1 = vadd.f32 %v13956_v6, %v2739_v14  ;;  %v2742_v13 = vadd.f32 %v10941_v25, %v2479_v63  ;;  %v2797_v61 = vmul.f32 %v14310_v31, %v14295_v0  ;;  %v14323_v63 = vld [vmem:[%s17971_s1 + $0xc0] sm:$0xff]  ;;  %v14330_v30 = vld [vmem:[%s17971_s1 + $0xc8] sm:$0xff] }
 0x2c6   :  { %v2708_v2 = vpop.f32.mrf.mxu1  ;;  %18276 = vst [vmem:[#allocation9_spill] sm:$0xff] %v14323_v63  ;;  %18277 = vst [vmem:[#allocation12_spill] sm:$0xff] %v14330_v30 }
 0x2c7   :  { %v2796_v37 = vmul.f32 %v14303_v36, %v14298_v1  ;;  %v2820_v40 = vadd.f32 %v2819_v15, %v2795_v47  ;;  %v2741_v51 = vadd.f32 %v2708_v2, %v2478_v50  ;;  %v14315_v29 = vadd.f32 %v13956_v6, %v2742_v13 }
 0x2c9   :  { %v2821_v18 = vadd.f32 %v2820_v40, %v2796_v37  ;;  %v14318_v5 = vadd.f32 %v13956_v6, %v2741_v51  ;;  %v2799_v14 = vmul.f32 %v14330_v30, %v14315_v29 }
 0x2cb   :  { %v2798_v62 = vmul.f32 %v14323_v63, %v14318_v5  ;;  %v2822_v3 = vadd.f32 %v2821_v18, %v2797_v61  ;;  %v18278_v18 = vld [vmem:[#allocation29_spill] sm:$0xff] }
 0x2cc   :  { %v14335_v63 = vsub.s32 0, %v18278_v18 }
 0x2cd   :  { %v2823_v50 = vadd.f32 %v2822_v3, %v2798_v62 }
 0x2ce   :  { %18279 = vst [vmem:[#allocation28_spill] sm:$0xff] %v14335_v63 }
 0x2cf   :  { %v2824_v6 = vadd.f32 %v2823_v50, %v2799_v14 }
 0x2d1   :  { %v2825_v47 = vrot.slane %v2824_v6, 4 }
 0x2d3   :  { %v2826_v25 = vadd.f32 %v2825_v47, %v2824_v6 }
 0x2d5   :  { %v2827_v15 = vrot.slane %v2826_v25, 2 }
 0x2d7   :  { %v2828_v13 = vadd.f32 %v2827_v15, %v2826_v25 }
 0x2d9   :  { %v2829_v2 = vrot.slane %v2828_v13, 1 }
 0x2db   :  { %v2830_v37 = vadd.f32 %v2829_v2, %v2828_v13 }
 0x2dd   :  { %10975 = vmatmul.mubr.f32.vlgmr.msra.gmra.mxu0 %v2830_v37 }
 0x39d   :  { %v2897_v40 = vpop.f32.mrf.mxu0 }
 0x39e   :  { %v2901_v61 = vmul.f32 0.00048828125, %v2897_v40 }
 0x39f   :  { %v10976_v51 = vpop.f32.mrf.mxu0 }
 0x3a0   :  { %v14338_v31 = vrot.slane %v2901_v61, %v14335_v63 }
 0x3a2   :  { %v2906_v62 = vsub.f32 %v13973_v19, %v14338_v31  ;;  %v2907_v3 = vsub.f32 %v13970_v23, %v14338_v31  ;;  %v2908_v14 = vsub.f32 %v14008_v11, %v14338_v31  ;;  %v2909_v47 = vsub.f32 %v14005_v8, %v14338_v31 }
 0x3a3   :  { %v2910_v25 = vsub.f32 %v14041_v55, %v14338_v31  ;;  %v2911_v15 = vsub.f32 %v14031_v53, %v14338_v31  ;;  %v2912_v8 = vsub.f32 %v14073_v41, %v14338_v31  ;;  %v2913_v40 = vsub.f32 %v14070_v4, %v14338_v31 }
 0x3a4   :  { %v14347_v50 = vmul.f32 %v13986_v48, %v2906_v62  ;;  %v14350_v6 = vmul.f32 %v14000_v43, %v2907_v3  ;;  %v14357_v19 = vmul.f32 %v14022_v17, %v2908_v14  ;;  %v14366_v13 = vmul.f32 %v14036_v38, %v2909_v47 }
 0x3a5   :  { %v14371_v55 = vmul.f32 %v14054_v42, %v2910_v25  ;;  %v14378_v51 = vmul.f32 %v14065_v12, %v2911_v15  ;;  %v2914_v41 = vsub.f32 %v14106_v26, %v14338_v31  ;;  %v14385_v18 = vmul.f32 %v14087_v7, %v2912_v8 }
 0x3a6   :  { %v2958_v23 = vmul.f32 %v14347_v50, %v14347_v50  ;;  %v2959_v11 = vmul.f32 %v14350_v6, %v14350_v6  ;;  %v2960_v2 = vmul.f32 %v14357_v19, %v14357_v19  ;;  %v2961_v53 = vmul.f32 %v14366_v13, %v14366_v13 }
 0x3a7   :  { %v2962_v62 = vmul.f32 %v14371_v55, %v14371_v55  ;;  %v2915_v4 = vsub.f32 %v14096_v44, %v14338_v31  ;;  %v14392_v14 = vmul.f32 %v14101_v35, %v2913_v40  ;;  %v2963_v47 = vmul.f32 %v14378_v51, %v14378_v51  ;;  %v18280_v40 = vld [vmem:[#allocation4_spill] sm:$0xff] }
 0x3a8   :  { %v2984_v37 = vadd.f32 %v2959_v11, %v2958_v23  ;;  %v2916_v26 = vsub.f32 %v14139_v22, %v14338_v31  ;;  %v14399_v23 = vmul.f32 %v14120_v58, %v2914_v41  ;;  %v2964_v11 = vmul.f32 %v14385_v18, %v14385_v18 }
 0x3a9   :  { %v2917_v44 = vsub.f32 %v14136_v20, %v14338_v31  ;;  %v14406_v8 = vmul.f32 %v14131_v33, %v2915_v4  ;;  %v2918_v22 = vsub.f32 %v14169_v24, %v14338_v31  ;;  %v2919_v20 = vsub.f32 %v14159_v9, %v14338_v31 }
 0x3aa   :  { %v2985_v61 = vadd.f32 %v2984_v37, %v2960_v2  ;;  %v2965_v2 = vmul.f32 %v14392_v14, %v14392_v14  ;;  %v2920_v24 = vsub.f32 %v14200_v16, %v14338_v31  ;;  %v2921_v9 = vsub.f32 %v14197_v59, %v14338_v31 }
 0x3ab   :  { %v2922_v16 = vsub.f32 %v14229_v54, %v14338_v31  ;;  %v2923_v59 = vsub.f32 %v14219_v32, %v14338_v31  ;;  %v2924_v54 = vsub.f32 %v14255_v52, %v14338_v31  ;;  %v2925_v32 = vsub.f32 %v14252_v57, %v14338_v31 }
 0x3ac   :  { %v2986_v3 = vadd.f32 %v2985_v61, %v2961_v53  ;;  %v14413_v53 = vmul.f32 %v18280_v40, %v2916_v26  ;;  %v2966_v61 = vmul.f32 %v14399_v23, %v14399_v23  ;;  %v2926_v52 = vsub.f32 %v14278_v21, %v14338_v31 }
 0x3ad   :  { %v2927_v57 = vsub.f32 %v14268_v45, %v14338_v31  ;;  %v2928_v21 = vsub.f32 %v14298_v1, %v14338_v31  ;;  %v2929_v45 = vsub.f32 %v14295_v0, %v14338_v31  ;;  %v2930_v1 = vsub.f32 %v14318_v5, %v14338_v31 }
 0x3ae   :  { %v2987_v25 = vadd.f32 %v2986_v3, %v2962_v62  ;;  %v14420_v62 = vmul.f32 %v14164_v28, %v2917_v44  ;;  %v2967_v3 = vmul.f32 %v14406_v8, %v14406_v8  ;;  %v2968_v26 = vmul.f32 %v14413_v53, %v14413_v53 }
 0x3af   :  { %v2931_v0 = vsub.f32 %v14315_v29, %v14338_v31 }
 0x3b0   :  { %v2988_v15 = vadd.f32 %v2987_v25, %v2963_v47  ;;  %v18281_v47 = vld [vmem:[#allocation26_spill] sm:$0xff] }
 0x3b1   :  { %v14427_v25 = vmul.f32 %v18281_v47, %v2918_v22  ;;  %v14441_v22 = vmul.f32 %v14210_v60, %v2920_v24  ;;  %v14455_v24 = vmul.f32 %v14237_v46, %v2922_v16  ;;  %v14469_v16 = vmul.f32 %v14262_v49, %v2924_v54 }
 0x3b2   :  { %v2989_v37 = vadd.f32 %v2988_v15, %v2964_v11  ;;  %v18282_v15 = vld [vmem:[#allocation5_spill] sm:$0xff]  ;;  %v14483_v54 = vmul.f32 %v14283_v56, %v2926_v52  ;;  %v14497_v52 = vmul.f32 %v14303_v36, %v2928_v21  ;;  %v14514_v36 = vmul.f32 %v14330_v30, %v2931_v0 }
 0x3b3   :  { %v14434_v44 = vmul.f32 %v18282_v15, %v2919_v20  ;;  %v14448_v20 = vmul.f32 %v14224_v39, %v2921_v9  ;;  %v14462_v9 = vmul.f32 %v14247_v10, %v2923_v59  ;;  %v14476_v59 = vmul.f32 %v14273_v34, %v2925_v32 }
 0x3b4   :  { %v2990_v41 = vadd.f32 %v2989_v37, %v2965_v2  ;;  %v2969_v2 = vmul.f32 %v14420_v62, %v14420_v62  ;;  %v14490_v32 = vmul.f32 %v14290_v27, %v2927_v57  ;;  %v2980_v5 = vmul.f32 %v14497_v52, %v14497_v52  ;;  %18285 = vst [vmem:[#allocation27_spill] sm:$0xff] %v14514_v36 }
 0x3b6   :  { %v2991_v4 = vadd.f32 %v2990_v41, %v2966_v61  ;;  %v2970_v61 = vmul.f32 %v14427_v25, %v14427_v25 }
 0x3b8   :  { %v2992_v11 = vadd.f32 %v2991_v4, %v2967_v3  ;;  %v2971_v3 = vmul.f32 %v14434_v44, %v14434_v44 }
 0x3ba   :  { %v2993_v37 = vadd.f32 %v2992_v11, %v2968_v26  ;;  %v2972_v26 = vmul.f32 %v14441_v22, %v14441_v22 }
 0x3bc   :  { %v2994_v41 = vadd.f32 %v2993_v37, %v2969_v2  ;;  %v2973_v2 = vmul.f32 %v14448_v20, %v14448_v20 }
 0x3be   :  { %v2995_v4 = vadd.f32 %v2994_v41, %v2970_v61  ;;  %v2974_v61 = vmul.f32 %v14455_v24, %v14455_v24 }
 0x3c0   :  { %v2996_v11 = vadd.f32 %v2995_v4, %v2971_v3  ;;  %v2975_v3 = vmul.f32 %v14462_v9, %v14462_v9 }
 0x3c2   :  { %v2997_v37 = vadd.f32 %v2996_v11, %v2972_v26  ;;  %v2976_v26 = vmul.f32 %v14469_v16, %v14469_v16 }
 0x3c4   :  { %v2998_v41 = vadd.f32 %v2997_v37, %v2973_v2  ;;  %v2977_v2 = vmul.f32 %v14476_v59, %v14476_v59 }
 0x3c6   :  { %v2999_v4 = vadd.f32 %v2998_v41, %v2974_v61  ;;  %v2978_v61 = vmul.f32 %v14483_v54, %v14483_v54 }
 0x3c8   :  { %v3000_v11 = vadd.f32 %v2999_v4, %v2975_v3  ;;  %v18283_v3 = vld [vmem:[#allocation8_spill] sm:$0xff]  ;;  %v2979_v4 = vmul.f32 %v14490_v32, %v14490_v32 }
 0x3c9   :  { %v14504_v57 = vmul.f32 %v18283_v3, %v2929_v45 }
 0x3ca   :  { %v3001_v37 = vadd.f32 %v3000_v11, %v2976_v26  ;;  %v18284_v11 = vld [vmem:[#allocation9_spill] sm:$0xff] }
 0x3cb   :  { %v14509_v27 = vmul.f32 %v18284_v11, %v2930_v1  ;;  %v2981_v31 = vmul.f32 %v14504_v57, %v14504_v57 }
 0x3cc   :  { %v3002_v41 = vadd.f32 %v3001_v37, %v2977_v2  ;;  %v2983_v37 = vmul.f32 %v14514_v36, %v14514_v36 }
 0x3cd   :  { %v2982_v45 = vmul.f32 %v14509_v27, %v14509_v27 }
 0x3ce   :  { %v3003_v26 = vadd.f32 %v3002_v41, %v2978_v61 }
 0x3d0   :  { %v3004_v21 = vadd.f32 %v3003_v26, %v2979_v4 }
 0x3d2   :  { %v3005_v29 = vadd.f32 %v3004_v21, %v2980_v5  ;;  %v3312_v5 = vld [vmem:[%s17969_s3 + $0x578] sm:$0xff] }
 0x3d3   :  { %v3270_v21 = vld [vmem:[%s17969_s3 + $0x4f8] sm:$0xff]  ;;  %11012 = vmatprep.subr.mxu0 %v3312_v5 }
 0x3d4   :  { %v3006_v2 = vadd.f32 %v3005_v29, %v2981_v31  ;;  %v3311_v31 = vld [vmem:[%s17969_s3 + $0x570] sm:$0xff]  ;;  %11083 = vmatprep.subr.mxu1 %v3270_v21  ;;  %11013 = vmatpush3.msra.mxu0 %v3312_v5  ;;  %v3268_v29 = vld [vmem:[%s17969_s3 + $0x4e8] sm:$0xff]  ;;  %v3263_v5 = vld [vmem:[%s17969_s3 + $0x4c0] sm:$0xff] }
 0x3d5   :  { %11014 = vmatprep.subr.mxu0 %v3311_v31 }
 0x3d6   :  { %v3007_v1 = vadd.f32 %v3006_v2, %v2982_v45  ;;  %11015 = vmatpush3.msra.mxu0 %v3311_v31  ;;  %v3309_v45 = vld [vmem:[%s17969_s3 + $0x560] sm:$0xff]  ;;  %v3262_v31 = vld [vmem:[%s17969_s3 + $0x4b8] sm:$0xff] }
 0x3d7   :  { %v3267_v2 = vld [vmem:[%s17969_s3 + $0x4e0] sm:$0xff] }
 0x3d8   :  { %v3008_v61 = vadd.f32 %v3007_v1, %v2983_v37  ;;  %v3308_v37 = vld [vmem:[%s17969_s3 + $0x558] sm:$0xff] }
 0x3d9   :  { %v3266_v1 = vld [vmem:[%s17969_s3 + $0x4d8] sm:$0xff] }
 0x3da   :  { %v3009_v41 = vrot.slane %v3008_v61, 4 }
 0x3dc   :  { %v3010_v11 = vadd.f32 %v3009_v41, %v3008_v61  ;;  %v3307_v61 = vld [vmem:[%s17969_s3 + $0x550] sm:$0xff] }
 0x3dd   :  { %v3265_v41 = vld [vmem:[%s17969_s3 + $0x4d0] sm:$0xff] }
 0x3de   :  { %v3011_v3 = vrot.slane %v3010_v11, 2 }
 0x3e0   :  { %v3012_v4 = vadd.f32 %v3011_v3, %v3010_v11  ;;  %v3269_v3 = vld [vmem:[%s17969_s3 + $0x4f0] sm:$0xff]  ;;  %v3310_v11 = vld [vmem:[%s17969_s3 + $0x568] sm:$0xff] }
 0x3e1   :  { %11016 = vmatprep.subr.mxu0 %v3310_v11 }
 0x3e2   :  { %v3013_v26 = vrot.slane %v3012_v4, 1  ;;  %11017 = vmatpush3.msra.mxu0 %v3310_v11  ;;  %v3261_v11 = vld [vmem:[%s17969_s3 + $0x4b0] sm:$0xff] }
 0x3e3   :  { %11018 = vmatprep.subr.mxu0 %v3309_v45 }
 0x3e4   :  { %v3014_v0 = vadd.f32 %v3013_v26, %v3012_v4  ;;  %11019 = vmatpush3.msra.mxu0 %v3309_v45  ;;  %v3306_v4 = vld [vmem:[%s17969_s3 + $0x548] sm:$0xff] }
 0x3e5   :  { %11020 = vmatprep.subr.mxu0 %v3308_v37  ;;  %v3264_v26 = vld [vmem:[%s17969_s3 + $0x4c8] sm:$0xff] }
 0x3e6   :  { %11010 = vmatmul.mubr.f32.vlgmr.msra.gmra.mxu1 %v3014_v0  ;;  %11021 = vmatpush3.msra.mxu0 %v3308_v37  ;;  %v3305_v0 = vld [vmem:[%s17969_s3 + $0x540] sm:$0xff]  ;;  %v3260_v45 = vld [vmem:[%s17969_s3 + $0x4a8] sm:$0xff] }
 0x3e7   :  { %11084 = vmatpush3.msra.mxu1 %v3270_v21  ;;  %11022 = vmatprep.subr.mxu0 %v3307_v61  ;;  %v3304_v21 = vld [vmem:[%s17969_s3 + $0x538] sm:$0xff]  ;;  %v3259_v37 = vld [vmem:[%s17969_s3 + $0x4a0] sm:$0xff] }
 0x3e8   :  { %11085 = vmatprep.subr.mxu1 %v3269_v3  ;;  %11023 = vmatpush3.msra.mxu0 %v3307_v61  ;;  %v3258_v61 = vld [vmem:[%s17969_s3 + $0x498] sm:$0xff] }
 0x3e9   :  { %11086 = vmatpush3.msra.mxu1 %v3269_v3  ;;  %11024 = vmatprep.subr.mxu0 %v3306_v4  ;;  %v3303_v3 = vld [vmem:[%s17969_s3 + $0x530] sm:$0xff] }
 0x3ea   :  { %11087 = vmatprep.subr.mxu1 %v3268_v29  ;;  %11025 = vmatpush3.msra.mxu0 %v3306_v4  ;;  %v3257_v4 = vld [vmem:[%s17969_s3 + $0x490] sm:$0xff] }
 0x3eb   :  { %11088 = vmatpush3.msra.mxu1 %v3268_v29  ;;  %11026 = vmatprep.subr.mxu0 %v3305_v0  ;;  %v3302_v29 = vld [vmem:[%s17969_s3 + $0x528] sm:$0xff] }
 0x3ec   :  { %11089 = vmatprep.subr.mxu1 %v3267_v2  ;;  %11027 = vmatpush3.msra.mxu0 %v3305_v0  ;;  %v3256_v0 = vld [vmem:[%s17969_s3 + $0x488] sm:$0xff] }
 0x3ed   :  { %11090 = vmatpush3.msra.mxu1 %v3267_v2  ;;  %11028 = vmatprep.subr.mxu0 %v3304_v21  ;;  %v3301_v2 = vld [vmem:[%s17969_s3 + $0x520] sm:$0xff] }
 0x3ee   :  { %11091 = vmatprep.subr.mxu1 %v3266_v1  ;;  %11029 = vmatpush3.msra.mxu0 %v3304_v21  ;;  %v3255_v21 = vld [vmem:[%s17969_s3 + $0x480] sm:$0xff] }
 0x3ef   :  { %11092 = vmatpush3.msra.mxu1 %v3266_v1  ;;  %11030 = vmatprep.subr.mxu0 %v3303_v3  ;;  %v3300_v1 = vld [vmem:[%s17969_s3 + $0x518] sm:$0xff] }
 0x3f0   :  { %11093 = vmatprep.subr.mxu1 %v3265_v41  ;;  %11031 = vmatpush3.msra.mxu0 %v3303_v3  ;;  %v14627_v3 = vld [vmem:[%s17969_s3 + $0x678] sm:$0xff] }
 0x3f1   :  { %11094 = vmatpush3.msra.mxu1 %v3265_v41  ;;  %11032 = vmatprep.subr.mxu0 %v3302_v29  ;;  %v3299_v41 = vld [vmem:[%s17969_s3 + $0x510] sm:$0xff] }
 0x3f2   :  { %11095 = vmatprep.subr.mxu1 %v3264_v26  ;;  %11033 = vmatpush3.msra.mxu0 %v3302_v29 }
 0x3f3   :  { %11096 = vmatpush3.msra.mxu1 %v3264_v26  ;;  %11034 = vmatprep.subr.mxu0 %v3301_v2  ;;  %v3298_v26 = vld [vmem:[%s17969_s3 + $0x508] sm:$0xff] }
 0x3f4   :  { %11097 = vmatprep.subr.mxu1 %v3263_v5  ;;  %11035 = vmatpush3.msra.mxu0 %v3301_v2 }
 0x3f5   :  { %11098 = vmatpush3.msra.mxu1 %v3263_v5  ;;  %11036 = vmatprep.subr.mxu0 %v3300_v1  ;;  %v3297_v5 = vld [vmem:[%s17969_s3 + $0x500] sm:$0xff] }
 0x3f6   :  { %11099 = vmatprep.subr.mxu1 %v3262_v31  ;;  %11037 = vmatpush3.msra.mxu0 %v3300_v1 }
 0x3f7   :  { %11100 = vmatpush3.msra.mxu1 %v3262_v31  ;;  %11038 = vmatprep.subr.mxu0 %v3299_v41  ;;  %v14621_v31 = vld [vmem:[%s17969_s3 + $0x5f8] sm:$0xff] }
 0x3f8   :  { %11101 = vmatprep.subr.mxu1 %v3261_v11  ;;  %11039 = vmatpush3.msra.mxu0 %v3299_v41 }
 0x3f9   :  { %11102 = vmatpush3.msra.mxu1 %v3261_v11  ;;  %11040 = vmatprep.subr.mxu0 %v3298_v26 }
 0x3fa   :  { %11103 = vmatprep.subr.mxu1 %v3260_v45  ;;  %11041 = vmatpush3.msra.mxu0 %v3298_v26 }
 0x3fb   :  { %11104 = vmatpush3.msra.mxu1 %v3260_v45  ;;  %11042 = vmatprep.subr.mxu0 %v3297_v5 }
 0x3fc   :  { %11105 = vmatprep.subr.mxu1 %v3259_v37  ;;  %11043 = vmatpush3.msra.mxu0 %v3297_v5 }
 0x3fd   :  { %11106 = vmatpush3.msra.mxu1 %v3259_v37  ;;  %11154 = vmatprep.subr.mxu0 %v14621_v31  ;;  %v3086_v37 = vld [vmem:[%s17970_s4 + $0x4] sm:$0x1] }
 0x3fe   :  { %11107 = vmatprep.subr.mxu1 %v3258_v61 }
 0x3ff   :  { %11108 = vmatpush3.msra.mxu1 %v3258_v61 }
 0x400   :  { %11109 = vmatprep.subr.mxu1 %v3257_v4 }
 0x401   :  { %11110 = vmatpush3.msra.mxu1 %v3257_v4  ;;  %v14639_v4 = vld [vmem:[%s17970_s4 + $0x7] ss:$0 sm:$0xff] }
 0x402   :  { %11111 = vmatprep.subr.mxu1 %v3256_v0 }
 0x403   :  { %11112 = vmatpush3.msra.mxu1 %v3256_v0 }
 0x404   :  { %11113 = vmatprep.subr.mxu1 %v3255_v21 }
 0x405   :  { %11114 = vmatpush3.msra.mxu1 %v3255_v21 }
 0x406   :  { %11225 = vmatprep.subr.mxu1 %v14627_v3 }
 0x4a6   :  { %v3081_v11 = vpop.f32.mrf.mxu1 }
 0x4a7   :  { %v3085_v29 = vmul.f32 0.00048828125, %v3081_v11 }
 0x4a8   :  { %v11011_v45 = vpop.f32.mrf.mxu1 }
 0x4a9   :  { %v3087_v2 = vadd.f32 1e-05, %v3085_v29 }
 0x4ab   :  { %12433 = vrsqrt.f32 %v3087_v2 }
 0x4b8   :  { %v12434_v1 = vpop.eup %12433 }
 0x4b9   :  { %v3089_v61 = vmul.f32 %v12434_v1, %v3086_v37 }
 0x4bb   :  { %v14634_v41 = vrot.slane %v3089_v61, %v14335_v63 }
 0x4bd   :  { %v3094_v26 = vmul.f32 %v14634_v41, %v14347_v50  ;;  %v3095_v0 = vmul.f32 %v14634_v41, %v14350_v6  ;;  %v3096_v5 = vmul.f32 %v14634_v41, %v14357_v19  ;;  %v3097_v21 = vmul.f32 %v14634_v41, %v14366_v13 }
 0x4be   :  { %v3098_v11 = vmul.f32 %v14634_v41, %v14371_v55  ;;  %v3099_v29 = vmul.f32 %v14634_v41, %v14378_v51  ;;  %v3100_v45 = vmul.f32 %v14634_v41, %v14385_v18  ;;  %v3101_v50 = vmul.f32 %v14634_v41, %v14392_v14 }
 0x4bf   :  { %v3125_v6 = vadd.f32 %v14639_v4, %v3094_v26  ;;  %v3126_v2 = vadd.f32 %v14639_v4, %v3095_v0  ;;  %v3127_v19 = vadd.f32 %v14639_v4, %v3096_v5  ;;  %v3128_v13 = vadd.f32 %v14639_v4, %v3097_v21 }
 0x4c0   :  { %v3129_v37 = vadd.f32 %v14639_v4, %v3098_v11  ;;  %v3130_v55 = vadd.f32 %v14639_v4, %v3099_v29  ;;  %v3131_v51 = vadd.f32 %v14639_v4, %v3100_v45  ;;  %v3132_v1 = vadd.f32 %v14639_v4, %v3101_v50 }
 0x4c1   :  { %v3151_v18 = vmax.f32 %v3125_v6, 0.0  ;;  %v3152_v61 = vmax.f32 %v3126_v2, 0.0  ;;  %v3153_v63 = vmax.f32 %v3127_v19, 0.0  ;;  %v3154_v14 = vmax.f32 %v3128_v13, 0.0 }
 0x4c2   :  { %v3155_v30 = vmax.f32 %v3129_v37, 0.0  ;;  %v3156_v26 = vmax.f32 %v3130_v55, 0.0  ;;  %v3157_v36 = vmax.f32 %v3131_v51, 0.0  ;;  %v3158_v0 = vmax.f32 %v3132_v1, 0.0 }
 0x4c3   :  { %v3177_v5 = vmul.f32 %v13986_v48, %v3151_v18  ;;  %v3178_v21 = vmul.f32 %v14000_v43, %v3152_v61  ;;  %v3179_v11 = vmul.f32 %v14022_v17, %v3153_v63  ;;  %v14669_v29 = vmul.f32 %v14036_v38, %v3154_v14 }
 0x4c4   :  { %v3181_v45 = vmul.f32 %v14054_v42, %v3155_v30  ;;  %v3182_v50 = vmul.f32 %v14065_v12, %v3156_v26  ;;  %v3183_v6 = vmul.f32 %v14087_v7, %v3157_v36  ;;  %v3184_v2 = vmul.f32 %v14101_v35, %v3158_v0 }
 0x4c5   :  { %3203 = vst [vmem:[#allocation3 + $0x8] sm:$0xff] %v3177_v5  ;;  %3204 = vst [vmem:[#allocation3 + $0x10] sm:$0xff] %v3178_v21  ;;  %v3102_v48 = vmul.f32 %v14634_v41, %v14399_v23  ;;  %v3103_v43 = vmul.f32 %v14634_v41, %v14406_v8  ;;  %v3104_v17 = vmul.f32 %v14634_v41, %v14413_v53 }
 0x4c6   :  { %3205 = vst [vmem:[#allocation3 + $0x18] sm:$0xff] %v3179_v11  ;;  %3206 = vst [vmem:[#allocation3 + $0x20] sm:$0xff] %v14669_v29  ;;  %v3105_v38 = vmul.f32 %v14634_v41, %v14420_v62  ;;  %v3106_v42 = vmul.f32 %v14634_v41, %v14427_v25  ;;  %v3107_v12 = vmul.f32 %v14634_v41, %v14434_v44 }
 0x4c7   :  { %3207 = vst [vmem:[#allocation3 + $0x28] sm:$0xff] %v3181_v45  ;;  %3208 = vst [vmem:[#allocation3 + $0x30] sm:$0xff] %v3182_v50  ;;  %v3108_v7 = vmul.f32 %v14634_v41, %v14441_v22  ;;  %v3109_v35 = vmul.f32 %v14634_v41, %v14448_v20  ;;  %v3133_v36 = vadd.f32 %v14639_v4, %v3102_v48 }
 0x4c8   :  { %3209 = vst [vmem:[#allocation3 + $0x38] sm:$0xff] %v3183_v6  ;;  %3210 = vst [vmem:[#allocation3 + $0x40] sm:$0xff] %v3184_v2  ;;  %v3134_v63 = vadd.f32 %v14639_v4, %v3103_v43  ;;  %v3135_v30 = vadd.f32 %v14639_v4, %v3104_v17  ;;  %v3136_v23 = vadd.f32 %v14639_v4, %v3105_v38  ;;  %v4006_v17 = vld [vmem:[%s17969_s3 + $0x670] sm:$0xff] }
 0x4c9   :  { %v3137_v8 = vadd.f32 %v14639_v4, %v3106_v42  ;;  %v3138_v53 = vadd.f32 %v14639_v4, %v3107_v12  ;;  %v3139_v62 = vadd.f32 %v14639_v4, %v3108_v7  ;;  %v3140_v25 = vadd.f32 %v14639_v4, %v3109_v35 }
 0x4ca   :  { %v3159_v44 = vmax.f32 %v3133_v36, 0.0  ;;  %v3160_v22 = vmax.f32 %v3134_v63, 0.0  ;;  %v3161_v19 = vmax.f32 %v3135_v30, 0.0  ;;  %v3162_v20 = vmax.f32 %v3136_v23, 0.0 }
 0x4cb   :  { %v3163_v13 = vmax.f32 %v3137_v8, 0.0  ;;  %v3164_v37 = vmax.f32 %v3138_v53, 0.0  ;;  %v3165_v55 = vmax.f32 %v3139_v62, 0.0  ;;  %v3166_v51 = vmax.f32 %v3140_v25, 0.0  ;;  %v3741_v62 = vld [vmem:[%s17969_s3 + $0x5e0] sm:$0xff] }
 0x4cc   :  { %v14701_v1 = vmul.f32 %v14120_v58, %v3159_v44  ;;  %v14704_v18 = vmul.f32 %v14131_v33, %v3160_v22  ;;  %v14707_v61 = vmul.f32 %v18280_v40, %v3161_v19  ;;  %v3188_v14 = vmul.f32 %v14164_v28, %v3162_v20  ;;  %v3271_v26 = vld [vmem:[#allocation3 + $0x5] sm:$0xff]  ;;  %v3272_v5 = vld [vmem:[#allocation3 + $0xd] sm:$0xff] }
 0x4cd   :  { %v3229_v0 = vld [vmem:[#allocation3 + $0x4] sm:$0xff]  ;;  %v3189_v21 = vmul.f32 %v18281_v47, %v3163_v13  ;;  %v3190_v11 = vmul.f32 %v18282_v15, %v3164_v37  ;;  %v3191_v45 = vmul.f32 %v14210_v60, %v3165_v55  ;;  %v3192_v58 = vmul.f32 %v14224_v39, %v3166_v51  ;;  %11044 = vmatprep.mubr.f32.mxu0 %v3271_v26  ;;  %v3230_v33 = vld [vmem:[#allocation3 + $0xc] sm:$0xff]  ;;  %v3273_v47 = vld [vmem:[#allocation3 + $0x15] sm:$0xff] }
 0x4ce   :  { %11115 = vmatprep.mubr.f32.mxu1 %v3229_v0  ;;  %v3743_v40 = vld [vmem:[%s17969_s3 + $0x5f0] sm:$0xff]  ;;  %3211 = vst [vmem:[#allocation3 + $0x48] sm:$0xff] %v14701_v1  ;;  %3212 = vst [vmem:[#allocation3 + $0x50] sm:$0xff] %v14704_v18  ;;  %v3110_v28 = vmul.f32 %v14634_v41, %v14455_v24  ;;  %v3111_v60 = vmul.f32 %v14634_v41, %v14462_v9  ;;  %v3112_v39 = vmul.f32 %v14634_v41, %v14469_v16  ;;  %v3274_v48 = vld [vmem:[#allocation3 + $0x1d] sm:$0xff] }
 0x4cf   :  { %3213 = vst [vmem:[#allocation3 + $0x58] sm:$0xff] %v14707_v61  ;;  %3214 = vst [vmem:[#allocation3 + $0x60] sm:$0xff] %v3188_v14  ;;  %11045 = vmatmul.mubr.f32.vlgmr.msra.gmra.mxu0 %v3272_v5  ;;  %11116 = vmatmul.mubr.f32.vlgmr.msra.gmra.mxu1 %v3230_v33  ;;  %v3113_v15 = vmul.f32 %v14634_v41, %v14476_v59  ;;  %v3114_v50 = vmul.f32 %v14634_v41, %v14483_v54  ;;  %v3231_v9 = vld [vmem:[#allocation3 + $0x14] sm:$0xff]  ;;  %v3742_v59 = vld [vmem:[%s17969_s3 + $0x5e8] sm:$0xff] }
 0x4d0   :  { %3215 = vst [vmem:[#allocation3 + $0x68] sm:$0xff] %v3189_v21  ;;  %3216 = vst [vmem:[#allocation3 + $0x70] sm:$0xff] %v3190_v11  ;;  %v3115_v24 = vmul.f32 %v14634_v41, %v14490_v32  ;;  %11155 = vmatpush3.msra.mxu0 %v14621_v31  ;;  %11047 = vmatprep.mubr.f32.mxu0 %v3273_v47  ;;  %v3141_v16 = vadd.f32 %v14639_v4, %v3110_v28  ;;  %v3232_v43 = vld [vmem:[#allocation3 + $0x1c] sm:$0xff]  ;;  %v3275_v35 = vld [vmem:[#allocation3 + $0x25] sm:$0xff] }
 0x4d1   :  { %3217 = vst [vmem:[#allocation3 + $0x78] sm:$0xff] %v3191_v45  ;;  %3218 = vst [vmem:[#allocation3 + $0x80] sm:$0xff] %v3192_v58  ;;  %v3142_v6 = vadd.f32 %v14639_v4, %v3111_v60  ;;  %v3143_v2 = vadd.f32 %v14639_v4, %v3112_v39  ;;  %11118 = vmatprep.mubr.f32.mxu1 %v3231_v9  ;;  %11156 = vmatprep.subr.mxu0 %v3743_v40  ;;  %v3233_v36 = vld [vmem:[#allocation3 + $0x24] sm:$0xff]  ;;  %v3234_v22 = vld [vmem:[#allocation3 + $0x2c] sm:$0xff] }
 0x4d2   :  { %v3144_v54 = vadd.f32 %v14639_v4, %v3113_v15  ;;  %v3145_v32 = vadd.f32 %v14639_v4, %v3114_v50  ;;  %v3146_v31 = vadd.f32 %v14639_v4, %v3115_v24  ;;  %11157 = vmatpush3.msra.mxu0 %v3743_v40  ;;  %11226 = vmatpush3.msra.mxu1 %v14627_v3  ;;  %v3167_v38 = vmax.f32 %v3141_v16, 0.0  ;;  %v3277_v20 = vld [vmem:[#allocation3 + $0x35] sm:$0xff]  ;;  %v3278_v5 = vld [vmem:[#allocation3 + $0x3d] sm:$0xff]  ;;  %v18290_v47 = vld [vmem:[#allocation9_spill] sm:$0xff] }
 0x4d3   :  { %v3168_v42 = vmax.f32 %v3142_v6, 0.0  ;;  %v3169_v12 = vmax.f32 %v3143_v2, 0.0  ;;  %v3116_v7 = vmul.f32 %v14634_v41, %v14497_v52  ;;  %11048 = vmatmul.mubr.f32.gmra.mxu0 %v3274_v48  ;;  %11119 = vmatmul.mubr.f32.gmra.mxu1 %v3232_v43  ;;  %v3117_v3 = vmul.f32 %v14634_v41, %v14504_v57  ;;  %v3235_v13 = vld [vmem:[#allocation3 + $0x34] sm:$0xff]  ;;  %v3236_v21 = vld [vmem:[#allocation3 + $0x3c] sm:$0xff]  ;;  %v3738_v6 = vld [vmem:[%s17969_s3 + $0x5c8] sm:$0xff] }
 0x4d4   :  { %v3170_v63 = vmax.f32 %v3144_v54, 0.0  ;;  %v3171_v30 = vmax.f32 %v3145_v32, 0.0  ;;  %v3172_v23 = vmax.f32 %v3146_v31, 0.0  ;;  %11050 = vmatprep.mubr.f32.mxu0 %v3275_v35  ;;  %11121 = vmatprep.mubr.f32.mxu1 %v3233_v36  ;;  %v14751_v8 = vmul.f32 %v14237_v46, %v3167_v38  ;;  %v18286_v46 = vld [vmem:[#allocation6_spill] sm:$0xff]  ;;  %v18287_v37 = vld [vmem:[#allocation27_spill] sm:$0xff]  ;;  %v18289_v45 = vld [vmem:[#allocation8_spill] sm:$0xff] }
 0x4d5   :  { %v14754_v53 = vmul.f32 %v14247_v10, %v3168_v42  ;;  %v14757_v52 = vmul.f32 %v14262_v49, %v3169_v12  ;;  %11158 = vmatprep.subr.mxu0 %v3742_v59  ;;  %11227 = vmatprep.subr.mxu1 %v4006_v17  ;;  %v3276_v10 = vld [vmem:[#allocation3 + $0x2d] sm:$0xff]  ;;  %v3118_v19 = vmul.f32 %v14634_v41, %v14509_v27  ;;  %v3740_v27 = vld [vmem:[%s17969_s3 + $0x5d8] sm:$0xff]  ;;  %v3279_v40 = vld [vmem:[#allocation3 + $0x45] sm:$0xff] }
 0x4d6   :  { %v14763_v25 = vmul.f32 %v14273_v34, %v3170_v63  ;;  %v14766_v57 = vmul.f32 %v14283_v56, %v3171_v30  ;;  %v14769_v44 = vmul.f32 %v18286_v46, %v3172_v23  ;;  %11159 = vmatpush3.msra.mxu0 %v3742_v59  ;;  %11228 = vmatpush3.msra.mxu1 %v4006_v17  ;;  %v4005_v49 = vld [vmem:[%s17969_s3 + $0x668] sm:$0xff]  ;;  %v18288_v11 = vld [vmem:[#allocation7_spill] sm:$0xff]  ;;  %v3739_v28 = vld [vmem:[%s17969_s3 + $0x5d0] sm:$0xff] }
 0x4d7   :  { %3219 = vst [vmem:[#allocation3 + $0x88] sm:$0xff] %v14751_v8  ;;  %3220 = vst [vmem:[#allocation3 + $0x90] sm:$0xff] %v14754_v53  ;;  %v3147_v34 = vadd.f32 %v14639_v4, %v3116_v7  ;;  %v3148_v56 = vadd.f32 %v14639_v4, %v3117_v3  ;;  %11051 = vmatmul.mubr.f32.gmra.mxu0 %v3276_v10  ;;  %11122 = vmatmul.mubr.f32.gmra.mxu1 %v3234_v22  ;;  %v3237_v39 = vld [vmem:[#allocation3 + $0x44] sm:$0xff]  ;;  %v3280_v9 = vld [vmem:[#allocation3 + $0x4d] sm:$0xff] }
 0x4d8   :  { %3221 = vst [vmem:[#allocation3 + $0x98] sm:$0xff] %v14757_v52  ;;  %3222 = vst [vmem:[#allocation3 + $0xa0] sm:$0xff] %v14763_v25  ;;  %v3119_v55 = vmul.f32 %v14634_v41, %v18287_v37  ;;  %11053 = vmatprep.mubr.f32.mxu0 %v3277_v20  ;;  %11124 = vmatprep.mubr.f32.mxu1 %v3235_v13  ;;  %v3149_v26 = vadd.f32 %v14639_v4, %v3118_v19  ;;  %v18291_v50 = vld [vmem:[#allocation12_spill] sm:$0xff]  ;;  %v3238_v16 = vld [vmem:[#allocation3 + $0x4c] sm:$0xff] }
 0x4d9   :  { %3223 = vst [vmem:[#allocation3 + $0xa8] sm:$0xff] %v14766_v57  ;;  %3224 = vst [vmem:[#allocation3 + $0xb0] sm:$0xff] %v14769_v44  ;;  %v3173_v51 = vmax.f32 %v3147_v34, 0.0  ;;  %v3174_v14 = vmax.f32 %v3148_v56, 0.0  ;;  %11160 = vmatprep.subr.mxu0 %v3741_v62  ;;  %11229 = vmatprep.subr.mxu1 %v4005_v49  ;;  %v3281_v2 = vld [vmem:[#allocation3 + $0x55] sm:$0xff]  ;;  %v3282_v32 = vld [vmem:[#allocation3 + $0x5d] sm:$0xff] }
 0x4da   :  { %v3150_v0 = vadd.f32 %v14639_v4, %v3119_v55  ;;  %11161 = vmatpush3.msra.mxu0 %v3741_v62  ;;  %11230 = vmatpush3.msra.mxu1 %v4005_v49  ;;  %v3175_v33 = vmax.f32 %v3149_v26, 0.0  ;;  %v4004_v4 = vld [vmem:[%s17969_s3 + $0x660] sm:$0xff]  ;;  %v3239_v59 = vld [vmem:[#allocation3 + $0x54] sm:$0xff]  ;;  %v3242_v12 = vld [vmem:[#allocation3 + $0x6c] sm:$0xff] }
 0x4db   :  { %v14792_v41 = vmul.f32 %v18288_v11, %v3173_v51  ;;  %v14795_v58 = vmul.f32 %v18289_v45, %v3174_v14  ;;  %11054 = vmatmul.mubr.f32.gmra.mxu0 %v3278_v5  ;;  %11125 = vmatmul.mubr.f32.gmra.mxu1 %v3236_v21  ;;  %v4003_v54 = vld [vmem:[%s17969_s3 + $0x658] sm:$0xff]  ;;  %v3737_v48 = vld [vmem:[%s17969_s3 + $0x5c0] sm:$0xff]  ;;  %v3284_v42 = vld [vmem:[#allocation3 + $0x6d] sm:$0xff] }
 0x4dc   :  { %v3176_v60 = vmax.f32 %v3150_v0, 0.0  ;;  %11162 = vmatprep.subr.mxu0 %v3740_v27  ;;  %11056 = vmatprep.mubr.f32.mxu0 %v3279_v40  ;;  %v14806_v15 = vmul.f32 %v18290_v47, %v3175_v33  ;;  %v3240_v31 = vld [vmem:[#allocation3 + $0x5c] sm:$0xff]  ;;  %v3283_v43 = vld [vmem:[#allocation3 + $0x65] sm:$0xff]  ;;  %v4002_v7 = vld [vmem:[%s17969_s3 + $0x650] sm:$0xff] }
 0x4dd   :  { %3225 = vst [vmem:[#allocation3 + $0xb8] sm:$0xff] %v14792_v41  ;;  %3226 = vst [vmem:[#allocation3 + $0xc0] sm:$0xff] %v14795_v58  ;;  %11127 = vmatprep.mubr.f32.mxu1 %v3237_v39  ;;  %11163 = vmatpush3.msra.mxu0 %v3740_v27  ;;  %v3241_v17 = vld [vmem:[#allocation3 + $0x64] sm:$0xff]  ;;  %v3736_v38 = vld [vmem:[%s17969_s3 + $0x5b8] sm:$0xff] }
 0x4de   :  { %v14809_v24 = vmul.f32 %v18291_v50, %v3176_v60  ;;  %11164 = vmatprep.subr.mxu0 %v3739_v28  ;;  %11231 = vmatprep.subr.mxu1 %v4004_v4  ;;  %3227 = vst [vmem:[#allocation3 + $0xc8] sm:$0xff] %v14806_v15  ;;  %v3285_v35 = vld [vmem:[#allocation3 + $0x75] sm:$0xff]  ;;  %v3286_v30 = vld [vmem:[#allocation3 + $0x7d] sm:$0xff]  ;;  %v4001_v3 = vld [vmem:[%s17969_s3 + $0x648] sm:$0xff] }
 0x4df   :  { %11057 = vmatmul.mubr.f32.gmra.mxu0 %v3280_v9  ;;  %11128 = vmatmul.mubr.f32.gmra.mxu1 %v3238_v16  ;;  %v3243_v36 = vld [vmem:[#allocation3 + $0x74] sm:$0xff]  ;;  %v3244_v23 = vld [vmem:[#allocation3 + $0x7c] sm:$0xff]  ;;  %v3287_v62 = vld [vmem:[#allocation3 + $0x85] sm:$0xff] }
 0x4e0   :  { %3228 = vst [vmem:[#allocation3 + $0xd0] sm:$0xff] %v14809_v24  ;;  %11059 = vmatprep.mubr.f32.mxu0 %v3281_v2  ;;  %11130 = vmatprep.mubr.f32.mxu1 %v3239_v59  ;;  %v3735_v63 = vld [vmem:[%s17969_s3 + $0x5b0] sm:$0xff]  ;;  %v3245_v46 = vld [vmem:[#allocation3 + $0x84] sm:$0xff]  ;;  %v3999_v37 = vld [vmem:[%s17969_s3 + $0x638] sm:$0xff] }
 0x4e1   :  { %11165 = vmatpush3.msra.mxu0 %v3739_v28  ;;  %11232 = vmatpush3.msra.mxu1 %v4004_v4  ;;  %v3734_v10 = vld [vmem:[%s17969_s3 + $0x5a8] sm:$0xff]  ;;  %v3289_v34 = vld [vmem:[#allocation3 + $0x95] sm:$0xff]  ;;  %v4000_v56 = vld [vmem:[%s17969_s3 + $0x640] sm:$0xff] }
 0x4e2   :  { %11166 = vmatprep.subr.mxu0 %v3738_v6  ;;  %11233 = vmatprep.subr.mxu1 %v4003_v54  ;;  %v3288_v22 = vld [vmem:[#allocation3 + $0x8d] sm:$0xff]  ;;  %v3733_v19 = vld [vmem:[%s17969_s3 + $0x5a0] sm:$0xff]  ;;  %v3732_v14 = vld [vmem:[%s17969_s3 + $0x598] sm:$0xff] }
 0x4e3   :  { %11060 = vmatmul.mubr.f32.gmra.mxu0 %v3282_v32  ;;  %11131 = vmatmul.mubr.f32.gmra.mxu1 %v3240_v31  ;;  %v3246_v49 = vld [vmem:[#allocation3 + $0x8c] sm:$0xff]  ;;  %v3247_v20 = vld [vmem:[#allocation3 + $0x94] sm:$0xff]  ;;  %v3290_v13 = vld [vmem:[#allocation3 + $0x9d] sm:$0xff] }
 0x4e4   :  { %11167 = vmatpush3.msra.mxu0 %v3738_v6  ;;  %11062 = vmatprep.mubr.f32.mxu0 %v3283_v43  ;;  %v3248_v55 = vld [vmem:[#allocation3 + $0x9c] sm:$0xff]  ;;  %v3291_v51 = vld [vmem:[#allocation3 + $0xa5] sm:$0xff]  ;;  %v3998_v26 = vld [vmem:[%s17969_s3 + $0x630] sm:$0xff] }
 0x4e5   :  { %11133 = vmatprep.mubr.f32.mxu1 %v3241_v17  ;;  %11168 = vmatprep.subr.mxu0 %v3737_v48  ;;  %v3249_v27 = vld [vmem:[#allocation3 + $0xa4] sm:$0xff]  ;;  %v3292_v5 = vld [vmem:[#allocation3 + $0xad] sm:$0xff]  ;;  %v3293_v11 = vld [vmem:[#allocation3 + $0xb5] sm:$0xff] }
 0x4e6   :  { %11169 = vmatpush3.msra.mxu0 %v3737_v48  ;;  %11234 = vmatpush3.msra.mxu1 %v4003_v54  ;;  %v3997_v0 = vld [vmem:[%s17969_s3 + $0x628] sm:$0xff]  ;;  %v3731_v45 = vld [vmem:[%s17969_s3 + $0x590] sm:$0xff]  ;;  %v3996_v33 = vld [vmem:[%s17969_s3 + $0x620] sm:$0xff] }
 0x4e7   :  { %11063 = vmatmul.mubr.f32.gmra.mxu0 %v3284_v42  ;;  %11134 = vmatmul.mubr.f32.gmra.mxu1 %v3242_v12  ;;  %v3250_v21 = vld [vmem:[#allocation3 + $0xac] sm:$0xff]  ;;  %v3251_v40 = vld [vmem:[#allocation3 + $0xb4] sm:$0xff]  ;;  %v3294_v4 = vld [vmem:[#allocation3 + $0xbd] sm:$0xff] }
 0x4e8   :  { %11065 = vmatprep.mubr.f32.mxu0 %v3285_v35  ;;  %11136 = vmatprep.mubr.f32.mxu1 %v3243_v36  ;;  %v3995_v28 = vld [vmem:[%s17969_s3 + $0x618] sm:$0xff]  ;;  %v3730_v39 = vld [vmem:[%s17969_s3 + $0x588] sm:$0xff]  ;;  %v3994_v9 = vld [vmem:[%s17969_s3 + $0x610] sm:$0xff] }
 0x4e9   :  { %11170 = vmatprep.subr.mxu0 %v3736_v38  ;;  %11235 = vmatprep.subr.mxu1 %v4002_v7  ;;  %v3252_v60 = vld [vmem:[#allocation3 + $0xbc] sm:$0xff]  ;;  %v3295_v47 = vld [vmem:[#allocation3 + $0xc5] sm:$0xff]  ;;  %v3296_v6 = vld [vmem:[#allocation3 + $0xcd] sm:$0xff] }
 0x4ea   :  { %11171 = vmatpush3.msra.mxu0 %v3736_v38  ;;  %11236 = vmatpush3.msra.mxu1 %v4002_v7  ;;  %v3253_v50 = vld [vmem:[#allocation3 + $0xc4] sm:$0xff]  ;;  %v3254_v59 = vld [vmem:[#allocation3 + $0xcc] sm:$0xff]  ;;  %v4270_v31 = vld [vmem:[%s17969_s3 + $0x6f8] sm:$0xff] }
 0x4eb   :  { %11066 = vmatmul.mubr.f32.gmra.mxu0 %v3286_v30  ;;  %11137 = vmatmul.mubr.f32.gmra.mxu1 %v3244_v23  ;;  %v3729_v16 = vld [vmem:[%s17969_s3 + $0x580] sm:$0xff]  ;;  %v3993_v2 = vld [vmem:[%s17969_s3 + $0x608] sm:$0xff]  ;;  %v4269_v38 = vld [vmem:[%s17969_s3 + $0x6f0] sm:$0xff] }
 0x4ec   :  { %11068 = vmatprep.mubr.f32.mxu0 %v3287_v62  ;;  %11139 = vmatprep.mubr.f32.mxu1 %v3245_v46  ;;  %v3703_v54 = vld [vmem:[#allocation3 + $0x6] sm:$0xff]  ;;  %v3704_v43 = vld [vmem:[#allocation3 + $0xe] sm:$0xff]  ;;  %v4533_v42 = vld [vmem:[%s17969_s3 + $0x778] sm:$0xff] }
 0x4ed   :  { %11172 = vmatprep.subr.mxu0 %v3735_v63  ;;  %11237 = vmatprep.subr.mxu1 %v4001_v3  ;;  %v3992_v32 = vld [vmem:[%s17969_s3 + $0x600] sm:$0xff]  ;;  %v3967_v17 = vld [vmem:[#allocation3 + $0xf] sm:$0xff]  ;;  %v3968_v7 = vld [vmem:[#allocation3 + $0x17] sm:$0xff] }
 0x4ee   :  { %11173 = vmatpush3.msra.mxu0 %v3735_v63  ;;  %11238 = vmatpush3.msra.mxu1 %v4001_v3  ;;  %v3966_v48 = vld [vmem:[#allocation3 + $0x7] sm:$0xff]  ;;  %v3705_v12 = vld [vmem:[#allocation3 + $0x16] sm:$0xff]  ;;  %v3706_v35 = vld [vmem:[#allocation3 + $0x1e] sm:$0xff] }
 0x4ef   :  { %11069 = vmatmul.mubr.f32.gmra.mxu0 %v3288_v22  ;;  %11140 = vmatmul.mubr.f32.gmra.mxu1 %v3246_v49  ;;  %v3969_v36 = vld [vmem:[#allocation3 + $0x1f] sm:$0xff]  ;;  %v4268_v63 = vld [vmem:[%s17969_s3 + $0x6e8] sm:$0xff]  ;;  %v4532_v30 = vld [vmem:[%s17969_s3 + $0x770] sm:$0xff] }
 0x4f0   :  { %11174 = vmatprep.subr.mxu0 %v3734_v10  ;;  %11071 = vmatprep.mubr.f32.mxu0 %v3289_v34  ;;  %v3707_v23 = vld [vmem:[#allocation3 + $0x26] sm:$0xff]  ;;  %v3708_v46 = vld [vmem:[#allocation3 + $0x2e] sm:$0xff]  ;;  %v3709_v49 = vld [vmem:[#allocation3 + $0x36] sm:$0xff] }
 0x4f1   :  { %11142 = vmatprep.mubr.f32.mxu1 %v3247_v20  ;;  %11175 = vmatpush3.msra.mxu0 %v3734_v10  ;;  %v3970_v3 = vld [vmem:[#allocation3 + $0x27] sm:$0xff]  ;;  %v3971_v10 = vld [vmem:[#allocation3 + $0x2f] sm:$0xff]  ;;  %v3972_v34 = vld [vmem:[#allocation3 + $0x37] sm:$0xff] }
 0x4f2   :  { %11239 = vmatprep.subr.mxu1 %v4000_v56  ;;  %11176 = vmatprep.subr.mxu0 %v3733_v19  ;;  %v4267_v62 = vld [vmem:[%s17969_s3 + $0x6e0] sm:$0xff]  ;;  %v4531_v22 = vld [vmem:[%s17969_s3 + $0x768] sm:$0xff] }
 0x4f3   :  { %11240 = vmatpush3.msra.mxu1 %v4000_v56  ;;  %11072 = vmatmul.mubr.f32.gmra.mxu0 %v3290_v13  ;;  %v4266_v56 = vld [vmem:[%s17969_s3 + $0x6d8] sm:$0xff]  ;;  %v3711_v13 = vld [vmem:[#allocation3 + $0x46] sm:$0xff] }
 0x4f4   :  { %11143 = vmatmul.mubr.f32.gmra.mxu1 %v3248_v55  ;;  %11177 = vmatpush3.msra.mxu0 %v3733_v19  ;;  %v3710_v19 = vld [vmem:[#allocation3 + $0x3e] sm:$0xff] }
 0x4f5   :  { %11241 = vmatprep.subr.mxu1 %v3999_v37  ;;  %11074 = vmatprep.mubr.f32.mxu0 %v3291_v51  ;;  %v3973_v20 = vld [vmem:[#allocation3 + $0x3f] sm:$0xff]  ;;  %v3974_v51 = vld [vmem:[#allocation3 + $0x47] sm:$0xff] }
 0x4f6   :  { %11145 = vmatprep.mubr.f32.mxu1 %v3249_v27  ;;  %11242 = vmatpush3.msra.mxu1 %v3999_v37  ;;  %v4265_v37 = vld [vmem:[%s17969_s3 + $0x6d0] sm:$0xff]  ;;  %v4530_v55 = vld [vmem:[%s17969_s3 + $0x760] sm:$0xff]  ;;  %v4264_v27 = vld [vmem:[%s17969_s3 + $0x6c8] sm:$0xff] }
 0x4f7   :  { %11178 = vmatprep.subr.mxu0 %v3732_v14  ;;  %11243 = vmatprep.subr.mxu1 %v3998_v26 }
 0x4f8   :  { %11179 = vmatpush3.msra.mxu0 %v3732_v14  ;;  %11244 = vmatpush3.msra.mxu1 %v3998_v26  ;;  %v3712_v14 = vld [vmem:[#allocation3 + $0x4e] sm:$0xff] }
 0x4f9   :  { %11075 = vmatmul.mubr.f32.gmra.mxu0 %v3292_v5  ;;  %11146 = vmatmul.mubr.f32.gmra.mxu1 %v3250_v21  ;;  %v3975_v26 = vld [vmem:[#allocation3 + $0x4f] sm:$0xff]  ;;  %v3976_v5 = vld [vmem:[#allocation3 + $0x57] sm:$0xff] }
 0x4fa   :  { %11245 = vmatprep.subr.mxu1 %v3997_v0  ;;  %11077 = vmatprep.mubr.f32.mxu0 %v3293_v11  ;;  %v4529_v21 = vld [vmem:[%s17969_s3 + $0x758] sm:$0xff] }
 0x4fb   :  { %11148 = vmatprep.mubr.f32.mxu1 %v3251_v40  ;;  %11246 = vmatpush3.msra.mxu1 %v3997_v0  ;;  %v3713_v0 = vld [vmem:[#allocation3 + $0x56] sm:$0xff]  ;;  %v3714_v11 = vld [vmem:[#allocation3 + $0x5e] sm:$0xff]  ;;  %v3715_v40 = vld [vmem:[#allocation3 + $0x66] sm:$0xff] }
 0x4fc   :  { %11180 = vmatprep.subr.mxu0 %v3731_v45  ;;  %11247 = vmatprep.subr.mxu1 %v3996_v33 }
 0x4fd   :  { %11181 = vmatpush3.msra.mxu0 %v3731_v45  ;;  %11248 = vmatpush3.msra.mxu1 %v3996_v33  ;;  %v3977_v45 = vld [vmem:[#allocation3 + $0x5f] sm:$0xff] }
 0x4fe   :  { %11078 = vmatmul.mubr.f32.gmra.mxu0 %v3294_v4  ;;  %11149 = vmatmul.mubr.f32.gmra.mxu1 %v3252_v60  ;;  %v4263_v33 = vld [vmem:[%s17969_s3 + $0x6c0] sm:$0xff]  ;;  %v4262_v4 = vld [vmem:[%s17969_s3 + $0x6b8] sm:$0xff]  ;;  %v3716_v60 = vld [vmem:[#allocation3 + $0x6e] sm:$0xff] }
 0x4ff   :  { %11249 = vmatprep.subr.mxu1 %v3995_v28  ;;  %11080 = vmatprep.mubr.f32.mxu0 %v3295_v47  ;;  %v4528_v47 = vld [vmem:[%s17969_s3 + $0x750] sm:$0xff] }
 0x500   :  { %11151 = vmatprep.mubr.f32.mxu1 %v3253_v50  ;;  %11182 = vmatprep.subr.mxu0 %v3730_v39  ;;  %v3717_v50 = vld [vmem:[#allocation3 + $0x76] sm:$0xff] }
 0x501   :  { %11250 = vmatpush3.msra.mxu1 %v3995_v28  ;;  %11183 = vmatpush3.msra.mxu0 %v3730_v39  ;;  %v3978_v28 = vld [vmem:[#allocation3 + $0x67] sm:$0xff]  ;;  %v3979_v39 = vld [vmem:[#allocation3 + $0x6f] sm:$0xff] }
 0x502   :  { %11251 = vmatprep.subr.mxu1 %v3994_v9  ;;  %11081 = vmatmul.mubr.f32.gmra.mxu0 %v3296_v6  ;;  %v3718_v6 = vld [vmem:[#allocation3 + $0x7e] sm:$0xff] }
 0x503   :  { %11252 = vmatpush3.msra.mxu1 %v3994_v9  ;;  %11184 = vmatprep.subr.mxu0 %v3729_v16  ;;  %v3980_v9 = vld [vmem:[#allocation3 + $0x77] sm:$0xff] }
 0x504   :  { %11152 = vmatmul.mubr.f32.gmra.mxu1 %v3254_v59  ;;  %11253 = vmatprep.subr.mxu1 %v3993_v2  ;;  %v4527_v59 = vld [vmem:[%s17969_s3 + $0x748] sm:$0xff] }
 0x505   :  { %11185 = vmatpush3.msra.mxu0 %v3729_v16  ;;  %11186 = vmatprep.mubr.f32.mxu0 %v3703_v54  ;;  %v4261_v16 = vld [vmem:[%s17969_s3 + $0x6b0] sm:$0xff]  ;;  %v3719_v54 = vld [vmem:[#allocation3 + $0x86] sm:$0xff] }
 0x506   :  { %11254 = vmatpush3.msra.mxu1 %v3993_v2  ;;  %11257 = vmatprep.mubr.f32.mxu1 %v3966_v48  ;;  %v3981_v2 = vld [vmem:[#allocation3 + $0x7f] sm:$0xff]  ;;  %v3720_v48 = vld [vmem:[#allocation3 + $0x8e] sm:$0xff] }
 0x507   :  { %11255 = vmatprep.subr.mxu1 %v3992_v32  ;;  %11296 = vmatprep.subr.mxu0 %v4270_v31 }
 0x508   :  { %11256 = vmatpush3.msra.mxu1 %v3992_v32  ;;  %11187 = vmatmul.mubr.f32.vlgmr.msra.gmra.mxu0 %v3704_v43  ;;  %v3982_v32 = vld [vmem:[#allocation3 + $0x87] sm:$0xff]  ;;  %v3983_v43 = vld [vmem:[#allocation3 + $0x8f] sm:$0xff] }
 0x509   :  { %11258 = vmatmul.mubr.f32.vlgmr.msra.gmra.mxu1 %v3967_v17  ;;  %11297 = vmatpush3.msra.mxu0 %v4270_v31  ;;  %v4260_v31 = vld [vmem:[%s17969_s3 + $0x6a8] sm:$0xff]  ;;  %v3721_v17 = vld [vmem:[#allocation3 + $0x96] sm:$0xff] }
 0x50a   :  { %11189 = vmatprep.mubr.f32.mxu0 %v3705_v12  ;;  %11260 = vmatprep.mubr.f32.mxu1 %v3968_v7  ;;  %v3984_v12 = vld [vmem:[#allocation3 + $0x97] sm:$0xff] }
 0x50b   :  { %11298 = vmatprep.subr.mxu0 %v4269_v38  ;;  %11367 = vmatprep.subr.mxu1 %v4533_v42  ;;  %v3722_v7 = vld [vmem:[#allocation3 + $0x9e] sm:$0xff] }
 0x50c   :  { %11190 = vmatmul.mubr.f32.gmra.mxu0 %v3706_v35  ;;  %11368 = vmatpush3.msra.mxu1 %v4533_v42  ;;  %v4259_v42 = vld [vmem:[%s17969_s3 + $0x6a0] sm:$0xff]  ;;  %v4525_v35 = vld [vmem:[%s17969_s3 + $0x738] sm:$0xff] }
 0x50d   :  { %11261 = vmatmul.mubr.f32.gmra.mxu1 %v3969_v36  ;;  %11299 = vmatpush3.msra.mxu0 %v4269_v38  ;;  %v4526_v38 = vld [vmem:[%s17969_s3 + $0x740] sm:$0xff] }
 0x50e   :  { %11192 = vmatprep.mubr.f32.mxu0 %v3707_v23  ;;  %11263 = vmatprep.mubr.f32.mxu1 %v3970_v3  ;;  %v3985_v36 = vld [vmem:[#allocation3 + $0x9f] sm:$0xff]  ;;  %v4524_v23 = vld [vmem:[%s17969_s3 + $0x730] sm:$0xff]  ;;  %v3986_v3 = vld [vmem:[#allocation3 + $0xa7] sm:$0xff] }
 0x50f   :  { %11300 = vmatprep.subr.mxu0 %v4268_v63  ;;  %11369 = vmatprep.subr.mxu1 %v4532_v30 }
 0x510   :  { %11301 = vmatpush3.msra.mxu0 %v4268_v63  ;;  %11370 = vmatpush3.msra.mxu1 %v4532_v30  ;;  %v3723_v63 = vld [vmem:[#allocation3 + $0xa6] sm:$0xff]  ;;  %v4258_v30 = vld [vmem:[%s17969_s3 + $0x698] sm:$0xff] }
 0x511   :  { %11193 = vmatmul.mubr.f32.gmra.mxu0 %v3708_v46  ;;  %11264 = vmatmul.mubr.f32.gmra.mxu1 %v3971_v10  ;;  %v3724_v46 = vld [vmem:[#allocation3 + $0xae] sm:$0xff] }
 0x512   :  { %11195 = vmatprep.mubr.f32.mxu0 %v3709_v49  ;;  %11266 = vmatprep.mubr.f32.mxu1 %v3972_v34  ;;  %v3987_v10 = vld [vmem:[#allocation3 + $0xaf] sm:$0xff]  ;;  %v4522_v34 = vld [vmem:[%s17969_s3 + $0x720] sm:$0xff] }
 0x513   :  { %11302 = vmatprep.subr.mxu0 %v4267_v62  ;;  %11371 = vmatprep.subr.mxu1 %v4531_v22  ;;  %v4257_v49 = vld [vmem:[%s17969_s3 + $0x690] sm:$0xff] }
 0x514   :  { %11303 = vmatpush3.msra.mxu0 %v4267_v62  ;;  %11372 = vmatpush3.msra.mxu1 %v4531_v22  ;;  %v4523_v62 = vld [vmem:[%s17969_s3 + $0x728] sm:$0xff]  ;;  %v3725_v22 = vld [vmem:[#allocation3 + $0xb6] sm:$0xff] }
 0x515   :  { %11196 = vmatmul.mubr.f32.gmra.mxu0 %v3710_v19  ;;  %11267 = vmatmul.mubr.f32.gmra.mxu1 %v3973_v20  ;;  %v4521_v19 = vld [vmem:[%s17969_s3 + $0x718] sm:$0xff] }
 0x516   :  { %11304 = vmatprep.subr.mxu0 %v4266_v56  ;;  %11198 = vmatprep.mubr.f32.mxu0 %v3711_v13  ;;  %v3726_v20 = vld [vmem:[#allocation3 + $0xbe] sm:$0xff] }
 0x517   :  { %11269 = vmatprep.mubr.f32.mxu1 %v3974_v51  ;;  %11305 = vmatpush3.msra.mxu0 %v4266_v56  ;;  %v3988_v56 = vld [vmem:[#allocation3 + $0xb7] sm:$0xff]  ;;  %v3989_v13 = vld [vmem:[#allocation3 + $0xbf] sm:$0xff]  ;;  %v3990_v51 = vld [vmem:[#allocation3 + $0xc7] sm:$0xff] }
 0x518   :  { %11306 = vmatprep.subr.mxu0 %v4265_v37  ;;  %11373 = vmatprep.subr.mxu1 %v4530_v55 }
 0x519   :  { %11199 = vmatmul.mubr.f32.gmra.mxu0 %v3712_v14  ;;  %11270 = vmatmul.mubr.f32.gmra.mxu1 %v3975_v26  ;;  %v4520_v14 = vld [vmem:[%s17969_s3 + $0x710] sm:$0xff]  ;;  %v4255_v26 = vld [vmem:[%s17969_s3 + $0x680] sm:$0xff] }
 0x51a   :  { %11201 = vmatprep.mubr.f32.mxu0 %v3713_v0  ;;  %11272 = vmatprep.mubr.f32.mxu1 %v3976_v5  ;;  %v4519_v0 = vld [vmem:[%s17969_s3 + $0x708] sm:$0xff] }
 0x51b   :  { %11307 = vmatpush3.msra.mxu0 %v4265_v37  ;;  %11374 = vmatpush3.msra.mxu1 %v4530_v55  ;;  %v4256_v37 = vld [vmem:[%s17969_s3 + $0x688] sm:$0xff] }
 0x51c   :  { %11308 = vmatprep.subr.mxu0 %v4264_v27  ;;  %11375 = vmatprep.subr.mxu1 %v4529_v21  ;;  %v3727_v55 = vld [vmem:[#allocation3 + $0xc6] sm:$0xff]  ;;  %v3991_v5 = vld [vmem:[#allocation3 + $0xcf] sm:$0xff] }
 0x51d   :  { %11202 = vmatmul.mubr.f32.gmra.mxu0 %v3714_v11  ;;  %11273 = vmatmul.mubr.f32.gmra.mxu1 %v3977_v45  ;;  %v4518_v11 = vld [vmem:[%s17969_s3 + $0x700] sm:$0xff]  ;;  %v4796_v45 = vld [vmem:[%s17969_s3 + $0x7f8] sm:$0xff] }
 0x51e   :  { %11309 = vmatpush3.msra.mxu0 %v4264_v27  ;;  %11204 = vmatprep.mubr.f32.mxu0 %v3715_v40  ;;  %v3728_v27 = vld [vmem:[#allocation3 + $0xce] sm:$0xff] }
 0x51f   :  { %11275 = vmatprep.mubr.f32.mxu1 %v3978_v28  ;;  %11310 = vmatprep.subr.mxu0 %v4263_v33  ;;  %v4230_v40 = vld [vmem:[#allocation3 + $0x10] sm:$0xff] }
 0x520   :  { %11311 = vmatpush3.msra.mxu0 %v4263_v33  ;;  %11376 = vmatpush3.msra.mxu1 %v4529_v21  ;;  %v4229_v21 = vld [vmem:[#allocation3 + $0x8] sm:$0xff]  ;;  %v4493_v28 = vld [vmem:[#allocation3 + $0x11] sm:$0xff] }
 0x521   :  { %11205 = vmatmul.mubr.f32.gmra.mxu0 %v3716_v60  ;;  %11276 = vmatmul.mubr.f32.gmra.mxu1 %v3979_v39  ;;  %v4492_v33 = vld [vmem:[#allocation3 + $0x9] sm:$0xff]  ;;  %v5059_v60 = vld [vmem:[%s17969_s3 + $0x878] sm:$0xff] }
 0x522   :  { %11207 = vmatprep.mubr.f32.mxu0 %v3717_v50  ;;  %11278 = vmatprep.mubr.f32.mxu1 %v3980_v9  ;;  %v4231_v39 = vld [vmem:[#allocation3 + $0x18] sm:$0xff]  ;;  %v4495_v50 = vld [vmem:[#allocation3 + $0x21] sm:$0xff] }
 0x523   :  { %11312 = vmatprep.subr.mxu0 %v4262_v4  ;;  %11377 = vmatprep.subr.mxu1 %v4528_v47  ;;  %v4794_v9 = vld [vmem:[%s17969_s3 + $0x7e8] sm:$0xff] }
 0x524   :  { %11313 = vmatpush3.msra.mxu0 %v4262_v4  ;;  %11378 = vmatpush3.msra.mxu1 %v4528_v47  ;;  %v4795_v4 = vld [vmem:[%s17969_s3 + $0x7f0] sm:$0xff]  ;;  %v4494_v47 = vld [vmem:[#allocation3 + $0x19] sm:$0xff] }
 0x525   :  { %11208 = vmatmul.mubr.f32.gmra.mxu0 %v3718_v6  ;;  %11279 = vmatmul.mubr.f32.gmra.mxu1 %v3981_v2  ;;  %v4496_v6 = vld [vmem:[#allocation3 + $0x29] sm:$0xff] }
 0x526   :  { %11210 = vmatprep.mubr.f32.mxu0 %v3719_v54  ;;  %11281 = vmatprep.mubr.f32.mxu1 %v3982_v32  ;;  %v12467_v2 = vld [vmem:[#allocation3 + $0x28] sm:$0xff]  ;;  %v12468_v32 = vld [vmem:[#allocation3 + $0x30] sm:$0xff] }
 0x527   :  { %11314 = vmatprep.subr.mxu0 %v4261_v16  ;;  %11379 = vmatprep.subr.mxu1 %v4527_v59  ;;  %v5057_v54 = vld [vmem:[%s17969_s3 + $0x868] sm:$0xff] }
 0x528   :  { %11315 = vmatpush3.msra.mxu0 %v4261_v16  ;;  %11380 = vmatpush3.msra.mxu1 %v4527_v59  ;;  %v5058_v16 = vld [vmem:[%s17969_s3 + $0x870] sm:$0xff]  ;;  %v4793_v59 = vld [vmem:[%s17969_s3 + $0x7e0] sm:$0xff] }
 0x529   :  { %11211 = vmatmul.mubr.f32.gmra.mxu0 %v3720_v48  ;;  %11282 = vmatmul.mubr.f32.gmra.mxu1 %v3983_v43  ;;  %v12469_v48 = vld [vmem:[#allocation3 + $0x38] sm:$0xff] }
 0x52a   :  { %11316 = vmatprep.subr.mxu0 %v4260_v31  ;;  %11213 = vmatprep.mubr.f32.mxu0 %v3721_v17  ;;  %v4792_v43 = vld [vmem:[%s17969_s3 + $0x7d8] sm:$0xff]  ;;  %v4499_v17 = vld [vmem:[#allocation3 + $0x41] sm:$0xff] }
 0x52b   :  { %11284 = vmatprep.mubr.f32.mxu1 %v3984_v12  ;;  %11317 = vmatpush3.msra.mxu0 %v4260_v31  ;;  %v4498_v31 = vld [vmem:[#allocation3 + $0x39] sm:$0xff] }
 0x52c   :  { %11381 = vmatprep.subr.mxu1 %v4526_v38  ;;  %11318 = vmatprep.subr.mxu0 %v4259_v42  ;;  %v5056_v12 = vld [vmem:[%s17969_s3 + $0x860] sm:$0xff] }
 0x52d   :  { %11382 = vmatpush3.msra.mxu1 %v4526_v38  ;;  %11214 = vmatmul.mubr.f32.gmra.mxu0 %v3722_v7  ;;  %v12470_v38 = vld [vmem:[#allocation3 + $0x40] sm:$0xff]  ;;  %v4500_v7 = vld [vmem:[#allocation3 + $0x49] sm:$0xff] }
 0x52e   :  { %11285 = vmatmul.mubr.f32.gmra.mxu1 %v3985_v36  ;;  %11319 = vmatpush3.msra.mxu0 %v4259_v42  ;;  %v4791_v42 = vld [vmem:[%s17969_s3 + $0x7d0] sm:$0xff]  ;;  %v4502_v36 = vld [vmem:[#allocation3 + $0x59] sm:$0xff] }
 0x52f   :  { %11383 = vmatprep.subr.mxu1 %v4525_v35  ;;  %11216 = vmatprep.mubr.f32.mxu0 %v3723_v63  ;;  %v4790_v63 = vld [vmem:[%s17969_s3 + $0x7c8] sm:$0xff] }
 0x530   :  { %11287 = vmatprep.mubr.f32.mxu1 %v3986_v3  ;;  %11384 = vmatpush3.msra.mxu1 %v4525_v35  ;;  %v4501_v35 = vld [vmem:[#allocation3 + $0x51] sm:$0xff]  ;;  %v12472_v3 = vld [vmem:[#allocation3 + $0x68] sm:$0xff] }
 0x531   :  { %11320 = vmatprep.subr.mxu0 %v4258_v30  ;;  %11385 = vmatprep.subr.mxu1 %v4524_v23 }
 0x532   :  { %11321 = vmatpush3.msra.mxu0 %v4258_v30  ;;  %11386 = vmatpush3.msra.mxu1 %v4524_v23  ;;  %v5055_v30 = vld [vmem:[%s17969_s3 + $0x858] sm:$0xff]  ;;  %v12471_v23 = vld [vmem:[#allocation3 + $0x60] sm:$0xff] }
 0x533   :  { %11217 = vmatmul.mubr.f32.gmra.mxu0 %v3724_v46  ;;  %11288 = vmatmul.mubr.f32.gmra.mxu1 %v3987_v10  ;;  %v4788_v46 = vld [vmem:[%s17969_s3 + $0x7b8] sm:$0xff]  ;;  %v5054_v10 = vld [vmem:[%s17969_s3 + $0x850] sm:$0xff] }
 0x534   :  { %11387 = vmatprep.subr.mxu1 %v4523_v62  ;;  %11219 = vmatprep.mubr.f32.mxu0 %v3725_v22  ;;  %v12473_v22 = vld [vmem:[#allocation3 + $0x70] sm:$0xff] }
 0x535   :  { %11290 = vmatprep.mubr.f32.mxu1 %v3988_v56  ;;  %11388 = vmatpush3.msra.mxu1 %v4523_v62  ;;  %v4504_v62 = vld [vmem:[#allocation3 + $0x69] sm:$0xff]  ;;  %v4507_v56 = vld [vmem:[#allocation3 + $0x81] sm:$0xff] }
 0x536   :  { %11322 = vmatprep.subr.mxu0 %v4257_v49  ;;  %11389 = vmatprep.subr.mxu1 %v4522_v34 }
 0x537   :  { %11323 = vmatpush3.msra.mxu0 %v4257_v49  ;;  %11390 = vmatpush3.msra.mxu1 %v4522_v34  ;;  %v4506_v49 = vld [vmem:[#allocation3 + $0x79] sm:$0xff] }
 0x538   :  { %11220 = vmatmul.mubr.f32.gmra.mxu0 %v3726_v20  ;;  %11291 = vmatmul.mubr.f32.gmra.mxu1 %v3989_v13  ;;  %v12474_v34 = vld [vmem:[#allocation3 + $0x78] sm:$0xff]  ;;  %v5053_v20 = vld [vmem:[%s17969_s3 + $0x848] sm:$0xff]  ;;  %v12475_v13 = vld [vmem:[#allocation3 + $0x80] sm:$0xff] }
 0x539   :  { %11391 = vmatprep.subr.mxu1 %v4521_v19  ;;  %11222 = vmatprep.mubr.f32.mxu0 %v3727_v55  ;;  %v4786_v55 = vld [vmem:[%s17969_s3 + $0x7a8] sm:$0xff] }
 0x53a   :  { %11293 = vmatprep.mubr.f32.mxu1 %v3990_v51  ;;  %11324 = vmatprep.subr.mxu0 %v4256_v37  ;;  %v4509_v51 = vld [vmem:[#allocation3 + $0x91] sm:$0xff] }
 0x53b   :  { %11392 = vmatpush3.msra.mxu1 %v4521_v19  ;;  %11325 = vmatpush3.msra.mxu0 %v4256_v37  ;;  %v4787_v19 = vld [vmem:[%s17969_s3 + $0x7b0] sm:$0xff] }
 0x53c   :  { %11393 = vmatprep.subr.mxu1 %v4520_v14  ;;  %11223 = vmatmul.mubr.f32.gmra.mxu0 %v3728_v27  ;;  %v4508_v37 = vld [vmem:[#allocation3 + $0x89] sm:$0xff]  ;;  %v4511_v27 = vld [vmem:[#allocation3 + $0xa1] sm:$0xff] }
 0x53d   :  { %11394 = vmatpush3.msra.mxu1 %v4520_v14  ;;  %11326 = vmatprep.subr.mxu0 %v4255_v26  ;;  %v5052_v14 = vld [vmem:[%s17969_s3 + $0x840] sm:$0xff] }
 0x53e   :  { %11294 = vmatmul.mubr.f32.gmra.mxu1 %v3991_v5  ;;  %11395 = vmatprep.subr.mxu1 %v4519_v0  ;;  %v4512_v5 = vld [vmem:[#allocation3 + $0xa9] sm:$0xff] }
 0x53f   :  { %11327 = vmatpush3.msra.mxu0 %v4255_v26  ;;  %11328 = vmatprep.mubr.f32.mxu0 %v4229_v21  ;;  %v4510_v26 = vld [vmem:[#allocation3 + $0x99] sm:$0xff]  ;;  %v4513_v21 = vld [vmem:[#allocation3 + $0xb1] sm:$0xff] }
 0x540   :  { %11396 = vmatpush3.msra.mxu1 %v4519_v0  ;;  %11399 = vmatprep.mubr.f32.mxu1 %v4492_v33  ;;  %v4784_v0 = vld [vmem:[%s17969_s3 + $0x798] sm:$0xff]  ;;  %v4515_v33 = vld [vmem:[#allocation3 + $0xc1] sm:$0xff] }
 0x541   :  { %11397 = vmatprep.subr.mxu1 %v4518_v11  ;;  %11438 = vmatprep.subr.mxu0 %v4796_v45 }
 0x542   :  { %11398 = vmatpush3.msra.mxu1 %v4518_v11  ;;  %11329 = vmatmul.mubr.f32.vlgmr.msra.gmra.mxu0 %v4230_v40  ;;  %v4783_v11 = vld [vmem:[%s17969_s3 + $0x790] sm:$0xff]  ;;  %v4782_v40 = vld [vmem:[%s17969_s3 + $0x788] sm:$0xff] }
 0x543   :  { %11400 = vmatmul.mubr.f32.vlgmr.msra.gmra.mxu1 %v4493_v28  ;;  %11439 = vmatpush3.msra.mxu0 %v4796_v45  ;;  %v4514_v45 = vld [vmem:[#allocation3 + $0xb9] sm:$0xff]  ;;  %v5046_v28 = vld [vmem:[%s17969_s3 + $0x810] sm:$0xff] }
 0x544   :  { %11331 = vmatprep.mubr.f32.mxu0 %v4231_v39  ;;  %11402 = vmatprep.mubr.f32.mxu1 %v4494_v47  ;;  %v5044_v39 = vld [vmem:[%s17969_s3 + $0x800] sm:$0xff]  ;;  %v5322_v47 = vld [vmem:[%s17969_s3 + $0x8f8] sm:$0xff] }
 0x545   :  { %11440 = vmatprep.subr.mxu0 %v4795_v4  ;;  %11509 = vmatprep.subr.mxu1 %v5059_v60 }
 0x546   :  { %11332 = vmatmul.mubr.f32.gmra.mxu0 %v14669_v29  ;;  %11510 = vmatpush3.msra.mxu1 %v5059_v60  ;;  %v4497_v29 = vld [vmem:[#allocation3 + $0x31] sm:$0xff] }
 0x547   :  { %11403 = vmatmul.mubr.f32.gmra.mxu1 %v4495_v50  ;;  %11441 = vmatpush3.msra.mxu0 %v4795_v4  ;;  %v4781_v4 = vld [vmem:[%s17969_s3 + $0x780] sm:$0xff]  ;;  %v4755_v60 = vld [vmem:[#allocation3 + $0xa] sm:$0xff] }
 0x548   :  { %11334 = vmatprep.mubr.f32.mxu0 %v12467_v2  ;;  %11405 = vmatprep.mubr.f32.mxu1 %v4496_v6  ;;  %v5018_v50 = vld [vmem:[#allocation3 + $0xb] sm:$0xff]  ;;  %v4757_v6 = vld [vmem:[#allocation3 + $0x1a] sm:$0xff] }
 0x549   :  { %11442 = vmatprep.subr.mxu0 %v4794_v9  ;;  %11511 = vmatprep.subr.mxu1 %v5058_v16  ;;  %v5020_v2 = vld [vmem:[#allocation3 + $0x1b] sm:$0xff] }
 0x54a   :  { %11443 = vmatpush3.msra.mxu0 %v4794_v9  ;;  %11512 = vmatpush3.msra.mxu1 %v5058_v16  ;;  %v5019_v9 = vld [vmem:[#allocation3 + $0x13] sm:$0xff] }
 0x54b   :  { %11335 = vmatmul.mubr.f32.gmra.mxu0 %v12468_v32  ;;  %11406 = vmatmul.mubr.f32.gmra.mxu1 %v4497_v29  ;;  %v5321_v16 = vld [vmem:[%s17969_s3 + $0x8f0] sm:$0xff]  ;;  %v4758_v29 = vld [vmem:[#allocation3 + $0x22] sm:$0xff] }
 0x54c   :  { %11337 = vmatprep.mubr.f32.mxu0 %v12469_v48  ;;  %11408 = vmatprep.mubr.f32.mxu1 %v4498_v31  ;;  %v5320_v32 = vld [vmem:[%s17969_s3 + $0x8e8] sm:$0xff]  ;;  %v18292_v31 = vmov 1.0  }
 0x54d   :  { %11444 = vmatprep.subr.mxu0 %v4793_v59  ;;  %11513 = vmatprep.subr.mxu1 %v5057_v54 }
 0x54e   :  { %11445 = vmatpush3.msra.mxu0 %v4793_v59  ;;  %11514 = vmatpush3.msra.mxu1 %v5057_v54  ;;  %v15091_v59 = vld [vmem:[#allocation2] sm:$0xff] }
 0x54f   :  { %11338 = vmatmul.mubr.f32.gmra.mxu0 %v12470_v38  ;;  %11409 = vmatmul.mubr.f32.gmra.mxu1 %v4499_v17  ;;  %v5021_v54 = vld [vmem:[#allocation3 + $0x23] sm:$0xff]  ;;  %v5022_v17 = vld [vmem:[#allocation3 + $0x2b] sm:$0xff] }
 0x550   :  { %11446 = vmatprep.subr.mxu0 %v4792_v43  ;;  %11340 = vmatprep.mubr.f32.mxu0 %v14701_v1  ;;  %v4503_v1 = vld [vmem:[#allocation3 + $0x61] sm:$0xff]  ;;  %v4760_v38 = vld [vmem:[#allocation3 + $0x32] sm:$0xff] }
 0x551   :  { %11411 = vmatprep.mubr.f32.mxu1 %v4500_v7  ;;  %11447 = vmatpush3.msra.mxu0 %v4792_v43  ;;  %v4759_v43 = vld [vmem:[#allocation3 + $0x2a] sm:$0xff] }
 0x552   :  { %11448 = vmatprep.subr.mxu0 %v4791_v42  ;;  %11515 = vmatprep.subr.mxu1 %v5056_v12 }
 0x553   :  { %11341 = vmatmul.mubr.f32.gmra.mxu0 %v14704_v18  ;;  %11412 = vmatmul.mubr.f32.gmra.mxu1 %v4501_v35  ;;  %v4789_v18 = vld [vmem:[%s17969_s3 + $0x7c0] sm:$0xff] }
 0x554   :  { %11343 = vmatprep.mubr.f32.mxu0 %v14707_v61  ;;  %11414 = vmatprep.mubr.f32.mxu1 %v4502_v36  ;;  %v4505_v61 = vld [vmem:[#allocation3 + $0x71] sm:$0xff]  ;;  %v4761_v35 = vld [vmem:[#allocation3 + $0x3a] sm:$0xff] }
 0x555   :  { %11449 = vmatpush3.msra.mxu0 %v4791_v42  ;;  %11516 = vmatpush3.msra.mxu1 %v5056_v12  ;;  %v5023_v42 = vld [vmem:[#allocation3 + $0x33] sm:$0xff]  ;;  %v5319_v12 = vld [vmem:[%s17969_s3 + $0x8e0] sm:$0xff] }
 0x556   :  { %11450 = vmatprep.subr.mxu0 %v4790_v63  ;;  %11517 = vmatprep.subr.mxu1 %v5055_v30  ;;  %v5024_v36 = vld [vmem:[#allocation3 + $0x3b] sm:$0xff] }
 0x557   :  { %11344 = vmatmul.mubr.f32.gmra.mxu0 %v12471_v23  ;;  %11415 = vmatmul.mubr.f32.gmra.mxu1 %v4503_v1  ;;  %v5025_v1 = vld [vmem:[#allocation3 + $0x43] sm:$0xff] }
 0x558   :  { %11451 = vmatpush3.msra.mxu0 %v4790_v63  ;;  %11346 = vmatprep.mubr.f32.mxu0 %v12472_v3  ;;  %v5318_v63 = vld [vmem:[%s17969_s3 + $0x8d8] sm:$0xff]  ;;  %v4763_v23 = vld [vmem:[#allocation3 + $0x4a] sm:$0xff] }
 0x559   :  { %11417 = vmatprep.mubr.f32.mxu1 %v4504_v62  ;;  %11452 = vmatprep.subr.mxu0 %v4789_v18  ;;  %v5317_v3 = vld [vmem:[%s17969_s3 + $0x8d0] sm:$0xff] }
 0x55a   :  { %11453 = vmatpush3.msra.mxu0 %v4789_v18  ;;  %11518 = vmatpush3.msra.mxu1 %v5055_v30  ;;  %v4762_v30 = vld [vmem:[#allocation3 + $0x42] sm:$0xff]  ;;  %v5026_v62 = vld [vmem:[#allocation3 + $0x4b] sm:$0xff] }
 0x55b   :  { %11347 = vmatmul.mubr.f32.gmra.mxu0 %v12473_v22  ;;  %11418 = vmatmul.mubr.f32.gmra.mxu1 %v4505_v61  ;;  %v4764_v61 = vld [vmem:[#allocation3 + $0x52] sm:$0xff]  ;;  %v5028_v22 = vld [vmem:[#allocation3 + $0x5b] sm:$0xff] }
 0x55c   :  { %11349 = vmatprep.mubr.f32.mxu0 %v12474_v34  ;;  %11420 = vmatprep.mubr.f32.mxu1 %v4506_v49  ;;  %v5316_v49 = vld [vmem:[%s17969_s3 + $0x8c8] sm:$0xff] }
 0x55d   :  { %11454 = vmatprep.subr.mxu0 %v4788_v46  ;;  %11519 = vmatprep.subr.mxu1 %v5054_v10 }
 0x55e   :  { %11455 = vmatpush3.msra.mxu0 %v4788_v46  ;;  %11520 = vmatpush3.msra.mxu1 %v5054_v10  ;;  %v5027_v46 = vld [vmem:[#allocation3 + $0x53] sm:$0xff] }
 0x55f   :  { %11350 = vmatmul.mubr.f32.gmra.mxu0 %v12475_v13  ;;  %11421 = vmatmul.mubr.f32.gmra.mxu1 %v4507_v56  ;;  %v4765_v10 = vld [vmem:[#allocation3 + $0x5a] sm:$0xff]  ;;  %v5029_v13 = vld [vmem:[#allocation3 + $0x63] sm:$0xff] }
 0x560   :  { %11352 = vmatprep.mubr.f32.mxu0 %v14751_v8  ;;  %11423 = vmatprep.mubr.f32.mxu1 %v4508_v37  ;;  %v4785_v8 = vld [vmem:[%s17969_s3 + $0x7a0] sm:$0xff] }
 0x561   :  { %11456 = vmatprep.subr.mxu0 %v4787_v19  ;;  %11521 = vmatprep.subr.mxu1 %v5053_v20  ;;  %v5315_v37 = vld [vmem:[%s17969_s3 + $0x8c0] sm:$0xff] }
 0x562   :  { %11457 = vmatpush3.msra.mxu0 %v4787_v19  ;;  %11522 = vmatpush3.msra.mxu1 %v5053_v20  ;;  %v4766_v20 = vld [vmem:[#allocation3 + $0x62] sm:$0xff] }
 0x563   :  { %11353 = vmatmul.mubr.f32.gmra.mxu0 %v14754_v53  ;;  %11424 = vmatmul.mubr.f32.gmra.mxu1 %v4509_v51  ;;  %v5051_v53 = vld [vmem:[%s17969_s3 + $0x838] sm:$0xff]  ;;  %v4767_v51 = vld [vmem:[#allocation3 + $0x6a] sm:$0xff] }
 0x564   :  { %11458 = vmatprep.subr.mxu0 %v4786_v55  ;;  %11355 = vmatprep.mubr.f32.mxu0 %v14757_v52  ;;  %v5050_v52 = vld [vmem:[%s17969_s3 + $0x830] sm:$0xff] }
 0x565   :  { %11426 = vmatprep.mubr.f32.mxu1 %v4510_v26  ;;  %11459 = vmatpush3.msra.mxu0 %v4786_v55  ;;  %v5030_v26 = vld [vmem:[#allocation3 + $0x6b] sm:$0xff] }
 0x566   :  { %11523 = vmatprep.subr.mxu1 %v5052_v14  ;;  %11460 = vmatprep.subr.mxu0 %v4785_v8 }
 0x567   :  { %11524 = vmatpush3.msra.mxu1 %v5052_v14  ;;  %11356 = vmatmul.mubr.f32.gmra.mxu0 %v14763_v25  ;;  %v5049_v25 = vld [vmem:[%s17969_s3 + $0x828] sm:$0xff] }
 0x568   :  { %11427 = vmatmul.mubr.f32.gmra.mxu1 %v4511_v27  ;;  %11461 = vmatpush3.msra.mxu0 %v4785_v8 }
 0x569   :  { %11525 = vmatprep.subr.mxu1 %v5051_v53  ;;  %11358 = vmatprep.mubr.f32.mxu0 %v14766_v57  ;;  %v5048_v57 = vld [vmem:[%s17969_s3 + $0x820] sm:$0xff] }
 0x56a   :  { %11429 = vmatprep.mubr.f32.mxu1 %v4512_v5  ;;  %11526 = vmatpush3.msra.mxu1 %v5051_v53  ;;  %v5314_v5 = vld [vmem:[%s17969_s3 + $0x8b8] sm:$0xff] }
 0x56b   :  { %11462 = vmatprep.subr.mxu0 %v4784_v0  ;;  %11527 = vmatprep.subr.mxu1 %v5050_v52 }
 0x56c   :  { %11463 = vmatpush3.msra.mxu0 %v4784_v0  ;;  %11528 = vmatpush3.msra.mxu1 %v5050_v52  ;;  %v4768_v0 = vld [vmem:[#allocation3 + $0x72] sm:$0xff] }
 0x56d   :  { %11359 = vmatmul.mubr.f32.gmra.mxu0 %v14769_v44  ;;  %11430 = vmatmul.mubr.f32.gmra.mxu1 %v4513_v21  ;;  %v5047_v44 = vld [vmem:[%s17969_s3 + $0x818] sm:$0xff] }
 0x56e   :  { %11529 = vmatprep.subr.mxu1 %v5049_v25  ;;  %11361 = vmatprep.mubr.f32.mxu0 %v14792_v41  ;;  %v4516_v41 = vld [vmem:[#allocation3 + $0xc9] sm:$0xff]  ;;  %v5031_v52 = vld [vmem:[#allocation3 + $0x73] sm:$0xff] }
 0x56f   :  { %11432 = vmatprep.mubr.f32.mxu1 %v4514_v45  ;;  %11530 = vmatpush3.msra.mxu1 %v5049_v25 }
 0x570   :  { %11464 = vmatprep.subr.mxu0 %v4783_v11  ;;  %11531 = vmatprep.subr.mxu1 %v5048_v57 }
 0x571   :  { %11465 = vmatpush3.msra.mxu0 %v4783_v11  ;;  %11532 = vmatpush3.msra.mxu1 %v5048_v57  ;;  %v4769_v11 = vld [vmem:[#allocation3 + $0x7a] sm:$0xff] }
 0x572   :  { %11362 = vmatmul.mubr.f32.gmra.mxu0 %v14795_v58  ;;  %11433 = vmatmul.mubr.f32.gmra.mxu1 %v4515_v33  ;;  %v5045_v58 = vld [vmem:[%s17969_s3 + $0x808] sm:$0xff]  ;;  %v5032_v57 = vld [vmem:[#allocation3 + $0x7b] sm:$0xff] }
 0x573   :  { %11533 = vmatprep.subr.mxu1 %v5047_v44  ;;  %11364 = vmatprep.mubr.f32.mxu0 %v14806_v15  ;;  %v4517_v15 = vld [vmem:[#allocation3 + $0xd1] sm:$0xff] }
 0x574   :  { %11435 = vmatprep.mubr.f32.mxu1 %v4516_v41  ;;  %11466 = vmatprep.subr.mxu0 %v4782_v40  ;;  %v4770_v41 = vld [vmem:[#allocation3 + $0x82] sm:$0xff] }
 0x575   :  { %11534 = vmatpush3.msra.mxu1 %v5047_v44  ;;  %11467 = vmatpush3.msra.mxu0 %v4782_v40 }
 0x576   :  { %11535 = vmatprep.subr.mxu1 %v5046_v28  ;;  %11365 = vmatmul.mubr.f32.gmra.mxu0 %v14809_v24  ;;  %v4756_v24 = vld [vmem:[#allocation3 + $0x12] sm:$0xff] }
 0x577   :  { %11536 = vmatpush3.msra.mxu1 %v5046_v28  ;;  %11468 = vmatprep.subr.mxu0 %v4781_v4  ;;  %v5033_v28 = vld [vmem:[#allocation3 + $0x83] sm:$0xff] }
 0x578   :  { %11436 = vmatmul.mubr.f32.gmra.mxu1 %v4517_v15  ;;  %11537 = vmatprep.subr.mxu1 %v5045_v58 }
 0x579   :  { %11469 = vmatpush3.msra.mxu0 %v4781_v4  ;;  %11470 = vmatprep.mubr.f32.mxu0 %v4755_v60  ;;  %v5313_v4 = vld [vmem:[%s17969_s3 + $0x8b0] sm:$0xff] }
 0x57a   :  { %11538 = vmatpush3.msra.mxu1 %v5045_v58  ;;  %11541 = vmatprep.mubr.f32.mxu1 %v5018_v50  ;;  %v4771_v60 = vld [vmem:[#allocation3 + $0x8a] sm:$0xff] }
 0x57b   :  { %11539 = vmatprep.subr.mxu1 %v5044_v39  ;;  %11580 = vmatprep.subr.mxu0 %v5322_v47 }
 0x57c   :  { %11540 = vmatpush3.msra.mxu1 %v5044_v39  ;;  %11471 = vmatmul.mubr.f32.vlgmr.msra.gmra.mxu0 %v4756_v24  ;;  %v5034_v39 = vld [vmem:[#allocation3 + $0x8b] sm:$0xff] }
 0x57d   :  { %11542 = vmatmul.mubr.f32.vlgmr.msra.gmra.mxu1 %v5019_v9  ;;  %11581 = vmatpush3.msra.mxu0 %v5322_v47  ;;  %v5312_v24 = vld [vmem:[%s17969_s3 + $0x8a8] sm:$0xff] }
 0x57e   :  { %11473 = vmatprep.mubr.f32.mxu0 %v4757_v6  ;;  %11544 = vmatprep.mubr.f32.mxu1 %v5020_v2  ;;  %v4772_v6 = vld [vmem:[#allocation3 + $0x92] sm:$0xff] }
 0x57f   :  { %11582 = vmatprep.subr.mxu0 %v5321_v16  ;;  %11651 = vmatprep.subr.mxu1 %v15091_v59  ;;  %v5035_v2 = vld [vmem:[#allocation3 + $0x93] sm:$0xff] }
 0x580   :  { %11474 = vmatmul.mubr.f32.gmra.mxu0 %v4758_v29  ;;  %11652 = vmatpush3.msk.msra.mxu1 %vm13509_vm0, %v18292_v31 }
 0x581   :  { %11545 = vmatmul.mubr.f32.gmra.mxu1 %v5021_v54  ;;  %11583 = vmatpush3.msra.mxu0 %v5321_v16 }
 0x582   :  { %11476 = vmatprep.mubr.f32.mxu0 %v4759_v43  ;;  %11547 = vmatprep.mubr.f32.mxu1 %v5022_v17  ;;  %v5311_v43 = vld [vmem:[%s17969_s3 + $0x8a0] sm:$0xff] }
 0x583   :  { %11584 = vmatprep.subr.mxu0 %v5320_v32  ;;  %11653 = vmatprep.subr.mxu1 %v15091_v59 }
 0x584   :  { %11585 = vmatpush3.msra.mxu0 %v5320_v32  ;;  %11654 = vmatpush3.msk.msra.mxu1 %vm13520_vm1, %v18292_v31  ;;  %v4773_v32 = vld [vmem:[#allocation3 + $0x9a] sm:$0xff] }
 0x585   :  { %11477 = vmatmul.mubr.f32.gmra.mxu0 %v4760_v38  ;;  %11548 = vmatmul.mubr.f32.gmra.mxu1 %v5023_v42  ;;  %v5036_v42 = vld [vmem:[#allocation3 + $0x9b] sm:$0xff] }
 0x586   :  { %11479 = vmatprep.mubr.f32.mxu0 %v4761_v35  ;;  %11550 = vmatprep.mubr.f32.mxu1 %v5024_v36  ;;  %v4774_v36 = vld [vmem:[#allocation3 + $0xa2] sm:$0xff] }
 0x587   :  { %11586 = vmatprep.subr.mxu0 %v5319_v12  ;;  %11655 = vmatprep.subr.mxu1 %v15091_v59 }
 0x588   :  { %11587 = vmatpush3.msra.mxu0 %v5319_v12  ;;  %11656 = vmatpush3.msk.msra.mxu1 %vm13544_vm2, %v18292_v31 }
 0x589   :  { %11480 = vmatmul.mubr.f32.gmra.mxu0 %v4762_v30  ;;  %11551 = vmatmul.mubr.f32.gmra.mxu1 %v5025_v1  ;;  %v5310_v30 = vld [vmem:[%s17969_s3 + $0x898] sm:$0xff] }
 0x58a   :  { %11588 = vmatprep.subr.mxu0 %v5318_v63  ;;  %11482 = vmatprep.mubr.f32.mxu0 %v4763_v23  ;;  %v4775_v23 = vld [vmem:[#allocation3 + $0xaa] sm:$0xff] }
 0x58b   :  { %11553 = vmatprep.mubr.f32.mxu1 %v5026_v62  ;;  %11589 = vmatpush3.msra.mxu0 %v5318_v63  ;;  %v5037_v63 = vld [vmem:[#allocation3 + $0xa3] sm:$0xff] }
 0x58c   :  { %11590 = vmatprep.subr.mxu0 %v5317_v3  ;;  %11657 = vmatprep.subr.mxu1 %v15091_v59 }
 0x58d   :  { %11483 = vmatmul.mubr.f32.gmra.mxu0 %v4764_v61  ;;  %11554 = vmatmul.mubr.f32.gmra.mxu1 %v5027_v46  ;;  %v5038_v61 = vld [vmem:[#allocation3 + $0xab] sm:$0xff] }
 0x58e   :  { %11485 = vmatprep.mubr.f32.mxu0 %v4765_v10  ;;  %11556 = vmatprep.mubr.f32.mxu1 %v5028_v22  ;;  %v4776_v22 = vld [vmem:[#allocation3 + $0xb2] sm:$0xff] }
 0x58f   :  { %11591 = vmatpush3.msra.mxu0 %v5317_v3  ;;  %v11046_v34 = vpop.f32.mrf.mxu0  ;;  %v11117_v56 = vpop.f32.mrf.mxu1  ;;  %11658 = vmatpush3.msk.msra.mxu1 %vm13568_vm3, %v18292_v31 }
 0x590   :  { %11592 = vmatprep.subr.mxu0 %v5316_v49  ;;  %v15127_v55 = vadd.f32 %v11117_v56, %v11046_v34  ;;  %11659 = vmatprep.subr.mxu1 %v15091_v59  ;;  %v5309_v34 = vld [vmem:[%s17969_s3 + $0x890] sm:$0xff] }
 0x591   :  { %11486 = vmatmul.mubr.f32.gmra.mxu0 %v4766_v20  ;;  %11557 = vmatmul.mubr.f32.gmra.mxu1 %v5029_v13  ;;  %v15130_v14 = vpop.f32.mrf.mxu0  ;;  %v15132_v8 = vpop.f32.mrf.mxu1  ;;  %v4777_v13 = vld [vmem:[#allocation3 + $0xba] sm:$0xff] }
 0x592   :  { %11593 = vmatpush3.msra.mxu0 %v5316_v49  ;;  %11488 = vmatprep.mubr.f32.mxu0 %v4767_v51  ;;  %v5039_v49 = vld [vmem:[#allocation3 + $0xb3] sm:$0xff] }
 0x593   :  { %11559 = vmatprep.mubr.f32.mxu1 %v5030_v26  ;;  %11594 = vmatprep.subr.mxu0 %v5315_v37  ;;  %v11049_v53 = vpop.f32.mrf.mxu0  ;;  %v11120_v27 = vpop.f32.mrf.mxu1 }
 0x594   :  { %11595 = vmatpush3.msra.mxu0 %v5315_v37  ;;  %v15137_v25 = vadd.f32 %v11120_v27, %v11049_v53  ;;  %11660 = vmatpush3.msk.msra.mxu1 %vm13591_vm4, %v18292_v31  ;;  %v5040_v37 = vld [vmem:[#allocation3 + $0xbb] sm:$0xff] }
 0x595   :  { %11489 = vmatmul.mubr.f32.gmra.mxu0 %v4768_v0  ;;  %11560 = vmatmul.mubr.f32.gmra.mxu1 %v5031_v52  ;;  %v15142_v45 = vpop.f32.mrf.mxu0  ;;  %v15144_v44 = vpop.f32.mrf.mxu1  ;;  %v4778_v0 = vld [vmem:[#allocation3 + $0xc2] sm:$0xff] }
 0x596   :  { %11491 = vmatprep.mubr.f32.mxu0 %v4769_v11  ;;  %11562 = vmatprep.mubr.f32.mxu1 %v5032_v57  ;;  %v5041_v52 = vld [vmem:[#allocation3 + $0xc3] sm:$0xff] }
 0x597   :  { %11596 = vmatprep.subr.mxu0 %v5314_v5  ;;  %v11052_v33 = vpop.f32.mrf.mxu0  ;;  %v11123_v40 = vpop.f32.mrf.mxu1  ;;  %11661 = vmatprep.subr.mxu1 %v15091_v59 }
 0x598   :  { %11597 = vmatpush3.msra.mxu0 %v5314_v5  ;;  %v15150_v58 = vadd.f32 %v11123_v40, %v11052_v33  ;;  %11662 = vmatpush3.msk.msra.mxu1 %vm13615_vm5, %v18292_v31  ;;  %v5308_v5 = vld [vmem:[%s17969_s3 + $0x888] sm:$0xff] }
 0x599   :  { %11492 = vmatmul.mubr.f32.gmra.mxu0 %v4770_v41  ;;  %11563 = vmatmul.mubr.f32.gmra.mxu1 %v5033_v28  ;;  %v15155_v47 = vpop.f32.mrf.mxu0  ;;  %v15157_v50 = vpop.f32.mrf.mxu1  ;;  %v4779_v33 = vld [vmem:[#allocation3 + $0xca] sm:$0xff] }
 0x59a   :  { %11494 = vmatprep.mubr.f32.mxu0 %v4771_v60  ;;  %11565 = vmatprep.mubr.f32.mxu1 %v5034_v39  ;;  %v5042_v40 = vld [vmem:[#allocation3 + $0xcb] sm:$0xff] }
 0x59b   :  { %11598 = vmatprep.subr.mxu0 %v5313_v4  ;;  %v11055_v9 = vpop.f32.mrf.mxu0  ;;  %v11126_v16 = vpop.f32.mrf.mxu1  ;;  %11663 = vmatprep.subr.mxu1 %v15091_v59 }
 0x59c   :  { %11599 = vmatpush3.msra.mxu0 %v5313_v4  ;;  %v15163_v29 = vadd.f32 %v11126_v16, %v11055_v9  ;;  %11664 = vmatpush3.msk.msra.mxu1 %vm13626_vm6, %v18292_v31  ;;  %v5307_v4 = vld [vmem:[%s17969_s3 + $0x880] sm:$0xff]  ;;  %v5043_v9 = vld [vmem:[#allocation3 + $0xd3] sm:$0xff] }
 0x59d   :  { %11495 = vmatmul.mubr.f32.gmra.mxu0 %v4772_v6  ;;  %11566 = vmatmul.mubr.f32.gmra.mxu1 %v5035_v2  ;;  %v15171_v17 = vpop.f32.mrf.mxu0  ;;  %v15173_v38 = vpop.f32.mrf.mxu1  ;;  %v5281_v2 = vld [vmem:[#allocation3 + $0xc] sm:$0xff] }
 0x59e   :  { %11600 = vmatprep.subr.mxu0 %v5312_v24  ;;  %11497 = vmatprep.mubr.f32.mxu0 %v4773_v32 }
 0x59f   :  { %11568 = vmatprep.mubr.f32.mxu1 %v5036_v42  ;;  %11601 = vmatpush3.msra.mxu0 %v5312_v24  ;;  %v11058_v12 = vpop.f32.mrf.mxu0  ;;  %v11129_v35 = vpop.f32.mrf.mxu1  ;;  %v4780_v24 = vld [vmem:[#allocation3 + $0xd2] sm:$0xff] }
 0x5a0   :  { %11602 = vmatprep.subr.mxu0 %v5311_v43  ;;  %v15178_v1 = vadd.f32 %v11129_v35, %v11058_v12  ;;  %11665 = vmatprep.subr.mxu1 %v15091_v59  ;;  %v5282_v35 = vld [vmem:[#allocation3 + $0x14] sm:$0xff] }
 0x5a1   :  { %11498 = vmatmul.mubr.f32.gmra.mxu0 %v4774_v36  ;;  %11569 = vmatmul.mubr.f32.gmra.mxu1 %v5037_v63  ;;  %v15181_v3 = vpop.f32.mrf.mxu0  ;;  %v15183_v62 = vpop.f32.mrf.mxu1 }
 0x5a2   :  { %11603 = vmatpush3.msra.mxu0 %v5311_v43  ;;  %11500 = vmatprep.mubr.f32.mxu0 %v4775_v23 }
 0x5a3   :  { %11571 = vmatprep.mubr.f32.mxu1 %v5038_v61  ;;  %11604 = vmatprep.subr.mxu0 %v5310_v30  ;;  %v11061_v46 = vpop.f32.mrf.mxu0  ;;  %v11132_v10 = vpop.f32.mrf.mxu1 }
 0x5a4   :  { %11605 = vmatpush3.msra.mxu0 %v5310_v30  ;;  %v15188_v56 = vadd.f32 %v11132_v10, %v11061_v46  ;;  %11666 = vmatpush3.msk.msra.mxu1 %vm13650_vm7, %v18292_v31  ;;  %v5283_v30 = vld [vmem:[#allocation3 + $0x1c] sm:$0xff] }
 0x5a5   :  { %11501 = vmatmul.mubr.f32.gmra.mxu0 %v4776_v22  ;;  %11572 = vmatmul.mubr.f32.gmra.mxu1 %v5039_v49  ;;  %v15193_v51 = vpop.f32.mrf.mxu0  ;;  %v15195_v26 = vpop.f32.mrf.mxu1  ;;  %v5284_v22 = vld [vmem:[#allocation3 + $0x24] sm:$0xff] }
 0x5a6   :  { %11503 = vmatprep.mubr.f32.mxu0 %v4777_v13  ;;  %11574 = vmatprep.mubr.f32.mxu1 %v5040_v37  ;;  %v5285_v13 = vld [vmem:[#allocation3 + $0x2c] sm:$0xff] }
 0x5a7   :  { %11606 = vmatprep.subr.mxu0 %v5309_v34  ;;  %v11064_v53 = vpop.f32.mrf.mxu0  ;;  %v11135_v27 = vpop.f32.mrf.mxu1  ;;  %11667 = vmatprep.subr.mxu1 %v15091_v59 }
 0x5a8   :  { %11607 = vmatpush3.msra.mxu0 %v5309_v34  ;;  %v15201_v11 = vadd.f32 %v11135_v27, %v11064_v53  ;;  %11668 = vmatpush3.msk.msra.mxu1 %vm13674_vm8, %v18292_v31  ;;  %v18305_v34 = vld [vmem:[#allocation79_spill] sm:$0xff] }
 0x5a9   :  { %11504 = vmatmul.mubr.f32.gmra.mxu0 %v4778_v0  ;;  %11575 = vmatmul.mubr.f32.gmra.mxu1 %v5041_v52  ;;  %v15206_v41 = vpop.f32.mrf.mxu0  ;;  %v15208_v28 = vpop.f32.mrf.mxu1  ;;  %v5286_v52 = vld [vmem:[#allocation3 + $0x34] sm:$0xff] }
 0x5aa   :  { %11506 = vmatprep.mubr.f32.mxu0 %v4779_v33  ;;  %11577 = vmatprep.mubr.f32.mxu1 %v5042_v40  ;;  %v5287_v33 = vld [vmem:[#allocation3 + $0x3c] sm:$0xff] }
 0x5ab   :  { %11608 = vmatprep.subr.mxu0 %v5308_v5  ;;  %v11067_v60 = vpop.f32.mrf.mxu0  ;;  %v11138_v39 = vpop.f32.mrf.mxu1  ;;  %11669 = vmatprep.subr.mxu1 %v15091_v59 }
 0x5ac   :  { %11609 = vmatpush3.msra.mxu0 %v5308_v5  ;;  %v15214_v16 = vadd.f32 %v11138_v39, %v11067_v60  ;;  %11670 = vmatpush3.msk.msra.mxu1 %vm13721_vm9, %v18292_v31  ;;  %v5295_v39 = vld [vmem:[#allocation3 + $0x7c] sm:$0xff] }
 0x5ad   :  { %11507 = vmatmul.mubr.f32.gmra.mxu0 %v4780_v24  ;;  %11578 = vmatmul.mubr.f32.gmra.mxu1 %v5043_v9  ;;  %v15219_v32 = vpop.f32.mrf.mxu0  ;;  %v15221_v43 = vpop.f32.mrf.mxu1 }
 0x5ae   :  { %11610 = vmatprep.subr.mxu0 %v5307_v4  ;;  %11612 = vmatprep.mubr.f32.mxu0 %v5281_v2  ;;  %v5288_v2 = vld [vmem:[#allocation3 + $0x44] sm:$0xff] }
 0x5af   :  { %11611 = vmatpush3.msra.mxu0 %v5307_v4  ;;  %v11070_v42 = vpop.f32.mrf.mxu0  ;;  %v11141_v12 = vpop.f32.mrf.mxu1  ;;  %11671 = vmatprep.subr.mxu1 %v15091_v59 }
 0x5b0   :  { %v15224_v36 = vadd.f32 %v11141_v12, %v11070_v42  ;;  %11672 = vmatpush3.msk.msra.mxu1 %vm13726_vm10, %v18292_v31  ;;  %11683 = vmatprep.mubr.msk.f32.mxu1 %vm18175_vm13, %v15091_v59  ;;  %vm18306_vm10 = vnez %v18305_v34  ;;  %v5289_v42 = vld [vmem:[#allocation3 + $0x4c] sm:$0xff] }
 0x5b1   :  { %11613 = vmatmul.mubr.f32.vlgmr.msra.gmra.mxu0 %v5282_v35  ;;  %v15231_v23 = vpop.f32.mrf.mxu0  ;;  %v15233_v61 = vpop.f32.mrf.mxu1  ;;  %11673 = vmatprep.subr.mxu1 %v15091_v59 }
 0x5b2   :  { %11615 = vmatprep.mubr.f32.mxu0 %v5283_v30  ;;  %11674 = vmatpush3.msk.msra.mxu1 %vm13740_vm11, %v18292_v31 }
 0x5b3   :  { %v11073_v10 = vpop.f32.mrf.mxu0  ;;  %11675 = vmatprep.subr.mxu1 %v15091_v59 }
 0x5b4   :  { %v11144_v49 = vpop.f32.mrf.mxu1  ;;  %11676 = vmatpush3.msk.msra.mxu1 %vm18306_vm10, %v18292_v31 }
 0x5b5   :  { %11616 = vmatmul.mubr.f32.gmra.mxu0 %v5284_v22  ;;  %v15243_v37 = vadd.f32 %v11144_v49, %v11073_v10  ;;  %v15245_v53 = vpop.f32.mrf.mxu0  ;;  %11677 = vmatprep.subr.mxu1 %v15091_v59  ;;  %v5290_v10 = vld [vmem:[#allocation3 + $0x54] sm:$0xff] }
 0x5b6   :  { %11618 = vmatprep.mubr.f32.mxu0 %v5285_v13  ;;  %v15248_v27 = vpop.f32.mrf.mxu1  ;;  %11678 = vmatpush3.msk.msra.mxu1 %vm13773_vm14, %v18292_v31  ;;  %v5291_v13 = vld [vmem:[#allocation3 + $0x5c] sm:$0xff] }
 0x5b7   :  { %11679 = vmatprep.subr.mxu1 %v15091_v59 }
 0x5b8   :  { %11680 = vmatpush3.msk.msra.mxu1 %vm13789_vm15, %v18292_v31 }
 0x5b9   :  { %11619 = vmatmul.mubr.f32.gmra.mxu0 %v5286_v52  ;;  %v11076_v40 = vpop.f32.mrf.mxu0  ;;  %v11147_v4 = vpop.f32.mrf.mxu1  ;;  %11681 = vmatprep.subr.mxu1 %v15091_v59 }
 0x5ba   :  { %11621 = vmatprep.mubr.f32.mxu0 %v5287_v33  ;;  %v15258_v60 = vadd.f32 %v11147_v4, %v11076_v40  ;;  %11682 = vmatpush3.msk.msra.mxu1 %vm13804_vm12, %v18292_v31  ;;  %v5292_v33 = vld [vmem:[#allocation3 + $0x64] sm:$0xff]  ;;  %v5293_v4 = vld [vmem:[#allocation3 + $0x6c] sm:$0xff] }
 0x5bb   :  { %v15263_v24 = vpop.f32.mrf.mxu0  ;;  %v15265_v9 = vpop.f32.mrf.mxu1  ;;  %11686 = vmatprep.subr.mxu1 %v15091_v59 }
 0x5bd   :  { %11622 = vmatmul.mubr.f32.gmra.mxu0 %v5288_v2 }
 0x5be   :  { %11624 = vmatprep.mubr.f32.mxu0 %v5289_v42  ;;  %v11079_v12 = vpop.f32.mrf.mxu0  ;;  %v11150_v35 = vpop.f32.mrf.mxu1 }
 0x5bf   :  { %v15268_v30 = vadd.f32 %v11150_v35, %v11079_v12  ;;  %v5294_v12 = vld [vmem:[#allocation3 + $0x74] sm:$0xff] }
 0x5c0   :  { %v15270_v22 = vpop.f32.mrf.mxu0  ;;  %v15272_v49 = vpop.f32.mrf.mxu1 }
 0x5c1   :  { %11625 = vmatmul.mubr.f32.gmra.mxu0 %v5290_v10 }
 0x5c2   :  { %11627 = vmatprep.mubr.f32.mxu0 %v5291_v13  ;;  %v11082_v52 = vpop.f32.mrf.mxu0 }
 0x5c4   :  { %v11153_v40 = vpop.f32.mrf.mxu1  ;;  %v15274_v59 = vpop.f32.mrf.mxu0 }
 0x5c5   :  { %18310 = vst [vmem:[#allocation10_spill] sm:$0xff] %v15274_v59  ;;  %11628 = vmatmul.mubr.f32.gmra.mxu0 %v5292_v33  ;;  %v15276_v2 = vadd.f32 %v11153_v40, %v11082_v52  ;;  %v5296_v33 = vld [vmem:[#allocation3 + $0x84] sm:$0xff]  ;;  %v5297_v40 = vld [vmem:[#allocation3 + $0x8c] sm:$0xff] }
 0x5c6   :  { %11630 = vmatprep.mubr.f32.mxu0 %v5293_v4  ;;  %v15278_v42 = vpop.f32.mrf.mxu1 }
 0x5c7   :  { %18311 = vst [vmem:[#allocation11_spill] sm:$0xff] %v15278_v42 }
 0x5c8   :  { %v11188_v35 = vpop.f32.mrf.mxu0 }
 0x5c9   :  { %11631 = vmatmul.mubr.f32.gmra.mxu0 %v5294_v12  ;;  %v3941_v10 = vadd.f32 %v11188_v35, %v15127_v55  ;;  %v11259_v5 = vpop.f32.mrf.mxu1 }
 0x5ca   :  { %11633 = vmatprep.mubr.f32.mxu0 %v5295_v39  ;;  %v15281_v13 = vpop.f32.mrf.mxu0  ;;  %v5298_v39 = vld [vmem:[#allocation3 + $0x94] sm:$0xff] }
 0x5cb   :  { %v15283_v0 = vadd.f32 %v11259_v5, %v3941_v10  ;;  %v15285_v34 = vpop.f32.mrf.mxu1  ;;  %v5299_v5 = vld [vmem:[#allocation3 + $0x9c] sm:$0xff] }
 0x5cc   :  { %v11191_v52 = vpop.f32.mrf.mxu0 }
 0x5cd   :  { %11634 = vmatmul.mubr.f32.gmra.mxu0 %v5296_v33  ;;  %v3943_v4 = vadd.f32 %v11191_v52, %v15137_v25  ;;  %v11262_v46 = vpop.f32.mrf.mxu1  ;;  %v5300_v25 = vld [vmem:[#allocation3 + $0xa4] sm:$0xff] }
 0x5ce   :  { %11636 = vmatprep.mubr.f32.mxu0 %v5297_v40  ;;  %v15288_v12 = vpop.f32.mrf.mxu0 }
 0x5cf   :  { %v15290_v63 = vadd.f32 %v11262_v46, %v3943_v4  ;;  %v15292_v55 = vpop.f32.mrf.mxu1  ;;  %v5301_v46 = vld [vmem:[#allocation3 + $0xac] sm:$0xff] }
 0x5d1   :  { %11637 = vmatmul.mubr.f32.gmra.mxu0 %v5298_v39  ;;  %v11194_v35 = vpop.f32.mrf.mxu0  ;;  %v11265_v10 = vpop.f32.mrf.mxu1 }
 0x5d2   :  { %11639 = vmatprep.mubr.f32.mxu0 %v5299_v5  ;;  %v3945_v6 = vadd.f32 %v11194_v35, %v15150_v58  ;;  %v5302_v5 = vld [vmem:[#allocation3 + $0xb4] sm:$0xff]  ;;  %v5303_v35 = vld [vmem:[#allocation3 + $0xbc] sm:$0xff] }
 0x5d3   :  { %v15295_v33 = vpop.f32.mrf.mxu0  ;;  %v15297_v57 = vpop.f32.mrf.mxu1 }
 0x5d4   :  { %v15299_v52 = vadd.f32 %v11265_v10, %v3945_v6 }
 0x5d5   :  { %11640 = vmatmul.mubr.f32.gmra.mxu0 %v5300_v25  ;;  %v11197_v40 = vpop.f32.mrf.mxu0  ;;  %v11268_v4 = vpop.f32.mrf.mxu1 }
 0x5d6   :  { %11642 = vmatprep.mubr.f32.mxu0 %v5301_v46  ;;  %v3947_v39 = vadd.f32 %v11197_v40, %v15163_v29  ;;  %v5304_v46 = vld [vmem:[#allocation3 + $0xc4] sm:$0xff]  ;;  %v5305_v40 = vld [vmem:[#allocation3 + $0xcc] sm:$0xff] }
 0x5d7   :  { %v15302_v20 = vpop.f32.mrf.mxu0  ;;  %v15304_v54 = vpop.f32.mrf.mxu1 }
 0x5d8   :  { %18312 = vst [vmem:[#allocation30_spill] sm:$0xff] %v15304_v54  ;;  %v15306_v58 = vadd.f32 %v11268_v4, %v3947_v39 }
 0x5d9   :  { %11643 = vmatmul.mubr.f32.gmra.mxu0 %v5302_v5  ;;  %v11200_v15 = vpop.f32.mrf.mxu0  ;;  %v11271_v21 = vpop.f32.mrf.mxu1 }
 0x5da   :  { %11645 = vmatprep.mubr.f32.mxu0 %v5303_v35  ;;  %v3949_v6 = vadd.f32 %v11200_v15, %v15178_v1  ;;  %v5306_v35 = vld [vmem:[#allocation3 + $0xd4] sm:$0xff] }
 0x5db   :  { %v15309_v10 = vpop.f32.mrf.mxu0  ;;  %v15311_v25 = vpop.f32.mrf.mxu1 }
 0x5dc   :  { %18313 = vst [vmem:[#allocation14_spill] sm:$0xff] %v15311_v25  ;;  %v15313_v29 = vadd.f32 %v11271_v21, %v3949_v6 }
 0x5dd   :  { %11646 = vmatmul.mubr.f32.gmra.mxu0 %v5304_v46  ;;  %v11203_v19 = vpop.f32.mrf.mxu0  ;;  %v11274_v18 = vpop.f32.mrf.mxu1 }
 0x5de   :  { %11648 = vmatprep.mubr.f32.mxu0 %v5305_v40  ;;  %v3951_v4 = vadd.f32 %v11203_v19, %v15188_v56 }
 0x5df   :  { %v15316_v39 = vpop.f32.mrf.mxu0  ;;  %v15318_v5 = vpop.f32.mrf.mxu1 }
 0x5e0   :  { %18314 = vst [vmem:[#allocation13_spill] sm:$0xff] %v15318_v5  ;;  %v15320_v15 = vadd.f32 %v11274_v18, %v3951_v4 }
 0x5e1   :  { %11649 = vmatmul.mubr.f32.gmra.mxu0 %v5306_v35  ;;  %v11206_v1 = vpop.f32.mrf.mxu0  ;;  %v11277_v7 = vpop.f32.mrf.mxu1 }
 0x5e2   :  { %v3953_v21 = vadd.f32 %v11206_v1, %v15201_v11 }
 0x5e3   :  { %v15323_v6 = vpop.f32.mrf.mxu0  ;;  %v15325_v46 = vpop.f32.mrf.mxu1 }
 0x5e4   :  { %18315 = vst [vmem:[#allocation16_spill] sm:$0xff] %v15323_v6  ;;  %18316 = vst [vmem:[#allocation31_spill] sm:$0xff] %v15325_v46  ;;  %v15327_v48 = vadd.f32 %v11277_v7, %v3953_v21 }
 0x5e5   :  { %v11209_v40 = vpop.f32.mrf.mxu0  ;;  %v11280_v19 = vpop.f32.mrf.mxu1 }
 0x5e6   :  { %v3955_v56 = vadd.f32 %v11209_v40, %v15214_v16 }
 0x5e7   :  { %v15330_v31 = vpop.f32.mrf.mxu0  ;;  %v15332_v5 = vpop.f32.mrf.mxu1 }
 0x5e8   :  { %18317 = vst [vmem:[#allocation18_spill] sm:$0xff] %v15330_v31  ;;  %18318 = vst [vmem:[#allocation15_spill] sm:$0xff] %v15332_v5  ;;  %v15334_v18 = vadd.f32 %v11280_v19, %v3955_v56 }
 0x5e9   :  { %v11212_v4 = vpop.f32.mrf.mxu0  ;;  %v11283_v35 = vpop.f32.mrf.mxu1 }
 0x5ea   :  { %v3957_v11 = vadd.f32 %v11212_v4, %v15224_v36 }
 0x5eb   :  { %v15337_v1 = vpop.f32.mrf.mxu0  ;;  %v15339_v25 = vpop.f32.mrf.mxu1 }
 0x5ec   :  { %18319 = vst [vmem:[#allocation84_spill] sm:$0xff] %v15337_v1  ;;  %18320 = vst [vmem:[#allocation17_spill] sm:$0xff] %v15339_v25  ;;  %v15341_v7 = vadd.f32 %v11283_v35, %v3957_v11 }
 0x5ed   :  { %v11215_v21 = vpop.f32.mrf.mxu0 }
 0x5ee   :  { %v3959_v46 = vadd.f32 %v11215_v21, %v15243_v37  ;;  %v11286_v16 = vpop.f32.mrf.mxu1 }
 0x5ef   :  { %v15344_v40 = vpop.f32.mrf.mxu0 }
 0x5f0   :  { %18321 = vst [vmem:[#allocation35_spill] sm:$0xff] %v15344_v40  ;;  %v15346_v31 = vadd.f32 %v11286_v16, %v3959_v46  ;;  %v15348_v19 = vpop.f32.mrf.mxu1 }
 0x5f1   :  { %18322 = vst [vmem:[#allocation33_spill] sm:$0xff] %v15348_v19 }
 0x5f3   :  { %v11218_v56 = vpop.f32.mrf.mxu0  ;;  %v11289_v5 = vpop.f32.mrf.mxu1 }
 0x5f4   :  { %v3961_v36 = vadd.f32 %v11218_v56, %v15258_v60 }
 0x5f5   :  { %v15351_v4 = vpop.f32.mrf.mxu0  ;;  %v15353_v1 = vpop.f32.mrf.mxu1 }
 0x5f6   :  { %18323 = vst [vmem:[#allocation87_spill] sm:$0xff] %v15351_v4  ;;  %18324 = vst [vmem:[#allocation83_spill] sm:$0xff] %v15353_v1  ;;  %v15355_v35 = vadd.f32 %v11289_v5, %v3961_v36 }
 0x5f8   :  { %v11221_v11 = vpop.f32.mrf.mxu0  ;;  %v11292_v25 = vpop.f32.mrf.mxu1 }
 0x5f9   :  { %v3963_v37 = vadd.f32 %v11221_v11, %v15268_v30 }
 0x5fa   :  { %v15358_v21 = vpop.f32.mrf.mxu0  ;;  %v15360_v46 = vpop.f32.mrf.mxu1 }
 0x5fb   :  { %18325 = vst [vmem:[#allocation19_spill] sm:$0xff] %v15358_v21  ;;  %18326 = vst [vmem:[#allocation36_spill] sm:$0xff] %v15360_v46  ;;  %v15362_v16 = vadd.f32 %v11292_v25, %v3963_v37 }
 0x5fc   :  { %v11224_v19 = vpop.f32.mrf.mxu0 }
 0x5fd   :  { %v3965_v40 = vadd.f32 %v11224_v19, %v15276_v2 }
 0x5fe   :  { %v11295_v60 = vpop.f32.mrf.mxu1  ;;  %v15365_v56 = vpop.f32.mrf.mxu0 }
 0x5ff   :  { %18327 = vst [vmem:[#allocation40_spill] sm:$0xff] %v15365_v56  ;;  %v15367_v4 = vadd.f32 %v11295_v60, %v3965_v40 }
 0x600   :  { %v15369_v5 = vpop.f32.mrf.mxu1 }
 0x601   :  { %18328 = vst [vmem:[#allocation85_spill] sm:$0xff] %v15369_v5 }
 0x602   :  { %v11330_v36 = vpop.f32.mrf.mxu0 }
 0x603   :  { %v15372_v1 = vadd.f32 %v11330_v36, %v15283_v0  ;;  %v15374_v30 = vpop.f32.mrf.mxu1 }
 0x604   :  { %v15376_v11 = vpop.f32.mrf.mxu0 }
 0x605   :  { %v15378_v25 = vpop.f32.mrf.mxu1 }
 0x606   :  { %v11333_v37 = vpop.f32.mrf.mxu0 }
 0x607   :  { %v15381_v2 = vadd.f32 %v11333_v37, %v15290_v63  ;;  %v15383_v19 = vpop.f32.mrf.mxu1 }
 0x608   :  { %v15385_v40 = vpop.f32.mrf.mxu0 }
 0x609   :  { %v15387_v60 = vpop.f32.mrf.mxu1 }
 0x60b   :  { %v11336_v5 = vpop.f32.mrf.mxu0  ;;  %v15389_v56 = vpop.f32.mrf.mxu1 }
 0x60c   :  { %18329 = vst [vmem:[#allocation39_spill] sm:$0xff] %v15389_v56  ;;  %v15392_v0 = vadd.f32 %v11336_v5, %v15299_v52 }
 0x60d   :  { %v15394_v36 = vpop.f32.mrf.mxu0  ;;  %v15396_v46 = vpop.f32.mrf.mxu1 }
 0x60e   :  { %18330 = vst [vmem:[#allocation38_spill] sm:$0xff] %v15392_v0  ;;  %18331 = vst [vmem:[#allocation92_spill] sm:$0xff] %v15396_v46 }
 0x60f   :  { %v11339_v21 = vpop.f32.mrf.mxu0  ;;  %v15398_v6 = vpop.f32.mrf.mxu1 }
 0x610   :  { %18332 = vst [vmem:[#allocation86_spill] sm:$0xff] %v15398_v6  ;;  %v15401_v63 = vadd.f32 %v11339_v21, %v15306_v58 }
 0x611   :  { %v15403_v37 = vpop.f32.mrf.mxu0  ;;  %v15405_v54 = vpop.f32.mrf.mxu1 }
 0x612   :  { %18333 = vst [vmem:[#allocation20_spill] sm:$0xff] %v15401_v63  ;;  %18334 = vst [vmem:[#allocation41_spill] sm:$0xff] %v15405_v54 }
 0x613   :  { %v11342_v42 = vpop.f32.mrf.mxu0  ;;  %v15407_v59 = vpop.f32.mrf.mxu1 }
 0x614   :  { %18335 = vst [vmem:[#allocation45_spill] sm:$0xff] %v15407_v59  ;;  %v15410_v52 = vadd.f32 %v11342_v42, %v15313_v29 }
 0x615   :  { %v15412_v5 = vpop.f32.mrf.mxu0  ;;  %v15414_v56 = vpop.f32.mrf.mxu1 }
 0x616   :  { %18336 = vst [vmem:[#allocation88_spill] sm:$0xff] %v15410_v52  ;;  %18337 = vst [vmem:[#allocation95_spill] sm:$0xff] %v15412_v5 }
 0x617   :  { %18338 = vst [vmem:[#allocation44_spill] sm:$0xff] %v15414_v56  ;;  %v11345_v46 = vpop.f32.mrf.mxu0  ;;  %v15416_v0 = vpop.f32.mrf.mxu1 }
 0x618   :  { %18339 = vst [vmem:[#allocation43_spill] sm:$0xff] %v15416_v0  ;;  %v15419_v58 = vadd.f32 %v11345_v46, %v15320_v15 }
 0x619   :  { %v15421_v21 = vpop.f32.mrf.mxu0  ;;  %v15423_v6 = vpop.f32.mrf.mxu1 }
 0x61a   :  { %18340 = vst [vmem:[#allocation89_spill] sm:$0xff] %v15419_v58  ;;  %18341 = vst [vmem:[#allocation21_spill] sm:$0xff] %v15421_v21 }
 0x61b   :  { %18342 = vst [vmem:[#allocation46_spill] sm:$0xff] %v15423_v6  ;;  %v11348_v54 = vpop.f32.mrf.mxu0  ;;  %v15425_v63 = vpop.f32.mrf.mxu1 }
 0x61c   :  { %18343 = vst [vmem:[#allocation50_spill] sm:$0xff] %v15425_v63  ;;  %v15428_v42 = vadd.f32 %v11348_v54, %v15327_v48 }
 0x61d   :  { %v15430_v29 = vpop.f32.mrf.mxu0  ;;  %v15432_v59 = vpop.f32.mrf.mxu1 }
 0x61e   :  { %18344 = vst [vmem:[#allocation90_spill] sm:$0xff] %v15428_v42  ;;  %18345 = vst [vmem:[#allocation49_spill] sm:$0xff] %v15430_v29 }
 0x61f   :  { %18346 = vst [vmem:[#allocation48_spill] sm:$0xff] %v15432_v59  ;;  %v11351_v56 = vpop.f32.mrf.mxu0  ;;  %v15434_v52 = vpop.f32.mrf.mxu1 }
 0x620   :  { %18347 = vst [vmem:[#allocation91_spill] sm:$0xff] %v15434_v52  ;;  %v15437_v15 = vadd.f32 %v11351_v56, %v15334_v18 }
 0x621   :  { %v15439_v46 = vpop.f32.mrf.mxu0  ;;  %v15441_v0 = vpop.f32.mrf.mxu1 }
 0x622   :  { %18348 = vst [vmem:[#allocation22_spill] sm:$0xff] %v15437_v15  ;;  %18349 = vst [vmem:[#allocation51_spill] sm:$0xff] %v15439_v46 }
 0x623   :  { %18350 = vst [vmem:[#allocation56_spill] sm:$0xff] %v15441_v0  ;;  %v11354_v6 = vpop.f32.mrf.mxu0  ;;  %v15443_v58 = vpop.f32.mrf.mxu1 }
 0x624   :  { %18351 = vst [vmem:[#allocation93_spill] sm:$0xff] %v15443_v58  ;;  %v15446_v48 = vadd.f32 %v11354_v6, %v15341_v7 }
 0x625   :  { %v15448_v54 = vpop.f32.mrf.mxu0  ;;  %v15450_v63 = vpop.f32.mrf.mxu1 }
 0x626   :  { %18352 = vst [vmem:[#allocation55_spill] sm:$0xff] %v15446_v48  ;;  %18353 = vst [vmem:[#allocation53_spill] sm:$0xff] %v15448_v54 }
 0x627   :  { %18354 = vst [vmem:[#allocation94_spill] sm:$0xff] %v15450_v63  ;;  %v11357_v59 = vpop.f32.mrf.mxu0 }
 0x628   :  { %v15453_v52 = vadd.f32 %v11357_v59, %v15346_v31  ;;  %v15455_v18 = vpop.f32.mrf.mxu1 }
 0x629   :  { %18356 = vst [vmem:[#allocation57_spill] sm:$0xff] %v15455_v18  ;;  %v15457_v56 = vpop.f32.mrf.mxu0 }
 0x62a   :  { %18355 = vst [vmem:[#allocation23_spill] sm:$0xff] %v15453_v52  ;;  %18357 = vst [vmem:[#allocation61_spill] sm:$0xff] %v15457_v56  ;;  %v15459_v15 = vpop.f32.mrf.mxu1 }
 0x62b   :  { %18358 = vst [vmem:[#allocation96_spill] sm:$0xff] %v15459_v15 }
 0x62d   :  { %v11360_v0 = vpop.f32.mrf.mxu0  ;;  %v15461_v46 = vpop.f32.mrf.mxu1 }
 0x62e   :  { %18359 = vst [vmem:[#allocation59_spill] sm:$0xff] %v15461_v46  ;;  %v15464_v6 = vadd.f32 %v11360_v0, %v15355_v35 }
 0x62f   :  { %v15466_v7 = vpop.f32.mrf.mxu0  ;;  %v15468_v58 = vpop.f32.mrf.mxu1 }
 0x630   :  { %18360 = vst [vmem:[#allocation60_spill] sm:$0xff] %v15464_v6  ;;  %18361 = vst [vmem:[#allocation97_spill] sm:$0xff] %v15466_v7 }
 0x631   :  { %18362 = vst [vmem:[#allocation24_spill] sm:$0xff] %v15468_v58 }
 0x632   :  { %v11363_v63 = vpop.f32.mrf.mxu0  ;;  %v15470_v48 = vpop.f32.mrf.mxu1 }
 0x633   :  { %18363 = vst [vmem:[#allocation62_spill] sm:$0xff] %v15470_v48  ;;  %v15473_v31 = vadd.f32 %v11363_v63, %v15362_v16 }
 0x634   :  { %v15475_v59 = vpop.f32.mrf.mxu0  ;;  %v15477_v18 = vpop.f32.mrf.mxu1 }
 0x635   :  { %18364 = vst [vmem:[#allocation66_spill] sm:$0xff] %v15473_v31  ;;  %18365 = vst [vmem:[#allocation65_spill] sm:$0xff] %v15475_v59 }
 0x636   :  { %18366 = vst [vmem:[#allocation64_spill] sm:$0xff] %v15477_v18  ;;  %v11366_v15 = vpop.f32.mrf.mxu0 }
 0x637   :  { %v15480_v46 = vadd.f32 %v11366_v15, %v15367_v4 }
 0x638   :  { %v15482_v35 = vpop.f32.mrf.mxu1  ;;  %v15484_v0 = vpop.f32.mrf.mxu0 }
 0x639   :  { %18367 = vst [vmem:[#allocation98_spill] sm:$0xff] %v15480_v46  ;;  %18368 = vst [vmem:[#allocation25_spill] sm:$0xff] %v15482_v35 }
 0x63a   :  { %18369 = vst [vmem:[#allocation67_spill] sm:$0xff] %v15484_v0  ;;  %v15486_v6 = vpop.f32.mrf.mxu1 }
 0x63b   :  { %18370 = vst [vmem:[#allocation70_spill] sm:$0xff] %v15486_v6 }
 0x63c   :  { %v11472_v58 = vpop.f32.mrf.mxu0 }
 0x63d   :  { %v15488_v7 = vpop.f32.mrf.mxu1 }
 0x63e   :  { %v4863_v48 = vpop.f32.mrf.mxu0 }
 0x63f   :  { %v15490_v16 = vpop.f32.mrf.mxu1 }
 0x640   :  { %v15492_v63 = vpop.f32.mrf.mxu0 }
 0x641   :  { %v15496_v18 = vpop.f32.mrf.mxu1 }
 0x642   :  { %v15494_v31 = vpop.f32.mrf.mxu0 }
 0x643   :  { %v15502_v35 = vpop.f32.mrf.mxu1 }
 0x645   :  { %v15498_v4 = vpop.f32.mrf.mxu0  ;;  %v15508_v0 = vpop.f32.mrf.mxu1 }
 0x646   :  { %18373 = vst [vmem:[#allocation71_spill] sm:$0xff] %v15508_v0 }
 0x647   :  { %v15500_v15 = vpop.f32.mrf.mxu0  ;;  %v15514_v56 = vpop.f32.mrf.mxu1 }
 0x648   :  { %18376 = vst [vmem:[#allocation73_spill] sm:$0xff] %v15514_v56 }
 0x649   :  { %v15504_v46 = vpop.f32.mrf.mxu0  ;;  %v15520_v29 = vpop.f32.mrf.mxu1 }
 0x64a   :  { %18371 = vst [vmem:[#allocation69_spill] sm:$0xff] %v15504_v46 }
 0x64b   :  { %v15506_v6 = vpop.f32.mrf.mxu0  ;;  %v15526_v46 = vpop.f32.mrf.mxu1 }
 0x64c   :  { %18372 = vst [vmem:[#allocation68_spill] sm:$0xff] %v15506_v6  ;;  %18381 = vst [vmem:[#allocation5_spill] sm:$0xff] %v15526_v46 }
 0x64d   :  { %v15510_v59 = vpop.f32.mrf.mxu0 }
 0x64e   :  { %18374 = vst [vmem:[#allocation74_spill] sm:$0xff] %v15510_v59  ;;  %v15532_v59 = vpop.f32.mrf.mxu1 }
 0x64f   :  { %v15512_v52 = vpop.f32.mrf.mxu0  ;;  %18384 = vst [vmem:[#allocation7_spill] sm:$0xff] %v15532_v59 }
 0x650   :  { %18375 = vst [vmem:[#allocation72_spill] sm:$0xff] %v15512_v52 }
 0x651   :  { %v15516_v54 = vpop.f32.mrf.mxu0 }
 0x652   :  { %18377 = vst [vmem:[#allocation75_spill] sm:$0xff] %v15516_v54  ;;  %v15540_v54 = vpop.f32.mrf.mxu1 }
 0x653   :  { %v15518_v42 = vpop.f32.mrf.mxu0 }
 0x654   :  { %18378 = vst [vmem:[#allocation29_spill] sm:$0xff] %v15518_v42  ;;  %v3575_v42 = vadd.f32 %v15132_v8, %v15130_v14  ;;  %v3595_v14 = vadd.f32 %v15157_v50, %v15155_v47  ;;  %v3615_v47 = vadd.f32 %v15183_v62, %v15181_v3  ;;  %v3645_v3 = vadd.f32 %v15221_v43, %v15219_v32 }
 0x655   :  { %v15522_v21 = vpop.f32.mrf.mxu0  ;;  %v3655_v62 = vadd.f32 %v15233_v61, %v15231_v23 }
 0x656   :  { %18379 = vst [vmem:[#allocation4_spill] sm:$0xff] %v15522_v21 }
 0x657   :  { %v15524_v5 = vpop.f32.mrf.mxu0 }
 0x658   :  { %18380 = vst [vmem:[#allocation26_spill] sm:$0xff] %v15524_v5  ;;  %v3940_v5 = vadd.f32 %v15281_v13, %v3575_v42 }
 0x659   :  { %v15528_v6 = vpop.f32.mrf.mxu0 }
 0x65a   :  { %18382 = vst [vmem:[#allocation6_spill] sm:$0xff] %v15528_v6  ;;  %v15549_v6 = vpop.f32.mrf.mxu1 }
 0x65b   :  { %v15530_v0 = vpop.f32.mrf.mxu0 }
 0x65c   :  { %18383 = vst [vmem:[#allocation27_spill] sm:$0xff] %v15530_v0  ;;  %v3585_v0 = vadd.f32 %v15144_v44, %v15142_v45  ;;  %v15560_v42 = vpop.f32.mrf.mxu1 }
 0x65d   :  { %v15534_v52 = vpop.f32.mrf.mxu0 }
 0x65e   :  { %18385 = vst [vmem:[#allocation8_spill] sm:$0xff] %v15534_v52  ;;  %v3942_v52 = vadd.f32 %v15288_v12, %v3585_v0  ;;  %v3605_v12 = vadd.f32 %v15173_v38, %v15171_v17  ;;  %v18394_v0 = vld [vmem:[#allocation14_spill] sm:$0xff] }
 0x65f   :  { %v15536_v56 = vpop.f32.mrf.mxu0 }
 0x660   :  { %18386 = vst [vmem:[#allocation9_spill] sm:$0xff] %v15536_v56  ;;  %v4203_v56 = vadd.f32 %v15285_v34, %v3940_v5  ;;  %v4205_v44 = vadd.f32 %v15292_v55, %v3942_v52  ;;  %v4730_v34 = vadd.f32 %v15374_v30, %v15372_v1  ;;  %v3625_v55 = vadd.f32 %v15195_v26, %v15193_v51  ;;  %v18393_v52 = vld [vmem:[#allocation39_spill] sm:$0xff] }
 0x661   :  { %v15542_v21 = vpop.f32.mrf.mxu0  ;;  %v3635_v1 = vadd.f32 %v15208_v28, %v15206_v41  ;;  %v3946_v38 = vadd.f32 %v15302_v20, %v3605_v12  ;;  %v3665_v51 = vadd.f32 %v15248_v27, %v15245_v53  ;;  %v3948_v26 = vadd.f32 %v15309_v10, %v3615_v47  ;;  %v18388_v27 = vld [vmem:[#allocation10_spill] sm:$0xff]  ;;  %v18389_v10 = vld [vmem:[#allocation11_spill] sm:$0xff] }
 0x662   :  { %v4466_v13 = vadd.f32 %v15376_v11, %v4203_v56  ;;  %v4468_v11 = vadd.f32 %v15385_v40, %v4205_v44  ;;  %v15576_v56 = vpop.f32.mrf.mxu1  ;;  %v15601_v28 = vadd.f32 %v15265_v9, %v15263_v24  ;;  %v15610_v53 = vadd.f32 %v15272_v49, %v15270_v22  ;;  %v18391_v24 = vld [vmem:[#allocation16_spill] sm:$0xff]  ;;  %v18395_v49 = vld [vmem:[#allocation13_spill] sm:$0xff]  ;;  %v18397_v47 = vld [vmem:[#allocation18_spill] sm:$0xff] }
 0x663   :  { %v15545_v46 = vpop.f32.mrf.mxu0  ;;  %v3952_v9 = vadd.f32 %v18391_v24, %v3635_v1  ;;  %v4211_v22 = vadd.f32 %v18394_v0, %v3948_v26  ;;  %v18410_v0 = vld [vmem:[#allocation45_spill] sm:$0xff] }
 0x664   :  { %18387 = vst [vmem:[#allocation12_spill] sm:$0xff] %v15545_v46  ;;  %v3944_v46 = vadd.f32 %v15295_v33, %v3595_v14  ;;  %v4729_v50 = vadd.f32 %v15378_v25, %v4466_v13  ;;  %v4993_v33 = vadd.f32 %v11472_v58, %v4730_v34  ;;  %v4732_v25 = vadd.f32 %v15383_v19, %v15381_v2  ;;  %v15606_v61 = vpop.f32.mrf.mxu1  ;;  %v18390_v2 = vld [vmem:[#allocation30_spill] sm:$0xff]  ;;  %v18396_v14 = vld [vmem:[#allocation92_spill] sm:$0xff] }
 0x665   :  { %v15551_v59 = vpop.f32.mrf.mxu0  ;;  %v4731_v32 = vadd.f32 %v15387_v60, %v4468_v11  ;;  %v4209_v19 = vadd.f32 %v18390_v2, %v3946_v38  ;;  %v18392_v60 = vld [vmem:[#allocation38_spill] sm:$0xff]  ;;  %v15629_v34 = vld [vmem:[%s17970_s4 + $0x2] ss:$0 sm:$0xff]  ;;  %v18405_v2 = vld [vmem:[#allocation69_spill] sm:$0xff] }
 0x666   :  { %v4207_v17 = vadd.f32 %v15297_v57, %v3944_v46  ;;  %v4992_v40 = vadd.f32 %v4863_v48, %v4729_v50  ;;  %v3950_v57 = vadd.f32 %v15316_v39, %v3625_v55  ;;  %v5256_v43 = vadd.f32 %v15488_v7, %v4993_v33  ;;  %v15634_v11 = vpop.f32.mrf.mxu1  ;;  %v18398_v55 = vld [vmem:[#allocation31_spill] sm:$0xff] }
 0x667   :  { %v15557_v8 = vpop.f32.mrf.mxu0  ;;  %v4995_v23 = vadd.f32 %v15492_v63, %v4732_v25  ;;  %v15614_v39 = vadd.f32 %v18389_v10, %v18388_v27  ;;  %v4734_v58 = vadd.f32 %v18393_v52, %v18392_v60  ;;  %v4994_v48 = vadd.f32 %v15494_v31, %v4731_v32  ;;  %v18401_v25 = vld [vmem:[#allocation86_spill] sm:$0xff]  ;;  %v18402_v32 = vld [vmem:[#allocation35_spill] sm:$0xff]  ;;  %v15659_v52 = vld [vmem:[%s17971_s1] sm:$0xff] }
 0x668   :  { %v4470_v20 = vadd.f32 %v15394_v36, %v4207_v17  ;;  %v5255_v46 = vadd.f32 %v15490_v16, %v4992_v40  ;;  %v4213_v63 = vadd.f32 %v18395_v49, %v3950_v57  ;;  %v4472_v44 = vadd.f32 %v15403_v37, %v4209_v19  ;;  %v18399_v17 = vld [vmem:[#allocation84_spill] sm:$0xff]  ;;  %v15654_v60 = vpop.f32.mrf.mxu1  ;;  %v18411_v49 = vld [vmem:[#allocation73_spill] sm:$0xff] }
 0x669   :  { %v15563_v45 = vpop.f32.mrf.mxu0  ;;  %v3954_v50 = vadd.f32 %v18397_v47, %v3645_v3  ;;  %v5258_v16 = vadd.f32 %v15496_v18, %v4995_v23  ;;  %v4997_v31 = vadd.f32 %v15498_v4, %v4734_v58  ;;  %v4215_v1 = vadd.f32 %v18398_v55, %v3952_v9  ;;  %v18400_v37 = vld [vmem:[#allocation20_spill] sm:$0xff]  ;;  %v18403_v23 = vld [vmem:[#allocation41_spill] sm:$0xff] }
 0x66a   :  { %v4733_v13 = vadd.f32 %v18396_v14, %v4470_v20  ;;  %v3956_v38 = vadd.f32 %v18399_v17, %v3655_v62  ;;  %v4736_v40 = vadd.f32 %v18401_v25, %v18400_v37  ;;  %v5257_v20 = vadd.f32 %v15502_v35, %v4994_v48  ;;  %v18404_v62 = vld [vmem:[#allocation95_spill] sm:$0xff]  ;;  %v15673_v47 = vld [vmem:[%s17971_s1 + $0x8] sm:$0xff] }
 0x66b   :  { %v15570_v5 = vpop.f32.mrf.mxu0  ;;  %v4735_v27 = vadd.f32 %v18403_v23, %v4472_v44  ;;  %v4474_v10 = vadd.f32 %v18404_v62, %v4211_v22  ;;  %v18413_v55 = vld [vmem:[#allocation33_spill] sm:$0xff]  ;;  %v15690_v23 = vpop.f32.mrf.mxu1 }
 0x66c   :  { %v4996_v26 = vadd.f32 %v15500_v15, %v4733_v13  ;;  %v4999_v19 = vadd.f32 %v18405_v2, %v4736_v40  ;;  %v18406_v15 = vld [vmem:[#allocation15_spill] sm:$0xff]  ;;  %v18412_v13 = vld [vmem:[#allocation68_spill] sm:$0xff]  ;;  %v18415_v25 = vld [vmem:[#allocation21_spill] sm:$0xff] }
 0x66d   :  { %v15584_v30 = vpop.f32.mrf.mxu0  ;;  %v4217_v9 = vadd.f32 %v18406_v15, %v3954_v50  ;;  %v4998_v44 = vadd.f32 %v18412_v13, %v4735_v27  ;;  %v4476_v40 = vadd.f32 %v18415_v25, %v4213_v63  ;;  %v15695_v27 = vld [vmem:[%s17971_s1 + $0x10] sm:$0xff]  ;;  %v18418_v2 = vld [vmem:[#allocation43_spill] sm:$0xff]  ;;  %v15722_v25 = vpop.f32.mrf.mxu1 }
 0x66e   :  { %v5259_v14 = vadd.f32 %v18411_v49, %v4996_v26  ;;  %v5262_v26 = vadd.f32 %v15520_v29, %v4999_v19  ;;  %v18420_v19 = vld [vmem:[#allocation72_spill] sm:$0xff] }
 0x66f   :  { %v15597_v41 = vpop.f32.mrf.mxu0 }
 0x671   :  { %v11614_v36 = vpop.f32.mrf.mxu0 }
 0x672   :  { %v5519_v7 = vadd.f32 %v11614_v36, %v5256_v43  ;;  %v3958_v43 = vadd.f32 %v18402_v32, %v3665_v51  ;;  %v18407_v36 = vld [vmem:[#allocation71_spill] sm:$0xff] }
 0x673   :  { %v5389_v12 = vpop.f32.mrf.mxu0  ;;  %v5260_v35 = vadd.f32 %v18407_v36, %v4997_v31 }
 0x674   :  { %v5518_v33 = vadd.f32 %v5389_v12, %v5255_v46  ;;  %v15643_v3 = vadd.f32 %v15629_v34, %v5519_v7  ;;  %v18408_v46 = vld [vmem:[#allocation17_spill] sm:$0xff]  ;;  %v18409_v7 = vld [vmem:[#allocation88_spill] sm:$0xff]  ;;  %v15684_v17 = vadd.f32 %v18413_v55, %v3958_v43 }
 0x675   :  { %v11617_v57 = vpop.f32.mrf.mxu0  ;;  %v15664_v48 = vadd.f32 %v18408_v46, %v3956_v38  ;;  %v4738_v22 = vadd.f32 %v18410_v0, %v18409_v7  ;;  %v18414_v38 = vld [vmem:[#allocation44_spill] sm:$0xff] }
 0x676   :  { %v15646_v18 = vadd.f32 %v15629_v34, %v5518_v33  ;;  %v5521_v4 = vadd.f32 %v11617_v57, %v5258_v16  ;;  %v5576_v50 = vmul.f32 %v15673_v47, %v15643_v3  ;;  %v4737_v37 = vadd.f32 %v18414_v38, %v4474_v10  ;;  %v18417_v10 = vld [vmem:[#allocation89_spill] sm:$0xff]  ;;  %v18425_v38 = vld [vmem:[#allocation7_spill] sm:$0xff] }
 0x677   :  { %v5399_v24 = vpop.f32.mrf.mxu0  ;;  %v4740_v63 = vadd.f32 %v18418_v2, %v18417_v10 }
 0x678   :  { %v5575_v51 = vmul.f32 %v15659_v52, %v15646_v18  ;;  %v5520_v58 = vadd.f32 %v5399_v24, %v5257_v20  ;;  %v15678_v16 = vadd.f32 %v15629_v34, %v5521_v4  ;;  %v18416_v20 = vld [vmem:[#allocation74_spill] sm:$0xff]  ;;  %v18419_v24 = vld [vmem:[#allocation5_spill] sm:$0xff]  ;;  %v5000_v15 = vadd.f32 %v18420_v19, %v4737_v37 }
 0x679   :  { %v11620_v12 = vpop.f32.mrf.mxu0  ;;  %v5001_v32 = vadd.f32 %v18416_v20, %v4738_v22  ;;  %v5261_v29 = vadd.f32 %v18419_v24, %v4998_v44  ;;  %v18421_v22 = vld [vmem:[#allocation87_spill] sm:$0xff]  ;;  %v18423_v44 = vld [vmem:[#allocation49_spill] sm:$0xff] }
 0x67a   :  { %v15681_v31 = vadd.f32 %v15629_v34, %v5520_v58  ;;  %v5523_v33 = vadd.f32 %v11620_v12, %v5260_v35  ;;  %v5601_v4 = vadd.f32 %v5576_v50, %v5575_v51  ;;  %v15709_v51 = vld [vmem:[%s17971_s1 + $0x18] sm:$0xff]  ;;  %v3960_v49 = vadd.f32 %v18421_v22, %v15601_v28 }
 0x67b   :  { %v5409_v57 = vpop.f32.mrf.mxu0  ;;  %v5578_v58 = vmul.f32 %v15709_v51, %v15678_v16  ;;  %v4478_v12 = vadd.f32 %v18423_v44, %v4215_v1  ;;  %v18424_v50 = vld [vmem:[#allocation75_spill] sm:$0xff]  ;;  %v5264_v37 = vadd.f32 %v18425_v38, %v5001_v32  ;;  %v15738_v32 = vld [vmem:[%s17971_s1 + $0x28] sm:$0xff]  ;;  %v15755_v38 = vpop.f32.mrf.mxu1 }
 0x67c   :  { %v5577_v43 = vmul.f32 %v15695_v27, %v15681_v31  ;;  %v5522_v62 = vadd.f32 %v5409_v57, %v5259_v14  ;;  %v15704_v36 = vadd.f32 %v15629_v34, %v5523_v33  ;;  %v18422_v14 = vld [vmem:[#allocation46_spill] sm:$0xff]  ;;  %v5003_v33 = vadd.f32 %v18424_v50, %v4740_v63  ;;  %v15727_v57 = vld [vmem:[%s17971_s1 + $0x20] sm:$0xff]  ;;  %v18431_v22 = vld [vmem:[#allocation51_spill] sm:$0xff] }
 0x67d   :  { %v11623_v35 = vpop.f32.mrf.mxu0  ;;  %v4739_v13 = vadd.f32 %v18422_v14, %v4476_v40  ;;  %v18426_v40 = vld [vmem:[#allocation90_spill] sm:$0xff]  ;;  %v4480_v14 = vadd.f32 %v18431_v22, %v4217_v9  ;;  %v18432_v50 = vld [vmem:[#allocation4_spill] sm:$0xff] }
 0x67e   :  { %v5602_v46 = vadd.f32 %v5601_v4, %v5577_v43  ;;  %v15714_v7 = vadd.f32 %v15629_v34, %v5522_v62  ;;  %v5525_v0 = vadd.f32 %v11623_v35, %v5262_v26  ;;  %v18427_v4 = vld [vmem:[#allocation50_spill] sm:$0xff]  ;;  %v5263_v43 = vadd.f32 %v15540_v54, %v5000_v15  ;;  %v18428_v62 = vld [vmem:[#allocation29_spill] sm:$0xff]  ;;  %v18429_v54 = vld [vmem:[#allocation83_spill] sm:$0xff] }
 0x67f   :  { %v5419_v55 = vpop.f32.mrf.mxu0  ;;  %v4742_v1 = vadd.f32 %v18427_v4, %v18426_v40  ;;  %v5002_v10 = vadd.f32 %v18428_v62, %v4739_v13  ;;  %v5580_v2 = vmul.f32 %v15738_v32, %v15704_v36  ;;  %v15749_v15 = vadd.f32 %v18429_v54, %v3960_v49  ;;  %v18438_v54 = vld [vmem:[#allocation53_spill] sm:$0xff] }
 0x680   :  { %v5579_v26 = vmul.f32 %v15727_v57, %v15714_v7  ;;  %v5603_v28 = vadd.f32 %v5602_v46, %v5578_v58  ;;  %v5524_v20 = vadd.f32 %v5419_v55, %v5261_v29  ;;  %v15743_v19 = vadd.f32 %v15629_v34, %v5525_v0  ;;  %v18430_v58 = vld [vmem:[#allocation48_spill] sm:$0xff]  ;;  %v15760_v0 = vld [vmem:[%s17971_s1 + $0x30] sm:$0xff] }
 0x681   :  { %v11626_v63 = vpop.f32.mrf.mxu0  ;;  %v4741_v46 = vadd.f32 %v18430_v58, %v4478_v12  ;;  %v5266_v13 = vadd.f32 %v15549_v6, %v5003_v33  ;;  %v5005_v55 = vadd.f32 %v18432_v50, %v4742_v1  ;;  %v18433_v12 = vld [vmem:[#allocation22_spill] sm:$0xff]  ;;  %v5265_v6 = vadd.f32 %v15560_v42, %v5002_v10  ;;  %v15774_v1 = vld [vmem:[%s17971_s1 + $0x38] sm:$0xff] }
 0x682   :  { %v5604_v24 = vadd.f32 %v5603_v28, %v5579_v26  ;;  %v15746_v29 = vadd.f32 %v15629_v34, %v5524_v20  ;;  %v5527_v35 = vadd.f32 %v11626_v63, %v5264_v37  ;;  %v18434_v28 = vld [vmem:[#allocation91_spill] sm:$0xff]  ;;  %v18435_v33 = vld [vmem:[#allocation26_spill] sm:$0xff]  ;;  %v5582_v62 = vmul.f32 %v15774_v1, %v15743_v19 }
 0x683   :  { %v5429_v44 = vpop.f32.mrf.mxu0  ;;  %v4744_v9 = vadd.f32 %v18434_v28, %v18433_v12  ;;  %v5004_v20 = vadd.f32 %v18435_v33, %v4741_v46  ;;  %v18436_v42 = vld [vmem:[#allocation19_spill] sm:$0xff]  ;;  %v4482_v58 = vadd.f32 %v18438_v54, %v15664_v48  ;;  %v18439_v46 = vld [vmem:[#allocation6_spill] sm:$0xff]  ;;  %v5268_v50 = vadd.f32 %v15576_v56, %v5005_v55  ;;  %v15788_v12 = vpop.f32.mrf.mxu1  ;;  %v15804_v56 = vld [vmem:[%s17971_s1 + $0x48] sm:$0xff] }
 0x684   :  { %v5581_v49 = vmul.f32 %v15760_v0, %v15746_v29  ;;  %v5605_v37 = vadd.f32 %v5604_v24, %v5580_v2  ;;  %v5526_v26 = vadd.f32 %v5429_v44, %v5263_v43  ;;  %v15769_v40 = vadd.f32 %v15629_v34, %v5527_v35  ;;  %v18437_v24 = vld [vmem:[#allocation56_spill] sm:$0xff]  ;;  %v18445_v54 = vld [vmem:[#allocation61_spill] sm:$0xff] }
 0x685   :  { %v11629_v4 = vpop.f32.mrf.mxu0  ;;  %v3962_v10 = vadd.f32 %v18436_v42, %v15610_v53  ;;  %v4743_v35 = vadd.f32 %v18437_v24, %v4480_v14  ;;  %v5007_v22 = vadd.f32 %v18439_v46, %v4744_v9  ;;  %v5267_v28 = vadd.f32 %v15606_v61, %v5004_v20  ;;  %v18442_v9 = vld [vmem:[#allocation27_spill] sm:$0xff]  ;;  %v18443_v61 = vld [vmem:[#allocation36_spill] sm:$0xff]  ;;  %v18444_v24 = vld [vmem:[#allocation94_spill] sm:$0xff] }
 0x686   :  { %v5606_v43 = vadd.f32 %v5605_v37, %v5581_v49  ;;  %v15779_v2 = vadd.f32 %v15629_v34, %v5526_v26  ;;  %v5529_v63 = vadd.f32 %v11629_v4, %v5266_v13  ;;  %v15793_v49 = vld [vmem:[%s17971_s1 + $0x40] sm:$0xff]  ;;  %v18440_v37 = vld [vmem:[#allocation55_spill] sm:$0xff]  ;;  %v18441_v26 = vld [vmem:[#allocation93_spill] sm:$0xff]  ;;  %v5584_v55 = vmul.f32 %v15804_v56, %v15769_v40 }
 0x687   :  { %v5439_v44 = vpop.f32.mrf.mxu0  ;;  %v4746_v48 = vadd.f32 %v18441_v26, %v18440_v37  ;;  %v5006_v33 = vadd.f32 %v18442_v9, %v4743_v35  ;;  %v4225_v20 = vadd.f32 %v18443_v61, %v3962_v10  ;;  %v4745_v35 = vadd.f32 %v18444_v24, %v4482_v58  ;;  %v18446_v26 = vld [vmem:[#allocation8_spill] sm:$0xff]  ;;  %v18448_v58 = vld [vmem:[#allocation23_spill] sm:$0xff] }
 0x688   :  { %v5583_v53 = vmul.f32 %v15793_v49, %v15779_v2  ;;  %v5607_v13 = vadd.f32 %v5606_v43, %v5582_v62  ;;  %v5528_v14 = vadd.f32 %v5439_v44, %v5265_v6  ;;  %v15809_v62 = vadd.f32 %v15629_v34, %v5529_v63  ;;  %v15823_v63 = vld [vmem:[%s17971_s1 + $0x50] sm:$0xff]  ;;  %v15837_v24 = vld [vmem:[%s17971_s1 + $0x58] sm:$0xff] }
 0x689   :  { %v11632_v4 = vpop.f32.mrf.mxu0  ;;  %v4484_v46 = vadd.f32 %v18445_v54, %v15684_v17  ;;  %v5270_v44 = vadd.f32 %v15634_v11, %v5007_v22  ;;  %v5009_v9 = vadd.f32 %v18446_v26, %v4746_v48  ;;  %18447 = vst [vmem:[#allocation10_spill] sm:$0xff] %v15823_v63  ;;  %v5269_v17 = vadd.f32 %v15654_v60, %v5006_v33  ;;  %v18450_v11 = vld [vmem:[#allocation9_spill] sm:$0xff]  ;;  %v18452_v60 = vld [vmem:[#allocation40_spill] sm:$0xff] }
 0x68a   :  { %v5608_v42 = vadd.f32 %v5607_v13, %v5583_v53  ;;  %v15812_v6 = vadd.f32 %v15629_v34, %v5528_v14  ;;  %v5531_v43 = vadd.f32 %v11632_v4, %v5268_v50  ;;  %v11573_v53 = vpop.f32.mrf.mxu1  ;;  %v18449_v14 = vld [vmem:[#allocation57_spill] sm:$0xff]  ;;  %v5008_v22 = vadd.f32 %v18450_v11, %v4745_v35  ;;  %18451 = vst [vmem:[#allocation11_spill] sm:$0xff] %v15837_v24  ;;  %v18453_v35 = vld [vmem:[#allocation96_spill] sm:$0xff] }
 0x68b   :  { %v5449_v37 = vpop.f32.mrf.mxu0  ;;  %v4748_v4 = vadd.f32 %v18449_v14, %v18448_v58  ;;  %v3964_v33 = vadd.f32 %v18452_v60, %v15614_v39  ;;  %v5272_v11 = vadd.f32 %v15690_v23, %v5009_v9  ;;  %v15865_v23 = vld [vmem:[%s17971_s1 + $0x68] sm:$0xff] }
 0x68c   :  { %v5585_v50 = vmul.f32 %v15823_v63, %v15812_v6  ;;  %v5609_v10 = vadd.f32 %v5608_v42, %v5584_v55  ;;  %v5530_v13 = vadd.f32 %v5449_v37, %v5267_v28  ;;  %v15832_v48 = vadd.f32 %v15629_v34, %v5531_v43  ;;  %v18454_v37 = vld [vmem:[#allocation97_spill] sm:$0xff]  ;;  %v5226_v63 = vpop.f32.mrf.mxu1  ;;  %18459 = vst [vmem:[#allocation16_spill] sm:$0xff] %v15865_v23 }
 0x68d   :  { %v11635_v61 = vpop.f32.mrf.mxu0  ;;  %v5586_v55 = vmul.f32 %v15837_v24, %v15809_v62  ;;  %v4747_v43 = vadd.f32 %v18453_v35, %v4484_v46  ;;  %v4486_v26 = vadd.f32 %v18454_v37, %v15749_v15  ;;  %v5011_v58 = vadd.f32 %v15542_v21, %v4748_v4  ;;  %v18456_v46 = vld [vmem:[#allocation60_spill] sm:$0xff] }
 0x68e   :  { %v5610_v28 = vadd.f32 %v5609_v10, %v5585_v50  ;;  %v15842_v42 = vadd.f32 %v15629_v34, %v5530_v13  ;;  %v5533_v54 = vadd.f32 %v11635_v61, %v5270_v44  ;;  %v15854_v50 = vld [vmem:[%s17971_s1 + $0x60] sm:$0xff]  ;;  %v18457_v13 = vld [vmem:[#allocation59_spill] sm:$0xff]  ;;  %v5271_v15 = vadd.f32 %v15722_v25, %v5008_v22  ;;  %v18460_v25 = vld [vmem:[#allocation85_spill] sm:$0xff] }
 0x68f   :  { %v5459_v14 = vpop.f32.mrf.mxu0  ;;  %18455 = vst [vmem:[#allocation30_spill] sm:$0xff] %v15854_v50  ;;  %v4750_v61 = vadd.f32 %v18457_v13, %v18456_v46  ;;  %v18458_v21 = vld [vmem:[#allocation12_spill] sm:$0xff]  ;;  %v5588_v9 = vmul.f32 %v15865_v23, %v15832_v48  ;;  %v4227_v22 = vadd.f32 %v18460_v25, %v3964_v33  ;;  %v5274_v13 = vadd.f32 %v15755_v38, %v5011_v58 }
 0x690   :  { %v5587_v44 = vmul.f32 %v15854_v50, %v15842_v42  ;;  %v5611_v39 = vadd.f32 %v5610_v28, %v5586_v55  ;;  %v5532_v10 = vadd.f32 %v5459_v14, %v5269_v17  ;;  %v5010_v4 = vadd.f32 %v18458_v21, %v4747_v43  ;;  %v18461_v43 = vld [vmem:[#allocation24_spill] sm:$0xff]  ;;  %v18462_v14 = vld [vmem:[#allocation65_spill] sm:$0xff]  ;;  %v11576_v50 = vpop.f32.mrf.mxu1 }
 0x691   :  { %v11638_v60 = vpop.f32.mrf.mxu0  ;;  %v15870_v55 = vadd.f32 %v15629_v34, %v5533_v54  ;;  %v4749_v37 = vadd.f32 %v18461_v43, %v4486_v26  ;;  %v4488_v46 = vadd.f32 %v18462_v14, %v4225_v20  ;;  %v5013_v23 = vadd.f32 %v15551_v59, %v4750_v61  ;;  %v15883_v54 = vld [vmem:[%s17971_s1 + $0x70] sm:$0xff]  ;;  %v15897_v61 = vld [vmem:[%s17971_s1 + $0x78] sm:$0xff] }
 0x692   :  { %v5612_v35 = vadd.f32 %v5611_v39, %v5587_v44  ;;  %v15873_v17 = vadd.f32 %v15629_v34, %v5532_v10  ;;  %v5535_v28 = vadd.f32 %v11638_v60, %v5272_v11  ;;  %v18463_v39 = vld [vmem:[#allocation66_spill] sm:$0xff]  ;;  %v5273_v20 = vadd.f32 %v15788_v12, %v5010_v4  ;;  %v18465_v12 = vld [vmem:[#allocation64_spill] sm:$0xff]  ;;  %v5236_v14 = vpop.f32.mrf.mxu1 }
 0x693   :  { %v5469_v21 = vpop.f32.mrf.mxu0  ;;  %v18464_v26 = vld [vmem:[#allocation62_spill] sm:$0xff]  ;;  %v5012_v38 = vadd.f32 %v15557_v8, %v4749_v37  ;;  %v4751_v4 = vadd.f32 %v18465_v12, %v4488_v46  ;;  %v18466_v8 = vld [vmem:[#allocation67_spill] sm:$0xff]  ;;  %v5276_v37 = vadd.f32 %v11573_v53, %v5013_v23 }
 0x694   :  { %v5589_v11 = vmul.f32 %v15883_v54, %v15873_v17  ;;  %v5613_v44 = vadd.f32 %v5612_v35, %v5588_v9  ;;  %v5534_v33 = vadd.f32 %v5469_v21, %v5271_v15  ;;  %v4752_v10 = vadd.f32 %v18464_v26, %v18463_v39  ;;  %v15910_v21 = vld [vmem:[%s17971_s1 + $0x80] sm:$0xff]  ;;  %v18468_v39 = vld [vmem:[#allocation25_spill] sm:$0xff] }
 0x695   :  { %v15892_v59 = vadd.f32 %v15629_v34, %v5535_v28  ;;  %v11641_v58 = vpop.f32.mrf.mxu0  ;;  %v5590_v9 = vmul.f32 %v15897_v61, %v15870_v55  ;;  %v4490_v25 = vadd.f32 %v18466_v8, %v4227_v22  ;;  %v5275_v26 = vadd.f32 %v5226_v63, %v5012_v38  ;;  %v18469_v63 = vld [vmem:[#allocation70_spill] sm:$0xff] }
 0x696   :  { %v5614_v15 = vadd.f32 %v5613_v44, %v5589_v11  ;;  %v15902_v60 = vadd.f32 %v15629_v34, %v5534_v33  ;;  %v5537_v35 = vadd.f32 %v11641_v58, %v5274_v13  ;;  %v5015_v28 = vadd.f32 %v15563_v45, %v4752_v10  ;;  %v18467_v13 = vld [vmem:[#allocation98_spill] sm:$0xff]  ;;  %v15920_v45 = vld [vmem:[%s17971_s1 + $0x88] sm:$0xff] }
 0x697   :  { %v5479_v43 = vpop.f32.mrf.mxu0  ;;  %v4754_v46 = vadd.f32 %v18468_v39, %v18467_v13  ;;  %v5014_v22 = vadd.f32 %v15570_v5, %v4751_v4  ;;  %v5592_v53 = vmul.f32 %v15920_v45, %v15892_v59  ;;  %v4753_v38 = vadd.f32 %v18469_v63, %v4490_v25  ;;  %v11579_v4 = vpop.f32.mrf.mxu1  ;;  %v15935_v8 = vld [vmem:[%s17971_s1 + $0x90] sm:$0xff] }
 0x698   :  { %v5591_v11 = vmul.f32 %v15910_v21, %v15902_v60  ;;  %v5615_v44 = vadd.f32 %v5614_v15, %v5590_v9  ;;  %v5536_v33 = vadd.f32 %v5479_v43, %v5273_v20  ;;  %v15925_v58 = vadd.f32 %v15629_v34, %v5537_v35 }
 0x699   :  { %v11644_v23 = vpop.f32.mrf.mxu0  ;;  %v5278_v5 = vadd.f32 %v11576_v50, %v5015_v28  ;;  %v5017_v12 = vadd.f32 %v15584_v30, %v4754_v46  ;;  %v15946_v30 = vld [vmem:[%s17971_s1 + $0x98] sm:$0xff] }
 0x69a   :  { %v5616_v10 = vadd.f32 %v5615_v44, %v5591_v11  ;;  %v15928_v20 = vadd.f32 %v15629_v34, %v5536_v33  ;;  %v5539_v9 = vadd.f32 %v11644_v23, %v5276_v37  ;;  %v5277_v44 = vadd.f32 %v5236_v14, %v5014_v22 }
 0x69b   :  { %v5489_v15 = vpop.f32.mrf.mxu0  ;;  %v5016_v37 = vadd.f32 %v15597_v41, %v4753_v38  ;;  %v5594_v28 = vmul.f32 %v15946_v30, %v15925_v58  ;;  %v5280_v46 = vadd.f32 %v11579_v4, %v5017_v12  ;;  %v5246_v41 = vpop.f32.mrf.mxu1 }
 0x69c   :  { %v5593_v35 = vmul.f32 %v15935_v8, %v15928_v20  ;;  %v5617_v43 = vadd.f32 %v5616_v10, %v5592_v53  ;;  %v5538_v11 = vadd.f32 %v5489_v15, %v5275_v26  ;;  %v15941_v25 = vadd.f32 %v15629_v34, %v5539_v9  ;;  %v15956_v26 = vld [vmem:[%s17971_s1 + $0xa0] sm:$0xff]  ;;  %v15963_v9 = vld [vmem:[%s17971_s1 + $0xa8] sm:$0xff] }
 0x69d   :  { %v11647_v50 = vpop.f32.mrf.mxu0  ;;  %v5279_v10 = vadd.f32 %v5246_v41, %v5016_v37 }
 0x69e   :  { %v5618_v33 = vadd.f32 %v5617_v43, %v5593_v35  ;;  %v15951_v13 = vadd.f32 %v15629_v34, %v5538_v11  ;;  %v5541_v39 = vadd.f32 %v11647_v50, %v5278_v5  ;;  %v5596_v63 = vmul.f32 %v15963_v9, %v15941_v25  ;;  %v15976_v43 = vld [vmem:[%s17971_s1 + $0xb0] sm:$0xff]  ;;  %v15983_v50 = vld [vmem:[%s17971_s1 + $0xb8] sm:$0xff] }
 0x69f   :  { %v5499_v14 = vpop.f32.mrf.mxu0  ;;  %18470 = vst [vmem:[#allocation38_spill] sm:$0xff] %v15976_v43  ;;  %18471 = vst [vmem:[#allocation39_spill] sm:$0xff] %v15983_v50 }
 0x6a0   :  { %v5595_v22 = vmul.f32 %v15956_v26, %v15951_v13  ;;  %v5619_v53 = vadd.f32 %v5618_v33, %v5594_v28  ;;  %v5540_v23 = vadd.f32 %v5499_v14, %v5277_v44  ;;  %v15968_v15 = vadd.f32 %v15629_v34, %v5541_v39 }
 0x6a1   :  { %v11650_v38 = vpop.f32.mrf.mxu0 }
 0x6a2   :  { %v5620_v5 = vadd.f32 %v5619_v53, %v5595_v22  ;;  %v15971_v12 = vadd.f32 %v15629_v34, %v5540_v23  ;;  %v5543_v4 = vadd.f32 %v11650_v38, %v5280_v46  ;;  %v5598_v28 = vmul.f32 %v15983_v50, %v15968_v15  ;;  %v15996_v46 = vld [vmem:[%s17971_s1 + $0xc0] sm:$0xff]  ;;  %v16003_v53 = vld [vmem:[%s17971_s1 + $0xc8] sm:$0xff] }
 0x6a3   :  { %v5509_v35 = vpop.f32.mrf.mxu0  ;;  %18472 = vst [vmem:[#allocation14_spill] sm:$0xff] %v15996_v46  ;;  %18473 = vst [vmem:[#allocation13_spill] sm:$0xff] %v16003_v53 }
 0x6a4   :  { %v5597_v11 = vmul.f32 %v15976_v43, %v15971_v12  ;;  %v5621_v44 = vadd.f32 %v5620_v5, %v5596_v63  ;;  %v5542_v37 = vadd.f32 %v5509_v35, %v5279_v10  ;;  %v15988_v39 = vadd.f32 %v15629_v34, %v5543_v4 }
 0x6a6   :  { %v5622_v33 = vadd.f32 %v5621_v44, %v5597_v11  ;;  %v15991_v14 = vadd.f32 %v15629_v34, %v5542_v37  ;;  %v5600_v23 = vmul.f32 %v16003_v53, %v15988_v39  ;;  %v18474_v44 = vmov 1.0  }
 0x6a8   :  { %v5599_v41 = vmul.f32 %v15996_v46, %v15991_v14  ;;  %v5623_v22 = vadd.f32 %v5622_v33, %v5598_v28  ;;  %v12503_v28 = vld [vmem:[#allocation2] sm:$0xff] }
 0x6aa   :  { %v5624_v10 = vadd.f32 %v5623_v22, %v5599_v41 }
 0x6ac   :  { %v5625_v34 = vadd.f32 %v5624_v10, %v5600_v23 }
 0x6ae   :  { %v5626_v63 = vrot.slane %v5625_v34, 4 }
 0x6b0   :  { %v5627_v38 = vadd.f32 %v5626_v63, %v5625_v34  ;;  %v18492_v34 = vld [vmem:[#allocation28_spill] sm:$0xff] }
 0x6b2   :  { %v5628_v5 = vrot.slane %v5627_v38, 2 }
 0x6b4   :  { %v5629_v4 = vadd.f32 %v5628_v5, %v5627_v38  ;;  %v6111_v5 = vld [vmem:[%s17969_s3 + $0x9e8] sm:$0xff] }
 0x6b6   :  { %v5630_v35 = vrot.slane %v5629_v4, 1 }
 0x6b8   :  { %v5631_v11 = vadd.f32 %v5630_v35, %v5629_v4  ;;  %v18485_v4 = vld [vmem:[#allocation77_spill] sm:$0xff]  ;;  %v6112_v35 = vld [vmem:[%s17969_s3 + $0x9f0] sm:$0xff] }
 0x6ba   :  { %11684 = vmatmul.mubr.f32.vlgmr.msra.gmra.mxu1 %v5631_v11  ;;  %v6113_v11 = vld [vmem:[%s17969_s3 + $0x9f8] sm:$0xff] }
 0x6bb   :  { %11687 = vmatpush3.msk.msra.mxu1 %vm13509_vm0, %v18474_v44  ;;  %11718 = vmatprep.mubr.msk.f32.mxu1 %vm18175_vm13, %v12503_v28  ;;  %vm18486_vm13 = vnez %v18485_v4 }
 0x6bc   :  { %11688 = vmatprep.subr.mxu1 %v12503_v28  ;;  %11721 = vmatprep.subr.mxu0 %v6113_v11 }
 0x6bd   :  { %11689 = vmatpush3.msk.msra.mxu1 %vm13520_vm1, %v18474_v44  ;;  %11722 = vmatpush3.msra.mxu0 %v6113_v11 }
 0x6be   :  { %11690 = vmatprep.subr.mxu1 %v12503_v28  ;;  %11723 = vmatprep.subr.mxu0 %v6112_v35 }
 0x6bf   :  { %11691 = vmatpush3.msk.msra.mxu1 %vm13544_vm2, %v18474_v44  ;;  %11724 = vmatpush3.msra.mxu0 %v6112_v35 }
 0x6c0   :  { %11692 = vmatprep.subr.mxu1 %v12503_v28  ;;  %11725 = vmatprep.subr.mxu0 %v6111_v5 }
 0x6c1   :  { %11693 = vmatpush3.msk.msra.mxu1 %vm13568_vm3, %v18474_v44  ;;  %11726 = vmatpush3.msra.mxu0 %v6111_v5 }
 0x6c2   :  { %11694 = vmatprep.subr.mxu1 %v12503_v28 }
 0x6c3   :  { %11695 = vmatpush3.msk.msra.mxu1 %vm13591_vm4, %v18474_v44 }
 0x6c4   :  { %11696 = vmatprep.subr.mxu1 %v12503_v28 }
 0x6c5   :  { %11697 = vmatpush3.msk.msra.mxu1 %vm13615_vm5, %v18474_v44 }
 0x6c6   :  { %11698 = vmatprep.subr.mxu1 %v12503_v28 }
 0x6c7   :  { %11699 = vmatpush3.msk.msra.mxu1 %vm13626_vm6, %v18474_v44 }
 0x6c8   :  { %11700 = vmatprep.subr.mxu1 %v12503_v28 }
 0x6c9   :  { %11701 = vmatpush3.msk.msra.mxu1 %vm13650_vm7, %v18474_v44 }
 0x6ca   :  { %11702 = vmatprep.subr.mxu1 %v12503_v28 }
 0x6cb   :  { %11703 = vmatpush3.msk.msra.mxu1 %vm13674_vm8, %v18474_v44 }
 0x6cc   :  { %11704 = vmatprep.subr.mxu1 %v12503_v28 }
 0x6cd   :  { %11705 = vmatpush3.msk.msra.mxu1 %vm13721_vm9, %v18474_v44 }
 0x6ce   :  { %11706 = vmatprep.subr.mxu1 %v12503_v28 }
 0x6cf   :  { %11707 = vmatpush3.msk.msra.mxu1 %vm18486_vm13, %v18474_v44 }
 0x6d0   :  { %11708 = vmatprep.subr.mxu1 %v12503_v28 }
 0x6d1   :  { %11709 = vmatpush3.msk.msra.mxu1 %vm13740_vm11, %v18474_v44 }
 0x6d2   :  { %11710 = vmatprep.subr.mxu1 %v12503_v28 }
 0x6d3   :  { %11711 = vmatpush3.msk.msra.mxu1 %vm18306_vm10, %v18474_v44 }
 0x6d4   :  { %11712 = vmatprep.subr.mxu1 %v12503_v28 }
 0x6d5   :  { %11713 = vmatpush3.msk.msra.mxu1 %vm13773_vm14, %v18474_v44 }
 0x6d6   :  { %11714 = vmatprep.subr.mxu1 %v12503_v28 }
 0x6d7   :  { %11715 = vmatpush3.msk.msra.mxu1 %vm13789_vm15, %v18474_v44 }
 0x6d8   :  { %11716 = vmatprep.subr.mxu1 %v12503_v28  ;;  %v6110_v28 = vld [vmem:[%s17969_s3 + $0x9e0] sm:$0xff] }
 0x6d9   :  { %11717 = vmatpush3.msk.msra.mxu1 %vm13804_vm12, %v18474_v44  ;;  %11727 = vmatprep.subr.mxu0 %v6110_v28 }
 0x6da   :  { %11728 = vmatpush3.msra.mxu0 %v6110_v28 }
 0x77a   :  { %v5698_v4 = vpop.f32.mrf.mxu1 }
 0x77b   :  { %v5702_v63 = vmul.f32 0.00048828125, %v5698_v4 }
 0x77c   :  { %v11685_v38 = vpop.f32.mrf.mxu1 }
 0x77d   :  { %v16069_v10 = vrot.slane %v5702_v63, %v18492_v34 }
 0x77f   :  { %v5707_v11 = vsub.f32 %v15646_v18, %v16069_v10  ;;  %v5708_v35 = vsub.f32 %v15643_v3, %v16069_v10  ;;  %v5709_v23 = vsub.f32 %v15681_v31, %v16069_v10  ;;  %v5710_v38 = vsub.f32 %v15678_v16, %v16069_v10 }
 0x780   :  { %v5711_v63 = vsub.f32 %v15714_v7, %v16069_v10  ;;  %v5712_v4 = vsub.f32 %v15704_v36, %v16069_v10  ;;  %v5713_v16 = vsub.f32 %v15746_v29, %v16069_v10  ;;  %v5715_v29 = vsub.f32 %v15779_v2, %v16069_v10 }
 0x781   :  { %v16078_v22 = vmul.f32 %v15659_v52, %v5707_v11  ;;  %v16081_v5 = vmul.f32 %v15673_v47, %v5708_v35  ;;  %v16088_v18 = vmul.f32 %v15695_v27, %v5709_v23  ;;  %v16097_v28 = vmul.f32 %v15709_v51, %v5710_v38 }
 0x782   :  { %v16102_v7 = vmul.f32 %v15727_v57, %v5711_v63  ;;  %v5714_v35 = vsub.f32 %v15743_v19, %v16069_v10  ;;  %v16109_v41 = vmul.f32 %v15738_v32, %v5712_v4  ;;  %v16116_v63 = vmul.f32 %v15760_v0, %v5713_v16 }
 0x783   :  { %v5759_v3 = vmul.f32 %v16078_v22, %v16078_v22  ;;  %v5760_v31 = vmul.f32 %v16081_v5, %v16081_v5  ;;  %v5761_v23 = vmul.f32 %v16088_v18, %v16088_v18  ;;  %v5762_v36 = vmul.f32 %v16097_v28, %v16097_v28 }
 0x784   :  { %v5763_v33 = vmul.f32 %v16102_v7, %v16102_v7  ;;  %v5716_v19 = vsub.f32 %v15769_v40, %v16069_v10  ;;  %v5764_v4 = vmul.f32 %v16109_v41, %v16109_v41  ;;  %v5717_v2 = vsub.f32 %v15812_v6, %v16069_v10 }
 0x785   :  { %v5785_v11 = vadd.f32 %v5760_v31, %v5759_v3  ;;  %v16123_v31 = vmul.f32 %v15774_v1, %v5714_v35  ;;  %v16130_v16 = vmul.f32 %v15793_v49, %v5715_v29  ;;  %v5718_v40 = vsub.f32 %v15809_v62, %v16069_v10 }
 0x786   :  { %v16137_v35 = vmul.f32 %v15804_v56, %v5716_v19  ;;  %v5719_v6 = vsub.f32 %v15842_v42, %v16069_v10  ;;  %v5720_v62 = vsub.f32 %v15832_v48, %v16069_v10  ;;  %v5721_v42 = vsub.f32 %v15873_v17, %v16069_v10 }
 0x787   :  { %v5786_v38 = vadd.f32 %v5785_v11, %v5761_v23  ;;  %v5765_v11 = vmul.f32 %v16116_v63, %v16116_v63  ;;  %v5767_v37 = vmul.f32 %v16130_v16, %v16130_v16  ;;  %v16151_v19 = vmul.f32 %v15837_v24, %v5718_v40 }
 0x788   :  { %v5722_v48 = vsub.f32 %v15870_v55, %v16069_v10  ;;  %v5723_v17 = vsub.f32 %v15902_v60, %v16069_v10  ;;  %v5724_v55 = vsub.f32 %v15892_v59, %v16069_v10  ;;  %v5725_v60 = vsub.f32 %v15928_v20, %v16069_v10 }
 0x789   :  { %v5787_v3 = vadd.f32 %v5786_v38, %v5762_v36  ;;  %v5766_v38 = vmul.f32 %v16123_v31, %v16123_v31  ;;  %v5770_v24 = vmul.f32 %v16151_v19, %v16151_v19  ;;  %v5726_v59 = vsub.f32 %v15925_v58, %v16069_v10 }
 0x78a   :  { %v5727_v20 = vsub.f32 %v15951_v13, %v16069_v10  ;;  %v5728_v58 = vsub.f32 %v15941_v25, %v16069_v10  ;;  %v5729_v13 = vsub.f32 %v15971_v12, %v16069_v10  ;;  %v5730_v25 = vsub.f32 %v15968_v15, %v16069_v10 }
 0x78b   :  { %v5788_v23 = vadd.f32 %v5787_v3, %v5763_v33  ;;  %v18493_v3 = vld [vmem:[#allocation10_spill] sm:$0xff]  ;;  %v5731_v12 = vsub.f32 %v15991_v14, %v16069_v10  ;;  %v5732_v15 = vsub.f32 %v15988_v39, %v16069_v10 }
 0x78c   :  { %v16144_v29 = vmul.f32 %v18493_v3, %v5717_v2 }
 0x78d   :  { %v5789_v36 = vadd.f32 %v5788_v23, %v5764_v4  ;;  %v5768_v23 = vmul.f32 %v16137_v35, %v16137_v35 }
 0x78e   :  { %v5769_v44 = vmul.f32 %v16144_v29, %v16144_v29 }
 0x78f   :  { %v5790_v33 = vadd.f32 %v5789_v36, %v5765_v11  ;;  %v18494_v36 = vld [vmem:[#allocation30_spill] sm:$0xff] }
 0x790   :  { %v16158_v2 = vmul.f32 %v18494_v36, %v5719_v6  ;;  %v16172_v6 = vmul.f32 %v15883_v54, %v5721_v42  ;;  %v16186_v42 = vmul.f32 %v15910_v21, %v5723_v17  ;;  %v16200_v17 = vmul.f32 %v15935_v8, %v5725_v60 }
 0x791   :  { %v5791_v4 = vadd.f32 %v5790_v33, %v5766_v38  ;;  %v18495_v33 = vld [vmem:[#allocation16_spill] sm:$0xff]  ;;  %v16214_v60 = vmul.f32 %v15956_v26, %v5727_v20  ;;  %v16228_v20 = vmul.f32 %v15976_v43, %v5729_v13  ;;  %v16245_v43 = vmul.f32 %v16003_v53, %v5732_v15 }
 0x792   :  { %v16165_v40 = vmul.f32 %v18495_v33, %v5720_v62  ;;  %v16179_v62 = vmul.f32 %v15897_v61, %v5722_v48  ;;  %v16193_v48 = vmul.f32 %v15920_v45, %v5724_v55  ;;  %v16207_v55 = vmul.f32 %v15946_v30, %v5726_v59 }
 0x793   :  { %v5792_v11 = vadd.f32 %v5791_v4, %v5767_v37  ;;  %v5771_v4 = vmul.f32 %v16158_v2, %v16158_v2  ;;  %v16221_v59 = vmul.f32 %v15963_v9, %v5728_v58  ;;  %v16235_v58 = vmul.f32 %v15983_v50, %v5730_v25  ;;  %18496 = vst [vmem:[#allocation92_spill] sm:$0xff] %v16245_v43 }
 0x794   :  { %v5781_v14 = vmul.f32 %v16228_v20, %v16228_v20 }
 0x795   :  { %v5793_v38 = vadd.f32 %v5792_v11, %v5768_v23  ;;  %v5772_v11 = vmul.f32 %v16165_v40, %v16165_v40  ;;  %v5782_v39 = vmul.f32 %v16235_v58, %v16235_v58 }
 0x797   :  { %v5794_v37 = vadd.f32 %v5793_v38, %v5769_v44  ;;  %v5773_v38 = vmul.f32 %v16172_v6, %v16172_v6 }
 0x799   :  { %v5795_v23 = vadd.f32 %v5794_v37, %v5770_v24  ;;  %v5774_v37 = vmul.f32 %v16179_v62, %v16179_v62 }
 0x79b   :  { %v5796_v44 = vadd.f32 %v5795_v23, %v5771_v4  ;;  %v5775_v23 = vmul.f32 %v16186_v42, %v16186_v42 }
 0x79d   :  { %v5797_v24 = vadd.f32 %v5796_v44, %v5772_v11  ;;  %v5776_v44 = vmul.f32 %v16193_v48, %v16193_v48 }
 0x79f   :  { %v5798_v4 = vadd.f32 %v5797_v24, %v5773_v38  ;;  %v5777_v24 = vmul.f32 %v16200_v17, %v16200_v17 }
 0x7a1   :  { %v5799_v11 = vadd.f32 %v5798_v4, %v5774_v37  ;;  %v5778_v4 = vmul.f32 %v16207_v55, %v16207_v55 }
 0x7a3   :  { %v5800_v38 = vadd.f32 %v5799_v11, %v5775_v23  ;;  %v5779_v11 = vmul.f32 %v16214_v60, %v16214_v60 }
 0x7a5   :  { %v5801_v37 = vadd.f32 %v5800_v38, %v5776_v44  ;;  %v5780_v38 = vmul.f32 %v16221_v59, %v16221_v59 }
 0x7a7   :  { %v5802_v23 = vadd.f32 %v5801_v37, %v5777_v24  ;;  %v16240_v37 = vmul.f32 %v15996_v46, %v5731_v12 }
 0x7a9   :  { %v5803_v44 = vadd.f32 %v5802_v23, %v5778_v4  ;;  %v5783_v25 = vmul.f32 %v16240_v37, %v16240_v37  ;;  %v5784_v23 = vmul.f32 %v16245_v43, %v16245_v43 }
 0x7ab   :  { %v5804_v24 = vadd.f32 %v5803_v44, %v5779_v11 }
 0x7ad   :  { %v5805_v13 = vadd.f32 %v5804_v24, %v5780_v38 }
 0x7af   :  { %v5806_v10 = vadd.f32 %v5805_v13, %v5781_v14  ;;  %v6109_v14 = vld [vmem:[%s17969_s3 + $0x9d8] sm:$0xff]  ;;  %v6108_v13 = vld [vmem:[%s17969_s3 + $0x9d0] sm:$0xff] }
 0x7b0   :  { %11729 = vmatprep.subr.mxu0 %v6109_v14 }
 0x7b1   :  { %v5807_v4 = vadd.f32 %v5806_v10, %v5782_v39  ;;  %v6071_v39 = vld [vmem:[%s17969_s3 + $0x978] sm:$0xff]  ;;  %11730 = vmatpush3.msra.mxu0 %v6109_v14  ;;  %v6069_v10 = vld [vmem:[%s17969_s3 + $0x968] sm:$0xff]  ;;  %v6064_v14 = vld [vmem:[%s17969_s3 + $0x940] sm:$0xff] }
 0x7b2   :  { %11792 = vmatprep.subr.mxu1 %v6071_v39  ;;  %11731 = vmatprep.subr.mxu0 %v6108_v13 }
 0x7b3   :  { %v5808_v12 = vadd.f32 %v5807_v4, %v5783_v25  ;;  %11732 = vmatpush3.msra.mxu0 %v6108_v13  ;;  %v6106_v25 = vld [vmem:[%s17969_s3 + $0x9c0] sm:$0xff]  ;;  %v6101_v13 = vld [vmem:[%s17969_s3 + $0x998] sm:$0xff] }
 0x7b4   :  { %v6068_v4 = vld [vmem:[%s17969_s3 + $0x960] sm:$0xff] }
 0x7b5   :  { %v5809_v11 = vadd.f32 %v5808_v12, %v5784_v23  ;;  %v6105_v23 = vld [vmem:[%s17969_s3 + $0x9b8] sm:$0xff] }
 0x7b6   :  { %v6067_v12 = vld [vmem:[%s17969_s3 + $0x958] sm:$0xff] }
 0x7b7   :  { %v5810_v44 = vrot.slane %v5809_v11, 4 }
 0x7b9   :  { %v5811_v46 = vadd.f32 %v5810_v44, %v5809_v11  ;;  %v6104_v11 = vld [vmem:[%s17969_s3 + $0x9b0] sm:$0xff] }
 0x7ba   :  { %v6066_v44 = vld [vmem:[%s17969_s3 + $0x950] sm:$0xff] }
 0x7bb   :  { %v5812_v50 = vrot.slane %v5811_v46, 2 }
 0x7bd   :  { %v5813_v38 = vadd.f32 %v5812_v50, %v5811_v46  ;;  %v6070_v50 = vld [vmem:[%s17969_s3 + $0x970] sm:$0xff]  ;;  %v6107_v46 = vld [vmem:[%s17969_s3 + $0x9c8] sm:$0xff] }
 0x7be   :  { %11733 = vmatprep.subr.mxu0 %v6107_v46 }
 0x7bf   :  { %v5814_v24 = vrot.slane %v5813_v38, 1  ;;  %11734 = vmatpush3.msra.mxu0 %v6107_v46  ;;  %v6062_v46 = vld [vmem:[%s17969_s3 + $0x930] sm:$0xff] }
 0x7c0   :  { %11735 = vmatprep.subr.mxu0 %v6106_v25 }
 0x7c1   :  { %v5815_v15 = vadd.f32 %v5814_v24, %v5813_v38  ;;  %11736 = vmatpush3.msra.mxu0 %v6106_v25  ;;  %v6103_v38 = vld [vmem:[%s17969_s3 + $0x9a8] sm:$0xff] }
 0x7c2   :  { %11737 = vmatprep.subr.mxu0 %v6105_v23  ;;  %v6065_v24 = vld [vmem:[%s17969_s3 + $0x948] sm:$0xff] }
 0x7c3   :  { %11719 = vmatmul.mubr.f32.vlgmr.msra.gmra.mxu1 %v5815_v15  ;;  %11738 = vmatpush3.msra.mxu0 %v6105_v23  ;;  %v6102_v15 = vld [vmem:[%s17969_s3 + $0x9a0] sm:$0xff]  ;;  %v6061_v25 = vld [vmem:[%s17969_s3 + $0x928] sm:$0xff] }
 0x7c4   :  { %11793 = vmatpush3.msra.mxu1 %v6071_v39  ;;  %11739 = vmatprep.subr.mxu0 %v6104_v11  ;;  %v6063_v39 = vld [vmem:[%s17969_s3 + $0x938] sm:$0xff]  ;;  %v6060_v23 = vld [vmem:[%s17969_s3 + $0x920] sm:$0xff] }
 0x7c5   :  { %11794 = vmatprep.subr.mxu1 %v6070_v50  ;;  %11740 = vmatpush3.msra.mxu0 %v6104_v11  ;;  %v6059_v11 = vld [vmem:[%s17969_s3 + $0x918] sm:$0xff] }
 0x7c6   :  { %11795 = vmatpush3.msra.mxu1 %v6070_v50  ;;  %11741 = vmatprep.subr.mxu0 %v6103_v38  ;;  %v6100_v50 = vld [vmem:[%s17969_s3 + $0x990] sm:$0xff] }
 0x7c7   :  { %11796 = vmatprep.subr.mxu1 %v6069_v10  ;;  %11742 = vmatpush3.msra.mxu0 %v6103_v38  ;;  %v6057_v38 = vld [vmem:[%s17969_s3 + $0x908] sm:$0xff] }
 0x7c8   :  { %11797 = vmatpush3.msra.mxu1 %v6069_v10  ;;  %11743 = vmatprep.subr.mxu0 %v6102_v15  ;;  %v6099_v10 = vld [vmem:[%s17969_s3 + $0x988] sm:$0xff] }
 0x7c9   :  { %11798 = vmatprep.subr.mxu1 %v6068_v4  ;;  %11744 = vmatpush3.msra.mxu0 %v6102_v15  ;;  %v16346_v15 = vld [vmem:[%s17969_s3 + $0xaf8] sm:$0xff] }
 0x7ca   :  { %11799 = vmatpush3.msra.mxu1 %v6068_v4  ;;  %11745 = vmatprep.subr.mxu0 %v6101_v13  ;;  %v6098_v4 = vld [vmem:[%s17969_s3 + $0x980] sm:$0xff] }
 0x7cb   :  { %11800 = vmatprep.subr.mxu1 %v6067_v12  ;;  %11746 = vmatpush3.msra.mxu0 %v6101_v13 }
 0x7cc   :  { %11801 = vmatpush3.msra.mxu1 %v6067_v12  ;;  %11747 = vmatprep.subr.mxu0 %v6100_v50  ;;  %v16328_v12 = vld [vmem:[%s17969_s3 + $0xa78] sm:$0xff] }
 0x7cd   :  { %11802 = vmatprep.subr.mxu1 %v6066_v44  ;;  %11748 = vmatpush3.msra.mxu0 %v6100_v50 }
 0x7ce   :  { %11803 = vmatpush3.msra.mxu1 %v6066_v44  ;;  %11749 = vmatprep.subr.mxu0 %v6099_v10  ;;  %v6058_v44 = vld [vmem:[%s17969_s3 + $0x910] sm:$0xff] }
 0x7cf   :  { %11804 = vmatprep.subr.mxu1 %v6065_v24  ;;  %11750 = vmatpush3.msra.mxu0 %v6099_v10 }
 0x7d0   :  { %11805 = vmatpush3.msra.mxu1 %v6065_v24  ;;  %11751 = vmatprep.subr.mxu0 %v6098_v4  ;;  %v6056_v24 = vld [vmem:[%s17969_s3 + $0x900] sm:$0xff] }
 0x7d1   :  { %11806 = vmatprep.subr.mxu1 %v6064_v14  ;;  %11752 = vmatpush3.msra.mxu0 %v6098_v4 }
 0x7d2   :  { %11807 = vmatpush3.msra.mxu1 %v6064_v14  ;;  %11863 = vmatprep.subr.mxu0 %v16328_v12 }
 0x7d3   :  { %11808 = vmatprep.subr.mxu1 %v6063_v39 }
 0x7d4   :  { %11809 = vmatpush3.msra.mxu1 %v6063_v39 }
 0x7d5   :  { %11810 = vmatprep.subr.mxu1 %v6062_v46 }
 0x7d6   :  { %11811 = vmatpush3.msra.mxu1 %v6062_v46  ;;  %v5887_v46 = vld [vmem:[%s17970_s4 + $0x5] sm:$0x1] }
 0x7d7   :  { %11812 = vmatprep.subr.mxu1 %v6061_v25 }
 0x7d8   :  { %11813 = vmatpush3.msra.mxu1 %v6061_v25 }
 0x7d9   :  { %11814 = vmatprep.subr.mxu1 %v6060_v23 }
 0x7da   :  { %11815 = vmatpush3.msra.mxu1 %v6060_v23  ;;  %v16358_v23 = vld [vmem:[%s17970_s4 + $0x8] ss:$0 sm:$0xff] }
 0x7db   :  { %11816 = vmatprep.subr.mxu1 %v6059_v11 }
 0x7dc   :  { %11817 = vmatpush3.msra.mxu1 %v6059_v11 }
 0x7dd   :  { %11818 = vmatprep.subr.mxu1 %v6058_v44 }
 0x7de   :  { %11819 = vmatpush3.msra.mxu1 %v6058_v44 }
 0x7df   :  { %11820 = vmatprep.subr.mxu1 %v6057_v38 }
 0x7e0   :  { %11821 = vmatpush3.msra.mxu1 %v6057_v38 }
 0x7e1   :  { %11822 = vmatprep.subr.mxu1 %v6056_v24 }
 0x7e2   :  { %11823 = vmatpush3.msra.mxu1 %v6056_v24 }
 0x7e3   :  { %11934 = vmatprep.subr.mxu1 %v16346_v15 }
 0x883   :  { %v5882_v14 = vpop.f32.mrf.mxu1 }
 0x884   :  { %v5886_v13 = vmul.f32 0.00048828125, %v5882_v14 }
 0x885   :  { %v11720_v39 = vpop.f32.mrf.mxu1 }
 0x886   :  { %v5888_v50 = vadd.f32 1e-05, %v5886_v13 }
 0x888   :  { %12435 = vrsqrt.f32 %v5888_v50 }
 0x895   :  { %v12436_v10 = vpop.eup %12435 }
 0x896   :  { %v5890_v25 = vmul.f32 %v12436_v10, %v5887_v46 }
 0x898   :  { %v16353_v4 = vrot.slane %v5890_v25, %v18492_v34 }
 0x89a   :  { %v5895_v11 = vmul.f32 %v16353_v4, %v16078_v22  ;;  %v5896_v44 = vmul.f32 %v16353_v4, %v16081_v5  ;;  %v5897_v38 = vmul.f32 %v16353_v4, %v16088_v18  ;;  %v5898_v24 = vmul.f32 %v16353_v4, %v16097_v28 }
 0x89b   :  { %v5899_v14 = vmul.f32 %v16353_v4, %v16102_v7  ;;  %v5900_v13 = vmul.f32 %v16353_v4, %v16109_v41  ;;  %v5901_v39 = vmul.f32 %v16353_v4, %v16116_v63  ;;  %v5902_v22 = vmul.f32 %v16353_v4, %v16123_v31 }
 0x89c   :  { %v5926_v5 = vadd.f32 %v16358_v23, %v5895_v11  ;;  %v5927_v50 = vadd.f32 %v16358_v23, %v5896_v44  ;;  %v5928_v18 = vadd.f32 %v16358_v23, %v5897_v38  ;;  %v5929_v28 = vadd.f32 %v16358_v23, %v5898_v24 }
 0x89d   :  { %v5930_v46 = vadd.f32 %v16358_v23, %v5899_v14  ;;  %v5931_v7 = vadd.f32 %v16358_v23, %v5900_v13  ;;  %v5932_v41 = vadd.f32 %v16358_v23, %v5901_v39  ;;  %v5933_v10 = vadd.f32 %v16358_v23, %v5902_v22 }
 0x89e   :  { %v5952_v63 = vmax.f32 %v5926_v5, 0.0  ;;  %v5953_v25 = vmax.f32 %v5927_v50, 0.0  ;;  %v5954_v34 = vmax.f32 %v5928_v18, 0.0  ;;  %v5955_v31 = vmax.f32 %v5929_v28, 0.0 }
 0x89f   :  { %v5956_v53 = vmax.f32 %v5930_v46, 0.0  ;;  %v5957_v11 = vmax.f32 %v5931_v7, 0.0  ;;  %v5958_v43 = vmax.f32 %v5932_v41, 0.0  ;;  %v5959_v44 = vmax.f32 %v5933_v10, 0.0 }
 0x8a0   :  { %v5978_v38 = vmul.f32 %v15659_v52, %v5952_v63  ;;  %v5979_v24 = vmul.f32 %v15673_v47, %v5953_v25  ;;  %v5980_v14 = vmul.f32 %v15695_v27, %v5954_v34  ;;  %v16388_v13 = vmul.f32 %v15709_v51, %v5955_v31  ;;  %v18497_v31 = vld [vmem:[#allocation11_spill] sm:$0xff] }
 0x8a1   :  { %v5982_v39 = vmul.f32 %v15727_v57, %v5956_v53  ;;  %v5983_v22 = vmul.f32 %v15738_v32, %v5957_v11  ;;  %v5984_v5 = vmul.f32 %v15760_v0, %v5958_v43  ;;  %v5985_v50 = vmul.f32 %v15774_v1, %v5959_v44 }
 0x8a2   :  { %6004 = vst [vmem:[#allocation2 + $0x8] sm:$0xff] %v5978_v38  ;;  %6005 = vst [vmem:[#allocation2 + $0x10] sm:$0xff] %v5979_v24  ;;  %v5903_v52 = vmul.f32 %v16353_v4, %v16130_v16  ;;  %v5904_v47 = vmul.f32 %v16353_v4, %v16137_v35  ;;  %v5905_v27 = vmul.f32 %v16353_v4, %v16144_v29 }
 0x8a3   :  { %6006 = vst [vmem:[#allocation2 + $0x18] sm:$0xff] %v5980_v14  ;;  %6007 = vst [vmem:[#allocation2 + $0x20] sm:$0xff] %v16388_v13  ;;  %v5906_v51 = vmul.f32 %v16353_v4, %v16151_v19  ;;  %v5907_v57 = vmul.f32 %v16353_v4, %v16158_v2  ;;  %v5908_v32 = vmul.f32 %v16353_v4, %v16165_v40 }
 0x8a4   :  { %6008 = vst [vmem:[#allocation2 + $0x28] sm:$0xff] %v5982_v39  ;;  %6009 = vst [vmem:[#allocation2 + $0x30] sm:$0xff] %v5983_v22  ;;  %v5909_v0 = vmul.f32 %v16353_v4, %v16172_v6  ;;  %v5910_v1 = vmul.f32 %v16353_v4, %v16179_v62  ;;  %v5934_v43 = vadd.f32 %v16358_v23, %v5903_v52 }
 0x8a5   :  { %6010 = vst [vmem:[#allocation2 + $0x38] sm:$0xff] %v5984_v5  ;;  %6011 = vst [vmem:[#allocation2 + $0x40] sm:$0xff] %v5985_v50  ;;  %v5935_v53 = vadd.f32 %v16358_v23, %v5904_v47  ;;  %v5936_v34 = vadd.f32 %v16358_v23, %v5905_v27  ;;  %v5937_v16 = vadd.f32 %v16358_v23, %v5906_v51 }
 0x8a6   :  { %v5938_v35 = vadd.f32 %v16358_v23, %v5907_v57  ;;  %v5939_v29 = vadd.f32 %v16358_v23, %v5908_v32  ;;  %v5940_v19 = vadd.f32 %v16358_v23, %v5909_v0  ;;  %v5941_v2 = vadd.f32 %v16358_v23, %v5910_v1  ;;  %v6807_v57 = vld [vmem:[%s17969_s3 + $0xaf0] sm:$0xff] }
 0x8a7   :  { %v5960_v40 = vmax.f32 %v5934_v43, 0.0  ;;  %v5961_v6 = vmax.f32 %v5935_v53, 0.0  ;;  %v5962_v18 = vmax.f32 %v5936_v34, 0.0  ;;  %v5963_v62 = vmax.f32 %v5937_v16, 0.0 }
 0x8a8   :  { %v5964_v28 = vmax.f32 %v5938_v35, 0.0  ;;  %v5965_v46 = vmax.f32 %v5939_v29, 0.0  ;;  %v5966_v7 = vmax.f32 %v5940_v19, 0.0  ;;  %v5967_v41 = vmax.f32 %v5941_v2, 0.0 }
 0x8a9   :  { %v16420_v10 = vmul.f32 %v15793_v49, %v5960_v40  ;;  %v16423_v63 = vmul.f32 %v15804_v56, %v5961_v6  ;;  %v16426_v25 = vmul.f32 %v18493_v3, %v5962_v18  ;;  %v5989_v11 = vmul.f32 %v18497_v31, %v5963_v62  ;;  %v6072_v44 = vld [vmem:[#allocation2 + $0x5] sm:$0xff]  ;;  %v6073_v24 = vld [vmem:[#allocation2 + $0xd] sm:$0xff] }
 0x8aa   :  { %v6030_v38 = vld [vmem:[#allocation2 + $0x4] sm:$0xff]  ;;  %v5990_v14 = vmul.f32 %v18494_v36, %v5964_v28  ;;  %v5991_v39 = vmul.f32 %v18495_v33, %v5965_v46  ;;  %v5992_v22 = vmul.f32 %v15883_v54, %v5966_v7  ;;  %v5993_v49 = vmul.f32 %v15897_v61, %v5967_v41  ;;  %11753 = vmatprep.mubr.f32.mxu0 %v6072_v44  ;;  %v6031_v56 = vld [vmem:[#allocation2 + $0xc] sm:$0xff]  ;;  %v6074_v33 = vld [vmem:[#allocation2 + $0x15] sm:$0xff] }
 0x8ab   :  { %11824 = vmatprep.mubr.f32.mxu1 %v6030_v38  ;;  %v6544_v3 = vld [vmem:[%s17969_s3 + $0xa70] sm:$0xff]  ;;  %6012 = vst [vmem:[#allocation2 + $0x48] sm:$0xff] %v16420_v10  ;;  %6013 = vst [vmem:[#allocation2 + $0x50] sm:$0xff] %v16423_v63  ;;  %v5911_v36 = vmul.f32 %v16353_v4, %v16186_v42  ;;  %v5912_v54 = vmul.f32 %v16353_v4, %v16193_v48  ;;  %v5913_v61 = vmul.f32 %v16353_v4, %v16200_v17  ;;  %v6075_v27 = vld [vmem:[#allocation2 + $0x1d] sm:$0xff] }
 0x8ac   :  { %6014 = vst [vmem:[#allocation2 + $0x58] sm:$0xff] %v16426_v25  ;;  %6015 = vst [vmem:[#allocation2 + $0x60] sm:$0xff] %v5989_v11  ;;  %11754 = vmatmul.mubr.f32.vlgmr.msra.gmra.mxu0 %v6073_v24  ;;  %11825 = vmatmul.mubr.f32.vlgmr.msra.gmra.mxu1 %v6031_v56  ;;  %v5914_v5 = vmul.f32 %v16353_v4, %v16207_v55  ;;  %v5915_v50 = vmul.f32 %v16353_v4, %v16214_v60  ;;  %v6032_v48 = vld [vmem:[#allocation2 + $0x14] sm:$0xff]  ;;  %v6543_v55 = vld [vmem:[%s17969_s3 + $0xa68] sm:$0xff] }
 0x8ad   :  { %6016 = vst [vmem:[#allocation2 + $0x68] sm:$0xff] %v5990_v14  ;;  %6017 = vst [vmem:[#allocation2 + $0x70] sm:$0xff] %v5991_v39  ;;  %v5916_v42 = vmul.f32 %v16353_v4, %v16221_v59  ;;  %11864 = vmatpush3.msra.mxu0 %v16328_v12  ;;  %11756 = vmatprep.mubr.f32.mxu0 %v6074_v33  ;;  %v5942_v17 = vadd.f32 %v16358_v23, %v5911_v36  ;;  %v6033_v51 = vld [vmem:[#allocation2 + $0x1c] sm:$0xff]  ;;  %v6076_v53 = vld [vmem:[#allocation2 + $0x25] sm:$0xff] }
 0x8ae   :  { %6018 = vst [vmem:[#allocation2 + $0x78] sm:$0xff] %v5992_v22  ;;  %6019 = vst [vmem:[#allocation2 + $0x80] sm:$0xff] %v5993_v49  ;;  %v5943_v52 = vadd.f32 %v16358_v23, %v5912_v54  ;;  %v5944_v47 = vadd.f32 %v16358_v23, %v5913_v61  ;;  %11827 = vmatprep.mubr.f32.mxu1 %v6032_v48  ;;  %11865 = vmatprep.subr.mxu0 %v6544_v3  ;;  %v6034_v34 = vld [vmem:[#allocation2 + $0x24] sm:$0xff]  ;;  %v6035_v18 = vld [vmem:[#allocation2 + $0x2c] sm:$0xff] }
 0x8af   :  { %v5945_v60 = vadd.f32 %v16358_v23, %v5914_v5  ;;  %v5946_v59 = vadd.f32 %v16358_v23, %v5915_v50  ;;  %v5947_v12 = vadd.f32 %v16358_v23, %v5916_v42  ;;  %11866 = vmatpush3.msra.mxu0 %v6544_v3  ;;  %11935 = vmatpush3.msra.mxu1 %v16346_v15  ;;  %v5968_v32 = vmax.f32 %v5942_v17, 0.0  ;;  %v6542_v40 = vld [vmem:[%s17969_s3 + $0xa60] sm:$0xff]  ;;  %v6078_v62 = vld [vmem:[#allocation2 + $0x35] sm:$0xff]  ;;  %v18502_v5 = vld [vmem:[#allocation13_spill] sm:$0xff] }
 0x8b0   :  { %v5969_v0 = vmax.f32 %v5943_v52, 0.0  ;;  %v5970_v1 = vmax.f32 %v5944_v47, 0.0  ;;  %v5917_v43 = vmul.f32 %v16353_v4, %v16228_v20  ;;  %11757 = vmatmul.mubr.f32.gmra.mxu0 %v6075_v27  ;;  %11828 = vmatmul.mubr.f32.gmra.mxu1 %v6033_v51  ;;  %v5918_v15 = vmul.f32 %v16353_v4, %v16235_v58  ;;  %v6036_v28 = vld [vmem:[#allocation2 + $0x34] sm:$0xff]  ;;  %v18498_v46 = vld [vmem:[#allocation92_spill] sm:$0xff]  ;;  %v6539_v17 = vld [vmem:[%s17969_s3 + $0xa48] sm:$0xff] }
 0x8b1   :  { %v5971_v16 = vmax.f32 %v5945_v60, 0.0  ;;  %v5972_v35 = vmax.f32 %v5946_v59, 0.0  ;;  %v5973_v29 = vmax.f32 %v5947_v12, 0.0  ;;  %11759 = vmatprep.mubr.f32.mxu0 %v6076_v53  ;;  %11830 = vmatprep.mubr.f32.mxu1 %v6034_v34  ;;  %v16470_v19 = vmul.f32 %v15910_v21, %v5968_v32  ;;  %v6079_v38 = vld [vmem:[#allocation2 + $0x3d] sm:$0xff]  ;;  %v18499_v14 = vld [vmem:[#allocation38_spill] sm:$0xff] }
 0x8b2   :  { %v16473_v2 = vmul.f32 %v15920_v45, %v5969_v0  ;;  %v16476_v20 = vmul.f32 %v15935_v8, %v5970_v1  ;;  %11867 = vmatprep.subr.mxu0 %v6543_v55  ;;  %11936 = vmatprep.subr.mxu1 %v6807_v57  ;;  %v6077_v45 = vld [vmem:[#allocation2 + $0x2d] sm:$0xff]  ;;  %v5920_v7 = vmul.f32 %v16353_v4, %v18498_v46  ;;  %v6037_v24 = vld [vmem:[#allocation2 + $0x3c] sm:$0xff]  ;;  %v6080_v56 = vld [vmem:[#allocation2 + $0x45] sm:$0xff] }
 0x8b3   :  { %v16482_v6 = vmul.f32 %v15946_v30, %v5971_v16  ;;  %v16485_v58 = vmul.f32 %v15956_v26, %v5972_v35  ;;  %v16488_v21 = vmul.f32 %v15963_v9, %v5973_v29  ;;  %11868 = vmatpush3.msra.mxu0 %v6543_v55  ;;  %11937 = vmatpush3.msra.mxu1 %v6807_v57  ;;  %v6806_v8 = vld [vmem:[%s17969_s3 + $0xae8] sm:$0xff]  ;;  %v18500_v39 = vld [vmem:[#allocation39_spill] sm:$0xff]  ;;  %v6540_v3 = vld [vmem:[%s17969_s3 + $0xa50] sm:$0xff] }
 0x8b4   :  { %6020 = vst [vmem:[#allocation2 + $0x88] sm:$0xff] %v16470_v19  ;;  %6021 = vst [vmem:[#allocation2 + $0x90] sm:$0xff] %v16473_v2  ;;  %v5948_v30 = vadd.f32 %v16358_v23, %v5917_v43  ;;  %v5949_v26 = vadd.f32 %v16358_v23, %v5918_v15  ;;  %v5919_v9 = vmul.f32 %v16353_v4, %v16240_v37  ;;  %11760 = vmatmul.mubr.f32.gmra.mxu0 %v6077_v45  ;;  %v6541_v37 = vld [vmem:[%s17969_s3 + $0xa58] sm:$0xff]  ;;  %v6038_v54 = vld [vmem:[#allocation2 + $0x44] sm:$0xff] }
 0x8b5   :  { %6022 = vst [vmem:[#allocation2 + $0x98] sm:$0xff] %v16476_v20  ;;  %11831 = vmatmul.mubr.f32.gmra.mxu1 %v6035_v18  ;;  %6023 = vst [vmem:[#allocation2 + $0xa0] sm:$0xff] %v16482_v6  ;;  %11762 = vmatprep.mubr.f32.mxu0 %v6078_v62  ;;  %v5951_v44 = vadd.f32 %v16358_v23, %v5920_v7  ;;  %v18501_v61 = vld [vmem:[#allocation14_spill] sm:$0xff]  ;;  %v6804_v55 = vld [vmem:[%s17969_s3 + $0xad8] sm:$0xff] }
 0x8b6   :  { %6024 = vst [vmem:[#allocation2 + $0xa8] sm:$0xff] %v16485_v58  ;;  %6025 = vst [vmem:[#allocation2 + $0xb0] sm:$0xff] %v16488_v21  ;;  %11833 = vmatprep.mubr.f32.mxu1 %v6036_v28  ;;  %v5974_v41 = vmax.f32 %v5948_v30, 0.0  ;;  %v5975_v31 = vmax.f32 %v5949_v26, 0.0  ;;  %v5950_v11 = vadd.f32 %v16358_v23, %v5919_v9  ;;  %11869 = vmatprep.subr.mxu0 %v6542_v40  ;;  %v6805_v23 = vld [vmem:[%s17969_s3 + $0xae0] sm:$0xff]  ;;  %v6081_v42 = vld [vmem:[#allocation2 + $0x4d] sm:$0xff] }
 0x8b7   :  { %11938 = vmatprep.subr.mxu1 %v6806_v8  ;;  %11870 = vmatpush3.msra.mxu0 %v6542_v40  ;;  %v5977_v36 = vmax.f32 %v5951_v44, 0.0  ;;  %v6039_v48 = vld [vmem:[#allocation2 + $0x4c] sm:$0xff]  ;;  %v6082_v52 = vld [vmem:[#allocation2 + $0x55] sm:$0xff]  ;;  %v6083_v60 = vld [vmem:[#allocation2 + $0x5d] sm:$0xff] }
 0x8b8   :  { %11939 = vmatpush3.msra.mxu1 %v6806_v8  ;;  %v16511_v4 = vmul.f32 %v18499_v14, %v5974_v41  ;;  %v16514_v22 = vmul.f32 %v18500_v39, %v5975_v31  ;;  %v5976_v49 = vmax.f32 %v5950_v11, 0.0  ;;  %11763 = vmatmul.mubr.f32.gmra.mxu0 %v6079_v38  ;;  %v6040_v47 = vld [vmem:[#allocation2 + $0x54] sm:$0xff]  ;;  %v6041_v59 = vld [vmem:[#allocation2 + $0x5c] sm:$0xff]  ;;  %v6084_v27 = vld [vmem:[#allocation2 + $0x65] sm:$0xff] }
 0x8b9   :  { %11834 = vmatmul.mubr.f32.gmra.mxu1 %v6037_v24  ;;  %11871 = vmatprep.subr.mxu0 %v6541_v37  ;;  %v16528_v50 = vmul.f32 %v18502_v5, %v5977_v36  ;;  %v6538_v12 = vld [vmem:[%s17969_s3 + $0xa40] sm:$0xff]  ;;  %v6537_v57 = vld [vmem:[%s17969_s3 + $0xa38] sm:$0xff]  ;;  %v6085_v32 = vld [vmem:[#allocation2 + $0x6d] sm:$0xff] }
 0x8ba   :  { %11765 = vmatprep.mubr.f32.mxu0 %v6080_v56  ;;  %6026 = vst [vmem:[#allocation2 + $0xb8] sm:$0xff] %v16511_v4  ;;  %6027 = vst [vmem:[#allocation2 + $0xc0] sm:$0xff] %v16514_v22  ;;  %v16525_v33 = vmul.f32 %v18501_v61, %v5976_v49  ;;  %11836 = vmatprep.mubr.f32.mxu1 %v6038_v54  ;;  %v6042_v51 = vld [vmem:[#allocation2 + $0x64] sm:$0xff]  ;;  %v6043_v0 = vld [vmem:[#allocation2 + $0x6c] sm:$0xff] }
 0x8bb   :  { %11872 = vmatpush3.msra.mxu0 %v6541_v37  ;;  %11940 = vmatprep.subr.mxu1 %v6805_v23  ;;  %6029 = vst [vmem:[#allocation2 + $0xd0] sm:$0xff] %v16528_v50  ;;  %v6803_v1 = vld [vmem:[%s17969_s3 + $0xad0] sm:$0xff]  ;;  %v6087_v16 = vld [vmem:[#allocation2 + $0x7d] sm:$0xff]  ;;  %v6802_v29 = vld [vmem:[%s17969_s3 + $0xac8] sm:$0xff] }
 0x8bc   :  { %11873 = vmatprep.subr.mxu0 %v6540_v3  ;;  %6028 = vst [vmem:[#allocation2 + $0xc8] sm:$0xff] %v16525_v33  ;;  %11766 = vmatmul.mubr.f32.gmra.mxu0 %v6081_v42  ;;  %v6086_v43 = vld [vmem:[#allocation2 + $0x75] sm:$0xff]  ;;  %v6088_v15 = vld [vmem:[#allocation2 + $0x85] sm:$0xff]  ;;  %v6089_v18 = vld [vmem:[#allocation2 + $0x8d] sm:$0xff] }
 0x8bd   :  { %11837 = vmatmul.mubr.f32.gmra.mxu1 %v6039_v48  ;;  %11768 = vmatprep.mubr.f32.mxu0 %v6082_v52  ;;  %v6044_v53 = vld [vmem:[#allocation2 + $0x74] sm:$0xff]  ;;  %v6045_v35 = vld [vmem:[#allocation2 + $0x7c] sm:$0xff]  ;;  %v6046_v40 = vld [vmem:[#allocation2 + $0x84] sm:$0xff] }
 0x8be   :  { %11839 = vmatprep.mubr.f32.mxu1 %v6040_v47  ;;  %11874 = vmatpush3.msra.mxu0 %v6540_v3  ;;  %v6536_v34 = vld [vmem:[%s17969_s3 + $0xa30] sm:$0xff]  ;;  %v6535_v45 = vld [vmem:[%s17969_s3 + $0xa28] sm:$0xff]  ;;  %v6801_v26 = vld [vmem:[%s17969_s3 + $0xac0] sm:$0xff] }
 0x8bf   :  { %11941 = vmatpush3.msra.mxu1 %v6805_v23  ;;  %11875 = vmatprep.subr.mxu0 %v6539_v17  ;;  %v6047_v8 = vld [vmem:[#allocation2 + $0x8c] sm:$0xff]  ;;  %v6090_v30 = vld [vmem:[#allocation2 + $0x95] sm:$0xff]  ;;  %v6534_v9 = vld [vmem:[%s17969_s3 + $0xa20] sm:$0xff] }
 0x8c0   :  { %11942 = vmatprep.subr.mxu1 %v6804_v55  ;;  %11769 = vmatmul.mubr.f32.gmra.mxu0 %v6083_v60  ;;  %v6048_v62 = vld [vmem:[#allocation2 + $0x94] sm:$0xff]  ;;  %v6091_v28 = vld [vmem:[#allocation2 + $0x9d] sm:$0xff]  ;;  %v6092_v41 = vld [vmem:[#allocation2 + $0xa5] sm:$0xff] }
 0x8c1   :  { %11840 = vmatmul.mubr.f32.gmra.mxu1 %v6041_v59  ;;  %11876 = vmatpush3.msra.mxu0 %v6539_v17  ;;  %v6800_v46 = vld [vmem:[%s17969_s3 + $0xab8] sm:$0xff]  ;;  %v6799_v11 = vld [vmem:[%s17969_s3 + $0xab0] sm:$0xff]  ;;  %v6050_v37 = vld [vmem:[#allocation2 + $0xa4] sm:$0xff] }
 0x8c2   :  { %11771 = vmatprep.mubr.f32.mxu0 %v6084_v27  ;;  %11842 = vmatprep.mubr.f32.mxu1 %v6042_v51  ;;  %v6049_v7 = vld [vmem:[#allocation2 + $0x9c] sm:$0xff]  ;;  %v6798_v44 = vld [vmem:[%s17969_s3 + $0xaa8] sm:$0xff]  ;;  %v6532_v39 = vld [vmem:[%s17969_s3 + $0xa10] sm:$0xff] }
 0x8c3   :  { %11877 = vmatprep.subr.mxu0 %v6538_v12  ;;  %11943 = vmatpush3.msra.mxu1 %v6804_v55  ;;  %v6533_v31 = vld [vmem:[%s17969_s3 + $0xa18] sm:$0xff]  ;;  %v6093_v38 = vld [vmem:[#allocation2 + $0xad] sm:$0xff]  ;;  %v6797_v49 = vld [vmem:[%s17969_s3 + $0xaa0] sm:$0xff] }
 0x8c4   :  { %11878 = vmatpush3.msra.mxu0 %v6538_v12  ;;  %11944 = vmatprep.subr.mxu1 %v6803_v1  ;;  %v6051_v24 = vld [vmem:[#allocation2 + $0xac] sm:$0xff]  ;;  %v6094_v14 = vld [vmem:[#allocation2 + $0xb5] sm:$0xff]  ;;  %v6095_v23 = vld [vmem:[#allocation2 + $0xbd] sm:$0xff] }
 0x8c5   :  { %11772 = vmatmul.mubr.f32.gmra.mxu0 %v6085_v32  ;;  %11843 = vmatmul.mubr.f32.gmra.mxu1 %v6043_v0  ;;  %v6052_v56 = vld [vmem:[#allocation2 + $0xb4] sm:$0xff]  ;;  %v6053_v36 = vld [vmem:[#allocation2 + $0xbc] sm:$0xff]  ;;  %v6531_v54 = vld [vmem:[%s17969_s3 + $0xa08] sm:$0xff] }
 0x8c6   :  { %11774 = vmatprep.mubr.f32.mxu0 %v6086_v43  ;;  %11845 = vmatprep.mubr.f32.mxu1 %v6044_v53  ;;  %v6796_v3 = vld [vmem:[%s17969_s3 + $0xa98] sm:$0xff]  ;;  %v6096_v61 = vld [vmem:[#allocation2 + $0xc5] sm:$0xff]  ;;  %v6795_v42 = vld [vmem:[%s17969_s3 + $0xa90] sm:$0xff] }
 0x8c7   :  { %11879 = vmatprep.subr.mxu0 %v6537_v57  ;;  %11945 = vmatpush3.msra.mxu1 %v6803_v1  ;;  %v6054_v5 = vld [vmem:[#allocation2 + $0xc4] sm:$0xff]  ;;  %v6097_v17 = vld [vmem:[#allocation2 + $0xcd] sm:$0xff]  ;;  %v7071_v59 = vld [vmem:[%s17969_s3 + $0xb78] sm:$0xff] }
 0x8c8   :  { %11880 = vmatpush3.msra.mxu0 %v6537_v57  ;;  %11946 = vmatprep.subr.mxu1 %v6802_v29  ;;  %v6530_v48 = vld [vmem:[%s17969_s3 + $0xa00] sm:$0xff]  ;;  %v6794_v52 = vld [vmem:[%s17969_s3 + $0xa88] sm:$0xff]  ;;  %v7070_v57 = vld [vmem:[%s17969_s3 + $0xb70] sm:$0xff] }
 0x8c9   :  { %11775 = vmatmul.mubr.f32.gmra.mxu0 %v6087_v16  ;;  %11846 = vmatmul.mubr.f32.gmra.mxu1 %v6045_v35  ;;  %v6055_v47 = vld [vmem:[#allocation2 + $0xcc] sm:$0xff]  ;;  %v6793_v60 = vld [vmem:[%s17969_s3 + $0xa80] sm:$0xff]  ;;  %v7334_v32 = vld [vmem:[%s17969_s3 + $0xbf8] sm:$0xff] }
 0x8ca   :  { %11777 = vmatprep.mubr.f32.mxu0 %v6088_v15  ;;  %11848 = vmatprep.mubr.f32.mxu1 %v6046_v40  ;;  %v6504_v55 = vld [vmem:[#allocation2 + $0x6] sm:$0xff]  ;;  %v6505_v27 = vld [vmem:[#allocation2 + $0xe] sm:$0xff]  ;;  %v6506_v0 = vld [vmem:[#allocation2 + $0x16] sm:$0xff] }
 0x8cb   :  { %11881 = vmatprep.subr.mxu0 %v6536_v34  ;;  %11947 = vmatpush3.msra.mxu1 %v6802_v29  ;;  %v6767_v12 = vld [vmem:[#allocation2 + $0x7] sm:$0xff]  ;;  %v6768_v51 = vld [vmem:[#allocation2 + $0xf] sm:$0xff]  ;;  %v6769_v1 = vld [vmem:[#allocation2 + $0x17] sm:$0xff] }
 0x8cc   :  { %11882 = vmatpush3.msra.mxu0 %v6536_v34  ;;  %11948 = vmatprep.subr.mxu1 %v6801_v26  ;;  %v6507_v43 = vld [vmem:[#allocation2 + $0x1e] sm:$0xff]  ;;  %v7069_v34 = vld [vmem:[%s17969_s3 + $0xb68] sm:$0xff]  ;;  %v7333_v16 = vld [vmem:[%s17969_s3 + $0xbf0] sm:$0xff] }
 0x8cd   :  { %11778 = vmatmul.mubr.f32.gmra.mxu0 %v6089_v18  ;;  %11849 = vmatmul.mubr.f32.gmra.mxu1 %v6047_v8  ;;  %v6770_v53 = vld [vmem:[#allocation2 + $0x1f] sm:$0xff]  ;;  %v6771_v29 = vld [vmem:[#allocation2 + $0x27] sm:$0xff]  ;;  %v6510_v8 = vld [vmem:[#allocation2 + $0x36] sm:$0xff] }
 0x8ce   :  { %11883 = vmatprep.subr.mxu0 %v6535_v45  ;;  %11780 = vmatprep.mubr.f32.mxu0 %v6090_v30  ;;  %v6508_v35 = vld [vmem:[#allocation2 + $0x26] sm:$0xff]  ;;  %v6509_v40 = vld [vmem:[#allocation2 + $0x2e] sm:$0xff]  ;;  %v6773_v30 = vld [vmem:[#allocation2 + $0x37] sm:$0xff] }
 0x8cf   :  { %11851 = vmatprep.mubr.f32.mxu1 %v6048_v62  ;;  %11884 = vmatpush3.msra.mxu0 %v6535_v45  ;;  %v7068_v15 = vld [vmem:[%s17969_s3 + $0xb60] sm:$0xff]  ;;  %v6772_v45 = vld [vmem:[#allocation2 + $0x2f] sm:$0xff] }
 0x8d0   :  { %11885 = vmatprep.subr.mxu0 %v6534_v9  ;;  %11949 = vmatpush3.msra.mxu1 %v6801_v26  ;;  %v7332_v18 = vld [vmem:[%s17969_s3 + $0xbe8] sm:$0xff]  ;;  %v7067_v26 = vld [vmem:[%s17969_s3 + $0xb58] sm:$0xff] }
 0x8d1   :  { %11781 = vmatmul.mubr.f32.gmra.mxu0 %v6091_v28  ;;  %11852 = vmatmul.mubr.f32.gmra.mxu1 %v6049_v7  ;;  %v6774_v62 = vld [vmem:[#allocation2 + $0x3f] sm:$0xff] }
 0x8d2   :  { %11886 = vmatpush3.msra.mxu0 %v6534_v9  ;;  %11950 = vmatprep.subr.mxu1 %v6800_v46  ;;  %v6511_v9 = vld [vmem:[#allocation2 + $0x3e] sm:$0xff]  ;;  %v6512_v28 = vld [vmem:[#allocation2 + $0x46] sm:$0xff] }
 0x8d3   :  { %11783 = vmatprep.mubr.f32.mxu0 %v6092_v41  ;;  %11854 = vmatprep.mubr.f32.mxu1 %v6050_v37  ;;  %v7331_v7 = vld [vmem:[%s17969_s3 + $0xbe0] sm:$0xff]  ;;  %v7065_v37 = vld [vmem:[%s17969_s3 + $0xb48] sm:$0xff] }
 0x8d4   :  { %11951 = vmatpush3.msra.mxu1 %v6800_v46  ;;  %11887 = vmatprep.subr.mxu0 %v6533_v31  ;;  %v7066_v46 = vld [vmem:[%s17969_s3 + $0xb50] sm:$0xff]  ;;  %v6775_v41 = vld [vmem:[#allocation2 + $0x47] sm:$0xff] }
 0x8d5   :  { %11952 = vmatprep.subr.mxu1 %v6799_v11  ;;  %11888 = vmatpush3.msra.mxu0 %v6533_v31  ;;  %v6513_v31 = vld [vmem:[#allocation2 + $0x4e] sm:$0xff] }
 0x8d6   :  { %11953 = vmatpush3.msra.mxu1 %v6799_v11  ;;  %11784 = vmatmul.mubr.f32.gmra.mxu0 %v6093_v38  ;;  %v6776_v11 = vld [vmem:[#allocation2 + $0x4f] sm:$0xff]  ;;  %v6777_v38 = vld [vmem:[#allocation2 + $0x57] sm:$0xff] }
 0x8d7   :  { %11855 = vmatmul.mubr.f32.gmra.mxu1 %v6051_v24  ;;  %11954 = vmatprep.subr.mxu1 %v6798_v44  ;;  %v7330_v24 = vld [vmem:[%s17969_s3 + $0xbd8] sm:$0xff] }
 0x8d8   :  { %11786 = vmatprep.mubr.f32.mxu0 %v6094_v14  ;;  %11857 = vmatprep.mubr.f32.mxu1 %v6052_v56  ;;  %v6515_v14 = vld [vmem:[#allocation2 + $0x5e] sm:$0xff]  ;;  %v6516_v56 = vld [vmem:[#allocation2 + $0x66] sm:$0xff] }
 0x8d9   :  { %11955 = vmatpush3.msra.mxu1 %v6798_v44  ;;  %11889 = vmatprep.subr.mxu0 %v6532_v39  ;;  %v6514_v44 = vld [vmem:[#allocation2 + $0x56] sm:$0xff] }
 0x8da   :  { %11956 = vmatprep.subr.mxu1 %v6797_v49  ;;  %11890 = vmatpush3.msra.mxu0 %v6532_v39  ;;  %v6778_v39 = vld [vmem:[#allocation2 + $0x5f] sm:$0xff] }
 0x8db   :  { %11957 = vmatpush3.msra.mxu1 %v6797_v49  ;;  %11787 = vmatmul.mubr.f32.gmra.mxu0 %v6095_v23  ;;  %v7064_v49 = vld [vmem:[%s17969_s3 + $0xb40] sm:$0xff]  ;;  %v7063_v23 = vld [vmem:[%s17969_s3 + $0xb38] sm:$0xff] }
 0x8dc   :  { %11858 = vmatmul.mubr.f32.gmra.mxu1 %v6053_v36  ;;  %11958 = vmatprep.subr.mxu1 %v6796_v3  ;;  %v6517_v36 = vld [vmem:[#allocation2 + $0x6e] sm:$0xff] }
 0x8dd   :  { %11789 = vmatprep.mubr.f32.mxu0 %v6096_v61  ;;  %11860 = vmatprep.mubr.f32.mxu1 %v6054_v5  ;;  %v7329_v61 = vld [vmem:[%s17969_s3 + $0xbd0] sm:$0xff] }
 0x8de   :  { %11891 = vmatprep.subr.mxu0 %v6531_v54  ;;  %11959 = vmatpush3.msra.mxu1 %v6796_v3  ;;  %v6779_v3 = vld [vmem:[#allocation2 + $0x67] sm:$0xff]  ;;  %v6518_v5 = vld [vmem:[#allocation2 + $0x76] sm:$0xff] }
 0x8df   :  { %11892 = vmatpush3.msra.mxu0 %v6531_v54  ;;  %11960 = vmatprep.subr.mxu1 %v6795_v42  ;;  %v6780_v54 = vld [vmem:[#allocation2 + $0x6f] sm:$0xff] }
 0x8e0   :  { %11790 = vmatmul.mubr.f32.gmra.mxu0 %v6097_v17  ;;  %11961 = vmatpush3.msra.mxu1 %v6795_v42  ;;  %v6781_v42 = vld [vmem:[#allocation2 + $0x77] sm:$0xff] }
 0x8e1   :  { %11893 = vmatprep.subr.mxu0 %v6530_v48  ;;  %11861 = vmatmul.mubr.f32.gmra.mxu1 %v6055_v47  ;;  %v6519_v17 = vld [vmem:[#allocation2 + $0x7e] sm:$0xff]  ;;  %v7328_v47 = vld [vmem:[%s17969_s3 + $0xbc8] sm:$0xff] }
 0x8e2   :  { %11962 = vmatprep.subr.mxu1 %v6794_v52  ;;  %11894 = vmatpush3.msra.mxu0 %v6530_v48  ;;  %v7062_v48 = vld [vmem:[%s17969_s3 + $0xb30] sm:$0xff] }
 0x8e3   :  { %11895 = vmatprep.mubr.f32.mxu0 %v6504_v55  ;;  %11963 = vmatpush3.msra.mxu1 %v6794_v52  ;;  %v6782_v52 = vld [vmem:[#allocation2 + $0x7f] sm:$0xff] }
 0x8e4   :  { %11966 = vmatprep.mubr.f32.mxu1 %v6767_v12  ;;  %11964 = vmatprep.subr.mxu1 %v6793_v60  ;;  %v6520_v55 = vld [vmem:[#allocation2 + $0x86] sm:$0xff]  ;;  %v6521_v12 = vld [vmem:[#allocation2 + $0x8e] sm:$0xff] }
 0x8e5   :  { %12005 = vmatprep.subr.mxu0 %v7071_v59  ;;  %11965 = vmatpush3.msra.mxu1 %v6793_v60  ;;  %v6783_v60 = vld [vmem:[#allocation2 + $0x87] sm:$0xff] }
 0x8e6   :  { %11896 = vmatmul.mubr.f32.vlgmr.msra.gmra.mxu0 %v6505_v27  ;;  %11967 = vmatmul.mubr.f32.vlgmr.msra.gmra.mxu1 %v6768_v51  ;;  %v6784_v27 = vld [vmem:[#allocation2 + $0x8f] sm:$0xff] }
 0x8e7   :  { %12006 = vmatpush3.msra.mxu0 %v7071_v59  ;;  %11898 = vmatprep.mubr.f32.mxu0 %v6506_v0  ;;  %v7061_v59 = vld [vmem:[%s17969_s3 + $0xb28] sm:$0xff]  ;;  %v6522_v51 = vld [vmem:[#allocation2 + $0x96] sm:$0xff] }
 0x8e8   :  { %11969 = vmatprep.mubr.f32.mxu1 %v6769_v1  ;;  %12007 = vmatprep.subr.mxu0 %v7070_v57  ;;  %v6785_v0 = vld [vmem:[#allocation2 + $0x97] sm:$0xff] }
 0x8e9   :  { %12076 = vmatprep.subr.mxu1 %v7334_v32  ;;  %12008 = vmatpush3.msra.mxu0 %v7070_v57  ;;  %v7327_v57 = vld [vmem:[%s17969_s3 + $0xbc0] sm:$0xff] }
 0x8ea   :  { %11899 = vmatmul.mubr.f32.gmra.mxu0 %v6507_v43  ;;  %12077 = vmatpush3.msra.mxu1 %v7334_v32  ;;  %v7060_v32 = vld [vmem:[%s17969_s3 + $0xb20] sm:$0xff]  ;;  %v7326_v43 = vld [vmem:[%s17969_s3 + $0xbb8] sm:$0xff] }
 0x8eb   :  { %11970 = vmatmul.mubr.f32.gmra.mxu1 %v6770_v53  ;;  %11901 = vmatprep.mubr.f32.mxu0 %v6508_v35  ;;  %v6523_v1 = vld [vmem:[#allocation2 + $0x9e] sm:$0xff]  ;;  %v7325_v35 = vld [vmem:[%s17969_s3 + $0xbb0] sm:$0xff] }
 0x8ec   :  { %11972 = vmatprep.mubr.f32.mxu1 %v6771_v29  ;;  %12009 = vmatprep.subr.mxu0 %v7069_v34  ;;  %v6786_v53 = vld [vmem:[#allocation2 + $0x9f] sm:$0xff]  ;;  %v6787_v29 = vld [vmem:[#allocation2 + $0xa7] sm:$0xff] }
 0x8ed   :  { %12078 = vmatprep.subr.mxu1 %v7333_v16  ;;  %12010 = vmatpush3.msra.mxu0 %v7069_v34  ;;  %v6524_v34 = vld [vmem:[#allocation2 + $0xa6] sm:$0xff] }
 0x8ee   :  { %12079 = vmatpush3.msra.mxu1 %v7333_v16  ;;  %11902 = vmatmul.mubr.f32.gmra.mxu0 %v6509_v40  ;;  %v7059_v16 = vld [vmem:[%s17969_s3 + $0xb18] sm:$0xff]  ;;  %v6525_v40 = vld [vmem:[#allocation2 + $0xae] sm:$0xff] }
 0x8ef   :  { %11973 = vmatmul.mubr.f32.gmra.mxu1 %v6772_v45  ;;  %11904 = vmatprep.mubr.f32.mxu0 %v6510_v8  ;;  %v6788_v45 = vld [vmem:[#allocation2 + $0xaf] sm:$0xff] }
 0x8f0   :  { %11975 = vmatprep.mubr.f32.mxu1 %v6773_v30  ;;  %12011 = vmatprep.subr.mxu0 %v7068_v15  ;;  %v7058_v8 = vld [vmem:[%s17969_s3 + $0xb10] sm:$0xff]  ;;  %v7323_v30 = vld [vmem:[%s17969_s3 + $0xba0] sm:$0xff] }
 0x8f1   :  { %12080 = vmatprep.subr.mxu1 %v7332_v18  ;;  %12012 = vmatpush3.msra.mxu0 %v7068_v15  ;;  %v7324_v15 = vld [vmem:[%s17969_s3 + $0xba8] sm:$0xff] }
 0x8f2   :  { %12081 = vmatpush3.msra.mxu1 %v7332_v18  ;;  %11905 = vmatmul.mubr.f32.gmra.mxu0 %v6511_v9  ;;  %v6526_v18 = vld [vmem:[#allocation2 + $0xb6] sm:$0xff] }
 0x8f3   :  { %11976 = vmatmul.mubr.f32.gmra.mxu1 %v6774_v62  ;;  %12013 = vmatprep.subr.mxu0 %v7067_v26  ;;  %v7322_v9 = vld [vmem:[%s17969_s3 + $0xb98] sm:$0xff] }
 0x8f4   :  { %11907 = vmatprep.mubr.f32.mxu0 %v6512_v28  ;;  %11978 = vmatprep.mubr.f32.mxu1 %v6775_v41  ;;  %v6527_v62 = vld [vmem:[#allocation2 + $0xbe] sm:$0xff]  ;;  %v6791_v41 = vld [vmem:[#allocation2 + $0xc7] sm:$0xff] }
 0x8f5   :  { %12014 = vmatpush3.msra.mxu0 %v7067_v26  ;;  %12082 = vmatprep.subr.mxu1 %v7331_v7  ;;  %v6789_v26 = vld [vmem:[#allocation2 + $0xb7] sm:$0xff]  ;;  %v6790_v28 = vld [vmem:[#allocation2 + $0xbf] sm:$0xff] }
 0x8f6   :  { %12015 = vmatprep.subr.mxu0 %v7066_v46  ;;  %11908 = vmatmul.mubr.f32.gmra.mxu0 %v6513_v31  ;;  %v7321_v31 = vld [vmem:[%s17969_s3 + $0xb90] sm:$0xff] }
 0x8f7   :  { %11979 = vmatmul.mubr.f32.gmra.mxu1 %v6776_v11  ;;  %11910 = vmatprep.mubr.f32.mxu0 %v6514_v44  ;;  %v7056_v11 = vld [vmem:[%s17969_s3 + $0xb00] sm:$0xff]  ;;  %v7320_v44 = vld [vmem:[%s17969_s3 + $0xb88] sm:$0xff] }
 0x8f8   :  { %11981 = vmatprep.mubr.f32.mxu1 %v6777_v38  ;;  %12016 = vmatpush3.msra.mxu0 %v7066_v46  ;;  %v7057_v46 = vld [vmem:[%s17969_s3 + $0xb08] sm:$0xff] }
 0x8f9   :  { %12083 = vmatpush3.msra.mxu1 %v7331_v7  ;;  %12017 = vmatprep.subr.mxu0 %v7065_v37  ;;  %v6528_v7 = vld [vmem:[#allocation2 + $0xc6] sm:$0xff]  ;;  %v6792_v38 = vld [vmem:[#allocation2 + $0xcf] sm:$0xff] }
 0x8fa   :  { %12084 = vmatprep.subr.mxu1 %v7330_v24  ;;  %11911 = vmatmul.mubr.f32.gmra.mxu0 %v6515_v14  ;;  %v7319_v14 = vld [vmem:[%s17969_s3 + $0xb80] sm:$0xff] }
 0x8fb   :  { %11982 = vmatmul.mubr.f32.gmra.mxu1 %v6778_v39  ;;  %12018 = vmatpush3.msra.mxu0 %v7065_v37  ;;  %v6529_v37 = vld [vmem:[#allocation2 + $0xce] sm:$0xff]  ;;  %v7597_v39 = vld [vmem:[%s17969_s3 + $0xc78] sm:$0xff] }
 0x8fc   :  { %11913 = vmatprep.mubr.f32.mxu0 %v6516_v56  ;;  %11984 = vmatprep.mubr.f32.mxu1 %v6779_v3  ;;  %v7031_v56 = vld [vmem:[#allocation2 + $0x10] sm:$0xff] }
 0x8fd   :  { %12019 = vmatprep.subr.mxu0 %v7064_v49  ;;  %12085 = vmatpush3.msra.mxu1 %v7330_v24  ;;  %v7030_v24 = vld [vmem:[#allocation2 + $0x8] sm:$0xff]  ;;  %v7294_v3 = vld [vmem:[#allocation2 + $0x11] sm:$0xff] }
 0x8fe   :  { %12020 = vmatpush3.msra.mxu0 %v7064_v49  ;;  %12086 = vmatprep.subr.mxu1 %v7329_v61  ;;  %v7293_v49 = vld [vmem:[#allocation2 + $0x9] sm:$0xff] }
 0x8ff   :  { %11914 = vmatmul.mubr.f32.gmra.mxu0 %v6517_v36  ;;  %11985 = vmatmul.mubr.f32.gmra.mxu1 %v6780_v54  ;;  %v7860_v36 = vld [vmem:[%s17969_s3 + $0xcf8] sm:$0xff] }
 0x900   :  { %11916 = vmatprep.mubr.f32.mxu0 %v6518_v5  ;;  %11987 = vmatprep.mubr.f32.mxu1 %v6781_v42  ;;  %v7032_v54 = vld [vmem:[#allocation2 + $0x18] sm:$0xff]  ;;  %v7296_v5 = vld [vmem:[#allocation2 + $0x21] sm:$0xff] }
 0x901   :  { %12021 = vmatprep.subr.mxu0 %v7063_v23  ;;  %12087 = vmatpush3.msra.mxu1 %v7329_v61  ;;  %v7295_v61 = vld [vmem:[#allocation2 + $0x19] sm:$0xff]  ;;  %v7595_v42 = vld [vmem:[%s17969_s3 + $0xc68] sm:$0xff] }
 0x902   :  { %12022 = vmatpush3.msra.mxu0 %v7063_v23  ;;  %12088 = vmatprep.subr.mxu1 %v7328_v47  ;;  %v7596_v23 = vld [vmem:[%s17969_s3 + $0xc70] sm:$0xff] }
 0x903   :  { %11917 = vmatmul.mubr.f32.gmra.mxu0 %v6519_v17  ;;  %11988 = vmatmul.mubr.f32.gmra.mxu1 %v6782_v52  ;;  %v7297_v17 = vld [vmem:[#allocation2 + $0x29] sm:$0xff] }
 0x904   :  { %11919 = vmatprep.mubr.f32.mxu0 %v6520_v55  ;;  %11990 = vmatprep.mubr.f32.mxu1 %v6783_v60  ;;  %v12504_v52 = vld [vmem:[#allocation2 + $0x28] sm:$0xff]  ;;  %v12505_v60 = vld [vmem:[#allocation2 + $0x30] sm:$0xff] }
 0x905   :  { %12023 = vmatprep.subr.mxu0 %v7062_v48  ;;  %12089 = vmatpush3.msra.mxu1 %v7328_v47  ;;  %v7594_v47 = vld [vmem:[%s17969_s3 + $0xc60] sm:$0xff]  ;;  %v7858_v55 = vld [vmem:[%s17969_s3 + $0xce8] sm:$0xff] }
 0x906   :  { %12024 = vmatpush3.msra.mxu0 %v7062_v48  ;;  %12090 = vmatprep.subr.mxu1 %v7327_v57  ;;  %v7859_v48 = vld [vmem:[%s17969_s3 + $0xcf0] sm:$0xff] }
 0x907   :  { %11920 = vmatmul.mubr.f32.gmra.mxu0 %v6521_v12  ;;  %11991 = vmatmul.mubr.f32.gmra.mxu1 %v6784_v27  ;;  %v12506_v12 = vld [vmem:[#allocation2 + $0x38] sm:$0xff] }
 0x908   :  { %12025 = vmatprep.subr.mxu0 %v7061_v59  ;;  %11922 = vmatprep.mubr.f32.mxu0 %v6522_v51  ;;  %v7593_v27 = vld [vmem:[%s17969_s3 + $0xc58] sm:$0xff]  ;;  %v7300_v51 = vld [vmem:[#allocation2 + $0x41] sm:$0xff] }
 0x909   :  { %11993 = vmatprep.mubr.f32.mxu1 %v6785_v0  ;;  %12026 = vmatpush3.msra.mxu0 %v7061_v59  ;;  %v7299_v59 = vld [vmem:[#allocation2 + $0x39] sm:$0xff] }
 0x90a   :  { %12027 = vmatprep.subr.mxu0 %v7060_v32  ;;  %12091 = vmatpush3.msra.mxu1 %v7327_v57  ;;  %v12507_v57 = vld [vmem:[#allocation2 + $0x40] sm:$0xff] }
 0x90b   :  { %11923 = vmatmul.mubr.f32.gmra.mxu0 %v6523_v1  ;;  %11994 = vmatmul.mubr.f32.gmra.mxu1 %v6786_v53  ;;  %v7857_v0 = vld [vmem:[%s17969_s3 + $0xce0] sm:$0xff]  ;;  %v7301_v1 = vld [vmem:[#allocation2 + $0x49] sm:$0xff] }
 0x90c   :  { %12028 = vmatpush3.msra.mxu0 %v7060_v32  ;;  %12092 = vmatprep.subr.mxu1 %v7326_v43  ;;  %v7592_v32 = vld [vmem:[%s17969_s3 + $0xc50] sm:$0xff]  ;;  %v7303_v53 = vld [vmem:[#allocation2 + $0x59] sm:$0xff] }
 0x90d   :  { %11925 = vmatprep.mubr.f32.mxu0 %v6524_v34  ;;  %11996 = vmatprep.mubr.f32.mxu1 %v6787_v29  ;;  %v7591_v34 = vld [vmem:[%s17969_s3 + $0xc48] sm:$0xff] }
 0x90e   :  { %12093 = vmatpush3.msra.mxu1 %v7326_v43  ;;  %12029 = vmatprep.subr.mxu0 %v7059_v16  ;;  %v7302_v43 = vld [vmem:[#allocation2 + $0x51] sm:$0xff]  ;;  %v12509_v29 = vld [vmem:[#allocation2 + $0x68] sm:$0xff] }
 0x90f   :  { %12094 = vmatprep.subr.mxu1 %v7325_v35  ;;  %12030 = vmatpush3.msra.mxu0 %v7059_v16  ;;  %v7856_v16 = vld [vmem:[%s17969_s3 + $0xcd8] sm:$0xff] }
 0x910   :  { %12095 = vmatpush3.msra.mxu1 %v7325_v35  ;;  %11926 = vmatmul.mubr.f32.gmra.mxu0 %v6525_v40  ;;  %v12508_v35 = vld [vmem:[#allocation2 + $0x60] sm:$0xff]  ;;  %v7589_v40 = vld [vmem:[%s17969_s3 + $0xc38] sm:$0xff] }
 0x911   :  { %11997 = vmatmul.mubr.f32.gmra.mxu1 %v6788_v45  ;;  %12096 = vmatprep.subr.mxu1 %v7324_v15  ;;  %v7855_v45 = vld [vmem:[%s17969_s3 + $0xcd0] sm:$0xff] }
 0x912   :  { %11928 = vmatprep.mubr.f32.mxu0 %v6526_v18  ;;  %11999 = vmatprep.mubr.f32.mxu1 %v6789_v26  ;;  %v12510_v18 = vld [vmem:[#allocation2 + $0x70] sm:$0xff]  ;;  %v7308_v26 = vld [vmem:[#allocation2 + $0x81] sm:$0xff] }
 0x913   :  { %12097 = vmatpush3.msra.mxu1 %v7324_v15  ;;  %12031 = vmatprep.subr.mxu0 %v7058_v8  ;;  %v7305_v15 = vld [vmem:[#allocation2 + $0x69] sm:$0xff] }
 0x914   :  { %12098 = vmatprep.subr.mxu1 %v7323_v30  ;;  %12032 = vmatpush3.msra.mxu0 %v7058_v8  ;;  %v7307_v8 = vld [vmem:[#allocation2 + $0x79] sm:$0xff] }
 0x915   :  { %12099 = vmatpush3.msra.mxu1 %v7323_v30  ;;  %11929 = vmatmul.mubr.f32.gmra.mxu0 %v6527_v62  ;;  %v12511_v30 = vld [vmem:[#allocation2 + $0x78] sm:$0xff]  ;;  %v7854_v62 = vld [vmem:[%s17969_s3 + $0xcc8] sm:$0xff] }
 0x916   :  { %12000 = vmatmul.mubr.f32.gmra.mxu1 %v6790_v28  ;;  %12100 = vmatprep.subr.mxu1 %v7322_v9  ;;  %v12512_v28 = vld [vmem:[#allocation2 + $0x80] sm:$0xff] }
 0x917   :  { %11931 = vmatprep.mubr.f32.mxu0 %v6528_v7  ;;  %12002 = vmatprep.mubr.f32.mxu1 %v6791_v41  ;;  %v7587_v7 = vld [vmem:[%s17969_s3 + $0xc28] sm:$0xff]  ;;  %v7310_v41 = vld [vmem:[#allocation2 + $0x91] sm:$0xff] }
 0x918   :  { %12033 = vmatprep.subr.mxu0 %v7057_v46  ;;  %12101 = vmatpush3.msra.mxu1 %v7322_v9  ;;  %v7588_v9 = vld [vmem:[%s17969_s3 + $0xc30] sm:$0xff] }
 0x919   :  { %12034 = vmatpush3.msra.mxu0 %v7057_v46  ;;  %12102 = vmatprep.subr.mxu1 %v7321_v31  ;;  %v7309_v46 = vld [vmem:[#allocation2 + $0x89] sm:$0xff] }
 0x91a   :  { %11932 = vmatmul.mubr.f32.gmra.mxu0 %v6529_v37  ;;  %12103 = vmatpush3.msra.mxu1 %v7321_v31  ;;  %v7853_v31 = vld [vmem:[%s17969_s3 + $0xcc0] sm:$0xff] }
 0x91b   :  { %12035 = vmatprep.subr.mxu0 %v7056_v11  ;;  %12003 = vmatmul.mubr.f32.gmra.mxu1 %v6792_v38  ;;  %v7312_v37 = vld [vmem:[#allocation2 + $0xa1] sm:$0xff]  ;;  %v7313_v38 = vld [vmem:[#allocation2 + $0xa9] sm:$0xff] }
 0x91c   :  { %12104 = vmatprep.subr.mxu1 %v7320_v44  ;;  %12036 = vmatpush3.msra.mxu0 %v7056_v11  ;;  %v7311_v11 = vld [vmem:[#allocation2 + $0x99] sm:$0xff] }
 0x91d   :  { %12037 = vmatprep.mubr.f32.mxu0 %v7030_v24  ;;  %12105 = vmatpush3.msra.mxu1 %v7320_v44  ;;  %v7585_v44 = vld [vmem:[%s17969_s3 + $0xc18] sm:$0xff] }
 0x91e   :  { %12108 = vmatprep.mubr.f32.mxu1 %v7293_v49  ;;  %12106 = vmatprep.subr.mxu1 %v7319_v14  ;;  %v7314_v24 = vld [vmem:[#allocation2 + $0xb1] sm:$0xff]  ;;  %v7316_v49 = vld [vmem:[#allocation2 + $0xc1] sm:$0xff] }
 0x91f   :  { %12147 = vmatprep.subr.mxu0 %v7597_v39  ;;  %12107 = vmatpush3.msra.mxu1 %v7319_v14  ;;  %v7584_v14 = vld [vmem:[%s17969_s3 + $0xc10] sm:$0xff] }
 0x920   :  { %12038 = vmatmul.mubr.f32.vlgmr.msra.gmra.mxu0 %v7031_v56  ;;  %12109 = vmatmul.mubr.f32.vlgmr.msra.gmra.mxu1 %v7294_v3  ;;  %v7583_v56 = vld [vmem:[%s17969_s3 + $0xc08] sm:$0xff]  ;;  %v7847_v3 = vld [vmem:[%s17969_s3 + $0xc90] sm:$0xff] }
 0x921   :  { %12148 = vmatpush3.msra.mxu0 %v7597_v39  ;;  %12040 = vmatprep.mubr.f32.mxu0 %v7032_v54  ;;  %v7315_v39 = vld [vmem:[#allocation2 + $0xb9] sm:$0xff] }
 0x922   :  { %12111 = vmatprep.mubr.f32.mxu1 %v7295_v61  ;;  %12149 = vmatprep.subr.mxu0 %v7596_v23  ;;  %v7845_v54 = vld [vmem:[%s17969_s3 + $0xc80] sm:$0xff]  ;;  %v8123_v61 = vld [vmem:[%s17969_s3 + $0xd78] sm:$0xff] }
 0x923   :  { %12218 = vmatprep.subr.mxu1 %v7860_v36  ;;  %12150 = vmatpush3.msra.mxu0 %v7596_v23  ;;  %v7582_v23 = vld [vmem:[%s17969_s3 + $0xc00] sm:$0xff] }
 0x924   :  { %12041 = vmatmul.mubr.f32.gmra.mxu0 %v16388_v13  ;;  %12219 = vmatpush3.msra.mxu1 %v7860_v36  ;;  %v7298_v13 = vld [vmem:[#allocation2 + $0x31] sm:$0xff] }
 0x925   :  { %12112 = vmatmul.mubr.f32.gmra.mxu1 %v7296_v5  ;;  %12043 = vmatprep.mubr.f32.mxu0 %v12504_v52  ;;  %v7556_v36 = vld [vmem:[#allocation2 + $0xa] sm:$0xff]  ;;  %v7821_v52 = vld [vmem:[#allocation2 + $0x1b] sm:$0xff] }
 0x926   :  { %12114 = vmatprep.mubr.f32.mxu1 %v7297_v17  ;;  %12151 = vmatprep.subr.mxu0 %v7595_v42  ;;  %v7819_v5 = vld [vmem:[#allocation2 + $0xb] sm:$0xff]  ;;  %v7558_v17 = vld [vmem:[#allocation2 + $0x1a] sm:$0xff] }
 0x927   :  { %12220 = vmatprep.subr.mxu1 %v7859_v48  ;;  %12152 = vmatpush3.msra.mxu0 %v7595_v42  ;;  %v7820_v42 = vld [vmem:[#allocation2 + $0x13] sm:$0xff] }
 0x928   :  { %12221 = vmatpush3.msra.mxu1 %v7859_v48  ;;  %12044 = vmatmul.mubr.f32.gmra.mxu0 %v12505_v60  ;;  %v8122_v48 = vld [vmem:[%s17969_s3 + $0xd70] sm:$0xff]  ;;  %v8121_v60 = vld [vmem:[%s17969_s3 + $0xd68] sm:$0xff] }
 0x929   :  { %12115 = vmatmul.mubr.f32.gmra.mxu1 %v7298_v13  ;;  %12046 = vmatprep.mubr.f32.mxu0 %v12506_v12  ;;  %v7559_v13 = vld [vmem:[#allocation2 + $0x22] sm:$0xff] }
 0x92a   :  { %12117 = vmatprep.mubr.f32.mxu1 %v7299_v59  ;;  %12153 = vmatprep.subr.mxu0 %v7594_v47  ;;  %v18503_v59 = vmov 1.0  }
 0x92b   :  { %12222 = vmatprep.subr.mxu1 %v7858_v55  ;;  %12154 = vmatpush3.msra.mxu0 %v7594_v47  ;;  %v16810_v47 = vld [vmem:[#allocation2] sm:$0xff] }
 0x92c   :  { %12223 = vmatpush3.msra.mxu1 %v7858_v55  ;;  %12047 = vmatmul.mubr.f32.gmra.mxu0 %v12507_v57  ;;  %v7822_v55 = vld [vmem:[#allocation2 + $0x23] sm:$0xff]  ;;  %v7561_v57 = vld [vmem:[#allocation2 + $0x32] sm:$0xff] }
 0x92d   :  { %12118 = vmatmul.mubr.f32.gmra.mxu1 %v7300_v51  ;;  %12155 = vmatprep.subr.mxu0 %v7593_v27  ;;  %v7823_v51 = vld [vmem:[#allocation2 + $0x2b] sm:$0xff] }
 0x92e   :  { %12049 = vmatprep.mubr.f32.mxu0 %v16420_v10  ;;  %12120 = vmatprep.mubr.f32.mxu1 %v7301_v1  ;;  %v7304_v10 = vld [vmem:[#allocation2 + $0x61] sm:$0xff] }
 0x92f   :  { %12156 = vmatpush3.msra.mxu0 %v7593_v27  ;;  %12224 = vmatprep.subr.mxu1 %v7857_v0  ;;  %v7560_v27 = vld [vmem:[#allocation2 + $0x2a] sm:$0xff] }
 0x930   :  { %12157 = vmatprep.subr.mxu0 %v7592_v32  ;;  %12050 = vmatmul.mubr.f32.gmra.mxu0 %v16423_v63  ;;  %v7590_v63 = vld [vmem:[%s17969_s3 + $0xc40] sm:$0xff] }
 0x931   :  { %12121 = vmatmul.mubr.f32.gmra.mxu1 %v7302_v43  ;;  %12052 = vmatprep.mubr.f32.mxu0 %v16426_v25  ;;  %v7306_v25 = vld [vmem:[#allocation2 + $0x71] sm:$0xff]  ;;  %v7562_v43 = vld [vmem:[#allocation2 + $0x3a] sm:$0xff] }
 0x932   :  { %12123 = vmatprep.mubr.f32.mxu1 %v7303_v53  ;;  %12158 = vmatpush3.msra.mxu0 %v7592_v32  ;;  %v7824_v32 = vld [vmem:[#allocation2 + $0x33] sm:$0xff]  ;;  %v7825_v53 = vld [vmem:[#allocation2 + $0x3b] sm:$0xff] }
 0x933   :  { %12225 = vmatpush3.msra.mxu1 %v7857_v0  ;;  %12159 = vmatprep.subr.mxu0 %v7591_v34  ;;  %v8120_v0 = vld [vmem:[%s17969_s3 + $0xd60] sm:$0xff] }
 0x934   :  { %12226 = vmatprep.subr.mxu1 %v7856_v16  ;;  %12053 = vmatmul.mubr.f32.gmra.mxu0 %v12508_v35  ;;  %v7564_v35 = vld [vmem:[#allocation2 + $0x4a] sm:$0xff] }
 0x935   :  { %12124 = vmatmul.mubr.f32.gmra.mxu1 %v7304_v10  ;;  %12160 = vmatpush3.msra.mxu0 %v7591_v34  ;;  %v8119_v34 = vld [vmem:[%s17969_s3 + $0xd58] sm:$0xff]  ;;  %v7826_v10 = vld [vmem:[#allocation2 + $0x43] sm:$0xff] }
 0x936   :  { %12055 = vmatprep.mubr.f32.mxu0 %v12509_v29  ;;  %12126 = vmatprep.mubr.f32.mxu1 %v7305_v15  ;;  %v8118_v29 = vld [vmem:[%s17969_s3 + $0xd50] sm:$0xff] }
 0x937   :  { %12161 = vmatprep.subr.mxu0 %v7590_v63  ;;  %12227 = vmatpush3.msra.mxu1 %v7856_v16  ;;  %v7563_v16 = vld [vmem:[#allocation2 + $0x42] sm:$0xff]  ;;  %v7827_v15 = vld [vmem:[#allocation2 + $0x4b] sm:$0xff] }
 0x938   :  { %12162 = vmatpush3.msra.mxu0 %v7590_v63  ;;  %12228 = vmatprep.subr.mxu1 %v7855_v45 }
 0x939   :  { %12056 = vmatmul.mubr.f32.gmra.mxu0 %v12510_v18  ;;  %12127 = vmatmul.mubr.f32.gmra.mxu1 %v7306_v25  ;;  %v7565_v25 = vld [vmem:[#allocation2 + $0x52] sm:$0xff]  ;;  %v7829_v18 = vld [vmem:[#allocation2 + $0x5b] sm:$0xff] }
 0x93a   :  { %12058 = vmatprep.mubr.f32.mxu0 %v12511_v30  ;;  %12129 = vmatprep.mubr.f32.mxu1 %v7307_v8  ;;  %v8117_v8 = vld [vmem:[%s17969_s3 + $0xd48] sm:$0xff] }
 0x93b   :  { %12163 = vmatprep.subr.mxu0 %v7589_v40  ;;  %12229 = vmatpush3.msra.mxu1 %v7855_v45  ;;  %v7566_v45 = vld [vmem:[#allocation2 + $0x5a] sm:$0xff] }
 0x93c   :  { %12164 = vmatpush3.msra.mxu0 %v7589_v40  ;;  %12230 = vmatprep.subr.mxu1 %v7854_v62  ;;  %v7828_v40 = vld [vmem:[#allocation2 + $0x53] sm:$0xff] }
 0x93d   :  { %12059 = vmatmul.mubr.f32.gmra.mxu0 %v12512_v28  ;;  %12130 = vmatmul.mubr.f32.gmra.mxu1 %v7308_v26  ;;  %v7830_v28 = vld [vmem:[#allocation2 + $0x63] sm:$0xff] }
 0x93e   :  { %12061 = vmatprep.mubr.f32.mxu0 %v16470_v19  ;;  %12132 = vmatprep.mubr.f32.mxu1 %v7309_v46  ;;  %v7586_v19 = vld [vmem:[%s17969_s3 + $0xc20] sm:$0xff] }
 0x93f   :  { %12165 = vmatprep.subr.mxu0 %v7588_v9  ;;  %12231 = vmatpush3.msra.mxu1 %v7854_v62  ;;  %v7567_v62 = vld [vmem:[#allocation2 + $0x62] sm:$0xff] }
 0x940   :  { %12166 = vmatpush3.msra.mxu0 %v7588_v9  ;;  %12232 = vmatprep.subr.mxu1 %v7853_v31  ;;  %v8116_v46 = vld [vmem:[%s17969_s3 + $0xd40] sm:$0xff] }
 0x941   :  { %12062 = vmatmul.mubr.f32.gmra.mxu0 %v16473_v2  ;;  %12133 = vmatmul.mubr.f32.gmra.mxu1 %v7310_v41  ;;  %v7852_v2 = vld [vmem:[%s17969_s3 + $0xcb8] sm:$0xff]  ;;  %v7568_v41 = vld [vmem:[#allocation2 + $0x6a] sm:$0xff] }
 0x942   :  { %12167 = vmatprep.subr.mxu0 %v7587_v7  ;;  %12064 = vmatprep.mubr.f32.mxu0 %v16476_v20  ;;  %v7851_v20 = vld [vmem:[%s17969_s3 + $0xcb0] sm:$0xff] }
 0x943   :  { %12135 = vmatprep.mubr.f32.mxu1 %v7311_v11  ;;  %12168 = vmatpush3.msra.mxu0 %v7587_v7  ;;  %v7831_v11 = vld [vmem:[#allocation2 + $0x6b] sm:$0xff] }
 0x944   :  { %12169 = vmatprep.subr.mxu0 %v7586_v19  ;;  %12233 = vmatpush3.msra.mxu1 %v7853_v31 }
 0x945   :  { %12065 = vmatmul.mubr.f32.gmra.mxu0 %v16482_v6  ;;  %12136 = vmatmul.mubr.f32.gmra.mxu1 %v7312_v37  ;;  %v7850_v6 = vld [vmem:[%s17969_s3 + $0xca8] sm:$0xff] }
 0x946   :  { %12170 = vmatpush3.msra.mxu0 %v7586_v19  ;;  %12234 = vmatprep.subr.mxu1 %v7852_v2 }
 0x947   :  { %12067 = vmatprep.mubr.f32.mxu0 %v16485_v58  ;;  %12138 = vmatprep.mubr.f32.mxu1 %v7313_v38  ;;  %v7849_v58 = vld [vmem:[%s17969_s3 + $0xca0] sm:$0xff]  ;;  %v7832_v38 = vld [vmem:[#allocation2 + $0x73] sm:$0xff] }
 0x948   :  { %12235 = vmatpush3.msra.mxu1 %v7852_v2  ;;  %12171 = vmatprep.subr.mxu0 %v7585_v44 }
 0x949   :  { %12236 = vmatprep.subr.mxu1 %v7851_v20  ;;  %12172 = vmatpush3.msra.mxu0 %v7585_v44 }
 0x94a   :  { %12237 = vmatpush3.msra.mxu1 %v7851_v20  ;;  %12068 = vmatmul.mubr.f32.gmra.mxu0 %v16488_v21  ;;  %v7848_v21 = vld [vmem:[%s17969_s3 + $0xc98] sm:$0xff] }
 0x94b   :  { %12139 = vmatmul.mubr.f32.gmra.mxu1 %v7314_v24  ;;  %12238 = vmatprep.subr.mxu1 %v7850_v6  ;;  %v7569_v20 = vld [vmem:[#allocation2 + $0x72] sm:$0xff] }
 0x94c   :  { %12070 = vmatprep.mubr.f32.mxu0 %v16511_v4  ;;  %12141 = vmatprep.mubr.f32.mxu1 %v7315_v39  ;;  %v7317_v4 = vld [vmem:[#allocation2 + $0xc9] sm:$0xff]  ;;  %v7833_v39 = vld [vmem:[#allocation2 + $0x7b] sm:$0xff] }
 0x94d   :  { %12239 = vmatpush3.msra.mxu1 %v7850_v6  ;;  %12173 = vmatprep.subr.mxu0 %v7584_v14  ;;  %v8115_v6 = vld [vmem:[%s17969_s3 + $0xd38] sm:$0xff] }
 0x94e   :  { %12240 = vmatprep.subr.mxu1 %v7849_v58  ;;  %12174 = vmatpush3.msra.mxu0 %v7584_v14 }
 0x94f   :  { %12241 = vmatpush3.msra.mxu1 %v7849_v58  ;;  %12071 = vmatmul.mubr.f32.gmra.mxu0 %v16514_v22  ;;  %v7846_v22 = vld [vmem:[%s17969_s3 + $0xc88] sm:$0xff]  ;;  %v7570_v58 = vld [vmem:[#allocation2 + $0x7a] sm:$0xff] }
 0x950   :  { %12142 = vmatmul.mubr.f32.gmra.mxu1 %v7316_v49  ;;  %12242 = vmatprep.subr.mxu1 %v7848_v21 }
 0x951   :  { %12073 = vmatprep.mubr.f32.mxu0 %v16525_v33  ;;  %12144 = vmatprep.mubr.f32.mxu1 %v7317_v4  ;;  %v7318_v33 = vld [vmem:[#allocation2 + $0xd1] sm:$0xff] }
 0x952   :  { %12175 = vmatprep.subr.mxu0 %v7583_v56  ;;  %12243 = vmatpush3.msra.mxu1 %v7848_v21 }
 0x953   :  { %12176 = vmatpush3.msra.mxu0 %v7583_v56  ;;  %12244 = vmatprep.subr.mxu1 %v7847_v3 }
 0x954   :  { %12074 = vmatmul.mubr.f32.gmra.mxu0 %v16528_v50  ;;  %12245 = vmatpush3.msra.mxu1 %v7847_v3  ;;  %v7557_v50 = vld [vmem:[#allocation2 + $0x12] sm:$0xff] }
 0x955   :  { %12177 = vmatprep.subr.mxu0 %v7582_v23  ;;  %12145 = vmatmul.mubr.f32.gmra.mxu1 %v7318_v33  ;;  %v8114_v33 = vld [vmem:[%s17969_s3 + $0xd30] sm:$0xff] }
 0x956   :  { %12246 = vmatprep.subr.mxu1 %v7846_v22  ;;  %12178 = vmatpush3.msra.mxu0 %v7582_v23  ;;  %v7571_v23 = vld [vmem:[#allocation2 + $0x82] sm:$0xff] }
 0x957   :  { %12179 = vmatprep.mubr.f32.mxu0 %v7556_v36  ;;  %12247 = vmatpush3.msra.mxu1 %v7846_v22  ;;  %v7834_v22 = vld [vmem:[#allocation2 + $0x83] sm:$0xff] }
 0x958   :  { %12250 = vmatprep.mubr.f32.mxu1 %v7819_v5  ;;  %12248 = vmatprep.subr.mxu1 %v7845_v54  ;;  %v7835_v5 = vld [vmem:[#allocation2 + $0x8b] sm:$0xff] }
 0x959   :  { %12289 = vmatprep.subr.mxu0 %v8123_v61  ;;  %12249 = vmatpush3.msra.mxu1 %v7845_v54 }
 0x95a   :  { %12180 = vmatmul.mubr.f32.vlgmr.msra.gmra.mxu0 %v7557_v50  ;;  %12251 = vmatmul.mubr.f32.vlgmr.msra.gmra.mxu1 %v7820_v42 }
 0x95b   :  { %12290 = vmatpush3.msra.mxu0 %v8123_v61  ;;  %12182 = vmatprep.mubr.f32.mxu0 %v7558_v17  ;;  %v7572_v61 = vld [vmem:[#allocation2 + $0x8a] sm:$0xff] }
 0x95c   :  { %12253 = vmatprep.mubr.f32.mxu1 %v7821_v52  ;;  %12291 = vmatprep.subr.mxu0 %v8122_v48  ;;  %v8113_v17 = vld [vmem:[%s17969_s3 + $0xd28] sm:$0xff] }
 0x95d   :  { %12360 = vmatprep.subr.mxu1 %v16810_v47  ;;  %12292 = vmatpush3.msra.mxu0 %v8122_v48 }
 0x95e   :  { %12183 = vmatmul.mubr.f32.gmra.mxu0 %v7559_v13  ;;  %12361 = vmatpush3.msk.msra.mxu1 %vm13509_vm0, %v18503_v59 }
 0x95f   :  { %12254 = vmatmul.mubr.f32.gmra.mxu1 %v7822_v55  ;;  %12185 = vmatprep.mubr.f32.mxu0 %v7560_v27  ;;  %v7573_v55 = vld [vmem:[#allocation2 + $0x92] sm:$0xff] }
 0x960   :  { %12256 = vmatprep.mubr.f32.mxu1 %v7823_v51  ;;  %12293 = vmatprep.subr.mxu0 %v8121_v60 }
 0x961   :  { %12362 = vmatprep.subr.mxu1 %v16810_v47  ;;  %12294 = vmatpush3.msra.mxu0 %v8121_v60  ;;  %v7836_v60 = vld [vmem:[#allocation2 + $0x93] sm:$0xff] }
 0x962   :  { %12363 = vmatpush3.msk.msra.mxu1 %vm13520_vm1, %v18503_v59  ;;  %12186 = vmatmul.mubr.f32.gmra.mxu0 %v7561_v57  ;;  %v7574_v57 = vld [vmem:[#allocation2 + $0x9a] sm:$0xff] }
 0x963   :  { %12257 = vmatmul.mubr.f32.gmra.mxu1 %v7824_v32  ;;  %12188 = vmatprep.mubr.f32.mxu0 %v7562_v43  ;;  %v8112_v32 = vld [vmem:[%s17969_s3 + $0xd20] sm:$0xff] }
 0x964   :  { %12259 = vmatprep.mubr.f32.mxu1 %v7825_v53  ;;  %12295 = vmatprep.subr.mxu0 %v8120_v0  ;;  %v7837_v53 = vld [vmem:[#allocation2 + $0x9b] sm:$0xff] }
 0x965   :  { %12364 = vmatprep.subr.mxu1 %v16810_v47  ;;  %12296 = vmatpush3.msra.mxu0 %v8120_v0 }
 0x966   :  { %12365 = vmatpush3.msk.msra.mxu1 %vm13544_vm2, %v18503_v59  ;;  %12189 = vmatmul.mubr.f32.gmra.mxu0 %v7563_v16 }
 0x967   :  { %12260 = vmatmul.mubr.f32.gmra.mxu1 %v7826_v10  ;;  %12297 = vmatprep.subr.mxu0 %v8119_v34 }
 0x968   :  { %12191 = vmatprep.mubr.f32.mxu0 %v7564_v35  ;;  %12262 = vmatprep.mubr.f32.mxu1 %v7827_v15  ;;  %v7575_v35 = vld [vmem:[#allocation2 + $0xa2] sm:$0xff]  ;;  %v8111_v15 = vld [vmem:[%s17969_s3 + $0xd18] sm:$0xff] }
 0x969   :  { %12298 = vmatpush3.msra.mxu0 %v8119_v34  ;;  %12366 = vmatprep.subr.mxu1 %v16810_v47 }
 0x96a   :  { %12299 = vmatprep.subr.mxu0 %v8118_v29  ;;  %12192 = vmatmul.mubr.f32.gmra.mxu0 %v7565_v25 }
 0x96b   :  { %12263 = vmatmul.mubr.f32.gmra.mxu1 %v7828_v40  ;;  %12194 = vmatprep.mubr.f32.mxu0 %v7566_v45  ;;  %v7576_v40 = vld [vmem:[#allocation2 + $0xaa] sm:$0xff] }
 0x96c   :  { %12265 = vmatprep.mubr.f32.mxu1 %v7829_v18  ;;  %12300 = vmatpush3.msra.mxu0 %v8118_v29  ;;  %v11755_v30 = vpop.f32.mrf.mxu0  ;;  %v11826_v26 = vpop.f32.mrf.mxu1  ;;  %v7838_v29 = vld [vmem:[#allocation2 + $0xa3] sm:$0xff] }
 0x96d   :  { %12367 = vmatpush3.msk.msra.mxu1 %vm13568_vm3, %v18503_v59  ;;  %12301 = vmatprep.subr.mxu0 %v8117_v8  ;;  %v16846_v7 = vadd.f32 %v11826_v26, %v11755_v30 }
 0x96e   :  { %12368 = vmatprep.subr.mxu1 %v16810_v47  ;;  %12195 = vmatmul.mubr.f32.gmra.mxu0 %v7567_v62  ;;  %v6180_v31 = vpop.f32.mrf.mxu0  ;;  %v6375_v19 = vpop.f32.mrf.mxu1 }
 0x96f   :  { %12266 = vmatmul.mubr.f32.gmra.mxu1 %v7830_v28  ;;  %12302 = vmatpush3.msra.mxu0 %v8117_v8  ;;  %v16849_v2 = vadd.f32 %v6375_v19, %v6180_v31  ;;  %v7839_v8 = vld [vmem:[#allocation2 + $0xab] sm:$0xff] }
 0x970   :  { %12197 = vmatprep.mubr.f32.mxu0 %v7568_v41  ;;  %12268 = vmatprep.mubr.f32.mxu1 %v7831_v11  ;;  %v11758_v37 = vpop.f32.mrf.mxu0  ;;  %v11829_v44 = vpop.f32.mrf.mxu1  ;;  %v7577_v28 = vld [vmem:[#allocation2 + $0xb2] sm:$0xff]  ;;  %v7578_v11 = vld [vmem:[#allocation2 + $0xba] sm:$0xff] }
 0x971   :  { %12303 = vmatprep.subr.mxu0 %v8116_v46  ;;  %v16854_v24 = vadd.f32 %v11829_v44, %v11758_v37  ;;  %12369 = vmatpush3.msk.msra.mxu1 %vm13591_vm4, %v18503_v59  ;;  %v8110_v41 = vld [vmem:[%s17969_s3 + $0xd10] sm:$0xff]  ;;  %v7841_v37 = vld [vmem:[#allocation2 + $0xbb] sm:$0xff] }
 0x972   :  { %12304 = vmatpush3.msra.mxu0 %v8116_v46  ;;  %v6190_v21 = vpop.f32.mrf.mxu0  ;;  %v6385_v49 = vpop.f32.mrf.mxu1  ;;  %12370 = vmatprep.subr.mxu1 %v16810_v47  ;;  %v7840_v46 = vld [vmem:[#allocation2 + $0xb3] sm:$0xff] }
 0x973   :  { %12198 = vmatmul.mubr.f32.gmra.mxu0 %v7569_v20  ;;  %12269 = vmatmul.mubr.f32.gmra.mxu1 %v7832_v38  ;;  %v16859_v56 = vadd.f32 %v6385_v49, %v6190_v21  ;;  %v7842_v21 = vld [vmem:[#allocation2 + $0xc3] sm:$0xff] }
 0x974   :  { %12200 = vmatprep.mubr.f32.mxu0 %v7570_v58  ;;  %12271 = vmatprep.mubr.f32.mxu1 %v7833_v39  ;;  %v11761_v4 = vpop.f32.mrf.mxu0  ;;  %v7579_v39 = vld [vmem:[#allocation2 + $0xc2] sm:$0xff] }
 0x975   :  { %12305 = vmatprep.subr.mxu0 %v8115_v6  ;;  %v11832_v3 = vpop.f32.mrf.mxu1  ;;  %12371 = vmatpush3.msk.msra.mxu1 %vm13615_vm5, %v18503_v59  ;;  %v8109_v49 = vld [vmem:[%s17969_s3 + $0xd08] sm:$0xff] }
 0x976   :  { %12306 = vmatpush3.msra.mxu0 %v8115_v6  ;;  %v16865_v36 = vadd.f32 %v11832_v3, %v11761_v4  ;;  %v6200_v50 = vpop.f32.mrf.mxu0  ;;  %12372 = vmatprep.subr.mxu1 %v16810_v47 }
 0x977   :  { %12201 = vmatmul.mubr.f32.gmra.mxu0 %v7571_v23  ;;  %12272 = vmatmul.mubr.f32.gmra.mxu1 %v7834_v22  ;;  %v6395_v42 = vpop.f32.mrf.mxu1  ;;  %v7580_v23 = vld [vmem:[#allocation2 + $0xca] sm:$0xff] }
 0x978   :  { %12203 = vmatprep.mubr.f32.mxu0 %v7572_v61  ;;  %12274 = vmatprep.mubr.f32.mxu1 %v7835_v5  ;;  %v16870_v48 = vadd.f32 %v6395_v42, %v6200_v50  ;;  %v11764_v52 = vpop.f32.mrf.mxu0  ;;  %v7843_v22 = vld [vmem:[#allocation2 + $0xcb] sm:$0xff]  ;;  %v8108_v50 = vld [vmem:[%s17969_s3 + $0xd00] sm:$0xff] }
 0x979   :  { %12307 = vmatprep.subr.mxu0 %v8114_v33  ;;  %v11835_v13 = vpop.f32.mrf.mxu1  ;;  %12373 = vmatpush3.msk.msra.mxu1 %vm13626_vm6, %v18503_v59 }
 0x97a   :  { %12308 = vmatpush3.msra.mxu0 %v8114_v33  ;;  %v16876_v27 = vadd.f32 %v11835_v13, %v11764_v52  ;;  %v6210_v0 = vpop.f32.mrf.mxu0  ;;  %12374 = vmatprep.subr.mxu1 %v16810_v47  ;;  %v7581_v52 = vld [vmem:[#allocation2 + $0xd2] sm:$0xff] }
 0x97b   :  { %12204 = vmatmul.mubr.f32.gmra.mxu0 %v7573_v55  ;;  %12275 = vmatmul.mubr.f32.gmra.mxu1 %v7836_v60  ;;  %v6405_v43 = vpop.f32.mrf.mxu1  ;;  %v7844_v13 = vld [vmem:[#allocation2 + $0xd3] sm:$0xff] }
 0x97c   :  { %12309 = vmatprep.subr.mxu0 %v8113_v17  ;;  %12206 = vmatprep.mubr.f32.mxu0 %v7574_v57  ;;  %v16884_v34 = vadd.f32 %v6405_v43, %v6210_v0  ;;  %v11767_v16 = vpop.f32.mrf.mxu0  ;;  %v8082_v57 = vld [vmem:[#allocation2 + $0xc] sm:$0xff] }
 0x97d   :  { %12277 = vmatprep.mubr.f32.mxu1 %v7837_v53  ;;  %12310 = vmatpush3.msra.mxu0 %v8113_v17  ;;  %v11838_v10 = vpop.f32.mrf.mxu1 }
 0x97e   :  { %12311 = vmatprep.subr.mxu0 %v8112_v32  ;;  %v16889_v25 = vadd.f32 %v11838_v10, %v11767_v16  ;;  %v6220_v45 = vpop.f32.mrf.mxu0  ;;  %12375 = vmatpush3.msk.msra.mxu1 %vm13650_vm7, %v18503_v59  ;;  %v8083_v10 = vld [vmem:[#allocation2 + $0x14] sm:$0xff] }
 0x97f   :  { %12207 = vmatmul.mubr.f32.gmra.mxu0 %v7575_v35  ;;  %12278 = vmatmul.mubr.f32.gmra.mxu1 %v7838_v29  ;;  %v6415_v18 = vpop.f32.mrf.mxu1 }
 0x980   :  { %12312 = vmatpush3.msra.mxu0 %v8112_v32  ;;  %12209 = vmatprep.mubr.f32.mxu0 %v7576_v40  ;;  %v16892_v30 = vadd.f32 %v6415_v18, %v6220_v45  ;;  %v11770_v26 = vpop.f32.mrf.mxu0 }
 0x981   :  { %12280 = vmatprep.mubr.f32.mxu1 %v7839_v8  ;;  %12313 = vmatprep.subr.mxu0 %v8111_v15  ;;  %v11841_v62 = vpop.f32.mrf.mxu1 }
 0x982   :  { %12314 = vmatpush3.msra.mxu0 %v8111_v15  ;;  %v16897_v31 = vadd.f32 %v11841_v62, %v11770_v26  ;;  %v6230_v44 = vpop.f32.mrf.mxu0  ;;  %12376 = vmatprep.subr.mxu1 %v16810_v47  ;;  %v8084_v15 = vld [vmem:[#allocation2 + $0x1c] sm:$0xff]  ;;  %v8085_v62 = vld [vmem:[#allocation2 + $0x24] sm:$0xff] }
 0x983   :  { %12210 = vmatmul.mubr.f32.gmra.mxu0 %v7577_v28  ;;  %12281 = vmatmul.mubr.f32.gmra.mxu1 %v7840_v46  ;;  %v6425_v20 = vpop.f32.mrf.mxu1 }
 0x984   :  { %12212 = vmatprep.mubr.f32.mxu0 %v7578_v11  ;;  %12283 = vmatprep.mubr.f32.mxu1 %v7841_v37  ;;  %v16902_v38 = vadd.f32 %v6425_v20, %v6230_v44 }
 0x985   :  { %12315 = vmatprep.subr.mxu0 %v8110_v41  ;;  %v11773_v6 = vpop.f32.mrf.mxu0  ;;  %v11844_v58 = vpop.f32.mrf.mxu1  ;;  %12377 = vmatpush3.msk.msra.mxu1 %vm13674_vm8, %v18503_v59 }
 0x986   :  { %12316 = vmatpush3.msra.mxu0 %v8110_v41  ;;  %v16908_v4 = vadd.f32 %v11844_v58, %v11773_v6  ;;  %12378 = vmatprep.subr.mxu1 %v16810_v47  ;;  %v8086_v41 = vld [vmem:[#allocation2 + $0x2c] sm:$0xff]  ;;  %v8087_v58 = vld [vmem:[#allocation2 + $0x34] sm:$0xff] }
 0x987   :  { %12213 = vmatmul.mubr.f32.gmra.mxu0 %v7579_v39  ;;  %12284 = vmatmul.mubr.f32.gmra.mxu1 %v7842_v21  ;;  %v6240_v33 = vpop.f32.mrf.mxu0  ;;  %v6435_v61 = vpop.f32.mrf.mxu1  ;;  %v8088_v21 = vld [vmem:[#allocation2 + $0x3c] sm:$0xff] }
 0x988   :  { %12215 = vmatprep.mubr.f32.mxu0 %v7580_v23  ;;  %12286 = vmatprep.mubr.f32.mxu1 %v7843_v22  ;;  %v16913_v5 = vadd.f32 %v6435_v61, %v6240_v33 }
 0x989   :  { %12317 = vmatprep.subr.mxu0 %v8109_v49  ;;  %v11776_v42 = vpop.f32.mrf.mxu0  ;;  %v11847_v17 = vpop.f32.mrf.mxu1  ;;  %12379 = vmatpush3.msk.msra.mxu1 %vm13721_vm9, %v18503_v59  ;;  %vm18515_vm9 = vmmov 0  }
 0x98a   :  { %12318 = vmatpush3.msra.mxu0 %v8109_v49  ;;  %v16919_v55 = vadd.f32 %v11847_v17, %v11776_v42  ;;  %12380 = vmatprep.subr.mxu1 %v16810_v47  ;;  %v8089_v42 = vld [vmem:[#allocation2 + $0x44] sm:$0xff] }
 0x98b   :  { %12216 = vmatmul.mubr.f32.gmra.mxu0 %v7581_v52  ;;  %12287 = vmatmul.mubr.f32.gmra.mxu1 %v7844_v13  ;;  %v6250_v32 = vpop.f32.mrf.mxu0  ;;  %v6445_v0 = vpop.f32.mrf.mxu1  ;;  %v8090_v52 = vld [vmem:[#allocation2 + $0x4c] sm:$0xff] }
 0x98c   :  { %12319 = vmatprep.subr.mxu0 %v8108_v50  ;;  %12321 = vmatprep.mubr.f32.mxu0 %v8082_v57  ;;  %v16924_v43 = vadd.f32 %v6445_v0, %v6250_v32  ;;  %v8091_v0 = vld [vmem:[#allocation2 + $0x54] sm:$0xff] }
 0x98d   :  { %12320 = vmatpush3.msra.mxu0 %v8108_v50  ;;  %v11779_v53 = vpop.f32.mrf.mxu0  ;;  %v11850_v16 = vpop.f32.mrf.mxu1  ;;  %12381 = vmatpush3.msk.msra.mxu1 %vm18486_vm13, %v18503_v59 }
 0x98e   :  { %v16927_v35 = vadd.f32 %v11850_v16, %v11779_v53  ;;  %12392 = vmatprep.mubr.msk.f32.mxu1 %vm18515_vm9, %v16810_v47  ;;  %12382 = vmatprep.subr.mxu1 %v16810_v47 }
 0x98f   :  { %12322 = vmatmul.mubr.f32.vlgmr.msra.gmra.mxu0 %v8083_v10  ;;  %v6260_v40 = vpop.f32.mrf.mxu0  ;;  %v6455_v45 = vpop.f32.mrf.mxu1  ;;  %12383 = vmatpush3.msk.msra.mxu1 %vm13740_vm11, %v18503_v59  ;;  %v8092_v10 = vld [vmem:[#allocation2 + $0x5c] sm:$0xff] }
 0x990   :  { %12324 = vmatprep.mubr.f32.mxu0 %v8084_v15  ;;  %v16935_v18 = vadd.f32 %v6455_v45, %v6260_v40  ;;  %12384 = vmatprep.subr.mxu1 %v16810_v47 }
 0x991   :  { %v11782_v26 = vpop.f32.mrf.mxu0  ;;  %v11853_v28 = vpop.f32.mrf.mxu1  ;;  %12385 = vmatpush3.msk.msra.mxu1 %vm18306_vm10, %v18503_v59 }
 0x992   :  { %v16944_v11 = vadd.f32 %v11853_v28, %v11782_v26  ;;  %12386 = vmatprep.subr.mxu1 %v16810_v47 }
 0x993   :  { %12325 = vmatmul.mubr.f32.gmra.mxu0 %v8085_v62  ;;  %v6270_v37 = vpop.f32.mrf.mxu0  ;;  %v6465_v44 = vpop.f32.mrf.mxu1  ;;  %12387 = vmatpush3.msk.msra.mxu1 %vm13773_vm14, %v18503_v59  ;;  %v8094_v62 = vld [vmem:[#allocation2 + $0x6c] sm:$0xff] }
 0x994   :  { %12327 = vmatprep.mubr.f32.mxu0 %v8086_v41  ;;  %v16950_v6 = vadd.f32 %v6465_v44, %v6270_v37  ;;  %12388 = vmatprep.subr.mxu1 %v16810_v47  ;;  %v8095_v44 = vld [vmem:[#allocation2 + $0x74] sm:$0xff] }
 0x995   :  { %12389 = vmatpush3.msk.msra.mxu1 %vm13789_vm15, %v18503_v59 }
 0x996   :  { %v11785_v49 = vpop.f32.mrf.mxu0  ;;  %12390 = vmatprep.subr.mxu1 %v16810_v47 }
 0x997   :  { %12328 = vmatmul.mubr.f32.gmra.mxu0 %v8087_v58  ;;  %v11856_v23 = vpop.f32.mrf.mxu1  ;;  %12391 = vmatpush3.msk.msra.mxu1 %vm13804_vm12, %v18503_v59 }
 0x998   :  { %12330 = vmatprep.mubr.f32.mxu0 %v8088_v21  ;;  %v16957_v22 = vadd.f32 %v11856_v23, %v11785_v49  ;;  %v6280_v61 = vpop.f32.mrf.mxu0  ;;  %12395 = vmatprep.subr.mxu1 %v16810_v47  ;;  %v8093_v47 = vld [vmem:[#allocation2 + $0x64] sm:$0xff]  ;;  %v8096_v21 = vld [vmem:[#allocation2 + $0x7c] sm:$0xff] }
 0x999   :  { %v6475_v50 = vpop.f32.mrf.mxu1 }
 0x99a   :  { %v16963_v17 = vadd.f32 %v6475_v50, %v6280_v61 }
 0x99b   :  { %12331 = vmatmul.mubr.f32.gmra.mxu0 %v8089_v42  ;;  %v11788_v13 = vpop.f32.mrf.mxu0 }
 0x99c   :  { %12333 = vmatprep.mubr.f32.mxu0 %v8090_v52  ;;  %v11859_v57 = vpop.f32.mrf.mxu1 }
 0x99d   :  { %v16965_v32 = vadd.f32 %v11859_v57, %v11788_v13  ;;  %v6290_v53 = vpop.f32.mrf.mxu0  ;;  %v8097_v13 = vld [vmem:[#allocation2 + $0x84] sm:$0xff] }
 0x99e   :  { %v6485_v16 = vpop.f32.mrf.mxu1 }
 0x99f   :  { %12334 = vmatmul.mubr.f32.gmra.mxu0 %v8091_v0  ;;  %v16967_v15 = vadd.f32 %v6485_v16, %v6290_v53  ;;  %v8098_v0 = vld [vmem:[#allocation2 + $0x8c] sm:$0xff] }
 0x9a0   :  { %12336 = vmatprep.mubr.f32.mxu0 %v8092_v10  ;;  %v11791_v40 = vpop.f32.mrf.mxu0 }
 0x9a1   :  { %v11862_v45 = vpop.f32.mrf.mxu1 }
 0x9a2   :  { %v6300_v26 = vpop.f32.mrf.mxu0  ;;  %v16969_v28 = vadd.f32 %v11862_v45, %v11791_v40 }
 0x9a3   :  { %12337 = vmatmul.mubr.f32.gmra.mxu0 %v8093_v47  ;;  %v6495_v41 = vpop.f32.mrf.mxu1 }
 0x9a4   :  { %12339 = vmatprep.mubr.f32.mxu0 %v8094_v62  ;;  %v16971_v37 = vadd.f32 %v6495_v41, %v6300_v26  ;;  %v8099_v26 = vld [vmem:[#allocation2 + $0x94] sm:$0xff] }
 0x9a6   :  { %v11897_v58 = vpop.f32.mrf.mxu0  ;;  %v11968_v23 = vpop.f32.mrf.mxu1 }
 0x9a7   :  { %12340 = vmatmul.mubr.f32.gmra.mxu0 %v8095_v44  ;;  %v6742_v49 = vadd.f32 %v11897_v58, %v16846_v7 }
 0x9a8   :  { %12342 = vmatprep.mubr.f32.mxu0 %v8096_v21  ;;  %v6612_v61 = vpop.f32.mrf.mxu0  ;;  %v6875_v52 = vpop.f32.mrf.mxu1 }
 0x9a9   :  { %v16974_v50 = vadd.f32 %v11968_v23, %v6742_v49  ;;  %v6741_v42 = vadd.f32 %v6612_v61, %v16849_v2  ;;  %v8100_v2 = vld [vmem:[#allocation2 + $0x9c] sm:$0xff]  ;;  %v8101_v49 = vld [vmem:[#allocation2 + $0xa4] sm:$0xff] }
 0x9aa   :  { %v11900_v57 = vpop.f32.mrf.mxu0 }
 0x9ab   :  { %12343 = vmatmul.mubr.f32.gmra.mxu0 %v8097_v13  ;;  %v16977_v53 = vadd.f32 %v6875_v52, %v6741_v42  ;;  %v6744_v16 = vadd.f32 %v11900_v57, %v16854_v24  ;;  %v11971_v10 = vpop.f32.mrf.mxu1 }
 0x9ac   :  { %12345 = vmatprep.mubr.f32.mxu0 %v8098_v0  ;;  %v6622_v40 = vpop.f32.mrf.mxu0 }
 0x9ad   :  { %v16980_v7 = vadd.f32 %v11971_v10, %v6744_v16  ;;  %v6743_v47 = vadd.f32 %v6622_v40, %v16859_v56  ;;  %v6885_v45 = vpop.f32.mrf.mxu1  ;;  %v8102_v56 = vld [vmem:[#allocation2 + $0xac] sm:$0xff]  ;;  %v8103_v10 = vld [vmem:[#allocation2 + $0xb4] sm:$0xff] }
 0x9ae   :  { %v11903_v41 = vpop.f32.mrf.mxu0 }
 0x9af   :  { %12346 = vmatmul.mubr.f32.gmra.mxu0 %v8099_v26  ;;  %v16983_v62 = vadd.f32 %v6885_v45, %v6743_v47  ;;  %v11974_v44 = vpop.f32.mrf.mxu1  ;;  %v6746_v58 = vadd.f32 %v11903_v41, %v16865_v36  ;;  %v8104_v47 = vld [vmem:[#allocation2 + $0xbc] sm:$0xff] }
 0x9b0   :  { %12348 = vmatprep.mubr.f32.mxu0 %v8100_v2  ;;  %v6632_v21 = vpop.f32.mrf.mxu0 }
 0x9b1   :  { %v6895_v24 = vpop.f32.mrf.mxu1  ;;  %v16986_v23 = vadd.f32 %v11974_v44, %v6746_v58  ;;  %v6745_v61 = vadd.f32 %v6632_v21, %v16870_v48  ;;  %v8105_v58 = vld [vmem:[#allocation2 + $0xc4] sm:$0xff] }
 0x9b2   :  { %v11906_v42 = vpop.f32.mrf.mxu0 }
 0x9b3   :  { %12349 = vmatmul.mubr.f32.gmra.mxu0 %v8101_v49  ;;  %v11977_v52 = vpop.f32.mrf.mxu1  ;;  %v16989_v13 = vadd.f32 %v6895_v24, %v6745_v61  ;;  %v6748_v57 = vadd.f32 %v11906_v42, %v16876_v27  ;;  %v8106_v24 = vld [vmem:[#allocation2 + $0xcc] sm:$0xff] }
 0x9b4   :  { %12351 = vmatprep.mubr.f32.mxu0 %v8102_v56  ;;  %v6642_v0 = vpop.f32.mrf.mxu0 }
 0x9b5   :  { %v6905_v16 = vpop.f32.mrf.mxu1  ;;  %v16992_v36 = vadd.f32 %v11977_v52, %v6748_v57  ;;  %v6747_v40 = vadd.f32 %v6642_v0, %v16884_v34  ;;  %v8107_v57 = vld [vmem:[#allocation2 + $0xd4] sm:$0xff] }
 0x9b6   :  { %v11909_v45 = vpop.f32.mrf.mxu0 }
 0x9b7   :  { %12352 = vmatmul.mubr.f32.gmra.mxu0 %v8103_v10  ;;  %v11980_v48 = vpop.f32.mrf.mxu1  ;;  %v16995_v26 = vadd.f32 %v6905_v16, %v6747_v40  ;;  %v6750_v2 = vadd.f32 %v11909_v45, %v16889_v25 }
 0x9b8   :  { %12354 = vmatprep.mubr.f32.mxu0 %v8104_v47  ;;  %v6652_v41 = vpop.f32.mrf.mxu0 }
 0x9b9   :  { %v6915_v44 = vpop.f32.mrf.mxu1  ;;  %v16998_v27 = vadd.f32 %v11980_v48, %v6750_v2  ;;  %v6749_v21 = vadd.f32 %v6652_v41, %v16892_v30 }
 0x9ba   :  { %v11912_v49 = vpop.f32.mrf.mxu0 }
 0x9bb   :  { %12355 = vmatmul.mubr.f32.gmra.mxu0 %v8105_v58  ;;  %v11983_v34 = vpop.f32.mrf.mxu1  ;;  %v17001_v61 = vadd.f32 %v6915_v44, %v6749_v21  ;;  %v6752_v56 = vadd.f32 %v11912_v49, %v16897_v31 }
 0x9bc   :  { %12357 = vmatprep.mubr.f32.mxu0 %v8106_v24  ;;  %v6662_v42 = vpop.f32.mrf.mxu0 }
 0x9bd   :  { %v6925_v52 = vpop.f32.mrf.mxu1  ;;  %v17004_v25 = vadd.f32 %v11983_v34, %v6752_v56  ;;  %v6751_v0 = vadd.f32 %v6662_v42, %v16902_v38 }
 0x9bf   :  { %12358 = vmatmul.mubr.f32.gmra.mxu0 %v8107_v57  ;;  %v11915_v16 = vpop.f32.mrf.mxu0  ;;  %v11986_v10 = vpop.f32.mrf.mxu1  ;;  %v17007_v30 = vadd.f32 %v6925_v52, %v6751_v0 }
 0x9c0   :  { %v6754_v40 = vadd.f32 %v11915_v16, %v16908_v4 }
 0x9c1   :  { %v6672_v47 = vpop.f32.mrf.mxu0  ;;  %v6935_v45 = vpop.f32.mrf.mxu1 }
 0x9c2   :  { %v17010_v48 = vadd.f32 %v11986_v10, %v6754_v40  ;;  %v6753_v31 = vadd.f32 %v6672_v47, %v16913_v5 }
 0x9c3   :  { %v11918_v2 = vpop.f32.mrf.mxu0  ;;  %v11989_v41 = vpop.f32.mrf.mxu1 }
 0x9c4   :  { %v17013_v44 = vadd.f32 %v6935_v45, %v6753_v31  ;;  %v6756_v58 = vadd.f32 %v11918_v2, %v16919_v55 }
 0x9c5   :  { %v6682_v38 = vpop.f32.mrf.mxu0  ;;  %v6945_v21 = vpop.f32.mrf.mxu1 }
 0x9c6   :  { %v17016_v24 = vadd.f32 %v11989_v41, %v6756_v58  ;;  %v6755_v49 = vadd.f32 %v6682_v38, %v16924_v43 }
 0x9c7   :  { %v11921_v34 = vpop.f32.mrf.mxu0  ;;  %v11992_v4 = vpop.f32.mrf.mxu1 }
 0x9c8   :  { %v17019_v56 = vadd.f32 %v6945_v21, %v6755_v49  ;;  %v6758_v42 = vadd.f32 %v11921_v34, %v16927_v35 }
 0x9c9   :  { %v6692_v52 = vpop.f32.mrf.mxu0  ;;  %v6955_v5 = vpop.f32.mrf.mxu1 }
 0x9ca   :  { %v17022_v57 = vadd.f32 %v11992_v4, %v6758_v42  ;;  %v6757_v0 = vadd.f32 %v6692_v52, %v16935_v18 }
 0x9cb   :  { %v11924_v16 = vpop.f32.mrf.mxu0  ;;  %v11995_v40 = vpop.f32.mrf.mxu1 }
 0x9cc   :  { %v17025_v55 = vadd.f32 %v6955_v5, %v6757_v0  ;;  %v6760_v10 = vadd.f32 %v11924_v16, %v16944_v11 }
 0x9cd   :  { %v6702_v47 = vpop.f32.mrf.mxu0  ;;  %v6965_v31 = vpop.f32.mrf.mxu1 }
 0x9ce   :  { %v17028_v43 = vadd.f32 %v11995_v40, %v6760_v10  ;;  %v6759_v45 = vadd.f32 %v6702_v47, %v16950_v6 }
 0x9d0   :  { %v17031_v2 = vadd.f32 %v6965_v31, %v6759_v45  ;;  %v11927_v35 = vpop.f32.mrf.mxu0 }
 0x9d1   :  { %v11998_v41 = vpop.f32.mrf.mxu1  ;;  %v6762_v58 = vadd.f32 %v11927_v35, %v16957_v22 }
 0x9d2   :  { %v6712_v38 = vpop.f32.mrf.mxu0 }
 0x9d3   :  { %v6975_v18 = vpop.f32.mrf.mxu1  ;;  %v17034_v21 = vadd.f32 %v11998_v41, %v6762_v58  ;;  %v6761_v49 = vadd.f32 %v6712_v38, %v16963_v17 }
 0x9d5   :  { %v17037_v11 = vadd.f32 %v6975_v18, %v6761_v49  ;;  %v11930_v34 = vpop.f32.mrf.mxu0 }
 0x9d6   :  { %v12001_v4 = vpop.f32.mrf.mxu1  ;;  %v6764_v42 = vadd.f32 %v11930_v34, %v16965_v32 }
 0x9d7   :  { %v6722_v6 = vpop.f32.mrf.mxu0 }
 0x9d8   :  { %v6985_v52 = vpop.f32.mrf.mxu1  ;;  %v17040_v5 = vadd.f32 %v12001_v4, %v6764_v42  ;;  %v6763_v0 = vadd.f32 %v6722_v6, %v16967_v15 }
 0x9da   :  { %v11933_v16 = vpop.f32.mrf.mxu0  ;;  %v17043_v22 = vadd.f32 %v6985_v52, %v6763_v0 }
 0x9db   :  { %v6766_v10 = vadd.f32 %v11933_v16, %v16969_v28  ;;  %v12004_v40 = vpop.f32.mrf.mxu1 }
 0x9dc   :  { %v6732_v47 = vpop.f32.mrf.mxu0 }
 0x9dd   :  { %v17046_v17 = vadd.f32 %v12004_v40, %v6766_v10  ;;  %v6765_v45 = vadd.f32 %v6732_v47, %v16971_v37  ;;  %v6995_v31 = vpop.f32.mrf.mxu1 }
 0x9df   :  { %v17049_v35 = vadd.f32 %v6995_v31, %v6765_v45 }
 0x9e0   :  { %v12039_v32 = vpop.f32.mrf.mxu0  ;;  %v17054_v58 = vpop.f32.mrf.mxu1 }
 0x9e1   :  { %v17052_v41 = vadd.f32 %v12039_v32, %v16974_v50 }
 0x9e2   :  { %v7138_v15 = vpop.f32.mrf.mxu0  ;;  %v17059_v28 = vpop.f32.mrf.mxu1 }
 0x9e3   :  { %v17057_v38 = vadd.f32 %v7138_v15, %v16977_v53 }
 0x9e4   :  { %v12042_v18 = vpop.f32.mrf.mxu0 }
 0x9e5   :  { %v17062_v49 = vadd.f32 %v12042_v18, %v16980_v7  ;;  %v17064_v37 = vpop.f32.mrf.mxu1 }
 0x9e6   :  { %v7148_v34 = vpop.f32.mrf.mxu0 }
 0x9e7   :  { %v17067_v4 = vadd.f32 %v7148_v34, %v16983_v62  ;;  %v17069_v50 = vpop.f32.mrf.mxu1 }
 0x9e8   :  { %v12045_v42 = vpop.f32.mrf.mxu0 }
 0x9e9   :  { %v17071_v6 = vpop.f32.mrf.mxu1  ;;  %v17074_v53 = vadd.f32 %v12045_v42, %v16986_v23 }
 0x9ea   :  { %v7158_v52 = vpop.f32.mrf.mxu0 }
 0x9eb   :  { %v17076_v0 = vpop.f32.mrf.mxu1  ;;  %v17079_v7 = vadd.f32 %v7158_v52, %v16989_v13 }
 0x9ec   :  { %v12048_v16 = vpop.f32.mrf.mxu0 }
 0x9ed   :  { %v17081_v10 = vpop.f32.mrf.mxu1  ;;  %v17084_v62 = vadd.f32 %v12048_v16, %v16992_v36 }
 0x9ee   :  { %v7168_v40 = vpop.f32.mrf.mxu0 }
 0x9ef   :  { %v17086_v47 = vpop.f32.mrf.mxu1  ;;  %v17089_v45 = vadd.f32 %v7168_v40, %v16995_v26 }
 0x9f0   :  { %v12051_v23 = vpop.f32.mrf.mxu0 }
 0x9f1   :  { %v17091_v31 = vpop.f32.mrf.mxu1  ;;  %v17094_v32 = vadd.f32 %v12051_v23, %v16998_v27 }
 0x9f2   :  { %v7178_v13 = vpop.f32.mrf.mxu0 }
 0x9f3   :  { %v17096_v15 = vpop.f32.mrf.mxu1  ;;  %v17099_v18 = vadd.f32 %v7178_v13, %v17001_v61 }
 0x9f4   :  { %v12054_v36 = vpop.f32.mrf.mxu0 }
 0x9f5   :  { %v17101_v34 = vpop.f32.mrf.mxu1  ;;  %v17104_v42 = vadd.f32 %v12054_v36, %v17004_v25 }
 0x9f6   :  { %v7188_v26 = vpop.f32.mrf.mxu0 }
 0x9f7   :  { %v17106_v52 = vpop.f32.mrf.mxu1  ;;  %v17109_v16 = vadd.f32 %v7188_v26, %v17007_v30 }
 0x9f9   :  { %v12057_v27 = vpop.f32.mrf.mxu0  ;;  %v17111_v40 = vpop.f32.mrf.mxu1 }
 0x9fa   :  { %v17114_v23 = vadd.f32 %v12057_v27, %v17010_v48 }
 0x9fb   :  { %v7198_v61 = vpop.f32.mrf.mxu0  ;;  %v17116_v13 = vpop.f32.mrf.mxu1 }
 0x9fc   :  { %v17119_v33 = vadd.f32 %v7198_v61, %v17013_v44 }
 0x9fd   :  { %v12060_v25 = vpop.f32.mrf.mxu0  ;;  %v17121_v36 = vpop.f32.mrf.mxu1 }
 0x9fe   :  { %18521 = vst [vmem:[#allocation18_spill] sm:$0xff] %v17121_v36  ;;  %v17124_v39 = vadd.f32 %v12060_v25, %v17016_v24 }
 0x9ff   :  { %v7208_v30 = vpop.f32.mrf.mxu0  ;;  %v17126_v26 = vpop.f32.mrf.mxu1 }
 0xa00   :  { %18522 = vst [vmem:[#allocation31_spill] sm:$0xff] %v17126_v26  ;;  %v17129_v20 = vadd.f32 %v7208_v30, %v17019_v56 }
 0xa01   :  { %v12063_v48 = vpop.f32.mrf.mxu0  ;;  %v17131_v27 = vpop.f32.mrf.mxu1 }
 0xa02   :  { %18523 = vst [vmem:[#allocation84_spill] sm:$0xff] %v17129_v20  ;;  %18524 = vst [vmem:[#allocation20_spill] sm:$0xff] %v17131_v27  ;;  %v17134_v46 = vadd.f32 %v12063_v48, %v17022_v57 }
 0xa03   :  { %v7218_v44 = vpop.f32.mrf.mxu0  ;;  %v17136_v61 = vpop.f32.mrf.mxu1 }
 0xa04   :  { %18525 = vst [vmem:[#allocation86_spill] sm:$0xff] %v17134_v46  ;;  %18526 = vst [vmem:[#allocation35_spill] sm:$0xff] %v17136_v61  ;;  %v17139_v8 = vadd.f32 %v7218_v44, %v17025_v55 }
 0xa05   :  { %v12066_v24 = vpop.f32.mrf.mxu0  ;;  %v17144_v29 = vpop.f32.mrf.mxu1 }
 0xa06   :  { %18527 = vst [vmem:[#allocation41_spill] sm:$0xff] %v17139_v8  ;;  %v17142_v25 = vadd.f32 %v12066_v24, %v17028_v43  ;;  %18529 = vst [vmem:[#allocation69_spill] sm:$0xff] %v17144_v29 }
 0xa07   :  { %v7228_v56 = vpop.f32.mrf.mxu0  ;;  %v17149_v60 = vpop.f32.mrf.mxu1 }
 0xa08   :  { %18528 = vst [vmem:[#allocation95_spill] sm:$0xff] %v17142_v25  ;;  %v17147_v30 = vadd.f32 %v7228_v56, %v17031_v2  ;;  %18531 = vst [vmem:[#allocation71_spill] sm:$0xff] %v17149_v60 }
 0xa0a   :  { %18530 = vst [vmem:[#allocation15_spill] sm:$0xff] %v17147_v30  ;;  %v12069_v57 = vpop.f32.mrf.mxu0 }
 0xa0b   :  { %v17151_v48 = vpop.f32.mrf.mxu1  ;;  %v17154_v3 = vadd.f32 %v12069_v57, %v17034_v21 }
 0xa0c   :  { %18532 = vst [vmem:[#allocation17_spill] sm:$0xff] %v17151_v48  ;;  %v7238_v55 = vpop.f32.mrf.mxu0 }
 0xa0d   :  { %18533 = vst [vmem:[#allocation88_spill] sm:$0xff] %v17154_v3  ;;  %v17156_v44 = vpop.f32.mrf.mxu1  ;;  %v17159_v43 = vadd.f32 %v7238_v55, %v17037_v11 }
 0xa0e   :  { %18534 = vst [vmem:[#allocation45_spill] sm:$0xff] %v17156_v44 }
 0xa0f   :  { %18535 = vst [vmem:[#allocation73_spill] sm:$0xff] %v17159_v43  ;;  %v12072_v24 = vpop.f32.mrf.mxu0 }
 0xa10   :  { %v17161_v19 = vpop.f32.mrf.mxu1  ;;  %v17164_v2 = vadd.f32 %v12072_v24, %v17040_v5 }
 0xa11   :  { %18536 = vst [vmem:[#allocation68_spill] sm:$0xff] %v17161_v19  ;;  %v7248_v56 = vpop.f32.mrf.mxu0 }
 0xa12   :  { %18537 = vst [vmem:[#allocation33_spill] sm:$0xff] %v17164_v2  ;;  %v17166_v51 = vpop.f32.mrf.mxu1  ;;  %v17169_v54 = vadd.f32 %v7248_v56, %v17043_v22 }
 0xa13   :  { %18538 = vst [vmem:[#allocation44_spill] sm:$0xff] %v17166_v51 }
 0xa14   :  { %18539 = vst [vmem:[#allocation21_spill] sm:$0xff] %v17169_v54  ;;  %v12075_v21 = vpop.f32.mrf.mxu0 }
 0xa15   :  { %v17172_v57 = vadd.f32 %v12075_v21, %v17046_v17  ;;  %v17174_v14 = vpop.f32.mrf.mxu1 }
 0xa16   :  { %18541 = vst [vmem:[#allocation89_spill] sm:$0xff] %v17174_v14  ;;  %v7258_v11 = vpop.f32.mrf.mxu0 }
 0xa17   :  { %18540 = vst [vmem:[#allocation74_spill] sm:$0xff] %v17172_v57  ;;  %v17177_v55 = vadd.f32 %v7258_v11, %v17049_v35  ;;  %v17179_v9 = vpop.f32.mrf.mxu1 }
 0xa18   :  { %18543 = vst [vmem:[#allocation5_spill] sm:$0xff] %v17179_v9 }
 0xa19   :  { %18542 = vst [vmem:[#allocation43_spill] sm:$0xff] %v17177_v55 }
 0xa1a   :  { %v12181_v5 = vpop.f32.mrf.mxu0  ;;  %v12252_v24 = vpop.f32.mrf.mxu1 }
 0xa1c   :  { %v7664_v63 = vpop.f32.mrf.mxu0  ;;  %v7927_v1 = vpop.f32.mrf.mxu1 }
 0xa1e   :  { %v12184_v12 = vpop.f32.mrf.mxu0 }
 0xa1f   :  { %v12255_v22 = vpop.f32.mrf.mxu1 }
 0xa20   :  { %v7674_v59 = vpop.f32.mrf.mxu0 }
 0xa21   :  { %v7937_v54 = vpop.f32.mrf.mxu1 }
 0xa22   :  { %v12187_v56 = vpop.f32.mrf.mxu0 }
 0xa23   :  { %v12258_v14 = vpop.f32.mrf.mxu1 }
 0xa24   :  { %v7684_v51 = vpop.f32.mrf.mxu0 }
 0xa25   :  { %v7947_v11 = vpop.f32.mrf.mxu1 }
 0xa26   :  { %v12190_v17 = vpop.f32.mrf.mxu0 }
 0xa27   :  { %v17191_v19 = vpop.f32.mrf.mxu1 }
 0xa28   :  { %v17181_v21 = vpop.f32.mrf.mxu0 }
 0xa29   :  { %v17197_v43 = vpop.f32.mrf.mxu1 }
 0xa2a   :  { %v17183_v57 = vpop.f32.mrf.mxu0 }
 0xa2b   :  { %v17203_v60 = vpop.f32.mrf.mxu1 }
 0xa2c   :  { %v17185_v35 = vpop.f32.mrf.mxu0 }
 0xa2d   :  { %v17209_v25 = vpop.f32.mrf.mxu1 }
 0xa2e   :  { %v17187_v9 = vpop.f32.mrf.mxu0 }
 0xa2f   :  { %v17215_v27 = vpop.f32.mrf.mxu1 }
 0xa30   :  { %v17189_v55 = vpop.f32.mrf.mxu0 }
 0xa33   :  { %v17193_v2 = vpop.f32.mrf.mxu0 }
 0xa35   :  { %v17195_v44 = vpop.f32.mrf.mxu0 }
 0xa36   :  { %18544 = vst [vmem:[#allocation72_spill] sm:$0xff] %v17195_v44 }
 0xa37   :  { %v17199_v48 = vpop.f32.mrf.mxu0 }
 0xa38   :  { %18545 = vst [vmem:[#allocation87_spill] sm:$0xff] %v17199_v48  ;;  %v17221_v48 = vpop.f32.mrf.mxu1 }
 0xa39   :  { %v17201_v3 = vpop.f32.mrf.mxu0  ;;  %18553 = vst [vmem:[#allocation83_spill] sm:$0xff] %v17221_v48 }
 0xa3a   :  { %18546 = vst [vmem:[#allocation46_spill] sm:$0xff] %v17201_v3 }
 0xa3b   :  { %v17205_v30 = vpop.f32.mrf.mxu0 }
 0xa3c   :  { %18547 = vst [vmem:[#allocation49_spill] sm:$0xff] %v17205_v30  ;;  %v7531_v30 = vadd.f32 %v17054_v58, %v17052_v41 }
 0xa3d   :  { %v17207_v29 = vpop.f32.mrf.mxu0 }
 0xa3e   :  { %18548 = vst [vmem:[#allocation75_spill] sm:$0xff] %v17207_v29  ;;  %v7794_v20 = vadd.f32 %v12181_v5, %v7531_v30 }
 0xa3f   :  { %v17211_v61 = vpop.f32.mrf.mxu0 }
 0xa40   :  { %18549 = vst [vmem:[#allocation7_spill] sm:$0xff] %v17211_v61  ;;  %v7530_v61 = vadd.f32 %v17059_v28, %v17057_v38  ;;  %v8057_v41 = vadd.f32 %v12252_v24, %v7794_v20  ;;  %v7535_v38 = vadd.f32 %v17071_v6, %v17074_v53  ;;  %v7537_v6 = vadd.f32 %v17081_v10, %v17084_v62 }
 0xa41   :  { %v17213_v8 = vpop.f32.mrf.mxu0  ;;  %v7539_v62 = vadd.f32 %v17091_v31, %v17094_v32  ;;  %v7538_v31 = vadd.f32 %v17096_v15, %v17099_v18  ;;  %v7541_v15 = vadd.f32 %v17101_v34, %v17104_v42  ;;  %v7540_v42 = vadd.f32 %v17106_v52, %v17109_v16 }
 0xa42   :  { %18550 = vst [vmem:[#allocation90_spill] sm:$0xff] %v17213_v8  ;;  %v17231_v8 = vpop.f32.mrf.mxu1  ;;  %v7543_v52 = vadd.f32 %v17111_v40, %v17114_v23  ;;  %v7542_v23 = vadd.f32 %v17116_v13, %v17119_v33  ;;  %v18557_v13 = vld [vmem:[#allocation83_spill] sm:$0xff] }
 0xa43   :  { %v17217_v46 = vpop.f32.mrf.mxu0  ;;  %v7801_v18 = vadd.f32 %v17185_v35, %v7538_v31  ;;  %v7803_v16 = vadd.f32 %v17189_v55, %v7540_v42 }
 0xa44   :  { %18551 = vst [vmem:[#allocation50_spill] sm:$0xff] %v17217_v46  ;;  %v7793_v46 = vadd.f32 %v7664_v63, %v7530_v61  ;;  %v17250_v63 = vld [vmem:[%s17970_s4 + $0x3] ss:$0 sm:$0xff] }
 0xa45   :  { %v17219_v26 = vpop.f32.mrf.mxu0 }
 0xa46   :  { %18552 = vst [vmem:[#allocation29_spill] sm:$0xff] %v17219_v26  ;;  %v7533_v26 = vadd.f32 %v17064_v37, %v17062_v49  ;;  %v8056_v28 = vadd.f32 %v7927_v1, %v7793_v46  ;;  %v7534_v49 = vadd.f32 %v17076_v0, %v17079_v7  ;;  %v7536_v7 = vadd.f32 %v17086_v47, %v17089_v45 }
 0xa47   :  { %v17223_v3 = vpop.f32.mrf.mxu0 }
 0xa48   :  { %18554 = vst [vmem:[#allocation48_spill] sm:$0xff] %v17223_v3  ;;  %v7532_v3 = vadd.f32 %v17069_v50, %v17067_v4  ;;  %v7796_v58 = vadd.f32 %v12184_v12, %v7533_v26  ;;  %v7798_v12 = vadd.f32 %v12187_v56, %v7535_v38  ;;  %v7797_v1 = vadd.f32 %v7684_v51, %v7534_v49  ;;  %v17269_v51 = vld [vmem:[%s17971_s1] sm:$0xff] }
 0xa49   :  { %v17227_v29 = vpop.f32.mrf.mxu0  ;;  %v7799_v47 = vadd.f32 %v17181_v21, %v7536_v7 }
 0xa4a   :  { %18555 = vst [vmem:[#allocation51_spill] sm:$0xff] %v17227_v29  ;;  %v17241_v29 = vpop.f32.mrf.mxu1  ;;  %v7795_v30 = vadd.f32 %v7674_v59, %v7532_v3  ;;  %v8059_v20 = vadd.f32 %v12255_v22, %v7796_v58  ;;  %v8061_v61 = vadd.f32 %v12258_v14, %v7798_v12  ;;  %v8060_v22 = vadd.f32 %v7947_v11, %v7797_v1  ;;  %v17279_v14 = vld [vmem:[%s17971_s1 + $0x8] sm:$0xff] }
 0xa4b   :  { %v17233_v44 = vpop.f32.mrf.mxu0  ;;  %v7802_v11 = vadd.f32 %v17183_v57, %v7539_v62 }
 0xa4c   :  { %v17252_v4 = vpop.f32.mrf.mxu1  ;;  %v8058_v3 = vadd.f32 %v7937_v54, %v7795_v30  ;;  %v17298_v30 = vld [vmem:[%s17971_s1 + $0x10] sm:$0xff] }
 0xa4d   :  { %v17237_v48 = vpop.f32.mrf.mxu0  ;;  %v8065_v1 = vadd.f32 %v17203_v60, %v7802_v11  ;;  %v17339_v60 = vld [vmem:[%s17971_s1 + $0x28] sm:$0xff] }
 0xa4e   :  { %v17264_v24 = vpop.f32.mrf.mxu1 }
 0xa4f   :  { %v12323_v36 = vpop.f32.mrf.mxu0 }
 0xa50   :  { %v8320_v5 = vadd.f32 %v12323_v36, %v8057_v41  ;;  %v7800_v36 = vadd.f32 %v12190_v17, %v7537_v6  ;;  %v17293_v38 = vpop.f32.mrf.mxu1 }
 0xa51   :  { %v8190_v37 = vpop.f32.mrf.mxu0 }
 0xa52   :  { %v8319_v50 = vadd.f32 %v8190_v37, %v8056_v28  ;;  %v17257_v46 = vadd.f32 %v17250_v63, %v8320_v5  ;;  %v8063_v32 = vadd.f32 %v17191_v19, %v7800_v36  ;;  %v8062_v19 = vadd.f32 %v17197_v43, %v7799_v47 }
 0xa53   :  { %v12326_v59 = vpop.f32.mrf.mxu0  ;;  %v7804_v43 = vadd.f32 %v17187_v9, %v7541_v15  ;;  %v8064_v9 = vadd.f32 %v17209_v25, %v7801_v18  ;;  %v18559_v18 = vld [vmem:[#allocation84_spill] sm:$0xff] }
 0xa54   :  { %v17260_v53 = vadd.f32 %v17250_v63, %v8319_v50  ;;  %v8322_v0 = vadd.f32 %v12326_v59, %v8059_v20  ;;  %v8377_v56 = vmul.f32 %v17279_v14, %v17257_v46  ;;  %v17312_v20 = vld [vmem:[%s17971_s1 + $0x18] sm:$0xff]  ;;  %v17323_v59 = vpop.f32.mrf.mxu1 }
 0xa55   :  { %v8200_v26 = vpop.f32.mrf.mxu0  ;;  %v8067_v25 = vadd.f32 %v17215_v27, %v7804_v43  ;;  %v8066_v27 = vadd.f32 %v18557_v13, %v7803_v16  ;;  %v18567_v13 = vld [vmem:[#allocation49_spill] sm:$0xff] }
 0xa56   :  { %v8376_v54 = vmul.f32 %v17269_v51, %v17260_v53  ;;  %v8321_v10 = vadd.f32 %v8200_v26, %v8058_v3  ;;  %v17284_v17 = vadd.f32 %v17250_v63, %v8322_v0  ;;  %v17328_v3 = vld [vmem:[%s17971_s1 + $0x20] sm:$0xff]  ;;  %v17353_v47 = vpop.f32.mrf.mxu1 }
 0xa57   :  { %v12329_v45 = vpop.f32.mrf.mxu0 }
 0xa58   :  { %v17287_v41 = vadd.f32 %v17250_v63, %v8321_v10  ;;  %v8324_v58 = vadd.f32 %v12329_v45, %v8061_v61  ;;  %v8402_v28 = vadd.f32 %v8377_v56, %v8376_v54  ;;  %v8379_v12 = vmul.f32 %v17312_v20, %v17284_v17  ;;  %v17358_v45 = vld [vmem:[%s17971_s1 + $0x30] sm:$0xff] }
 0xa59   :  { %v8210_v21 = vpop.f32.mrf.mxu0 }
 0xa5a   :  { %v8378_v5 = vmul.f32 %v17298_v30, %v17287_v41  ;;  %v8323_v49 = vadd.f32 %v8210_v21, %v8060_v22  ;;  %v17307_v57 = vadd.f32 %v17250_v63, %v8324_v58  ;;  %v7806_v22 = vadd.f32 %v17193_v2, %v7543_v52  ;;  %v18558_v21 = vld [vmem:[#allocation72_spill] sm:$0xff]  ;;  %v18562_v52 = vld [vmem:[#allocation86_spill] sm:$0xff] }
 0xa5b   :  { %v12332_v37 = vpop.f32.mrf.mxu0  ;;  %v7805_v11 = vadd.f32 %v18558_v21, %v7542_v23 }
 0xa5c   :  { %v8403_v50 = vadd.f32 %v8402_v28, %v8378_v5  ;;  %v17317_v6 = vadd.f32 %v17250_v63, %v8323_v49  ;;  %v8326_v34 = vadd.f32 %v12332_v37, %v8063_v32  ;;  %v8381_v26 = vmul.f32 %v17339_v60, %v17307_v57  ;;  %v18556_v32 = vld [vmem:[#allocation18_spill] sm:$0xff]  ;;  %v17372_v5 = vld [vmem:[%s17971_s1 + $0x38] sm:$0xff] }
 0xa5d   :  { %v8220_v35 = vpop.f32.mrf.mxu0  ;;  %v7545_v33 = vadd.f32 %v18556_v32, %v17124_v39  ;;  %v18560_v37 = vld [vmem:[#allocation31_spill] sm:$0xff]  ;;  %v8069_v43 = vadd.f32 %v17231_v8, %v7806_v22  ;;  %v17399_v8 = vld [vmem:[%s17971_s1 + $0x48] sm:$0xff] }
 0xa5e   :  { %v8380_v0 = vmul.f32 %v17328_v3, %v17317_v6  ;;  %v8404_v7 = vadd.f32 %v8403_v50, %v8379_v12  ;;  %v8325_v36 = vadd.f32 %v8220_v35, %v8062_v19  ;;  %v17344_v10 = vadd.f32 %v17250_v63, %v8326_v34  ;;  %v18561_v50 = vld [vmem:[#allocation87_spill] sm:$0xff]  ;;  %v17383_v35 = vpop.f32.mrf.mxu1 }
 0xa5f   :  { %v12335_v61 = vpop.f32.mrf.mxu0  ;;  %v7544_v12 = vadd.f32 %v18560_v37, %v18559_v18  ;;  %v7808_v34 = vadd.f32 %v18561_v50, %v7545_v33  ;;  %v18569_v18 = vld [vmem:[#allocation69_spill] sm:$0xff] }
 0xa60   :  { %v8405_v54 = vadd.f32 %v8404_v7, %v8380_v0  ;;  %v17347_v62 = vadd.f32 %v17250_v63, %v8325_v36  ;;  %v8328_v40 = vadd.f32 %v12335_v61, %v8065_v1  ;;  %v8383_v49 = vmul.f32 %v17372_v5, %v17344_v10  ;;  %v17388_v1 = vld [vmem:[%s17971_s1 + $0x40] sm:$0xff]  ;;  %v18564_v61 = vld [vmem:[#allocation46_spill] sm:$0xff]  ;;  %v12282_v21 = vpop.f32.mrf.mxu1 }
 0xa61   :  { %v8230_v55 = vpop.f32.mrf.mxu0  ;;  %v8071_v32 = vadd.f32 %v17252_v4, %v7808_v34  ;;  %v18570_v4 = vld [vmem:[#allocation75_spill] sm:$0xff] }
 0xa62   :  { %v8382_v56 = vmul.f32 %v17358_v45, %v17347_v62  ;;  %v8406_v58 = vadd.f32 %v8405_v54, %v8381_v26  ;;  %v8327_v31 = vadd.f32 %v8230_v55, %v8064_v9  ;;  %v17367_v2 = vadd.f32 %v17250_v63, %v8328_v40  ;;  %v18563_v9 = vld [vmem:[#allocation20_spill] sm:$0xff] }
 0xa63   :  { %v12338_v28 = vpop.f32.mrf.mxu0  ;;  %v7547_v16 = vadd.f32 %v18563_v9, %v18562_v52  ;;  %v8068_v26 = vadd.f32 %v17241_v29, %v7805_v11  ;;  %v7807_v54 = vadd.f32 %v18564_v61, %v7544_v12  ;;  %v18565_v29 = vld [vmem:[#allocation41_spill] sm:$0xff]  ;;  %v17416_v11 = vld [vmem:[%s17971_s1 + $0x50] sm:$0xff]  ;;  %v18572_v9 = vld [vmem:[#allocation71_spill] sm:$0xff] }
 0xa64   :  { %v8407_v15 = vadd.f32 %v8406_v58, %v8382_v56  ;;  %v17377_v19 = vadd.f32 %v17250_v63, %v8327_v31  ;;  %v8330_v39 = vadd.f32 %v12338_v28, %v8067_v25  ;;  %v8385_v40 = vmul.f32 %v17399_v8, %v17367_v2  ;;  %v18566_v58 = vld [vmem:[#allocation35_spill] sm:$0xff] }
 0xa65   :  { %v8240_v42 = vpop.f32.mrf.mxu0  ;;  %v7546_v31 = vadd.f32 %v18566_v58, %v18565_v29  ;;  %v8070_v12 = vadd.f32 %v17264_v24, %v7807_v54  ;;  %v18571_v24 = vld [vmem:[#allocation15_spill] sm:$0xff] }
 0xa66   :  { %v8384_v0 = vmul.f32 %v17388_v1, %v17377_v19  ;;  %v8408_v7 = vadd.f32 %v8407_v15, %v8383_v49  ;;  %v8329_v36 = vadd.f32 %v8240_v42, %v8066_v27  ;;  %v17404_v55 = vadd.f32 %v17250_v63, %v8330_v39  ;;  %v18568_v39 = vld [vmem:[#allocation95_spill] sm:$0xff] }
 0xa67   :  { %v12341_v23 = vpop.f32.mrf.mxu0  ;;  %v7810_v27 = vadd.f32 %v18567_v13, %v7547_v16  ;;  %v7549_v37 = vadd.f32 %v18569_v18, %v18568_v39  ;;  %v7809_v50 = vadd.f32 %v18570_v4, %v7546_v31  ;;  %v7548_v16 = vadd.f32 %v18572_v9, %v18571_v24  ;;  %v18574_v31 = vld [vmem:[#allocation88_spill] sm:$0xff]  ;;  %v18578_v4 = vld [vmem:[#allocation45_spill] sm:$0xff] }
 0xa68   :  { %v8409_v25 = vadd.f32 %v8408_v7, %v8384_v0  ;;  %v17407_v22 = vadd.f32 %v17250_v63, %v8329_v36  ;;  %v8332_v56 = vadd.f32 %v12341_v23, %v8069_v43  ;;  %v17430_v43 = vld [vmem:[%s17971_s1 + $0x58] sm:$0xff]  ;;  %v8027_v23 = vpop.f32.mrf.mxu1 }
 0xa69   :  { %v8250_v33 = vpop.f32.mrf.mxu0  ;;  %v8387_v0 = vmul.f32 %v17430_v43, %v17404_v55  ;;  %v8072_v13 = vadd.f32 %v17323_v59, %v7809_v50  ;;  %v18577_v59 = vld [vmem:[#allocation73_spill] sm:$0xff] }
 0xa6a   :  { %v8386_v28 = vmul.f32 %v17416_v11, %v17407_v22  ;;  %v8410_v49 = vadd.f32 %v8409_v25, %v8385_v40  ;;  %v8331_v15 = vadd.f32 %v8250_v33, %v8068_v26  ;;  %v17425_v34 = vadd.f32 %v17250_v63, %v8332_v56  ;;  %v18573_v26 = vld [vmem:[#allocation7_spill] sm:$0xff]  ;;  %v17444_v25 = vld [vmem:[%s17971_s1 + $0x60] sm:$0xff]  ;;  %v12285_v9 = vpop.f32.mrf.mxu1 }
 0xa6b   :  { %v12344_v42 = vpop.f32.mrf.mxu0  ;;  %v7812_v61 = vadd.f32 %v18573_v26, %v7549_v37  ;;  %v8073_v40 = vadd.f32 %v17293_v38, %v7810_v27  ;;  %v17455_v38 = vld [vmem:[%s17971_s1 + $0x68] sm:$0xff]  ;;  %v7550_v50 = vadd.f32 %v18578_v4, %v18577_v59  ;;  %v18587_v59 = vld [vmem:[#allocation48_spill] sm:$0xff] }
 0xa6c   :  { %v8411_v7 = vadd.f32 %v8410_v49, %v8386_v28  ;;  %v17435_v36 = vadd.f32 %v17250_v63, %v8331_v15  ;;  %v8334_v52 = vadd.f32 %v12344_v42, %v8071_v32  ;;  %v18575_v32 = vld [vmem:[#allocation17_spill] sm:$0xff]  ;;  %v18576_v28 = vld [vmem:[#allocation90_spill] sm:$0xff]  ;;  %v8389_v27 = vmul.f32 %v17455_v38, %v17425_v34 }
 0xa6d   :  { %v8260_v54 = vpop.f32.mrf.mxu0  ;;  %v7551_v33 = vadd.f32 %v18575_v32, %v18574_v31  ;;  %v7811_v49 = vadd.f32 %v18576_v28, %v7548_v16  ;;  %v8075_v42 = vadd.f32 %v17353_v47, %v7812_v61  ;;  %v17472_v16 = vld [vmem:[%s17971_s1 + $0x70] sm:$0xff]  ;;  %v18583_v47 = vld [vmem:[#allocation29_spill] sm:$0xff] }
 0xa6e   :  { %v8388_v56 = vmul.f32 %v17444_v25, %v17435_v36  ;;  %v8412_v29 = vadd.f32 %v8411_v7, %v8387_v0  ;;  %v8333_v58 = vadd.f32 %v8260_v54, %v8070_v12  ;;  %v17460_v18 = vadd.f32 %v17250_v63, %v8334_v52  ;;  %v18579_v7 = vld [vmem:[#allocation50_spill] sm:$0xff]  ;;  %18580 = vst [vmem:[#allocation4_spill] sm:$0xff] %v17472_v16 }
 0xa6f   :  { %v12347_v15 = vpop.f32.mrf.mxu0  ;;  %v7814_v24 = vadd.f32 %v18579_v7, %v7551_v33  ;;  %v7813_v61 = vadd.f32 %v18583_v47, %v7550_v50  ;;  %v17486_v33 = vld [vmem:[%s17971_s1 + $0x78] sm:$0xff]  ;;  %v17499_v7 = vld [vmem:[%s17971_s1 + $0x80] sm:$0xff] }
 0xa70   :  { %v8413_v39 = vadd.f32 %v8412_v29, %v8388_v56  ;;  %v17463_v37 = vadd.f32 %v17250_v63, %v8333_v58  ;;  %v8336_v12 = vadd.f32 %v12347_v15, %v8073_v40  ;;  %v18581_v40 = vld [vmem:[#allocation33_spill] sm:$0xff]  ;;  %v18582_v56 = vld [vmem:[#allocation68_spill] sm:$0xff]  ;;  %v8074_v58 = vadd.f32 %v17383_v35, %v7811_v49  ;;  %18584 = vst [vmem:[#allocation22_spill] sm:$0xff] %v17486_v33 }
 0xa71   :  { %v8270_v0 = vpop.f32.mrf.mxu0  ;;  %v7553_v29 = vadd.f32 %v18582_v56, %v18581_v40  ;;  %v8391_v28 = vmul.f32 %v17486_v33, %v17460_v18  ;;  %v18585_v35 = vld [vmem:[#allocation21_spill] sm:$0xff]  ;;  %v18586_v49 = vld [vmem:[#allocation44_spill] sm:$0xff]  ;;  %v8077_v50 = vadd.f32 %v12282_v21, %v7814_v24  ;;  %18588 = vst [vmem:[#allocation91_spill] sm:$0xff] %v17499_v7  ;;  %v18589_v40 = vld [vmem:[#allocation74_spill] sm:$0xff]  ;;  %v8076_v47 = vadd.f32 %v8027_v23, %v7813_v61 }
 0xa72   :  { %v8390_v52 = vmul.f32 %v17472_v16, %v17463_v37  ;;  %v8414_v26 = vadd.f32 %v8413_v39, %v8389_v27  ;;  %v8335_v54 = vadd.f32 %v8270_v0, %v8072_v13  ;;  %v17481_v31 = vadd.f32 %v17250_v63, %v8336_v12  ;;  %v8037_v0 = vpop.f32.mrf.mxu1  ;;  %v17509_v21 = vld [vmem:[%s17971_s1 + $0x88] sm:$0xff]  ;;  %v18593_v23 = vld [vmem:[#allocation43_spill] sm:$0xff] }
 0xa73   :  { %v12350_v32 = vpop.f32.mrf.mxu0  ;;  %v7552_v39 = vadd.f32 %v18586_v49, %v18585_v35  ;;  %v7816_v12 = vadd.f32 %v18587_v59, %v7553_v29  ;;  %18592 = vst [vmem:[#allocation26_spill] sm:$0xff] %v17509_v21  ;;  %v18594_v61 = vld [vmem:[#allocation5_spill] sm:$0xff] }
 0xa74   :  { %v8415_v13 = vadd.f32 %v8414_v26, %v8390_v52  ;;  %v17491_v27 = vadd.f32 %v17250_v63, %v8335_v54  ;;  %v8338_v15 = vadd.f32 %v12350_v32, %v8075_v42  ;;  %v18590_v42 = vld [vmem:[#allocation89_spill] sm:$0xff]  ;;  %v18591_v32 = vld [vmem:[#allocation51_spill] sm:$0xff]  ;;  %v8393_v24 = vmul.f32 %v17509_v21, %v17481_v31 }
 0xa75   :  { %v8280_v4 = vpop.f32.mrf.mxu0  ;;  %v7555_v56 = vadd.f32 %v18590_v42, %v18589_v40  ;;  %v7815_v35 = vadd.f32 %v18591_v32, %v7552_v39  ;;  %v8079_v39 = vadd.f32 %v12285_v9, %v7816_v12  ;;  %v12288_v42 = vpop.f32.mrf.mxu1  ;;  %v17525_v32 = vld [vmem:[%s17971_s1 + $0x90] sm:$0xff] }
 0xa76   :  { %v8392_v52 = vmul.f32 %v17499_v7, %v17491_v27  ;;  %v8416_v26 = vadd.f32 %v8415_v13, %v8391_v28  ;;  %v8337_v54 = vadd.f32 %v8280_v4, %v8074_v58  ;;  %v17514_v59 = vadd.f32 %v17250_v63, %v8338_v15  ;;  %18595 = vst [vmem:[#allocation19_spill] sm:$0xff] %v17525_v32 }
 0xa77   :  { %v12353_v29 = vpop.f32.mrf.mxu0  ;;  %v7554_v13 = vadd.f32 %v18594_v61, %v18593_v23  ;;  %v7818_v40 = vadd.f32 %v17233_v44, %v7555_v56  ;;  %v17536_v44 = vld [vmem:[%s17971_s1 + $0x98] sm:$0xff] }
 0xa78   :  { %v8417_v49 = vadd.f32 %v8416_v26, %v8392_v52  ;;  %v17517_v58 = vadd.f32 %v17250_v63, %v8337_v54  ;;  %v8340_v28 = vadd.f32 %v12353_v29, %v8077_v50  ;;  %v8078_v54 = vadd.f32 %v8037_v0, %v7815_v35  ;;  %18596 = vst [vmem:[#allocation56_spill] sm:$0xff] %v17536_v44 }
 0xa79   :  { %v8290_v4 = vpop.f32.mrf.mxu0  ;;  %v7817_v50 = vadd.f32 %v17237_v48, %v7554_v13  ;;  %v8395_v12 = vmul.f32 %v17536_v44, %v17514_v59  ;;  %v8081_v35 = vadd.f32 %v12288_v42, %v7818_v40  ;;  %v8047_v48 = vpop.f32.mrf.mxu1 }
 0xa7a   :  { %v8394_v15 = vmul.f32 %v17525_v32, %v17517_v58  ;;  %v8418_v52 = vadd.f32 %v8417_v49, %v8393_v24  ;;  %v8339_v26 = vadd.f32 %v8290_v4, %v8076_v47  ;;  %v17531_v29 = vadd.f32 %v17250_v63, %v8340_v28  ;;  %v17546_v24 = vld [vmem:[%s17971_s1 + $0xa0] sm:$0xff]  ;;  %v17553_v4 = vld [vmem:[%s17971_s1 + $0xa8] sm:$0xff] }
 0xa7b   :  { %v12356_v9 = vpop.f32.mrf.mxu0  ;;  %18597 = vst [vmem:[#allocation53_spill] sm:$0xff] %v17546_v24  ;;  %v8080_v13 = vadd.f32 %v8047_v48, %v7817_v50  ;;  %18598 = vst [vmem:[#allocation6_spill] sm:$0xff] %v17553_v4 }
 0xa7c   :  { %v8419_v56 = vadd.f32 %v8418_v52, %v8394_v15  ;;  %v17541_v23 = vadd.f32 %v17250_v63, %v8339_v26  ;;  %v8342_v47 = vadd.f32 %v12356_v9, %v8079_v39  ;;  %v8397_v39 = vmul.f32 %v17553_v4, %v17531_v29 }
 0xa7d   :  { %v8300_v0 = vpop.f32.mrf.mxu0 }
 0xa7e   :  { %v8396_v49 = vmul.f32 %v17546_v24, %v17541_v23  ;;  %v8420_v28 = vadd.f32 %v8419_v56, %v8395_v12  ;;  %v8341_v61 = vadd.f32 %v8300_v0, %v8078_v54  ;;  %v17558_v15 = vadd.f32 %v17250_v63, %v8342_v47  ;;  %v17566_v54 = vld [vmem:[%s17971_s1 + $0xb0] sm:$0xff]  ;;  %v17573_v47 = vld [vmem:[%s17971_s1 + $0xb8] sm:$0xff] }
 0xa7f   :  { %v12359_v40 = vpop.f32.mrf.mxu0  ;;  %18599 = vst [vmem:[#allocation55_spill] sm:$0xff] %v17566_v54  ;;  %18600 = vst [vmem:[#allocation93_spill] sm:$0xff] %v17573_v47 }
 0xa80   :  { %v8421_v42 = vadd.f32 %v8420_v28, %v8396_v49  ;;  %v17561_v52 = vadd.f32 %v17250_v63, %v8341_v61  ;;  %v8344_v26 = vadd.f32 %v12359_v40, %v8081_v35  ;;  %v8399_v0 = vmul.f32 %v17573_v47, %v17558_v15  ;;  %v17586_v28 = vld [vmem:[%s17971_s1 + $0xc0] sm:$0xff] }
 0xa81   :  { %v8310_v9 = vpop.f32.mrf.mxu0  ;;  %18601 = vst [vmem:[#allocation27_spill] sm:$0xff] %v17586_v28 }
 0xa82   :  { %v8398_v50 = vmul.f32 %v17566_v54, %v17561_v52  ;;  %v8422_v12 = vadd.f32 %v8421_v42, %v8397_v39  ;;  %v8343_v56 = vadd.f32 %v8310_v9, %v8080_v13  ;;  %v17578_v48 = vadd.f32 %v17250_v63, %v8344_v26  ;;  %v17593_v39 = vld [vmem:[%s17971_s1 + $0xc8] sm:$0xff] }
 0xa83   :  { %v18602_v54 = vmov 1.0  }
 0xa84   :  { %v8423_v35 = vadd.f32 %v8422_v12, %v8398_v50  ;;  %v17581_v49 = vadd.f32 %v17250_v63, %v8343_v56  ;;  %v8401_v40 = vmul.f32 %v17593_v39, %v17578_v48 }
 0xa86   :  { %v8400_v61 = vmul.f32 %v17586_v28, %v17581_v49  ;;  %v8424_v13 = vadd.f32 %v8423_v35, %v8399_v0  ;;  %v12540_v0 = vld [vmem:[#allocation2] sm:$0xff] }
 0xa88   :  { %v8425_v42 = vadd.f32 %v8424_v13, %v8400_v61 }
 0xa8a   :  { %v8426_v63 = vadd.f32 %v8425_v42, %v8401_v40  ;;  %v18620_v40 = vld [vmem:[#allocation28_spill] sm:$0xff] }
 0xa8c   :  { %v8427_v26 = vrot.slane %v8426_v63, 4 }
 0xa8e   :  { %v8428_v9 = vadd.f32 %v8427_v26, %v8426_v63  ;;  %v18612_v26 = vld [vmem:[#allocation76_spill] sm:$0xff] }
 0xa90   :  { %v8429_v50 = vrot.slane %v8428_v9, 2 }
 0xa92   :  { %v8430_v12 = vadd.f32 %v8429_v50, %v8428_v9 }
 0xa94   :  { %v8431_v56 = vrot.slane %v8430_v12, 1 }
 0xa96   :  { %v8432_v47 = vadd.f32 %v8431_v56, %v8430_v12 }
 0xa98   :  { %12393 = vmatmul.mubr.f32.vlgmr.msra.gmra.mxu1 %v8432_v47 }
 0xa99   :  { %12396 = vmatpush3.msk.msra.mxu1 %vm13509_vm0, %v18602_v54  ;;  %12427 = vmatprep.mubr.msk.f32.mxu1 %vm18515_vm9, %v12540_v0  ;;  %vm18613_vm0 = vnez %v18612_v26 }
 0xa9a   :  { %12397 = vmatprep.subr.mxu1 %v12540_v0 }
 0xa9b   :  { %12398 = vmatpush3.msk.msra.mxu1 %vm13520_vm1, %v18602_v54 }
 0xa9c   :  { %12399 = vmatprep.subr.mxu1 %v12540_v0 }
 0xa9d   :  { %12400 = vmatpush3.msk.msra.mxu1 %vm13544_vm2, %v18602_v54 }
 0xa9e   :  { %12401 = vmatprep.subr.mxu1 %v12540_v0 }
 0xa9f   :  { %12402 = vmatpush3.msk.msra.mxu1 %vm13568_vm3, %v18602_v54 }
 0xaa0   :  { %12403 = vmatprep.subr.mxu1 %v12540_v0 }
 0xaa1   :  { %12404 = vmatpush3.msk.msra.mxu1 %vm13591_vm4, %v18602_v54 }
 0xaa2   :  { %12405 = vmatprep.subr.mxu1 %v12540_v0 }
 0xaa3   :  { %12406 = vmatpush3.msk.msra.mxu1 %vm13615_vm5, %v18602_v54 }
 0xaa4   :  { %12407 = vmatprep.subr.mxu1 %v12540_v0 }
 0xaa5   :  { %12408 = vmatpush3.msk.msra.mxu1 %vm13626_vm6, %v18602_v54 }
 0xaa6   :  { %12409 = vmatprep.subr.mxu1 %v12540_v0 }
 0xaa7   :  { %12410 = vmatpush3.msk.msra.mxu1 %vm13650_vm7, %v18602_v54 }
 0xaa8   :  { %12411 = vmatprep.subr.mxu1 %v12540_v0 }
 0xaa9   :  { %12412 = vmatpush3.msk.msra.mxu1 %vm13674_vm8, %v18602_v54 }
 0xaaa   :  { %12413 = vmatprep.subr.mxu1 %v12540_v0 }
 0xaab   :  { %12414 = vmatpush3.msk.msra.mxu1 %vm18613_vm0, %v18602_v54 }
 0xaac   :  { %12415 = vmatprep.subr.mxu1 %v12540_v0 }
 0xaad   :  { %12416 = vmatpush3.msk.msra.mxu1 %vm18486_vm13, %v18602_v54 }
 0xaae   :  { %12417 = vmatprep.subr.mxu1 %v12540_v0 }
 0xaaf   :  { %12418 = vmatpush3.msk.msra.mxu1 %vm13740_vm11, %v18602_v54 }
 0xab0   :  { %12419 = vmatprep.subr.mxu1 %v12540_v0 }
 0xab1   :  { %12420 = vmatpush3.msk.msra.mxu1 %vm18306_vm10, %v18602_v54 }
 0xab2   :  { %12421 = vmatprep.subr.mxu1 %v12540_v0 }
 0xab3   :  { %12422 = vmatpush3.msk.msra.mxu1 %vm13773_vm14, %v18602_v54 }
 0xab4   :  { %12423 = vmatprep.subr.mxu1 %v12540_v0 }
 0xab5   :  { %12424 = vmatpush3.msk.msra.mxu1 %vm13789_vm15, %v18602_v54 }
 0xab6   :  { %12425 = vmatprep.subr.mxu1 %v12540_v0 }
 0xab7   :  { %12426 = vmatpush3.msk.msra.mxu1 %vm13804_vm12, %v18602_v54 }
 0xb58   :  { %v8499_v47 = vpop.f32.mrf.mxu1 }
 0xb59   :  { %v8503_v13 = vmul.f32 0.00048828125, %v8499_v47 }
 0xb5a   :  { %v12394_v28 = vpop.f32.mrf.mxu1 }
 0xb5b   :  { %v17647_v42 = vrot.slane %v8503_v13, %v18620_v40 }
 0xb5d   :  { %v8508_v63 = vsub.f32 %v17260_v53, %v17647_v42  ;;  %v8509_v26 = vsub.f32 %v17257_v46, %v17647_v42  ;;  %v8510_v9 = vsub.f32 %v17287_v41, %v17647_v42  ;;  %v8511_v50 = vsub.f32 %v17284_v17, %v17647_v42 }
 0xb5e   :  { %v8512_v12 = vsub.f32 %v17317_v6, %v17647_v42  ;;  %v8513_v56 = vsub.f32 %v17307_v57, %v17647_v42  ;;  %v8514_v17 = vsub.f32 %v17347_v62, %v17647_v42  ;;  %v8515_v28 = vsub.f32 %v17344_v10, %v17647_v42 }
 0xb5f   :  { %v17656_v0 = vmul.f32 %v17269_v51, %v8508_v63  ;;  %v17659_v54 = vmul.f32 %v17279_v14, %v8509_v26  ;;  %v17666_v53 = vmul.f32 %v17298_v30, %v8510_v9  ;;  %v17675_v35 = vmul.f32 %v17312_v20, %v8511_v50 }
 0xb60   :  { %v17680_v6 = vmul.f32 %v17328_v3, %v8512_v12  ;;  %v17687_v13 = vmul.f32 %v17339_v60, %v8513_v56  ;;  %v8516_v62 = vsub.f32 %v17377_v19, %v17647_v42  ;;  %v17694_v26 = vmul.f32 %v17358_v45, %v8514_v17 }
 0xb61   :  { %v8560_v46 = vmul.f32 %v17656_v0, %v17656_v0  ;;  %v8561_v41 = vmul.f32 %v17659_v54, %v17659_v54  ;;  %v8562_v61 = vmul.f32 %v17666_v53, %v17666_v53  ;;  %v8563_v57 = vmul.f32 %v17675_v35, %v17675_v35 }
 0xb62   :  { %v8564_v9 = vmul.f32 %v17680_v6, %v17680_v6  ;;  %v8517_v10 = vsub.f32 %v17367_v2, %v17647_v42  ;;  %v17701_v12 = vmul.f32 %v17372_v5, %v8515_v28  ;;  %v8518_v19 = vsub.f32 %v17407_v22, %v17647_v42 }
 0xb63   :  { %v8586_v47 = vadd.f32 %v8561_v41, %v8560_v46  ;;  %v8565_v46 = vmul.f32 %v17687_v13, %v17687_v13  ;;  %v17708_v56 = vmul.f32 %v17388_v1, %v8516_v62  ;;  %v8566_v17 = vmul.f32 %v17694_v26, %v17694_v26 }
 0xb64   :  { %v8519_v2 = vsub.f32 %v17404_v55, %v17647_v42  ;;  %v8567_v28 = vmul.f32 %v17701_v12, %v17701_v12  ;;  %v8520_v22 = vsub.f32 %v17435_v36, %v17647_v42  ;;  %v8521_v55 = vsub.f32 %v17425_v34, %v17647_v42 }
 0xb65   :  { %v8587_v63 = vadd.f32 %v8586_v47, %v8562_v61  ;;  %v17715_v47 = vmul.f32 %v17399_v8, %v8517_v10  ;;  %v8568_v62 = vmul.f32 %v17708_v56, %v17708_v56  ;;  %v8522_v36 = vsub.f32 %v17463_v37, %v17647_v42 }
 0xb66   :  { %v8523_v34 = vsub.f32 %v17460_v18, %v17647_v42  ;;  %v8524_v37 = vsub.f32 %v17491_v27, %v17647_v42  ;;  %v8525_v18 = vsub.f32 %v17481_v31, %v17647_v42  ;;  %v8526_v27 = vsub.f32 %v17517_v58, %v17647_v42 }
 0xb67   :  { %v8588_v50 = vadd.f32 %v8587_v63, %v8563_v57  ;;  %v17722_v63 = vmul.f32 %v17416_v11, %v8518_v19  ;;  %v8569_v10 = vmul.f32 %v17715_v47, %v17715_v47  ;;  %v8527_v31 = vsub.f32 %v17514_v59, %v17647_v42 }
 0xb68   :  { %v8528_v58 = vsub.f32 %v17541_v23, %v17647_v42  ;;  %v8529_v59 = vsub.f32 %v17531_v29, %v17647_v42  ;;  %v8530_v23 = vsub.f32 %v17561_v52, %v17647_v42  ;;  %v8531_v29 = vsub.f32 %v17558_v15, %v17647_v42  ;;  %v18621_v52 = vld [vmem:[#allocation55_spill] sm:$0xff] }
 0xb69   :  { %v8589_v41 = vadd.f32 %v8588_v50, %v8564_v9  ;;  %v17729_v50 = vmul.f32 %v17430_v43, %v8519_v2  ;;  %v8570_v19 = vmul.f32 %v17722_v63, %v17722_v63 }
 0xb6b   :  { %v8590_v61 = vadd.f32 %v8589_v41, %v8565_v46  ;;  %v17736_v41 = vmul.f32 %v17444_v25, %v8520_v22  ;;  %v8571_v2 = vmul.f32 %v17729_v50, %v17729_v50 }
 0xb6d   :  { %v8591_v57 = vadd.f32 %v8590_v61, %v8566_v17  ;;  %v17743_v61 = vmul.f32 %v17455_v38, %v8521_v55  ;;  %v8572_v22 = vmul.f32 %v17736_v41, %v17736_v41 }
 0xb6f   :  { %v8592_v9 = vadd.f32 %v8591_v57, %v8567_v28  ;;  %v17750_v57 = vmul.f32 %v17472_v16, %v8522_v36  ;;  %v8573_v55 = vmul.f32 %v17743_v61, %v17743_v61 }
 0xb71   :  { %v8593_v46 = vadd.f32 %v8592_v9, %v8568_v62  ;;  %v17757_v9 = vmul.f32 %v17486_v33, %v8523_v34  ;;  %v8574_v36 = vmul.f32 %v17750_v57, %v17750_v57 }
 0xb73   :  { %v8594_v17 = vadd.f32 %v8593_v46, %v8569_v10  ;;  %v17764_v46 = vmul.f32 %v17499_v7, %v8524_v37  ;;  %v8575_v34 = vmul.f32 %v17757_v9, %v17757_v9 }
 0xb75   :  { %v8595_v28 = vadd.f32 %v8594_v17, %v8570_v19  ;;  %v17771_v17 = vmul.f32 %v17509_v21, %v8525_v18  ;;  %v8576_v37 = vmul.f32 %v17764_v46, %v17764_v46 }
 0xb77   :  { %v8596_v62 = vadd.f32 %v8595_v28, %v8571_v2  ;;  %v17778_v28 = vmul.f32 %v17525_v32, %v8526_v27  ;;  %v8577_v18 = vmul.f32 %v17771_v17, %v17771_v17 }
 0xb79   :  { %v8597_v10 = vadd.f32 %v8596_v62, %v8572_v22  ;;  %v17785_v62 = vmul.f32 %v17536_v44, %v8527_v31  ;;  %v8578_v27 = vmul.f32 %v17778_v28, %v17778_v28 }
 0xb7b   :  { %v8598_v19 = vadd.f32 %v8597_v10, %v8573_v55  ;;  %v17792_v10 = vmul.f32 %v17546_v24, %v8528_v58  ;;  %v8579_v31 = vmul.f32 %v17785_v62, %v17785_v62 }
 0xb7d   :  { %v8599_v2 = vadd.f32 %v8598_v19, %v8574_v36  ;;  %v8555_v19 = vmul.f32 %v17553_v4, %v8529_v59  ;;  %v8580_v58 = vmul.f32 %v17792_v10, %v17792_v10  ;;  %v18623_v4 = vld [vmem:[#allocation27_spill] sm:$0xff] }
 0xb7f   :  { %v8600_v22 = vadd.f32 %v8599_v2, %v8575_v34  ;;  %v8532_v2 = vsub.f32 %v17581_v49, %v17647_v42  ;;  %v8581_v24 = vmul.f32 %v8555_v19, %v8555_v19 }
 0xb81   :  { %v8601_v55 = vadd.f32 %v8600_v22, %v8576_v37  ;;  %v8556_v37 = vmul.f32 %v18621_v52, %v8530_v23  ;;  %v8558_v44 = vmul.f32 %v18623_v4, %v8532_v2 }
 0xb83   :  { %v8602_v36 = vadd.f32 %v8601_v55, %v8577_v18  ;;  %v8533_v18 = vsub.f32 %v17578_v48, %v17647_v42  ;;  %v18622_v55 = vld [vmem:[#allocation93_spill] sm:$0xff]  ;;  %v8582_v32 = vmul.f32 %v8556_v37, %v8556_v37  ;;  %v8584_v23 = vmul.f32 %v8558_v44, %v8558_v44 }
 0xb84   :  { %v8557_v15 = vmul.f32 %v18622_v55, %v8531_v29 }
 0xb85   :  { %v8603_v34 = vadd.f32 %v8602_v36, %v8578_v27  ;;  %v8559_v36 = vmul.f32 %v17593_v39, %v8533_v18 }
 0xb86   :  { %v8583_v49 = vmul.f32 %v8557_v15, %v8557_v15 }
 0xb87   :  { %v8604_v22 = vadd.f32 %v8603_v34, %v8579_v31  ;;  %v8585_v7 = vmul.f32 %v8559_v36, %v8559_v36 }
 0xb89   :  { %v8605_v59 = vadd.f32 %v8604_v22, %v8580_v58 }
 0xb8b   :  { %v8606_v27 = vadd.f32 %v8605_v59, %v8581_v24 }
 0xb8d   :  { %v8607_v21 = vadd.f32 %v8606_v27, %v8582_v32  ;;  %v8688_v32 = vld [vmem:[%s17970_s4 + $0x6] sm:$0x1] }
 0xb8f   :  { %v8608_v52 = vadd.f32 %v8607_v21, %v8583_v49 }
 0xb91   :  { %v8609_v33 = vadd.f32 %v8608_v52, %v8584_v23 }
 0xb93   :  { %v8610_v31 = vadd.f32 %v8609_v33, %v8585_v7 }
 0xb95   :  { %v8611_v34 = vrot.slane %v8610_v31, 4 }
 0xb97   :  { %v8612_v16 = vadd.f32 %v8611_v34, %v8610_v31 }
 0xb99   :  { %v8613_v48 = vrot.slane %v8612_v16, 2 }
 0xb9b   :  { %v8614_v42 = vadd.f32 %v8613_v48, %v8612_v16 }
 0xb9d   :  { %v8615_v29 = vrot.slane %v8614_v42, 1 }
 0xb9f   :  { %v8616_v55 = vadd.f32 %v8615_v29, %v8614_v42 }
 0xba1   :  { %12428 = vmatmul.mubr.f32.vlgmr.msra.gmra.mxu1 %v8616_v55 }
 0xc61   :  { %v8683_v58 = vpop.f32.mrf.mxu1 }
 0xc62   :  { %v8687_v2 = vmul.f32 0.00048828125, %v8683_v58 }
 0xc63   :  { %v12429_v22 = vpop.f32.mrf.mxu1 }
 0xc64   :  { %v8689_v24 = vadd.f32 1e-05, %v8687_v2 }
 0xc66   :  { %12437 = vrsqrt.f32 %v8689_v24 }
 0xc73   :  { %v12438_v21 = vpop.eup %12437 }
 0xc74   :  { %v8691_v18 = vmul.f32 %v12438_v21, %v8688_v32 }
 0xc76   :  { %v8695_v33 = vrot.slane %v8691_v18, %v18620_v40 }
 0xc78   :  { %v8696_v7 = vmul.f32 %v8695_v33, %v17656_v0  ;;  %v8697_v16 = vmul.f32 %v8695_v33, %v17659_v54  ;;  %v8698_v52 = vmul.f32 %v8695_v33, %v17666_v53  ;;  %v8699_v55 = vmul.f32 %v8695_v33, %v17675_v35  ;;  %v8953_v53 = vld [vmem:[%s17970_s4 + $0x9] ss:$0 sm:$0xff] }
 0xc79   :  { %v8700_v59 = vmul.f32 %v8695_v33, %v17680_v6  ;;  %v8701_v27 = vmul.f32 %v8695_v33, %v17687_v13  ;;  %v8702_v49 = vmul.f32 %v8695_v33, %v17694_v26  ;;  %v8703_v23 = vmul.f32 %v8695_v33, %v17701_v12 }
 0xc7a   :  { %v8704_v31 = vmul.f32 %v8695_v33, %v17708_v56  ;;  %v8705_v40 = vmul.f32 %v8695_v33, %v17715_v47  ;;  %v8706_v0 = vmul.f32 %v8695_v33, %v17722_v63  ;;  %v8707_v54 = vmul.f32 %v8695_v33, %v17729_v50 }
 0xc7b   :  { %v8708_v35 = vmul.f32 %v8695_v33, %v17736_v41  ;;  %v8709_v6 = vmul.f32 %v8695_v33, %v17743_v61  ;;  %v8710_v13 = vmul.f32 %v8695_v33, %v17750_v57  ;;  %v8711_v26 = vmul.f32 %v8695_v33, %v17757_v9 }
 0xc7c   :  { %v8712_v12 = vmul.f32 %v8695_v33, %v17764_v46  ;;  %v8713_v56 = vmul.f32 %v8695_v33, %v17771_v17  ;;  %v8714_v47 = vmul.f32 %v8695_v33, %v17778_v28  ;;  %v8715_v63 = vmul.f32 %v8695_v33, %v17785_v62 }
 0xc7d   :  { %v8716_v50 = vmul.f32 %v8695_v33, %v17792_v10  ;;  %v8717_v34 = vmul.f32 %v8695_v33, %v8555_v19  ;;  %v8718_v48 = vmul.f32 %v8695_v33, %v8556_v37  ;;  %v8719_v42 = vmul.f32 %v8695_v33, %v8557_v15 }
 0xc7e   :  { %v8720_v41 = vmul.f32 %v8695_v33, %v8558_v44  ;;  %v8721_v29 = vmul.f32 %v8695_v33, %v8559_v36  ;;  %v8727_v61 = vadd.f32 %v8953_v53, %v8696_v7  ;;  %v8728_v58 = vadd.f32 %v8953_v53, %v8697_v16 }
 0xc7f   :  { %v8729_v57 = vadd.f32 %v8953_v53, %v8698_v52  ;;  %v8730_v2 = vadd.f32 %v8953_v53, %v8699_v55  ;;  %v8731_v9 = vadd.f32 %v8953_v53, %v8700_v59  ;;  %v8732_v22 = vadd.f32 %v8953_v53, %v8701_v27 }
 0xc80   :  { %v8733_v46 = vadd.f32 %v8953_v53, %v8702_v49  ;;  %v8734_v24 = vadd.f32 %v8953_v53, %v8703_v23  ;;  %v8735_v17 = vadd.f32 %v8953_v53, %v8704_v31  ;;  %v8736_v32 = vadd.f32 %v8953_v53, %v8705_v40 }
 0xc81   :  { %v8737_v28 = vadd.f32 %v8953_v53, %v8706_v0  ;;  %v8738_v21 = vadd.f32 %v8953_v53, %v8707_v54  ;;  %v8739_v62 = vadd.f32 %v8953_v53, %v8708_v35  ;;  %v8740_v18 = vadd.f32 %v8953_v53, %v8709_v6 }
 0xc82   :  { %v8741_v10 = vadd.f32 %v8953_v53, %v8710_v13  ;;  %v8742_v19 = vadd.f32 %v8953_v53, %v8711_v26  ;;  %v8743_v37 = vadd.f32 %v8953_v53, %v8712_v12  ;;  %v8744_v15 = vadd.f32 %v8953_v53, %v8713_v56 }
 0xc83   :  { %v17839_v44 = vadd.f32 %v8953_v53, %v8714_v47  ;;  %v17841_v36 = vadd.f32 %v8953_v53, %v8715_v63  ;;  %v17843_v33 = vadd.f32 %v8953_v53, %v8716_v50  ;;  %v17845_v7 = vadd.f32 %v8953_v53, %v8717_v34 }
 0xc84   :  { %v17847_v16 = vadd.f32 %v8953_v53, %v8718_v48  ;;  %v17849_v52 = vadd.f32 %v8953_v53, %v8719_v42  ;;  %v17851_v55 = vadd.f32 %v8953_v53, %v8720_v41  ;;  %v17853_v59 = vadd.f32 %v8953_v53, %v8721_v29 }
 0xc85   :  { %v8753_v27 = vmax.f32 %v8727_v61, 0.0  ;;  %v8754_v49 = vmax.f32 %v8728_v58, 0.0  ;;  %v8755_v23 = vmax.f32 %v8729_v57, 0.0  ;;  %v8756_v31 = vmax.f32 %v8730_v2, 0.0 }
 0xc86   :  { %v8757_v40 = vmax.f32 %v8731_v9, 0.0  ;;  %v8758_v0 = vmax.f32 %v8732_v22, 0.0  ;;  %v8759_v54 = vmax.f32 %v8733_v46, 0.0  ;;  %v8760_v35 = vmax.f32 %v8734_v24, 0.0 }
 0xc87   :  { %v8761_v6 = vmax.f32 %v8735_v17, 0.0  ;;  %v8762_v13 = vmax.f32 %v8736_v32, 0.0  ;;  %v8763_v26 = vmax.f32 %v8737_v28, 0.0  ;;  %v8764_v12 = vmax.f32 %v8738_v21, 0.0 }
 0xc88   :  { %v8765_v56 = vmax.f32 %v8739_v62, 0.0  ;;  %v8766_v47 = vmax.f32 %v8740_v18, 0.0  ;;  %v8767_v63 = vmax.f32 %v8741_v10, 0.0  ;;  %v8768_v50 = vmax.f32 %v8742_v19, 0.0  ;;  %v18629_v10 = vld [vmem:[#allocation56_spill] sm:$0xff] }
 0xc89   :  { %v8769_v34 = vmax.f32 %v8743_v37, 0.0  ;;  %v8770_v48 = vmax.f32 %v8744_v15, 0.0  ;;  %v8771_v53 = vmax.f32 %v17839_v44, 0.0  ;;  %v8772_v42 = vmax.f32 %v17841_v36, 0.0  ;;  %v18630_v37 = vld [vmem:[#allocation53_spill] sm:$0xff]  ;;  %v18631_v44 = vld [vmem:[#allocation6_spill] sm:$0xff] }
 0xc8a   :  { %v8773_v41 = vmax.f32 %v17843_v33, 0.0  ;;  %v8774_v29 = vmax.f32 %v17845_v7, 0.0  ;;  %v8775_v61 = vmax.f32 %v17847_v16, 0.0  ;;  %v8776_v58 = vmax.f32 %v17849_v52, 0.0  ;;  %v18632_v33 = vld [vmem:[#allocation55_spill] sm:$0xff]  ;;  %v18633_v16 = vld [vmem:[#allocation93_spill] sm:$0xff] }
 0xc8b   :  { %v8777_v57 = vmax.f32 %v17851_v55, 0.0  ;;  %v8778_v2 = vmax.f32 %v17853_v59, 0.0  ;;  %v8779_v9 = vmul.f32 %v17269_v51, %v8753_v27  ;;  %v8780_v22 = vmul.f32 %v17279_v14, %v8754_v49 }
 0xc8c   :  { %v8781_v46 = vmul.f32 %v17298_v30, %v8755_v23  ;;  %v8782_v24 = vmul.f32 %v17312_v20, %v8756_v31  ;;  %v8783_v17 = vmul.f32 %v17328_v3, %v8757_v40  ;;  %v8784_v32 = vmul.f32 %v17339_v60, %v8758_v0  ;;  %v18624_v3 = vld [vmem:[#allocation4_spill] sm:$0xff] }
 0xc8d   :  { %v8785_v28 = vmul.f32 %v17358_v45, %v8759_v54  ;;  %v8786_v21 = vmul.f32 %v17372_v5, %v8760_v35  ;;  %v8787_v62 = vmul.f32 %v17388_v1, %v8761_v6  ;;  %v8788_v18 = vmul.f32 %v17399_v8, %v8762_v13  ;;  %8805 = vst [vmem:[%s17972_s5] sm:$0xff] %v8779_v9  ;;  %v18625_v45 = vld [vmem:[#allocation22_spill] sm:$0xff]  ;;  %v18626_v1 = vld [vmem:[#allocation91_spill] sm:$0xff] }
 0xc8e   :  { %8806 = vst [vmem:[%s17972_s5 + $0x8] sm:$0xff] %v8780_v22  ;;  %v8789_v51 = vmul.f32 %v17416_v11, %v8763_v26  ;;  %v8790_v14 = vmul.f32 %v17430_v43, %v8764_v12  ;;  %v8791_v30 = vmul.f32 %v17444_v25, %v8765_v56  ;;  %v8792_v20 = vmul.f32 %v17455_v38, %v8766_v47  ;;  %v18627_v11 = vld [vmem:[#allocation26_spill] sm:$0xff]  ;;  %v18628_v25 = vld [vmem:[#allocation19_spill] sm:$0xff] }
 0xc8f   :  { %8807 = vst [vmem:[%s17972_s5 + $0x10] sm:$0xff] %v8781_v46  ;;  %8808 = vst [vmem:[%s17972_s5 + $0x18] sm:$0xff] %v8782_v24  ;;  %v8793_v60 = vmul.f32 %v18624_v3, %v8767_v63  ;;  %v8794_v5 = vmul.f32 %v18625_v45, %v8768_v50  ;;  %v8795_v8 = vmul.f32 %v18626_v1, %v8769_v34 }
 0xc90   :  { %8809 = vst [vmem:[%s17972_s5 + $0x20] sm:$0xff] %v8783_v17  ;;  %8810 = vst [vmem:[%s17972_s5 + $0x28] sm:$0xff] %v8784_v32  ;;  %v8796_v43 = vmul.f32 %v18627_v11, %v8770_v48  ;;  %v8797_v38 = vmul.f32 %v18628_v25, %v8771_v53  ;;  %v8798_v19 = vmul.f32 %v18629_v10, %v8772_v42 }
 0xc91   :  { %8811 = vst [vmem:[%s17972_s5 + $0x30] sm:$0xff] %v8785_v28  ;;  %8812 = vst [vmem:[%s17972_s5 + $0x38] sm:$0xff] %v8786_v21  ;;  %v8799_v15 = vmul.f32 %v18630_v37, %v8773_v41  ;;  %v8800_v36 = vmul.f32 %v18631_v44, %v8774_v29  ;;  %v8801_v7 = vmul.f32 %v18632_v33, %v8775_v61 }
 0xc92   :  { %8813 = vst [vmem:[%s17972_s5 + $0x40] sm:$0xff] %v8787_v62  ;;  %8814 = vst [vmem:[%s17972_s5 + $0x48] sm:$0xff] %v8788_v18  ;;  %v8802_v52 = vmul.f32 %v18633_v16, %v8776_v58  ;;  %v8803_v55 = vmul.f32 %v18623_v4, %v8777_v57  ;;  %v8804_v59 = vmul.f32 %v17593_v39, %v8778_v2 }
 0xc93   :  { %8815 = vst [vmem:[%s17972_s5 + $0x50] sm:$0xff] %v8789_v51  ;;  %8816 = vst [vmem:[%s17972_s5 + $0x58] sm:$0xff] %v8790_v14 }
 0xc94   :  { %8817 = vst [vmem:[%s17972_s5 + $0x60] sm:$0xff] %v8791_v30  ;;  %8818 = vst [vmem:[%s17972_s5 + $0x68] sm:$0xff] %v8792_v20 }
 0xc95   :  { %8819 = vst [vmem:[%s17972_s5 + $0x70] sm:$0xff] %v8793_v60  ;;  %8820 = vst [vmem:[%s17972_s5 + $0x78] sm:$0xff] %v8794_v5 }
 0xc96   :  { %8821 = vst [vmem:[%s17972_s5 + $0x80] sm:$0xff] %v8795_v8  ;;  %8822 = vst [vmem:[%s17972_s5 + $0x88] sm:$0xff] %v8796_v43 }
 0xc97   :  { %8823 = vst [vmem:[%s17972_s5 + $0x90] sm:$0xff] %v8797_v38  ;;  %8824 = vst [vmem:[%s17972_s5 + $0x98] sm:$0xff] %v8798_v19 }
 0xc98   :  { %8825 = vst [vmem:[%s17972_s5 + $0xa0] sm:$0xff] %v8799_v15  ;;  %8826 = vst [vmem:[%s17972_s5 + $0xa8] sm:$0xff] %v8800_v36 }
 0xc99   :  { %8827 = vst [vmem:[%s17972_s5 + $0xb0] sm:$0xff] %v8801_v7  ;;  %8828 = vst [vmem:[%s17972_s5 + $0xb8] sm:$0xff] %v8802_v52 }
 0xc9a   :  { %8829 = vst [vmem:[%s17972_s5 + $0xc0] sm:$0xff] %v8803_v55  ;;  %8830 = vst [vmem:[%s17972_s5 + $0xc8] sm:$0xff] %v8804_v59 }

</bundles_post_ra>
